<compile_context>
chip_gen: v5e
topology: v5e:2x2
jax: 0.10.0
libtpu: 0.0.40
codegen_flags: <defaults>
</compile_context>

<pallas_src>
import functools

import jax
import jax.numpy as jnp
from jax.experimental import pallas as pl
from jax.experimental.pallas import tpu as pltpu

KERNEL_SIZE = 5


def _physical_vmem_bytes():
    """Best-effort physical VMEM query; falls back to the v7x-safe 64 MiB."""
    try:
        info = pltpu.get_tpu_info()
        for attr in ("vmem_capacity_bytes", "vmem_size_bytes", "vmem_bytes"):
            v = getattr(info, attr, None)
            if v:
                return int(v)
    except Exception:
        pass
    return 64 * 1024 * 1024


def _kernel_conv_kernel(frame_pad_ref, core_ref, out_ref, *,
                        ksize, rate, tile_h, width, nb, inv_white_level):
    """One grid step: `nb` (b, n) slices x one H-tile of `tile_h` rows.

    frame_pad_ref: (nb, Hp, Wp)        full padded slices (resident across H-tiles)
    core_ref:      (nb, K*K, tile_h, W)
    out_ref:       (nb, tile_h, W)
    """
    h = pl.program_id(1)
    row0 = h * tile_h
    if tile_h % 8 == 0:
        row0 = pl.multiple_of(row0, 8)
    halo_h = tile_h + (ksize - 1) * rate  # rows needed to cover all sublane taps

    for b in range(nb):  # nb is small (<= 8); real-image path has nb == 1
        acc = jnp.zeros((tile_h, width), jnp.float32)
        # Hoist the lane (j) shift: 5 lane-shifted slabs per slice instead of 25
        # lane-unaligned tap loads; the i (sublane) offsets are cheap slices.
        for j in range(ksize):
            slab = frame_pad_ref[b, pl.ds(row0, halo_h),
                                 j * rate:j * rate + width].astype(jnp.float32)
            for i in range(ksize):
                k = i * ksize + j
                tap = core_ref[b, k].astype(jnp.float32)
                acc = acc + tap * slab[i * rate:i * rate + tile_h, :]
        out_ref[b] = (acc * inv_white_level).astype(out_ref.dtype)


def kernel_conv(frames, core, white_level=1.0, rate=1, kernel_size=KERNEL_SIZE,
                core_compute_dtype=jnp.bfloat16):
    """JAX/Pallas equivalent of KernelConv.forward (sep_conv=False, core_bias=False).

    frames: (B, N, H, W)                   (color == 1 case of the module)
    core:   (B, N * kernel_size**2, H, W)  (viewed as (B, N, K*K, 1, H, W))
    returns (B, N, H, W)  == torch output after .squeeze() when B, N > 1

    core_compute_dtype=bfloat16 halves the dominant HBM stream (pass None for the
    exact f32 path); accumulation is always float32 in-kernel.
    """
    B, N, H, W = frames.shape
    KK = kernel_size * kernel_size
    BN = B * N

    # _convert_dict: view core as (B, N, -1, color, H, W), keep first K*K taps.
    core = core.reshape(B, N, -1, H, W)[:, :, :KK, :, :]
    if core_compute_dtype is not None:
        core = core.astype(core_compute_dtype)

    pad = (kernel_size // 2) * rate
    frame_pad = jnp.pad(frames, ((0, 0), (0, 0), (pad, pad), (pad, pad)))
    Hp, Wp = H + 2 * pad, W + 2 * pad

    frame_pad_flat = frame_pad.reshape(BN, Hp, Wp)
    core_flat = core.reshape(BN, KK, H, W)

    # ---- generation-aware tile sizing ------------------------------------
    phys_vmem = _physical_vmem_bytes()
    budget = int(phys_vmem * 0.70)       # double-buffered blocks must fit here
    vmem_limit = int(phys_vmem * 0.85)   # raised scoped-VMEM limit

    core_isz = core_flat.dtype.itemsize
    frame_isz = frame_pad_flat.dtype.itemsize
    out_isz = frames.dtype.itemsize

    def blocks_fit(th, nslices):
        tiled = nslices * (KK * th * W * core_isz + th * W * out_isz)
        resident = nslices * Hp * Wp * frame_isz
        return 2 * (tiled + resident) <= budget  # x2: double-buffered pipeline

    # H-tile candidates: multiples of 8 dividing H (plus H itself).  Prefer the
    # smallest tile that already moves >= ~1 MiB of core per grid step (keeps the
    # DMA pipeline at the HBM roofline while bounding f32-accumulator / vreg
    # pressure); otherwise take the largest tile that fits the VMEM budget.
    cands = sorted({d for d in range(8, H + 1, 8) if H % d == 0} | {H})
    fitting = [c for c in cands if blocks_fit(c, 1)] or [cands[0]]
    tile_h = next((c for c in fitting if KK * c * W * core_isz >= (1 << 20)),
                  fitting[-1])

    # Tiny slices (e.g. 16x16 smoke test): pack several (b, n) slices per grid
    # step to amortize per-step overhead.  Capped at 8 to bound in-kernel unroll.
    nb = 1
    if tile_h == H:
        for d in (d for d in range(1, min(BN, 8) + 1) if BN % d == 0):
            if not blocks_fit(H, d):
                break
            nb = d
            if d * KK * H * W * core_isz >= (512 << 10):
                break

    grid = (BN // nb, H // tile_h)

    kernel = functools.partial(
        _kernel_conv_kernel,
        ksize=kernel_size, rate=rate, tile_h=tile_h, width=W, nb=nb,
        inv_white_level=float(1.0 / white_level),
    )

    out = pl.pallas_call(
        kernel,
        out_shape=jax.ShapeDtypeStruct((BN, H, W), frames.dtype),
        grid=grid,
        in_specs=[
            # Full padded slice; index_map ignores the H-tile index so it stays
            # resident across that axis (no halo logic needed for the tiling).
            pl.BlockSpec((nb, Hp, Wp), lambda s, h: (s, 0, 0)),
            pl.BlockSpec((nb, KK, tile_h, W), lambda s, h: (s, 0, h, 0)),
        ],
        out_specs=pl.BlockSpec((nb, tile_h, W), lambda s, h: (s, h, 0)),
        compiler_params=pltpu.CompilerParams(
            dimension_semantics=("parallel", "parallel"),
            vmem_limit_bytes=vmem_limit,
        ),
    )(frame_pad_flat, core_flat)

    return out.reshape(B, N, H, W)


def _reference(frames, core, white_level=1.0, rate=1, kernel_size=KERNEL_SIZE,
               core_compute_dtype=jnp.bfloat16):
    """Pure-JAX reference mirroring the PyTorch forward (color=1) with the same
    core-precision policy as the kernel."""
    B, N, H, W = frames.shape
    KK = kernel_size * kernel_size
    core = core.reshape(B, N, -1, H, W)[:, :, :KK, :, :]
    if core_compute_dtype is not None:
        core = core.astype(core_compute_dtype)
    core = core.astype(jnp.float32)
    pad = (kernel_size // 2) * rate
    fp = jnp.pad(frames.astype(jnp.float32),
                 ((0, 0), (0, 0), (pad, pad), (pad, pad)))
    stack = []
    for i in range(kernel_size):
        for j in range(kernel_size):
            stack.append(fp[:, :, i * rate:i * rate + H, j * rate:j * rate + W])
    stack = jnp.stack(stack, axis=2)                     # (B, N, KK, H, W)
    pred = jnp.sum(core * stack, axis=2)                 # (B, N, H, W)
    return (pred / white_level).astype(frames.dtype)


if __name__ == "__main__":
    B, N, H, W = 2, 4, 16, 16
    KK = KERNEL_SIZE * KERNEL_SIZE

    key = jax.random.PRNGKey(0)
    kf, kc = jax.random.split(key)
    frames = jax.random.normal(kf, (B, N, H, W), dtype=jnp.float32)
    # core as produced by an upstream predictor: (B, N*K*K, H, W) for color=1.
    core = jax.random.normal(kc, (B, N * KK, H, W), dtype=jnp.float32)

    out = jax.block_until_ready(kernel_conv(frames, core, white_level=1.0, rate=1))
    ref = jax.block_until_ready(_reference(frames, core, white_level=1.0, rate=1))

    assert out.shape == (B, N, H, W)
    assert jnp.allclose(out, ref, atol=1e-3, rtol=1e-3), \
        float(jnp.max(jnp.abs(out - ref)))

    print("KERNEL_OK")
</pallas_src>

<mosaic_0001>
module attributes {stable_mosaic.version = 11 : i64} {
  func.func @_kernel_conv_kernel(%arg0: i32, %arg1: i32, %arg2: memref<8x20x20xf32, #tpu.memory_space<vmem>>, %arg3: memref<8x25x16x16xbf16, #tpu.memory_space<vmem>>, %arg4: memref<8x16x16xf32, #tpu.memory_space<vmem>>) attributes {dimension_semantics = [#tpu.dimension_semantics<parallel>, #tpu.dimension_semantics<parallel>], iteration_bounds = array<i64: 1, 1>, scalar_prefetch = 0 : i64, scratch_operands = 0 : i64, tpu.core_type = #tpu.core_type<tc>, window_params = [{transform_indices = @transform_0, window_bounds = array<i64: 8, 20, 20>}, {transform_indices = @transform_1, window_bounds = array<i64: 8, 25, 16, 16>}, {transform_indices = @transform_2, window_bounds = array<i64: 8, 16, 16>}]} {
    %c16_i32 = arith.constant 16 : i32
    %0 = arith.muli %arg1, %c16_i32 : i32
    %1 = tpu.assume_multiple %0, 8 : i32
    %cst = arith.constant 0.000000e+00 : f32
    %2 = vector.broadcast %cst : f32 to vector<16x16xf32>
    %c0 = arith.constant 0 : index
    %3 = arith.index_cast %1 : i32 to index
    %c0_0 = arith.constant 0 : index
    %4 = vector.load %arg2[%c0, %3, %c0_0] : memref<8x20x20xf32, #tpu.memory_space<vmem>>, vector<1x20x16xf32>
    %5 = vector.shape_cast %4 : vector<1x20x16xf32> to vector<20x16xf32>
    %c0_1 = arith.constant 0 : index
    %c0_2 = arith.constant 0 : index
    %c0_3 = arith.constant 0 : index
    %c0_4 = arith.constant 0 : index
    %6 = vector.load %arg3[%c0_1, %c0_2, %c0_3, %c0_4] : memref<8x25x16x16xbf16, #tpu.memory_space<vmem>>, vector<1x1x16x16xbf16>
    %7 = vector.shape_cast %6 : vector<1x1x16x16xbf16> to vector<16x16xbf16>
    %8 = arith.extf %7 : vector<16x16xbf16> to vector<16x16xf32>
    %9 = vector.extract_strided_slice %5 {offsets = [0, 0], sizes = [16, 16], strides = [1, 1]} : vector<20x16xf32> to vector<16x16xf32>
    %10 = arith.mulf %8, %9 : vector<16x16xf32>
    %11 = arith.addf %2, %10 : vector<16x16xf32>
    %c0_5 = arith.constant 0 : index
    %c5 = arith.constant 5 : index
    %c0_6 = arith.constant 0 : index
    %c0_7 = arith.constant 0 : index
    %12 = vector.load %arg3[%c0_5, %c5, %c0_6, %c0_7] : memref<8x25x16x16xbf16, #tpu.memory_space<vmem>>, vector<1x1x16x16xbf16>
    %13 = vector.shape_cast %12 : vector<1x1x16x16xbf16> to vector<16x16xbf16>
    %14 = arith.extf %13 : vector<16x16xbf16> to vector<16x16xf32>
    %15 = vector.extract_strided_slice %5 {offsets = [1, 0], sizes = [16, 16], strides = [1, 1]} : vector<20x16xf32> to vector<16x16xf32>
    %16 = arith.mulf %14, %15 : vector<16x16xf32>
    %17 = arith.addf %11, %16 : vector<16x16xf32>
    %c0_8 = arith.constant 0 : index
    %c10 = arith.constant 10 : index
    %c0_9 = arith.constant 0 : index
    %c0_10 = arith.constant 0 : index
    %18 = vector.load %arg3[%c0_8, %c10, %c0_9, %c0_10] : memref<8x25x16x16xbf16, #tpu.memory_space<vmem>>, vector<1x1x16x16xbf16>
    %19 = vector.shape_cast %18 : vector<1x1x16x16xbf16> to vector<16x16xbf16>
    %20 = arith.extf %19 : vector<16x16xbf16> to vector<16x16xf32>
    %21 = vector.extract_strided_slice %5 {offsets = [2, 0], sizes = [16, 16], strides = [1, 1]} : vector<20x16xf32> to vector<16x16xf32>
    %22 = arith.mulf %20, %21 : vector<16x16xf32>
    %23 = arith.addf %17, %22 : vector<16x16xf32>
    %c0_11 = arith.constant 0 : index
    %c15 = arith.constant 15 : index
    %c0_12 = arith.constant 0 : index
    %c0_13 = arith.constant 0 : index
    %24 = vector.load %arg3[%c0_11, %c15, %c0_12, %c0_13] : memref<8x25x16x16xbf16, #tpu.memory_space<vmem>>, vector<1x1x16x16xbf16>
    %25 = vector.shape_cast %24 : vector<1x1x16x16xbf16> to vector<16x16xbf16>
    %26 = arith.extf %25 : vector<16x16xbf16> to vector<16x16xf32>
    %27 = vector.extract_strided_slice %5 {offsets = [3, 0], sizes = [16, 16], strides = [1, 1]} : vector<20x16xf32> to vector<16x16xf32>
    %28 = arith.mulf %26, %27 : vector<16x16xf32>
    %29 = arith.addf %23, %28 : vector<16x16xf32>
    %c0_14 = arith.constant 0 : index
    %c20 = arith.constant 20 : index
    %c0_15 = arith.constant 0 : index
    %c0_16 = arith.constant 0 : index
    %30 = vector.load %arg3[%c0_14, %c20, %c0_15, %c0_16] : memref<8x25x16x16xbf16, #tpu.memory_space<vmem>>, vector<1x1x16x16xbf16>
    %31 = vector.shape_cast %30 : vector<1x1x16x16xbf16> to vector<16x16xbf16>
    %32 = arith.extf %31 : vector<16x16xbf16> to vector<16x16xf32>
    %33 = vector.extract_strided_slice %5 {offsets = [4, 0], sizes = [16, 16], strides = [1, 1]} : vector<20x16xf32> to vector<16x16xf32>
    %34 = arith.mulf %32, %33 : vector<16x16xf32>
    %35 = arith.addf %29, %34 : vector<16x16xf32>
    %c0_17 = arith.constant 0 : index
    %36 = arith.index_cast %1 : i32 to index
    %c1 = arith.constant 1 : index
    %37 = vector.load %arg2[%c0_17, %36, %c1] : memref<8x20x20xf32, #tpu.memory_space<vmem>>, vector<1x20x16xf32>
    %38 = vector.shape_cast %37 : vector<1x20x16xf32> to vector<20x16xf32>
    %c0_18 = arith.constant 0 : index
    %c1_19 = arith.constant 1 : index
    %c0_20 = arith.constant 0 : index
    %c0_21 = arith.constant 0 : index
    %39 = vector.load %arg3[%c0_18, %c1_19, %c0_20, %c0_21] : memref<8x25x16x16xbf16, #tpu.memory_space<vmem>>, vector<1x1x16x16xbf16>
    %40 = vector.shape_cast %39 : vector<1x1x16x16xbf16> to vector<16x16xbf16>
    %41 = arith.extf %40 : vector<16x16xbf16> to vector<16x16xf32>
    %42 = vector.extract_strided_slice %38 {offsets = [0, 0], sizes = [16, 16], strides = [1, 1]} : vector<20x16xf32> to vector<16x16xf32>
    %43 = arith.mulf %41, %42 : vector<16x16xf32>
    %44 = arith.addf %35, %43 : vector<16x16xf32>
    %c0_22 = arith.constant 0 : index
    %c6 = arith.constant 6 : index
    %c0_23 = arith.constant 0 : index
    %c0_24 = arith.constant 0 : index
    %45 = vector.load %arg3[%c0_22, %c6, %c0_23, %c0_24] : memref<8x25x16x16xbf16, #tpu.memory_space<vmem>>, vector<1x1x16x16xbf16>
    %46 = vector.shape_cast %45 : vector<1x1x16x16xbf16> to vector<16x16xbf16>
    %47 = arith.extf %46 : vector<16x16xbf16> to vector<16x16xf32>
    %48 = vector.extract_strided_slice %38 {offsets = [1, 0], sizes = [16, 16], strides = [1, 1]} : vector<20x16xf32> to vector<16x16xf32>
    %49 = arith.mulf %47, %48 : vector<16x16xf32>
    %50 = arith.addf %44, %49 : vector<16x16xf32>
    %c0_25 = arith.constant 0 : index
    %c11 = arith.constant 11 : index
    %c0_26 = arith.constant 0 : index
    %c0_27 = arith.constant 0 : index
    %51 = vector.load %arg3[%c0_25, %c11, %c0_26, %c0_27] : memref<8x25x16x16xbf16, #tpu.memory_space<vmem>>, vector<1x1x16x16xbf16>
    %52 = vector.shape_cast %51 : vector<1x1x16x16xbf16> to vector<16x16xbf16>
    %53 = arith.extf %52 : vector<16x16xbf16> to vector<16x16xf32>
    %54 = vector.extract_strided_slice %38 {offsets = [2, 0], sizes = [16, 16], strides = [1, 1]} : vector<20x16xf32> to vector<16x16xf32>
    %55 = arith.mulf %53, %54 : vector<16x16xf32>
    %56 = arith.addf %50, %55 : vector<16x16xf32>
    %c0_28 = arith.constant 0 : index
    %c16 = arith.constant 16 : index
    %c0_29 = arith.constant 0 : index
    %c0_30 = arith.constant 0 : index
    %57 = vector.load %arg3[%c0_28, %c16, %c0_29, %c0_30] : memref<8x25x16x16xbf16, #tpu.memory_space<vmem>>, vector<1x1x16x16xbf16>
    %58 = vector.shape_cast %57 : vector<1x1x16x16xbf16> to vector<16x16xbf16>
    %59 = arith.extf %58 : vector<16x16xbf16> to vector<16x16xf32>
    %60 = vector.extract_strided_slice %38 {offsets = [3, 0], sizes = [16, 16], strides = [1, 1]} : vector<20x16xf32> to vector<16x16xf32>
    %61 = arith.mulf %59, %60 : vector<16x16xf32>
    %62 = arith.addf %56, %61 : vector<16x16xf32>
    %c0_31 = arith.constant 0 : index
    %c21 = arith.constant 21 : index
    %c0_32 = arith.constant 0 : index
    %c0_33 = arith.constant 0 : index
    %63 = vector.load %arg3[%c0_31, %c21, %c0_32, %c0_33] : memref<8x25x16x16xbf16, #tpu.memory_space<vmem>>, vector<1x1x16x16xbf16>
    %64 = vector.shape_cast %63 : vector<1x1x16x16xbf16> to vector<16x16xbf16>
    %65 = arith.extf %64 : vector<16x16xbf16> to vector<16x16xf32>
    %66 = vector.extract_strided_slice %38 {offsets = [4, 0], sizes = [16, 16], strides = [1, 1]} : vector<20x16xf32> to vector<16x16xf32>
    %67 = arith.mulf %65, %66 : vector<16x16xf32>
    %68 = arith.addf %62, %67 : vector<16x16xf32>
    %c0_34 = arith.constant 0 : index
    %69 = arith.index_cast %1 : i32 to index
    %c2 = arith.constant 2 : index
    %70 = vector.load %arg2[%c0_34, %69, %c2] : memref<8x20x20xf32, #tpu.memory_space<vmem>>, vector<1x20x16xf32>
    %71 = vector.shape_cast %70 : vector<1x20x16xf32> to vector<20x16xf32>
    %c0_35 = arith.constant 0 : index
    %c2_36 = arith.constant 2 : index
    %c0_37 = arith.constant 0 : index
    %c0_38 = arith.constant 0 : index
    %72 = vector.load %arg3[%c0_35, %c2_36, %c0_37, %c0_38] : memref<8x25x16x16xbf16, #tpu.memory_space<vmem>>, vector<1x1x16x16xbf16>
    %73 = vector.shape_cast %72 : vector<1x1x16x16xbf16> to vector<16x16xbf16>
    %74 = arith.extf %73 : vector<16x16xbf16> to vector<16x16xf32>
    %75 = vector.extract_strided_slice %71 {offsets = [0, 0], sizes = [16, 16], strides = [1, 1]} : vector<20x16xf32> to vector<16x16xf32>
    %76 = arith.mulf %74, %75 : vector<16x16xf32>
    %77 = arith.addf %68, %76 : vector<16x16xf32>
    %c0_39 = arith.constant 0 : index
    %c7 = arith.constant 7 : index
    %c0_40 = arith.constant 0 : index
    %c0_41 = arith.constant 0 : index
    %78 = vector.load %arg3[%c0_39, %c7, %c0_40, %c0_41] : memref<8x25x16x16xbf16, #tpu.memory_space<vmem>>, vector<1x1x16x16xbf16>
    %79 = vector.shape_cast %78 : vector<1x1x16x16xbf16> to vector<16x16xbf16>
    %80 = arith.extf %79 : vector<16x16xbf16> to vector<16x16xf32>
    %81 = vector.extract_strided_slice %71 {offsets = [1, 0], sizes = [16, 16], strides = [1, 1]} : vector<20x16xf32> to vector<16x16xf32>
    %82 = arith.mulf %80, %81 : vector<16x16xf32>
    %83 = arith.addf %77, %82 : vector<16x16xf32>
    %c0_42 = arith.constant 0 : index
    %c12 = arith.constant 12 : index
    %c0_43 = arith.constant 0 : index
    %c0_44 = arith.constant 0 : index
    %84 = vector.load %arg3[%c0_42, %c12, %c0_43, %c0_44] : memref<8x25x16x16xbf16, #tpu.memory_space<vmem>>, vector<1x1x16x16xbf16>
    %85 = vector.shape_cast %84 : vector<1x1x16x16xbf16> to vector<16x16xbf16>
    %86 = arith.extf %85 : vector<16x16xbf16> to vector<16x16xf32>
    %87 = vector.extract_strided_slice %71 {offsets = [2, 0], sizes = [16, 16], strides = [1, 1]} : vector<20x16xf32> to vector<16x16xf32>
    %88 = arith.mulf %86, %87 : vector<16x16xf32>
    %89 = arith.addf %83, %88 : vector<16x16xf32>
    %c0_45 = arith.constant 0 : index
    %c17 = arith.constant 17 : index
    %c0_46 = arith.constant 0 : index
    %c0_47 = arith.constant 0 : index
    %90 = vector.load %arg3[%c0_45, %c17, %c0_46, %c0_47] : memref<8x25x16x16xbf16, #tpu.memory_space<vmem>>, vector<1x1x16x16xbf16>
    %91 = vector.shape_cast %90 : vector<1x1x16x16xbf16> to vector<16x16xbf16>
    %92 = arith.extf %91 : vector<16x16xbf16> to vector<16x16xf32>
    %93 = vector.extract_strided_slice %71 {offsets = [3, 0], sizes = [16, 16], strides = [1, 1]} : vector<20x16xf32> to vector<16x16xf32>
    %94 = arith.mulf %92, %93 : vector<16x16xf32>
    %95 = arith.addf %89, %94 : vector<16x16xf32>
    %c0_48 = arith.constant 0 : index
    %c22 = arith.constant 22 : index
    %c0_49 = arith.constant 0 : index
    %c0_50 = arith.constant 0 : index
    %96 = vector.load %arg3[%c0_48, %c22, %c0_49, %c0_50] : memref<8x25x16x16xbf16, #tpu.memory_space<vmem>>, vector<1x1x16x16xbf16>
    %97 = vector.shape_cast %96 : vector<1x1x16x16xbf16> to vector<16x16xbf16>
    %98 = arith.extf %97 : vector<16x16xbf16> to vector<16x16xf32>
    %99 = vector.extract_strided_slice %71 {offsets = [4, 0], sizes = [16, 16], strides = [1, 1]} : vector<20x16xf32> to vector<16x16xf32>
    %100 = arith.mulf %98, %99 : vector<16x16xf32>
    %101 = arith.addf %95, %100 : vector<16x16xf32>
    %c0_51 = arith.constant 0 : index
    %102 = arith.index_cast %1 : i32 to index
    %c3 = arith.constant 3 : index
    %103 = vector.load %arg2[%c0_51, %102, %c3] : memref<8x20x20xf32, #tpu.memory_space<vmem>>, vector<1x20x16xf32>
    %104 = vector.shape_cast %103 : vector<1x20x16xf32> to vector<20x16xf32>
    %c0_52 = arith.constant 0 : index
    %c3_53 = arith.constant 3 : index
    %c0_54 = arith.constant 0 : index
    %c0_55 = arith.constant 0 : index
    %105 = vector.load %arg3[%c0_52, %c3_53, %c0_54, %c0_55] : memref<8x25x16x16xbf16, #tpu.memory_space<vmem>>, vector<1x1x16x16xbf16>
    %106 = vector.shape_cast %105 : vector<1x1x16x16xbf16> to vector<16x16xbf16>
    %107 = arith.extf %106 : vector<16x16xbf16> to vector<16x16xf32>
    %108 = vector.extract_strided_slice %104 {offsets = [0, 0], sizes = [16, 16], strides = [1, 1]} : vector<20x16xf32> to vector<16x16xf32>
    %109 = arith.mulf %107, %108 : vector<16x16xf32>
    %110 = arith.addf %101, %109 : vector<16x16xf32>
    %c0_56 = arith.constant 0 : index
    %c8 = arith.constant 8 : index
    %c0_57 = arith.constant 0 : index
    %c0_58 = arith.constant 0 : index
    %111 = vector.load %arg3[%c0_56, %c8, %c0_57, %c0_58] : memref<8x25x16x16xbf16, #tpu.memory_space<vmem>>, vector<1x1x16x16xbf16>
    %112 = vector.shape_cast %111 : vector<1x1x16x16xbf16> to vector<16x16xbf16>
    %113 = arith.extf %112 : vector<16x16xbf16> to vector<16x16xf32>
    %114 = vector.extract_strided_slice %104 {offsets = [1, 0], sizes = [16, 16], strides = [1, 1]} : vector<20x16xf32> to vector<16x16xf32>
    %115 = arith.mulf %113, %114 : vector<16x16xf32>
    %116 = arith.addf %110, %115 : vector<16x16xf32>
    %c0_59 = arith.constant 0 : index
    %c13 = arith.constant 13 : index
    %c0_60 = arith.constant 0 : index
    %c0_61 = arith.constant 0 : index
    %117 = vector.load %arg3[%c0_59, %c13, %c0_60, %c0_61] : memref<8x25x16x16xbf16, #tpu.memory_space<vmem>>, vector<1x1x16x16xbf16>
    %118 = vector.shape_cast %117 : vector<1x1x16x16xbf16> to vector<16x16xbf16>
    %119 = arith.extf %118 : vector<16x16xbf16> to vector<16x16xf32>
    %120 = vector.extract_strided_slice %104 {offsets = [2, 0], sizes = [16, 16], strides = [1, 1]} : vector<20x16xf32> to vector<16x16xf32>
    %121 = arith.mulf %119, %120 : vector<16x16xf32>
    %122 = arith.addf %116, %121 : vector<16x16xf32>
    %c0_62 = arith.constant 0 : index
    %c18 = arith.constant 18 : index
    %c0_63 = arith.constant 0 : index
    %c0_64 = arith.constant 0 : index
    %123 = vector.load %arg3[%c0_62, %c18, %c0_63, %c0_64] : memref<8x25x16x16xbf16, #tpu.memory_space<vmem>>, vector<1x1x16x16xbf16>
    %124 = vector.shape_cast %123 : vector<1x1x16x16xbf16> to vector<16x16xbf16>
    %125 = arith.extf %124 : vector<16x16xbf16> to vector<16x16xf32>
    %126 = vector.extract_strided_slice %104 {offsets = [3, 0], sizes = [16, 16], strides = [1, 1]} : vector<20x16xf32> to vector<16x16xf32>
    %127 = arith.mulf %125, %126 : vector<16x16xf32>
    %128 = arith.addf %122, %127 : vector<16x16xf32>
    %c0_65 = arith.constant 0 : index
    %c23 = arith.constant 23 : index
    %c0_66 = arith.constant 0 : index
    %c0_67 = arith.constant 0 : index
    %129 = vector.load %arg3[%c0_65, %c23, %c0_66, %c0_67] : memref<8x25x16x16xbf16, #tpu.memory_space<vmem>>, vector<1x1x16x16xbf16>
    %130 = vector.shape_cast %129 : vector<1x1x16x16xbf16> to vector<16x16xbf16>
    %131 = arith.extf %130 : vector<16x16xbf16> to vector<16x16xf32>
    %132 = vector.extract_strided_slice %104 {offsets = [4, 0], sizes = [16, 16], strides = [1, 1]} : vector<20x16xf32> to vector<16x16xf32>
    %133 = arith.mulf %131, %132 : vector<16x16xf32>
    %134 = arith.addf %128, %133 : vector<16x16xf32>
    %c0_68 = arith.constant 0 : index
    %135 = arith.index_cast %1 : i32 to index
    %c4 = arith.constant 4 : index
    %136 = vector.load %arg2[%c0_68, %135, %c4] : memref<8x20x20xf32, #tpu.memory_space<vmem>>, vector<1x20x16xf32>
    %137 = vector.shape_cast %136 : vector<1x20x16xf32> to vector<20x16xf32>
    %c0_69 = arith.constant 0 : index
    %c4_70 = arith.constant 4 : index
    %c0_71 = arith.constant 0 : index
    %c0_72 = arith.constant 0 : index
    %138 = vector.load %arg3[%c0_69, %c4_70, %c0_71, %c0_72] : memref<8x25x16x16xbf16, #tpu.memory_space<vmem>>, vector<1x1x16x16xbf16>
    %139 = vector.shape_cast %138 : vector<1x1x16x16xbf16> to vector<16x16xbf16>
    %140 = arith.extf %139 : vector<16x16xbf16> to vector<16x16xf32>
    %141 = vector.extract_strided_slice %137 {offsets = [0, 0], sizes = [16, 16], strides = [1, 1]} : vector<20x16xf32> to vector<16x16xf32>
    %142 = arith.mulf %140, %141 : vector<16x16xf32>
    %143 = arith.addf %134, %142 : vector<16x16xf32>
    %c0_73 = arith.constant 0 : index
    %c9 = arith.constant 9 : index
    %c0_74 = arith.constant 0 : index
    %c0_75 = arith.constant 0 : index
    %144 = vector.load %arg3[%c0_73, %c9, %c0_74, %c0_75] : memref<8x25x16x16xbf16, #tpu.memory_space<vmem>>, vector<1x1x16x16xbf16>
    %145 = vector.shape_cast %144 : vector<1x1x16x16xbf16> to vector<16x16xbf16>
    %146 = arith.extf %145 : vector<16x16xbf16> to vector<16x16xf32>
    %147 = vector.extract_strided_slice %137 {offsets = [1, 0], sizes = [16, 16], strides = [1, 1]} : vector<20x16xf32> to vector<16x16xf32>
    %148 = arith.mulf %146, %147 : vector<16x16xf32>
    %149 = arith.addf %143, %148 : vector<16x16xf32>
    %c0_76 = arith.constant 0 : index
    %c14 = arith.constant 14 : index
    %c0_77 = arith.constant 0 : index
    %c0_78 = arith.constant 0 : index
    %150 = vector.load %arg3[%c0_76, %c14, %c0_77, %c0_78] : memref<8x25x16x16xbf16, #tpu.memory_space<vmem>>, vector<1x1x16x16xbf16>
    %151 = vector.shape_cast %150 : vector<1x1x16x16xbf16> to vector<16x16xbf16>
    %152 = arith.extf %151 : vector<16x16xbf16> to vector<16x16xf32>
    %153 = vector.extract_strided_slice %137 {offsets = [2, 0], sizes = [16, 16], strides = [1, 1]} : vector<20x16xf32> to vector<16x16xf32>
    %154 = arith.mulf %152, %153 : vector<16x16xf32>
    %155 = arith.addf %149, %154 : vector<16x16xf32>
    %c0_79 = arith.constant 0 : index
    %c19 = arith.constant 19 : index
    %c0_80 = arith.constant 0 : index
    %c0_81 = arith.constant 0 : index
    %156 = vector.load %arg3[%c0_79, %c19, %c0_80, %c0_81] : memref<8x25x16x16xbf16, #tpu.memory_space<vmem>>, vector<1x1x16x16xbf16>
    %157 = vector.shape_cast %156 : vector<1x1x16x16xbf16> to vector<16x16xbf16>
    %158 = arith.extf %157 : vector<16x16xbf16> to vector<16x16xf32>
    %159 = vector.extract_strided_slice %137 {offsets = [3, 0], sizes = [16, 16], strides = [1, 1]} : vector<20x16xf32> to vector<16x16xf32>
    %160 = arith.mulf %158, %159 : vector<16x16xf32>
    %161 = arith.addf %155, %160 : vector<16x16xf32>
    %c0_82 = arith.constant 0 : index
    %c24 = arith.constant 24 : index
    %c0_83 = arith.constant 0 : index
    %c0_84 = arith.constant 0 : index
    %162 = vector.load %arg3[%c0_82, %c24, %c0_83, %c0_84] : memref<8x25x16x16xbf16, #tpu.memory_space<vmem>>, vector<1x1x16x16xbf16>
    %163 = vector.shape_cast %162 : vector<1x1x16x16xbf16> to vector<16x16xbf16>
    %164 = arith.extf %163 : vector<16x16xbf16> to vector<16x16xf32>
    %165 = vector.extract_strided_slice %137 {offsets = [4, 0], sizes = [16, 16], strides = [1, 1]} : vector<20x16xf32> to vector<16x16xf32>
    %166 = arith.mulf %164, %165 : vector<16x16xf32>
    %167 = arith.addf %161, %166 : vector<16x16xf32>
    %cst_85 = arith.constant 1.000000e+00 : f32
    %168 = vector.broadcast %cst_85 : f32 to vector<16x16xf32>
    %169 = arith.mulf %167, %168 : vector<16x16xf32>
    %c0_86 = arith.constant 0 : index
    %c0_87 = arith.constant 0 : index
    %c0_88 = arith.constant 0 : index
    %170 = vector.load %arg4[%c0_86, %c0_87, %c0_88] : memref<8x16x16xf32, #tpu.memory_space<vmem>>, vector<1x16x16xf32>
    %171 = vector.shape_cast %170 : vector<1x16x16xf32> to vector<16x16xf32>
    %172 = vector.shape_cast %169 : vector<16x16xf32> to vector<1x16x16xf32>
    tpu.vector_store %arg4[%c0_86, %c0_87, %c0_88], %172 {strides = array<i32>} : memref<8x16x16xf32, #tpu.memory_space<vmem>>, vector<1x16x16xf32>,
    %cst_89 = arith.constant 0.000000e+00 : f32
    %173 = vector.broadcast %cst_89 : f32 to vector<16x16xf32>
    %c1_90 = arith.constant 1 : index
    %174 = arith.index_cast %1 : i32 to index
    %c0_91 = arith.constant 0 : index
    %175 = vector.load %arg2[%c1_90, %174, %c0_91] : memref<8x20x20xf32, #tpu.memory_space<vmem>>, vector<1x20x16xf32>
    %176 = vector.shape_cast %175 : vector<1x20x16xf32> to vector<20x16xf32>
    %c1_92 = arith.constant 1 : index
    %c0_93 = arith.constant 0 : index
    %c0_94 = arith.constant 0 : index
    %c0_95 = arith.constant 0 : index
    %177 = vector.load %arg3[%c1_92, %c0_93, %c0_94, %c0_95] : memref<8x25x16x16xbf16, #tpu.memory_space<vmem>>, vector<1x1x16x16xbf16>
    %178 = vector.shape_cast %177 : vector<1x1x16x16xbf16> to vector<16x16xbf16>
    %179 = arith.extf %178 : vector<16x16xbf16> to vector<16x16xf32>
    %180 = vector.extract_strided_slice %176 {offsets = [0, 0], sizes = [16, 16], strides = [1, 1]} : vector<20x16xf32> to vector<16x16xf32>
    %181 = arith.mulf %179, %180 : vector<16x16xf32>
    %182 = arith.addf %173, %181 : vector<16x16xf32>
    %c1_96 = arith.constant 1 : index
    %c5_97 = arith.constant 5 : index
    %c0_98 = arith.constant 0 : index
    %c0_99 = arith.constant 0 : index
    %183 = vector.load %arg3[%c1_96, %c5_97, %c0_98, %c0_99] : memref<8x25x16x16xbf16, #tpu.memory_space<vmem>>, vector<1x1x16x16xbf16>
    %184 = vector.shape_cast %183 : vector<1x1x16x16xbf16> to vector<16x16xbf16>
    %185 = arith.extf %184 : vector<16x16xbf16> to vector<16x16xf32>
    %186 = vector.extract_strided_slice %176 {offsets = [1, 0], sizes = [16, 16], strides = [1, 1]} : vector<20x16xf32> to vector<16x16xf32>
    %187 = arith.mulf %185, %186 : vector<16x16xf32>
    %188 = arith.addf %182, %187 : vector<16x16xf32>
    %c1_100 = arith.constant 1 : index
    %c10_101 = arith.constant 10 : index
    %c0_102 = arith.constant 0 : index
    %c0_103 = arith.constant 0 : index
    %189 = vector.load %arg3[%c1_100, %c10_101, %c0_102, %c0_103] : memref<8x25x16x16xbf16, #tpu.memory_space<vmem>>, vector<1x1x16x16xbf16>
    %190 = vector.shape_cast %189 : vector<1x1x16x16xbf16> to vector<16x16xbf16>
    %191 = arith.extf %190 : vector<16x16xbf16> to vector<16x16xf32>
    %192 = vector.extract_strided_slice %176 {offsets = [2, 0], sizes = [16, 16], strides = [1, 1]} : vector<20x16xf32> to vector<16x16xf32>
    %193 = arith.mulf %191, %192 : vector<16x16xf32>
    %194 = arith.addf %188, %193 : vector<16x16xf32>
    %c1_104 = arith.constant 1 : index
    %c15_105 = arith.constant 15 : index
    %c0_106 = arith.constant 0 : index
    %c0_107 = arith.constant 0 : index
    %195 = vector.load %arg3[%c1_104, %c15_105, %c0_106, %c0_107] : memref<8x25x16x16xbf16, #tpu.memory_space<vmem>>, vector<1x1x16x16xbf16>
    %196 = vector.shape_cast %195 : vector<1x1x16x16xbf16> to vector<16x16xbf16>
    %197 = arith.extf %196 : vector<16x16xbf16> to vector<16x16xf32>
    %198 = vector.extract_strided_slice %176 {offsets = [3, 0], sizes = [16, 16], strides = [1, 1]} : vector<20x16xf32> to vector<16x16xf32>
    %199 = arith.mulf %197, %198 : vector<16x16xf32>
    %200 = arith.addf %194, %199 : vector<16x16xf32>
    %c1_108 = arith.constant 1 : index
    %c20_109 = arith.constant 20 : index
    %c0_110 = arith.constant 0 : index
    %c0_111 = arith.constant 0 : index
    %201 = vector.load %arg3[%c1_108, %c20_109, %c0_110, %c0_111] : memref<8x25x16x16xbf16, #tpu.memory_space<vmem>>, vector<1x1x16x16xbf16>
    %202 = vector.shape_cast %201 : vector<1x1x16x16xbf16> to vector<16x16xbf16>
    %203 = arith.extf %202 : vector<16x16xbf16> to vector<16x16xf32>
    %204 = vector.extract_strided_slice %176 {offsets = [4, 0], sizes = [16, 16], strides = [1, 1]} : vector<20x16xf32> to vector<16x16xf32>
    %205 = arith.mulf %203, %204 : vector<16x16xf32>
    %206 = arith.addf %200, %205 : vector<16x16xf32>
    %c1_112 = arith.constant 1 : index
    %207 = arith.index_cast %1 : i32 to index
    %c1_113 = arith.constant 1 : index
    %208 = vector.load %arg2[%c1_112, %207, %c1_113] : memref<8x20x20xf32, #tpu.memory_space<vmem>>, vector<1x20x16xf32>
    %209 = vector.shape_cast %208 : vector<1x20x16xf32> to vector<20x16xf32>
    %c1_114 = arith.constant 1 : index
    %c1_115 = arith.constant 1 : index
    %c0_116 = arith.constant 0 : index
    %c0_117 = arith.constant 0 : index
    %210 = vector.load %arg3[%c1_114, %c1_115, %c0_116, %c0_117] : memref<8x25x16x16xbf16, #tpu.memory_space<vmem>>, vector<1x1x16x16xbf16>
    %211 = vector.shape_cast %210 : vector<1x1x16x16xbf16> to vector<16x16xbf16>
    %212 = arith.extf %211 : vector<16x16xbf16> to vector<16x16xf32>
    %213 = vector.extract_strided_slice %209 {offsets = [0, 0], sizes = [16, 16], strides = [1, 1]} : vector<20x16xf32> to vector<16x16xf32>
    %214 = arith.mulf %212, %213 : vector<16x16xf32>
    %215 = arith.addf %206, %214 : vector<16x16xf32>
    %c1_118 = arith.constant 1 : index
    %c6_119 = arith.constant 6 : index
    %c0_120 = arith.constant 0 : index
    %c0_121 = arith.constant 0 : index
    %216 = vector.load %arg3[%c1_118, %c6_119, %c0_120, %c0_121] : memref<8x25x16x16xbf16, #tpu.memory_space<vmem>>, vector<1x1x16x16xbf16>
    %217 = vector.shape_cast %216 : vector<1x1x16x16xbf16> to vector<16x16xbf16>
    %218 = arith.extf %217 : vector<16x16xbf16> to vector<16x16xf32>
    %219 = vector.extract_strided_slice %209 {offsets = [1, 0], sizes = [16, 16], strides = [1, 1]} : vector<20x16xf32> to vector<16x16xf32>
    %220 = arith.mulf %218, %219 : vector<16x16xf32>
    %221 = arith.addf %215, %220 : vector<16x16xf32>
    %c1_122 = arith.constant 1 : index
    %c11_123 = arith.constant 11 : index
    %c0_124 = arith.constant 0 : index
    %c0_125 = arith.constant 0 : index
    %222 = vector.load %arg3[%c1_122, %c11_123, %c0_124, %c0_125] : memref<8x25x16x16xbf16, #tpu.memory_space<vmem>>, vector<1x1x16x16xbf16>
    %223 = vector.shape_cast %222 : vector<1x1x16x16xbf16> to vector<16x16xbf16>
    %224 = arith.extf %223 : vector<16x16xbf16> to vector<16x16xf32>
    %225 = vector.extract_strided_slice %209 {offsets = [2, 0], sizes = [16, 16], strides = [1, 1]} : vector<20x16xf32> to vector<16x16xf32>
    %226 = arith.mulf %224, %225 : vector<16x16xf32>
    %227 = arith.addf %221, %226 : vector<16x16xf32>
    %c1_126 = arith.constant 1 : index
    %c16_127 = arith.constant 16 : index
    %c0_128 = arith.constant 0 : index
    %c0_129 = arith.constant 0 : index
    %228 = vector.load %arg3[%c1_126, %c16_127, %c0_128, %c0_129] : memref<8x25x16x16xbf16, #tpu.memory_space<vmem>>, vector<1x1x16x16xbf16>
    %229 = vector.shape_cast %228 : vector<1x1x16x16xbf16> to vector<16x16xbf16>
    %230 = arith.extf %229 : vector<16x16xbf16> to vector<16x16xf32>
    %231 = vector.extract_strided_slice %209 {offsets = [3, 0], sizes = [16, 16], strides = [1, 1]} : vector<20x16xf32> to vector<16x16xf32>
    %232 = arith.mulf %230, %231 : vector<16x16xf32>
    %233 = arith.addf %227, %232 : vector<16x16xf32>
    %c1_130 = arith.constant 1 : index
    %c21_131 = arith.constant 21 : index
    %c0_132 = arith.constant 0 : index
    %c0_133 = arith.constant 0 : index
    %234 = vector.load %arg3[%c1_130, %c21_131, %c0_132, %c0_133] : memref<8x25x16x16xbf16, #tpu.memory_space<vmem>>, vector<1x1x16x16xbf16>
    %235 = vector.shape_cast %234 : vector<1x1x16x16xbf16> to vector<16x16xbf16>
    %236 = arith.extf %235 : vector<16x16xbf16> to vector<16x16xf32>
    %237 = vector.extract_strided_slice %209 {offsets = [4, 0], sizes = [16, 16], strides = [1, 1]} : vector<20x16xf32> to vector<16x16xf32>
    %238 = arith.mulf %236, %237 : vector<16x16xf32>
    %239 = arith.addf %233, %238 : vector<16x16xf32>
    %c1_134 = arith.constant 1 : index
    %240 = arith.index_cast %1 : i32 to index
    %c2_135 = arith.constant 2 : index
    %241 = vector.load %arg2[%c1_134, %240, %c2_135] : memref<8x20x20xf32, #tpu.memory_space<vmem>>, vector<1x20x16xf32>
    %242 = vector.shape_cast %241 : vector<1x20x16xf32> to vector<20x16xf32>
    %c1_136 = arith.constant 1 : index
    %c2_137 = arith.constant 2 : index
    %c0_138 = arith.constant 0 : index
    %c0_139 = arith.constant 0 : index
    %243 = vector.load %arg3[%c1_136, %c2_137, %c0_138, %c0_139] : memref<8x25x16x16xbf16, #tpu.memory_space<vmem>>, vector<1x1x16x16xbf16>
    %244 = vector.shape_cast %243 : vector<1x1x16x16xbf16> to vector<16x16xbf16>
    %245 = arith.extf %244 : vector<16x16xbf16> to vector<16x16xf32>
    %246 = vector.extract_strided_slice %242 {offsets = [0, 0], sizes = [16, 16], strides = [1, 1]} : vector<20x16xf32> to vector<16x16xf32>
    %247 = arith.mulf %245, %246 : vector<16x16xf32>
    %248 = arith.addf %239, %247 : vector<16x16xf32>
    %c1_140 = arith.constant 1 : index
    %c7_141 = arith.constant 7 : index
    %c0_142 = arith.constant 0 : index
    %c0_143 = arith.constant 0 : index
    %249 = vector.load %arg3[%c1_140, %c7_141, %c0_142, %c0_143] : memref<8x25x16x16xbf16, #tpu.memory_space<vmem>>, vector<1x1x16x16xbf16>
    %250 = vector.shape_cast %249 : vector<1x1x16x16xbf16> to vector<16x16xbf16>
    %251 = arith.extf %250 : vector<16x16xbf16> to vector<16x16xf32>
    %252 = vector.extract_strided_slice %242 {offsets = [1, 0], sizes = [16, 16], strides = [1, 1]} : vector<20x16xf32> to vector<16x16xf32>
    %253 = arith.mulf %251, %252 : vector<16x16xf32>
    %254 = arith.addf %248, %253 : vector<16x16xf32>
    %c1_144 = arith.constant 1 : index
    %c12_145 = arith.constant 12 : index
    %c0_146 = arith.constant 0 : index
    %c0_147 = arith.constant 0 : index
    %255 = vector.load %arg3[%c1_144, %c12_145, %c0_146, %c0_147] : memref<8x25x16x16xbf16, #tpu.memory_space<vmem>>, vector<1x1x16x16xbf16>
    %256 = vector.shape_cast %255 : vector<1x1x16x16xbf16> to vector<16x16xbf16>
    %257 = arith.extf %256 : vector<16x16xbf16> to vector<16x16xf32>
    %258 = vector.extract_strided_slice %242 {offsets = [2, 0], sizes = [16, 16], strides = [1, 1]} : vector<20x16xf32> to vector<16x16xf32>
    %259 = arith.mulf %257, %258 : vector<16x16xf32>
    %260 = arith.addf %254, %259 : vector<16x16xf32>
    %c1_148 = arith.constant 1 : index
    %c17_149 = arith.constant 17 : index
    %c0_150 = arith.constant 0 : index
    %c0_151 = arith.constant 0 : index
    %261 = vector.load %arg3[%c1_148, %c17_149, %c0_150, %c0_151] : memref<8x25x16x16xbf16, #tpu.memory_space<vmem>>, vector<1x1x16x16xbf16>
    %262 = vector.shape_cast %261 : vector<1x1x16x16xbf16> to vector<16x16xbf16>
    %263 = arith.extf %262 : vector<16x16xbf16> to vector<16x16xf32>
    %264 = vector.extract_strided_slice %242 {offsets = [3, 0], sizes = [16, 16], strides = [1, 1]} : vector<20x16xf32> to vector<16x16xf32>
    %265 = arith.mulf %263, %264 : vector<16x16xf32>
    %266 = arith.addf %260, %265 : vector<16x16xf32>
    %c1_152 = arith.constant 1 : index
    %c22_153 = arith.constant 22 : index
    %c0_154 = arith.constant 0 : index
    %c0_155 = arith.constant 0 : index
    %267 = vector.load %arg3[%c1_152, %c22_153, %c0_154, %c0_155] : memref<8x25x16x16xbf16, #tpu.memory_space<vmem>>, vector<1x1x16x16xbf16>
    %268 = vector.shape_cast %267 : vector<1x1x16x16xbf16> to vector<16x16xbf16>
    %269 = arith.extf %268 : vector<16x16xbf16> to vector<16x16xf32>
    %270 = vector.extract_strided_slice %242 {offsets = [4, 0], sizes = [16, 16], strides = [1, 1]} : vector<20x16xf32> to vector<16x16xf32>
    %271 = arith.mulf %269, %270 : vector<16x16xf32>
    %272 = arith.addf %266, %271 : vector<16x16xf32>
    %c1_156 = arith.constant 1 : index
    %273 = arith.index_cast %1 : i32 to index
    %c3_157 = arith.constant 3 : index
    %274 = vector.load %arg2[%c1_156, %273, %c3_157] : memref<8x20x20xf32, #tpu.memory_space<vmem>>, vector<1x20x16xf32>
    %275 = vector.shape_cast %274 : vector<1x20x16xf32> to vector<20x16xf32>
    %c1_158 = arith.constant 1 : index
    %c3_159 = arith.constant 3 : index
    %c0_160 = arith.constant 0 : index
    %c0_161 = arith.constant 0 : index
    %276 = vector.load %arg3[%c1_158, %c3_159, %c0_160, %c0_161] : memref<8x25x16x16xbf16, #tpu.memory_space<vmem>>, vector<1x1x16x16xbf16>
    %277 = vector.shape_cast %276 : vector<1x1x16x16xbf16> to vector<16x16xbf16>
    %278 = arith.extf %277 : vector<16x16xbf16> to vector<16x16xf32>
    %279 = vector.extract_strided_slice %275 {offsets = [0, 0], sizes = [16, 16], strides = [1, 1]} : vector<20x16xf32> to vector<16x16xf32>
    %280 = arith.mulf %278, %279 : vector<16x16xf32>
    %281 = arith.addf %272, %280 : vector<16x16xf32>
    %c1_162 = arith.constant 1 : index
    %c8_163 = arith.constant 8 : index
    %c0_164 = arith.constant 0 : index
    %c0_165 = arith.constant 0 : index
    %282 = vector.load %arg3[%c1_162, %c8_163, %c0_164, %c0_165] : memref<8x25x16x16xbf16, #tpu.memory_space<vmem>>, vector<1x1x16x16xbf16>
    %283 = vector.shape_cast %282 : vector<1x1x16x16xbf16> to vector<16x16xbf16>
    %284 = arith.extf %283 : vector<16x16xbf16> to vector<16x16xf32>
    %285 = vector.extract_strided_slice %275 {offsets = [1, 0], sizes = [16, 16], strides = [1, 1]} : vector<20x16xf32> to vector<16x16xf32>
    %286 = arith.mulf %284, %285 : vector<16x16xf32>
    %287 = arith.addf %281, %286 : vector<16x16xf32>
    %c1_166 = arith.constant 1 : index
    %c13_167 = arith.constant 13 : index
    %c0_168 = arith.constant 0 : index
    %c0_169 = arith.constant 0 : index
    %288 = vector.load %arg3[%c1_166, %c13_167, %c0_168, %c0_169] : memref<8x25x16x16xbf16, #tpu.memory_space<vmem>>, vector<1x1x16x16xbf16>
    %289 = vector.shape_cast %288 : vector<1x1x16x16xbf16> to vector<16x16xbf16>
    %290 = arith.extf %289 : vector<16x16xbf16> to vector<16x16xf32>
    %291 = vector.extract_strided_slice %275 {offsets = [2, 0], sizes = [16, 16], strides = [1, 1]} : vector<20x16xf32> to vector<16x16xf32>
    %292 = arith.mulf %290, %291 : vector<16x16xf32>
    %293 = arith.addf %287, %292 : vector<16x16xf32>
    %c1_170 = arith.constant 1 : index
    %c18_171 = arith.constant 18 : index
    %c0_172 = arith.constant 0 : index
    %c0_173 = arith.constant 0 : index
    %294 = vector.load %arg3[%c1_170, %c18_171, %c0_172, %c0_173] : memref<8x25x16x16xbf16, #tpu.memory_space<vmem>>, vector<1x1x16x16xbf16>
    %295 = vector.shape_cast %294 : vector<1x1x16x16xbf16> to vector<16x16xbf16>
    %296 = arith.extf %295 : vector<16x16xbf16> to vector<16x16xf32>
    %297 = vector.extract_strided_slice %275 {offsets = [3, 0], sizes = [16, 16], strides = [1, 1]} : vector<20x16xf32> to vector<16x16xf32>
    %298 = arith.mulf %296, %297 : vector<16x16xf32>
    %299 = arith.addf %293, %298 : vector<16x16xf32>
    %c1_174 = arith.constant 1 : index
    %c23_175 = arith.constant 23 : index
    %c0_176 = arith.constant 0 : index
    %c0_177 = arith.constant 0 : index
    %300 = vector.load %arg3[%c1_174, %c23_175, %c0_176, %c0_177] : memref<8x25x16x16xbf16, #tpu.memory_space<vmem>>, vector<1x1x16x16xbf16>
    %301 = vector.shape_cast %300 : vector<1x1x16x16xbf16> to vector<16x16xbf16>
    %302 = arith.extf %301 : vector<16x16xbf16> to vector<16x16xf32>
    %303 = vector.extract_strided_slice %275 {offsets = [4, 0], sizes = [16, 16], strides = [1, 1]} : vector<20x16xf32> to vector<16x16xf32>
    %304 = arith.mulf %302, %303 : vector<16x16xf32>
    %305 = arith.addf %299, %304 : vector<16x16xf32>
    %c1_178 = arith.constant 1 : index
    %306 = arith.index_cast %1 : i32 to index
    %c4_179 = arith.constant 4 : index
    %307 = vector.load %arg2[%c1_178, %306, %c4_179] : memref<8x20x20xf32, #tpu.memory_space<vmem>>, vector<1x20x16xf32>
    %308 = vector.shape_cast %307 : vector<1x20x16xf32> to vector<20x16xf32>
    %c1_180 = arith.constant 1 : index
    %c4_181 = arith.constant 4 : index
    %c0_182 = arith.constant 0 : index
    %c0_183 = arith.constant 0 : index
    %309 = vector.load %arg3[%c1_180, %c4_181, %c0_182, %c0_183] : memref<8x25x16x16xbf16, #tpu.memory_space<vmem>>, vector<1x1x16x16xbf16>
    %310 = vector.shape_cast %309 : vector<1x1x16x16xbf16> to vector<16x16xbf16>
    %311 = arith.extf %310 : vector<16x16xbf16> to vector<16x16xf32>
    %312 = vector.extract_strided_slice %308 {offsets = [0, 0], sizes = [16, 16], strides = [1, 1]} : vector<20x16xf32> to vector<16x16xf32>
    %313 = arith.mulf %311, %312 : vector<16x16xf32>
    %314 = arith.addf %305, %313 : vector<16x16xf32>
    %c1_184 = arith.constant 1 : index
    %c9_185 = arith.constant 9 : index
    %c0_186 = arith.constant 0 : index
    %c0_187 = arith.constant 0 : index
    %315 = vector.load %arg3[%c1_184, %c9_185, %c0_186, %c0_187] : memref<8x25x16x16xbf16, #tpu.memory_space<vmem>>, vector<1x1x16x16xbf16>
    %316 = vector.shape_cast %315 : vector<1x1x16x16xbf16> to vector<16x16xbf16>
    %317 = arith.extf %316 : vector<16x16xbf16> to vector<16x16xf32>
    %318 = vector.extract_strided_slice %308 {offsets = [1, 0], sizes = [16, 16], strides = [1, 1]} : vector<20x16xf32> to vector<16x16xf32>
    %319 = arith.mulf %317, %318 : vector<16x16xf32>
    %320 = arith.addf %314, %319 : vector<16x16xf32>
    %c1_188 = arith.constant 1 : index
    %c14_189 = arith.constant 14 : index
    %c0_190 = arith.constant 0 : index
    %c0_191 = arith.constant 0 : index
    %321 = vector.load %arg3[%c1_188, %c14_189, %c0_190, %c0_191] : memref<8x25x16x16xbf16, #tpu.memory_space<vmem>>, vector<1x1x16x16xbf16>
    %322 = vector.shape_cast %321 : vector<1x1x16x16xbf16> to vector<16x16xbf16>
    %323 = arith.extf %322 : vector<16x16xbf16> to vector<16x16xf32>
    %324 = vector.extract_strided_slice %308 {offsets = [2, 0], sizes = [16, 16], strides = [1, 1]} : vector<20x16xf32> to vector<16x16xf32>
    %325 = arith.mulf %323, %324 : vector<16x16xf32>
    %326 = arith.addf %320, %325 : vector<16x16xf32>
    %c1_192 = arith.constant 1 : index
    %c19_193 = arith.constant 19 : index
    %c0_194 = arith.constant 0 : index
    %c0_195 = arith.constant 0 : index
    %327 = vector.load %arg3[%c1_192, %c19_193, %c0_194, %c0_195] : memref<8x25x16x16xbf16, #tpu.memory_space<vmem>>, vector<1x1x16x16xbf16>
    %328 = vector.shape_cast %327 : vector<1x1x16x16xbf16> to vector<16x16xbf16>
    %329 = arith.extf %328 : vector<16x16xbf16> to vector<16x16xf32>
    %330 = vector.extract_strided_slice %308 {offsets = [3, 0], sizes = [16, 16], strides = [1, 1]} : vector<20x16xf32> to vector<16x16xf32>
    %331 = arith.mulf %329, %330 : vector<16x16xf32>
    %332 = arith.addf %326, %331 : vector<16x16xf32>
    %c1_196 = arith.constant 1 : index
    %c24_197 = arith.constant 24 : index
    %c0_198 = arith.constant 0 : index
    %c0_199 = arith.constant 0 : index
    %333 = vector.load %arg3[%c1_196, %c24_197, %c0_198, %c0_199] : memref<8x25x16x16xbf16, #tpu.memory_space<vmem>>, vector<1x1x16x16xbf16>
    %334 = vector.shape_cast %333 : vector<1x1x16x16xbf16> to vector<16x16xbf16>
    %335 = arith.extf %334 : vector<16x16xbf16> to vector<16x16xf32>
    %336 = vector.extract_strided_slice %308 {offsets = [4, 0], sizes = [16, 16], strides = [1, 1]} : vector<20x16xf32> to vector<16x16xf32>
    %337 = arith.mulf %335, %336 : vector<16x16xf32>
    %338 = arith.addf %332, %337 : vector<16x16xf32>
    %cst_200 = arith.constant 1.000000e+00 : f32
    %339 = vector.broadcast %cst_200 : f32 to vector<16x16xf32>
    %340 = arith.mulf %338, %339 : vector<16x16xf32>
    %c1_201 = arith.constant 1 : index
    %c0_202 = arith.constant 0 : index
    %c0_203 = arith.constant 0 : index
    %341 = vector.load %arg4[%c1_201, %c0_202, %c0_203] : memref<8x16x16xf32, #tpu.memory_space<vmem>>, vector<1x16x16xf32>
    %342 = vector.shape_cast %341 : vector<1x16x16xf32> to vector<16x16xf32>
    %343 = vector.shape_cast %340 : vector<16x16xf32> to vector<1x16x16xf32>
    tpu.vector_store %arg4[%c1_201, %c0_202, %c0_203], %343 {strides = array<i32>} : memref<8x16x16xf32, #tpu.memory_space<vmem>>, vector<1x16x16xf32>,
    %cst_204 = arith.constant 0.000000e+00 : f32
    %344 = vector.broadcast %cst_204 : f32 to vector<16x16xf32>
    %c2_205 = arith.constant 2 : index
    %345 = arith.index_cast %1 : i32 to index
    %c0_206 = arith.constant 0 : index
    %346 = vector.load %arg2[%c2_205, %345, %c0_206] : memref<8x20x20xf32, #tpu.memory_space<vmem>>, vector<1x20x16xf32>
    %347 = vector.shape_cast %346 : vector<1x20x16xf32> to vector<20x16xf32>
    %c2_207 = arith.constant 2 : index
    %c0_208 = arith.constant 0 : index
    %c0_209 = arith.constant 0 : index
    %c0_210 = arith.constant 0 : index
    %348 = vector.load %arg3[%c2_207, %c0_208, %c0_209, %c0_210] : memref<8x25x16x16xbf16, #tpu.memory_space<vmem>>, vector<1x1x16x16xbf16>
    %349 = vector.shape_cast %348 : vector<1x1x16x16xbf16> to vector<16x16xbf16>
    %350 = arith.extf %349 : vector<16x16xbf16> to vector<16x16xf32>
    %351 = vector.extract_strided_slice %347 {offsets = [0, 0], sizes = [16, 16], strides = [1, 1]} : vector<20x16xf32> to vector<16x16xf32>
    %352 = arith.mulf %350, %351 : vector<16x16xf32>
    %353 = arith.addf %344, %352 : vector<16x16xf32>
    %c2_211 = arith.constant 2 : index
    %c5_212 = arith.constant 5 : index
    %c0_213 = arith.constant 0 : index
    %c0_214 = arith.constant 0 : index
    %354 = vector.load %arg3[%c2_211, %c5_212, %c0_213, %c0_214] : memref<8x25x16x16xbf16, #tpu.memory_space<vmem>>, vector<1x1x16x16xbf16>
    %355 = vector.shape_cast %354 : vector<1x1x16x16xbf16> to vector<16x16xbf16>
    %356 = arith.extf %355 : vector<16x16xbf16> to vector<16x16xf32>
    %357 = vector.extract_strided_slice %347 {offsets = [1, 0], sizes = [16, 16], strides = [1, 1]} : vector<20x16xf32> to vector<16x16xf32>
    %358 = arith.mulf %356, %357 : vector<16x16xf32>
    %359 = arith.addf %353, %358 : vector<16x16xf32>
    %c2_215 = arith.constant 2 : index
    %c10_216 = arith.constant 10 : index
    %c0_217 = arith.constant 0 : index
    %c0_218 = arith.constant 0 : index
    %360 = vector.load %arg3[%c2_215, %c10_216, %c0_217, %c0_218] : memref<8x25x16x16xbf16, #tpu.memory_space<vmem>>, vector<1x1x16x16xbf16>
    %361 = vector.shape_cast %360 : vector<1x1x16x16xbf16> to vector<16x16xbf16>
    %362 = arith.extf %361 : vector<16x16xbf16> to vector<16x16xf32>
    %363 = vector.extract_strided_slice %347 {offsets = [2, 0], sizes = [16, 16], strides = [1, 1]} : vector<20x16xf32> to vector<16x16xf32>
    %364 = arith.mulf %362, %363 : vector<16x16xf32>
    %365 = arith.addf %359, %364 : vector<16x16xf32>
    %c2_219 = arith.constant 2 : index
    %c15_220 = arith.constant 15 : index
    %c0_221 = arith.constant 0 : index
    %c0_222 = arith.constant 0 : index
    %366 = vector.load %arg3[%c2_219, %c15_220, %c0_221, %c0_222] : memref<8x25x16x16xbf16, #tpu.memory_space<vmem>>, vector<1x1x16x16xbf16>
    %367 = vector.shape_cast %366 : vector<1x1x16x16xbf16> to vector<16x16xbf16>
    %368 = arith.extf %367 : vector<16x16xbf16> to vector<16x16xf32>
    %369 = vector.extract_strided_slice %347 {offsets = [3, 0], sizes = [16, 16], strides = [1, 1]} : vector<20x16xf32> to vector<16x16xf32>
    %370 = arith.mulf %368, %369 : vector<16x16xf32>
    %371 = arith.addf %365, %370 : vector<16x16xf32>
    %c2_223 = arith.constant 2 : index
    %c20_224 = arith.constant 20 : index
    %c0_225 = arith.constant 0 : index
    %c0_226 = arith.constant 0 : index
    %372 = vector.load %arg3[%c2_223, %c20_224, %c0_225, %c0_226] : memref<8x25x16x16xbf16, #tpu.memory_space<vmem>>, vector<1x1x16x16xbf16>
    %373 = vector.shape_cast %372 : vector<1x1x16x16xbf16> to vector<16x16xbf16>
    %374 = arith.extf %373 : vector<16x16xbf16> to vector<16x16xf32>
    %375 = vector.extract_strided_slice %347 {offsets = [4, 0], sizes = [16, 16], strides = [1, 1]} : vector<20x16xf32> to vector<16x16xf32>
    %376 = arith.mulf %374, %375 : vector<16x16xf32>
    %377 = arith.addf %371, %376 : vector<16x16xf32>
    %c2_227 = arith.constant 2 : index
    %378 = arith.index_cast %1 : i32 to index
    %c1_228 = arith.constant 1 : index
    %379 = vector.load %arg2[%c2_227, %378, %c1_228] : memref<8x20x20xf32, #tpu.memory_space<vmem>>, vector<1x20x16xf32>
    %380 = vector.shape_cast %379 : vector<1x20x16xf32> to vector<20x16xf32>
    %c2_229 = arith.constant 2 : index
    %c1_230 = arith.constant 1 : index
    %c0_231 = arith.constant 0 : index
    %c0_232 = arith.constant 0 : index
    %381 = vector.load %arg3[%c2_229, %c1_230, %c0_231, %c0_232] : memref<8x25x16x16xbf16, #tpu.memory_space<vmem>>, vector<1x1x16x16xbf16>
    %382 = vector.shape_cast %381 : vector<1x1x16x16xbf16> to vector<16x16xbf16>
    %383 = arith.extf %382 : vector<16x16xbf16> to vector<16x16xf32>
    %384 = vector.extract_strided_slice %380 {offsets = [0, 0], sizes = [16, 16], strides = [1, 1]} : vector<20x16xf32> to vector<16x16xf32>
    %385 = arith.mulf %383, %384 : vector<16x16xf32>
    %386 = arith.addf %377, %385 : vector<16x16xf32>
    %c2_233 = arith.constant 2 : index
    %c6_234 = arith.constant 6 : index
    %c0_235 = arith.constant 0 : index
    %c0_236 = arith.constant 0 : index
    %387 = vector.load %arg3[%c2_233, %c6_234, %c0_235, %c0_236] : memref<8x25x16x16xbf16, #tpu.memory_space<vmem>>, vector<1x1x16x16xbf16>
    %388 = vector.shape_cast %387 : vector<1x1x16x16xbf16> to vector<16x16xbf16>
    %389 = arith.extf %388 : vector<16x16xbf16> to vector<16x16xf32>
    %390 = vector.extract_strided_slice %380 {offsets = [1, 0], sizes = [16, 16], strides = [1, 1]} : vector<20x16xf32> to vector<16x16xf32>
    %391 = arith.mulf %389, %390 : vector<16x16xf32>
    %392 = arith.addf %386, %391 : vector<16x16xf32>
    %c2_237 = arith.constant 2 : index
    %c11_238 = arith.constant 11 : index
    %c0_239 = arith.constant 0 : index
    %c0_240 = arith.constant 0 : index
    %393 = vector.load %arg3[%c2_237, %c11_238, %c0_239, %c0_240] : memref<8x25x16x16xbf16, #tpu.memory_space<vmem>>, vector<1x1x16x16xbf16>
    %394 = vector.shape_cast %393 : vector<1x1x16x16xbf16> to vector<16x16xbf16>
    %395 = arith.extf %394 : vector<16x16xbf16> to vector<16x16xf32>
    %396 = vector.extract_strided_slice %380 {offsets = [2, 0], sizes = [16, 16], strides = [1, 1]} : vector<20x16xf32> to vector<16x16xf32>
    %397 = arith.mulf %395, %396 : vector<16x16xf32>
    %398 = arith.addf %392, %397 : vector<16x16xf32>
    %c2_241 = arith.constant 2 : index
    %c16_242 = arith.constant 16 : index
    %c0_243 = arith.constant 0 : index
    %c0_244 = arith.constant 0 : index
    %399 = vector.load %arg3[%c2_241, %c16_242, %c0_243, %c0_244] : memref<8x25x16x16xbf16, #tpu.memory_space<vmem>>, vector<1x1x16x16xbf16>
    %400 = vector.shape_cast %399 : vector<1x1x16x16xbf16> to vector<16x16xbf16>
    %401 = arith.extf %400 : vector<16x16xbf16> to vector<16x16xf32>
    %402 = vector.extract_strided_slice %380 {offsets = [3, 0], sizes = [16, 16], strides = [1, 1]} : vector<20x16xf32> to vector<16x16xf32>
    %403 = arith.mulf %401, %402 : vector<16x16xf32>
    %404 = arith.addf %398, %403 : vector<16x16xf32>
    %c2_245 = arith.constant 2 : index
    %c21_246 = arith.constant 21 : index
    %c0_247 = arith.constant 0 : index
    %c0_248 = arith.constant 0 : index
    %405 = vector.load %arg3[%c2_245, %c21_246, %c0_247, %c0_248] : memref<8x25x16x16xbf16, #tpu.memory_space<vmem>>, vector<1x1x16x16xbf16>
    %406 = vector.shape_cast %405 : vector<1x1x16x16xbf16> to vector<16x16xbf16>
    %407 = arith.extf %406 : vector<16x16xbf16> to vector<16x16xf32>
    %408 = vector.extract_strided_slice %380 {offsets = [4, 0], sizes = [16, 16], strides = [1, 1]} : vector<20x16xf32> to vector<16x16xf32>
    %409 = arith.mulf %407, %408 : vector<16x16xf32>
    %410 = arith.addf %404, %409 : vector<16x16xf32>
    %c2_249 = arith.constant 2 : index
    %411 = arith.index_cast %1 : i32 to index
    %c2_250 = arith.constant 2 : index
    %412 = vector.load %arg2[%c2_249, %411, %c2_250] : memref<8x20x20xf32, #tpu.memory_space<vmem>>, vector<1x20x16xf32>
    %413 = vector.shape_cast %412 : vector<1x20x16xf32> to vector<20x16xf32>
    %c2_251 = arith.constant 2 : index
    %c2_252 = arith.constant 2 : index
    %c0_253 = arith.constant 0 : index
    %c0_254 = arith.constant 0 : index
    %414 = vector.load %arg3[%c2_251, %c2_252, %c0_253, %c0_254] : memref<8x25x16x16xbf16, #tpu.memory_space<vmem>>, vector<1x1x16x16xbf16>
    %415 = vector.shape_cast %414 : vector<1x1x16x16xbf16> to vector<16x16xbf16>
    %416 = arith.extf %415 : vector<16x16xbf16> to vector<16x16xf32>
    %417 = vector.extract_strided_slice %413 {offsets = [0, 0], sizes = [16, 16], strides = [1, 1]} : vector<20x16xf32> to vector<16x16xf32>
    %418 = arith.mulf %416, %417 : vector<16x16xf32>
    %419 = arith.addf %410, %418 : vector<16x16xf32>
    %c2_255 = arith.constant 2 : index
    %c7_256 = arith.constant 7 : index
    %c0_257 = arith.constant 0 : index
    %c0_258 = arith.constant 0 : index
    %420 = vector.load %arg3[%c2_255, %c7_256, %c0_257, %c0_258] : memref<8x25x16x16xbf16, #tpu.memory_space<vmem>>, vector<1x1x16x16xbf16>
    %421 = vector.shape_cast %420 : vector<1x1x16x16xbf16> to vector<16x16xbf16>
    %422 = arith.extf %421 : vector<16x16xbf16> to vector<16x16xf32>
    %423 = vector.extract_strided_slice %413 {offsets = [1, 0], sizes = [16, 16], strides = [1, 1]} : vector<20x16xf32> to vector<16x16xf32>
    %424 = arith.mulf %422, %423 : vector<16x16xf32>
    %425 = arith.addf %419, %424 : vector<16x16xf32>
    %c2_259 = arith.constant 2 : index
    %c12_260 = arith.constant 12 : index
    %c0_261 = arith.constant 0 : index
    %c0_262 = arith.constant 0 : index
    %426 = vector.load %arg3[%c2_259, %c12_260, %c0_261, %c0_262] : memref<8x25x16x16xbf16, #tpu.memory_space<vmem>>, vector<1x1x16x16xbf16>
    %427 = vector.shape_cast %426 : vector<1x1x16x16xbf16> to vector<16x16xbf16>
    %428 = arith.extf %427 : vector<16x16xbf16> to vector<16x16xf32>
    %429 = vector.extract_strided_slice %413 {offsets = [2, 0], sizes = [16, 16], strides = [1, 1]} : vector<20x16xf32> to vector<16x16xf32>
    %430 = arith.mulf %428, %429 : vector<16x16xf32>
    %431 = arith.addf %425, %430 : vector<16x16xf32>
    %c2_263 = arith.constant 2 : index
    %c17_264 = arith.constant 17 : index
    %c0_265 = arith.constant 0 : index
    %c0_266 = arith.constant 0 : index
    %432 = vector.load %arg3[%c2_263, %c17_264, %c0_265, %c0_266] : memref<8x25x16x16xbf16, #tpu.memory_space<vmem>>, vector<1x1x16x16xbf16>
    %433 = vector.shape_cast %432 : vector<1x1x16x16xbf16> to vector<16x16xbf16>
    %434 = arith.extf %433 : vector<16x16xbf16> to vector<16x16xf32>
    %435 = vector.extract_strided_slice %413 {offsets = [3, 0], sizes = [16, 16], strides = [1, 1]} : vector<20x16xf32> to vector<16x16xf32>
    %436 = arith.mulf %434, %435 : vector<16x16xf32>
    %437 = arith.addf %431, %436 : vector<16x16xf32>
    %c2_267 = arith.constant 2 : index
    %c22_268 = arith.constant 22 : index
    %c0_269 = arith.constant 0 : index
    %c0_270 = arith.constant 0 : index
    %438 = vector.load %arg3[%c2_267, %c22_268, %c0_269, %c0_270] : memref<8x25x16x16xbf16, #tpu.memory_space<vmem>>, vector<1x1x16x16xbf16>
    %439 = vector.shape_cast %438 : vector<1x1x16x16xbf16> to vector<16x16xbf16>
    %440 = arith.extf %439 : vector<16x16xbf16> to vector<16x16xf32>
    %441 = vector.extract_strided_slice %413 {offsets = [4, 0], sizes = [16, 16], strides = [1, 1]} : vector<20x16xf32> to vector<16x16xf32>
    %442 = arith.mulf %440, %441 : vector<16x16xf32>
    %443 = arith.addf %437, %442 : vector<16x16xf32>
    %c2_271 = arith.constant 2 : index
    %444 = arith.index_cast %1 : i32 to index
    %c3_272 = arith.constant 3 : index
    %445 = vector.load %arg2[%c2_271, %444, %c3_272] : memref<8x20x20xf32, #tpu.memory_space<vmem>>, vector<1x20x16xf32>
    %446 = vector.shape_cast %445 : vector<1x20x16xf32> to vector<20x16xf32>
    %c2_273 = arith.constant 2 : index
    %c3_274 = arith.constant 3 : index
    %c0_275 = arith.constant 0 : index
    %c0_276 = arith.constant 0 : index
    %447 = vector.load %arg3[%c2_273, %c3_274, %c0_275, %c0_276] : memref<8x25x16x16xbf16, #tpu.memory_space<vmem>>, vector<1x1x16x16xbf16>
    %448 = vector.shape_cast %447 : vector<1x1x16x16xbf16> to vector<16x16xbf16>
    %449 = arith.extf %448 : vector<16x16xbf16> to vector<16x16xf32>
    %450 = vector.extract_strided_slice %446 {offsets = [0, 0], sizes = [16, 16], strides = [1, 1]} : vector<20x16xf32> to vector<16x16xf32>
    %451 = arith.mulf %449, %450 : vector<16x16xf32>
    %452 = arith.addf %443, %451 : vector<16x16xf32>
    %c2_277 = arith.constant 2 : index
    %c8_278 = arith.constant 8 : index
    %c0_279 = arith.constant 0 : index
    %c0_280 = arith.constant 0 : index
    %453 = vector.load %arg3[%c2_277, %c8_278, %c0_279, %c0_280] : memref<8x25x16x16xbf16, #tpu.memory_space<vmem>>, vector<1x1x16x16xbf16>
    %454 = vector.shape_cast %453 : vector<1x1x16x16xbf16> to vector<16x16xbf16>
    %455 = arith.extf %454 : vector<16x16xbf16> to vector<16x16xf32>
    %456 = vector.extract_strided_slice %446 {offsets = [1, 0], sizes = [16, 16], strides = [1, 1]} : vector<20x16xf32> to vector<16x16xf32>
    %457 = arith.mulf %455, %456 : vector<16x16xf32>
    %458 = arith.addf %452, %457 : vector<16x16xf32>
    %c2_281 = arith.constant 2 : index
    %c13_282 = arith.constant 13 : index
    %c0_283 = arith.constant 0 : index
    %c0_284 = arith.constant 0 : index
    %459 = vector.load %arg3[%c2_281, %c13_282, %c0_283, %c0_284] : memref<8x25x16x16xbf16, #tpu.memory_space<vmem>>, vector<1x1x16x16xbf16>
    %460 = vector.shape_cast %459 : vector<1x1x16x16xbf16> to vector<16x16xbf16>
    %461 = arith.extf %460 : vector<16x16xbf16> to vector<16x16xf32>
    %462 = vector.extract_strided_slice %446 {offsets = [2, 0], sizes = [16, 16], strides = [1, 1]} : vector<20x16xf32> to vector<16x16xf32>
    %463 = arith.mulf %461, %462 : vector<16x16xf32>
    %464 = arith.addf %458, %463 : vector<16x16xf32>
    %c2_285 = arith.constant 2 : index
    %c18_286 = arith.constant 18 : index
    %c0_287 = arith.constant 0 : index
    %c0_288 = arith.constant 0 : index
    %465 = vector.load %arg3[%c2_285, %c18_286, %c0_287, %c0_288] : memref<8x25x16x16xbf16, #tpu.memory_space<vmem>>, vector<1x1x16x16xbf16>
    %466 = vector.shape_cast %465 : vector<1x1x16x16xbf16> to vector<16x16xbf16>
    %467 = arith.extf %466 : vector<16x16xbf16> to vector<16x16xf32>
    %468 = vector.extract_strided_slice %446 {offsets = [3, 0], sizes = [16, 16], strides = [1, 1]} : vector<20x16xf32> to vector<16x16xf32>
    %469 = arith.mulf %467, %468 : vector<16x16xf32>
    %470 = arith.addf %464, %469 : vector<16x16xf32>
    %c2_289 = arith.constant 2 : index
    %c23_290 = arith.constant 23 : index
    %c0_291 = arith.constant 0 : index
    %c0_292 = arith.constant 0 : index
    %471 = vector.load %arg3[%c2_289, %c23_290, %c0_291, %c0_292] : memref<8x25x16x16xbf16, #tpu.memory_space<vmem>>, vector<1x1x16x16xbf16>
    %472 = vector.shape_cast %471 : vector<1x1x16x16xbf16> to vector<16x16xbf16>
    %473 = arith.extf %472 : vector<16x16xbf16> to vector<16x16xf32>
    %474 = vector.extract_strided_slice %446 {offsets = [4, 0], sizes = [16, 16], strides = [1, 1]} : vector<20x16xf32> to vector<16x16xf32>
    %475 = arith.mulf %473, %474 : vector<16x16xf32>
    %476 = arith.addf %470, %475 : vector<16x16xf32>
    %c2_293 = arith.constant 2 : index
    %477 = arith.index_cast %1 : i32 to index
    %c4_294 = arith.constant 4 : index
    %478 = vector.load %arg2[%c2_293, %477, %c4_294] : memref<8x20x20xf32, #tpu.memory_space<vmem>>, vector<1x20x16xf32>
    %479 = vector.shape_cast %478 : vector<1x20x16xf32> to vector<20x16xf32>
    %c2_295 = arith.constant 2 : index
    %c4_296 = arith.constant 4 : index
    %c0_297 = arith.constant 0 : index
    %c0_298 = arith.constant 0 : index
    %480 = vector.load %arg3[%c2_295, %c4_296, %c0_297, %c0_298] : memref<8x25x16x16xbf16, #tpu.memory_space<vmem>>, vector<1x1x16x16xbf16>
    %481 = vector.shape_cast %480 : vector<1x1x16x16xbf16> to vector<16x16xbf16>
    %482 = arith.extf %481 : vector<16x16xbf16> to vector<16x16xf32>
    %483 = vector.extract_strided_slice %479 {offsets = [0, 0], sizes = [16, 16], strides = [1, 1]} : vector<20x16xf32> to vector<16x16xf32>
    %484 = arith.mulf %482, %483 : vector<16x16xf32>
    %485 = arith.addf %476, %484 : vector<16x16xf32>
    %c2_299 = arith.constant 2 : index
    %c9_300 = arith.constant 9 : index
    %c0_301 = arith.constant 0 : index
    %c0_302 = arith.constant 0 : index
    %486 = vector.load %arg3[%c2_299, %c9_300, %c0_301, %c0_302] : memref<8x25x16x16xbf16, #tpu.memory_space<vmem>>, vector<1x1x16x16xbf16>
    %487 = vector.shape_cast %486 : vector<1x1x16x16xbf16> to vector<16x16xbf16>
    %488 = arith.extf %487 : vector<16x16xbf16> to vector<16x16xf32>
    %489 = vector.extract_strided_slice %479 {offsets = [1, 0], sizes = [16, 16], strides = [1, 1]} : vector<20x16xf32> to vector<16x16xf32>
    %490 = arith.mulf %488, %489 : vector<16x16xf32>
    %491 = arith.addf %485, %490 : vector<16x16xf32>
    %c2_303 = arith.constant 2 : index
    %c14_304 = arith.constant 14 : index
    %c0_305 = arith.constant 0 : index
    %c0_306 = arith.constant 0 : index
    %492 = vector.load %arg3[%c2_303, %c14_304, %c0_305, %c0_306] : memref<8x25x16x16xbf16, #tpu.memory_space<vmem>>, vector<1x1x16x16xbf16>
    %493 = vector.shape_cast %492 : vector<1x1x16x16xbf16> to vector<16x16xbf16>
    %494 = arith.extf %493 : vector<16x16xbf16> to vector<16x16xf32>
    %495 = vector.extract_strided_slice %479 {offsets = [2, 0], sizes = [16, 16], strides = [1, 1]} : vector<20x16xf32> to vector<16x16xf32>
    %496 = arith.mulf %494, %495 : vector<16x16xf32>
    %497 = arith.addf %491, %496 : vector<16x16xf32>
    %c2_307 = arith.constant 2 : index
    %c19_308 = arith.constant 19 : index
    %c0_309 = arith.constant 0 : index
    %c0_310 = arith.constant 0 : index
    %498 = vector.load %arg3[%c2_307, %c19_308, %c0_309, %c0_310] : memref<8x25x16x16xbf16, #tpu.memory_space<vmem>>, vector<1x1x16x16xbf16>
    %499 = vector.shape_cast %498 : vector<1x1x16x16xbf16> to vector<16x16xbf16>
    %500 = arith.extf %499 : vector<16x16xbf16> to vector<16x16xf32>
    %501 = vector.extract_strided_slice %479 {offsets = [3, 0], sizes = [16, 16], strides = [1, 1]} : vector<20x16xf32> to vector<16x16xf32>
    %502 = arith.mulf %500, %501 : vector<16x16xf32>
    %503 = arith.addf %497, %502 : vector<16x16xf32>
    %c2_311 = arith.constant 2 : index
    %c24_312 = arith.constant 24 : index
    %c0_313 = arith.constant 0 : index
    %c0_314 = arith.constant 0 : index
    %504 = vector.load %arg3[%c2_311, %c24_312, %c0_313, %c0_314] : memref<8x25x16x16xbf16, #tpu.memory_space<vmem>>, vector<1x1x16x16xbf16>
    %505 = vector.shape_cast %504 : vector<1x1x16x16xbf16> to vector<16x16xbf16>
    %506 = arith.extf %505 : vector<16x16xbf16> to vector<16x16xf32>
    %507 = vector.extract_strided_slice %479 {offsets = [4, 0], sizes = [16, 16], strides = [1, 1]} : vector<20x16xf32> to vector<16x16xf32>
    %508 = arith.mulf %506, %507 : vector<16x16xf32>
    %509 = arith.addf %503, %508 : vector<16x16xf32>
    %cst_315 = arith.constant 1.000000e+00 : f32
    %510 = vector.broadcast %cst_315 : f32 to vector<16x16xf32>
    %511 = arith.mulf %509, %510 : vector<16x16xf32>
    %c2_316 = arith.constant 2 : index
    %c0_317 = arith.constant 0 : index
    %c0_318 = arith.constant 0 : index
    %512 = vector.load %arg4[%c2_316, %c0_317, %c0_318] : memref<8x16x16xf32, #tpu.memory_space<vmem>>, vector<1x16x16xf32>
    %513 = vector.shape_cast %512 : vector<1x16x16xf32> to vector<16x16xf32>
    %514 = vector.shape_cast %511 : vector<16x16xf32> to vector<1x16x16xf32>
    tpu.vector_store %arg4[%c2_316, %c0_317, %c0_318], %514 {strides = array<i32>} : memref<8x16x16xf32, #tpu.memory_space<vmem>>, vector<1x16x16xf32>,
    %cst_319 = arith.constant 0.000000e+00 : f32
    %515 = vector.broadcast %cst_319 : f32 to vector<16x16xf32>
    %c3_320 = arith.constant 3 : index
    %516 = arith.index_cast %1 : i32 to index
    %c0_321 = arith.constant 0 : index
    %517 = vector.load %arg2[%c3_320, %516, %c0_321] : memref<8x20x20xf32, #tpu.memory_space<vmem>>, vector<1x20x16xf32>
    %518 = vector.shape_cast %517 : vector<1x20x16xf32> to vector<20x16xf32>
    %c3_322 = arith.constant 3 : index
    %c0_323 = arith.constant 0 : index
    %c0_324 = arith.constant 0 : index
    %c0_325 = arith.constant 0 : index
    %519 = vector.load %arg3[%c3_322, %c0_323, %c0_324, %c0_325] : memref<8x25x16x16xbf16, #tpu.memory_space<vmem>>, vector<1x1x16x16xbf16>
    %520 = vector.shape_cast %519 : vector<1x1x16x16xbf16> to vector<16x16xbf16>
    %521 = arith.extf %520 : vector<16x16xbf16> to vector<16x16xf32>
    %522 = vector.extract_strided_slice %518 {offsets = [0, 0], sizes = [16, 16], strides = [1, 1]} : vector<20x16xf32> to vector<16x16xf32>
    %523 = arith.mulf %521, %522 : vector<16x16xf32>
    %524 = arith.addf %515, %523 : vector<16x16xf32>
    %c3_326 = arith.constant 3 : index
    %c5_327 = arith.constant 5 : index
    %c0_328 = arith.constant 0 : index
    %c0_329 = arith.constant 0 : index
    %525 = vector.load %arg3[%c3_326, %c5_327, %c0_328, %c0_329] : memref<8x25x16x16xbf16, #tpu.memory_space<vmem>>, vector<1x1x16x16xbf16>
    %526 = vector.shape_cast %525 : vector<1x1x16x16xbf16> to vector<16x16xbf16>
    %527 = arith.extf %526 : vector<16x16xbf16> to vector<16x16xf32>
    %528 = vector.extract_strided_slice %518 {offsets = [1, 0], sizes = [16, 16], strides = [1, 1]} : vector<20x16xf32> to vector<16x16xf32>
    %529 = arith.mulf %527, %528 : vector<16x16xf32>
    %530 = arith.addf %524, %529 : vector<16x16xf32>
    %c3_330 = arith.constant 3 : index
    %c10_331 = arith.constant 10 : index
    %c0_332 = arith.constant 0 : index
    %c0_333 = arith.constant 0 : index
    %531 = vector.load %arg3[%c3_330, %c10_331, %c0_332, %c0_333] : memref<8x25x16x16xbf16, #tpu.memory_space<vmem>>, vector<1x1x16x16xbf16>
    %532 = vector.shape_cast %531 : vector<1x1x16x16xbf16> to vector<16x16xbf16>
    %533 = arith.extf %532 : vector<16x16xbf16> to vector<16x16xf32>
    %534 = vector.extract_strided_slice %518 {offsets = [2, 0], sizes = [16, 16], strides = [1, 1]} : vector<20x16xf32> to vector<16x16xf32>
    %535 = arith.mulf %533, %534 : vector<16x16xf32>
    %536 = arith.addf %530, %535 : vector<16x16xf32>
    %c3_334 = arith.constant 3 : index
    %c15_335 = arith.constant 15 : index
    %c0_336 = arith.constant 0 : index
    %c0_337 = arith.constant 0 : index
    %537 = vector.load %arg3[%c3_334, %c15_335, %c0_336, %c0_337] : memref<8x25x16x16xbf16, #tpu.memory_space<vmem>>, vector<1x1x16x16xbf16>
    %538 = vector.shape_cast %537 : vector<1x1x16x16xbf16> to vector<16x16xbf16>
    %539 = arith.extf %538 : vector<16x16xbf16> to vector<16x16xf32>
    %540 = vector.extract_strided_slice %518 {offsets = [3, 0], sizes = [16, 16], strides = [1, 1]} : vector<20x16xf32> to vector<16x16xf32>
    %541 = arith.mulf %539, %540 : vector<16x16xf32>
    %542 = arith.addf %536, %541 : vector<16x16xf32>
    %c3_338 = arith.constant 3 : index
    %c20_339 = arith.constant 20 : index
    %c0_340 = arith.constant 0 : index
    %c0_341 = arith.constant 0 : index
    %543 = vector.load %arg3[%c3_338, %c20_339, %c0_340, %c0_341] : memref<8x25x16x16xbf16, #tpu.memory_space<vmem>>, vector<1x1x16x16xbf16>
    %544 = vector.shape_cast %543 : vector<1x1x16x16xbf16> to vector<16x16xbf16>
    %545 = arith.extf %544 : vector<16x16xbf16> to vector<16x16xf32>
    %546 = vector.extract_strided_slice %518 {offsets = [4, 0], sizes = [16, 16], strides = [1, 1]} : vector<20x16xf32> to vector<16x16xf32>
    %547 = arith.mulf %545, %546 : vector<16x16xf32>
    %548 = arith.addf %542, %547 : vector<16x16xf32>
    %c3_342 = arith.constant 3 : index
    %549 = arith.index_cast %1 : i32 to index
    %c1_343 = arith.constant 1 : index
    %550 = vector.load %arg2[%c3_342, %549, %c1_343] : memref<8x20x20xf32, #tpu.memory_space<vmem>>, vector<1x20x16xf32>
    %551 = vector.shape_cast %550 : vector<1x20x16xf32> to vector<20x16xf32>
    %c3_344 = arith.constant 3 : index
    %c1_345 = arith.constant 1 : index
    %c0_346 = arith.constant 0 : index
    %c0_347 = arith.constant 0 : index
    %552 = vector.load %arg3[%c3_344, %c1_345, %c0_346, %c0_347] : memref<8x25x16x16xbf16, #tpu.memory_space<vmem>>, vector<1x1x16x16xbf16>
    %553 = vector.shape_cast %552 : vector<1x1x16x16xbf16> to vector<16x16xbf16>
    %554 = arith.extf %553 : vector<16x16xbf16> to vector<16x16xf32>
    %555 = vector.extract_strided_slice %551 {offsets = [0, 0], sizes = [16, 16], strides = [1, 1]} : vector<20x16xf32> to vector<16x16xf32>
    %556 = arith.mulf %554, %555 : vector<16x16xf32>
    %557 = arith.addf %548, %556 : vector<16x16xf32>
    %c3_348 = arith.constant 3 : index
    %c6_349 = arith.constant 6 : index
    %c0_350 = arith.constant 0 : index
    %c0_351 = arith.constant 0 : index
    %558 = vector.load %arg3[%c3_348, %c6_349, %c0_350, %c0_351] : memref<8x25x16x16xbf16, #tpu.memory_space<vmem>>, vector<1x1x16x16xbf16>
    %559 = vector.shape_cast %558 : vector<1x1x16x16xbf16> to vector<16x16xbf16>
    %560 = arith.extf %559 : vector<16x16xbf16> to vector<16x16xf32>
    %561 = vector.extract_strided_slice %551 {offsets = [1, 0], sizes = [16, 16], strides = [1, 1]} : vector<20x16xf32> to vector<16x16xf32>
    %562 = arith.mulf %560, %561 : vector<16x16xf32>
    %563 = arith.addf %557, %562 : vector<16x16xf32>
    %c3_352 = arith.constant 3 : index
    %c11_353 = arith.constant 11 : index
    %c0_354 = arith.constant 0 : index
    %c0_355 = arith.constant 0 : index
    %564 = vector.load %arg3[%c3_352, %c11_353, %c0_354, %c0_355] : memref<8x25x16x16xbf16, #tpu.memory_space<vmem>>, vector<1x1x16x16xbf16>
    %565 = vector.shape_cast %564 : vector<1x1x16x16xbf16> to vector<16x16xbf16>
    %566 = arith.extf %565 : vector<16x16xbf16> to vector<16x16xf32>
    %567 = vector.extract_strided_slice %551 {offsets = [2, 0], sizes = [16, 16], strides = [1, 1]} : vector<20x16xf32> to vector<16x16xf32>
    %568 = arith.mulf %566, %567 : vector<16x16xf32>
    %569 = arith.addf %563, %568 : vector<16x16xf32>
    %c3_356 = arith.constant 3 : index
    %c16_357 = arith.constant 16 : index
    %c0_358 = arith.constant 0 : index
    %c0_359 = arith.constant 0 : index
    %570 = vector.load %arg3[%c3_356, %c16_357, %c0_358, %c0_359] : memref<8x25x16x16xbf16, #tpu.memory_space<vmem>>, vector<1x1x16x16xbf16>
    %571 = vector.shape_cast %570 : vector<1x1x16x16xbf16> to vector<16x16xbf16>
    %572 = arith.extf %571 : vector<16x16xbf16> to vector<16x16xf32>
    %573 = vector.extract_strided_slice %551 {offsets = [3, 0], sizes = [16, 16], strides = [1, 1]} : vector<20x16xf32> to vector<16x16xf32>
    %574 = arith.mulf %572, %573 : vector<16x16xf32>
    %575 = arith.addf %569, %574 : vector<16x16xf32>
    %c3_360 = arith.constant 3 : index
    %c21_361 = arith.constant 21 : index
    %c0_362 = arith.constant 0 : index
    %c0_363 = arith.constant 0 : index
    %576 = vector.load %arg3[%c3_360, %c21_361, %c0_362, %c0_363] : memref<8x25x16x16xbf16, #tpu.memory_space<vmem>>, vector<1x1x16x16xbf16>
    %577 = vector.shape_cast %576 : vector<1x1x16x16xbf16> to vector<16x16xbf16>
    %578 = arith.extf %577 : vector<16x16xbf16> to vector<16x16xf32>
    %579 = vector.extract_strided_slice %551 {offsets = [4, 0], sizes = [16, 16], strides = [1, 1]} : vector<20x16xf32> to vector<16x16xf32>
    %580 = arith.mulf %578, %579 : vector<16x16xf32>
    %581 = arith.addf %575, %580 : vector<16x16xf32>
    %c3_364 = arith.constant 3 : index
    %582 = arith.index_cast %1 : i32 to index
    %c2_365 = arith.constant 2 : index
    %583 = vector.load %arg2[%c3_364, %582, %c2_365] : memref<8x20x20xf32, #tpu.memory_space<vmem>>, vector<1x20x16xf32>
    %584 = vector.shape_cast %583 : vector<1x20x16xf32> to vector<20x16xf32>
    %c3_366 = arith.constant 3 : index
    %c2_367 = arith.constant 2 : index
    %c0_368 = arith.constant 0 : index
    %c0_369 = arith.constant 0 : index
    %585 = vector.load %arg3[%c3_366, %c2_367, %c0_368, %c0_369] : memref<8x25x16x16xbf16, #tpu.memory_space<vmem>>, vector<1x1x16x16xbf16>
    %586 = vector.shape_cast %585 : vector<1x1x16x16xbf16> to vector<16x16xbf16>
    %587 = arith.extf %586 : vector<16x16xbf16> to vector<16x16xf32>
    %588 = vector.extract_strided_slice %584 {offsets = [0, 0], sizes = [16, 16], strides = [1, 1]} : vector<20x16xf32> to vector<16x16xf32>
    %589 = arith.mulf %587, %588 : vector<16x16xf32>
    %590 = arith.addf %581, %589 : vector<16x16xf32>
    %c3_370 = arith.constant 3 : index
    %c7_371 = arith.constant 7 : index
    %c0_372 = arith.constant 0 : index
    %c0_373 = arith.constant 0 : index
    %591 = vector.load %arg3[%c3_370, %c7_371, %c0_372, %c0_373] : memref<8x25x16x16xbf16, #tpu.memory_space<vmem>>, vector<1x1x16x16xbf16>
    %592 = vector.shape_cast %591 : vector<1x1x16x16xbf16> to vector<16x16xbf16>
    %593 = arith.extf %592 : vector<16x16xbf16> to vector<16x16xf32>
    %594 = vector.extract_strided_slice %584 {offsets = [1, 0], sizes = [16, 16], strides = [1, 1]} : vector<20x16xf32> to vector<16x16xf32>
    %595 = arith.mulf %593, %594 : vector<16x16xf32>
    %596 = arith.addf %590, %595 : vector<16x16xf32>
    %c3_374 = arith.constant 3 : index
    %c12_375 = arith.constant 12 : index
    %c0_376 = arith.constant 0 : index
    %c0_377 = arith.constant 0 : index
    %597 = vector.load %arg3[%c3_374, %c12_375, %c0_376, %c0_377] : memref<8x25x16x16xbf16, #tpu.memory_space<vmem>>, vector<1x1x16x16xbf16>
    %598 = vector.shape_cast %597 : vector<1x1x16x16xbf16> to vector<16x16xbf16>
    %599 = arith.extf %598 : vector<16x16xbf16> to vector<16x16xf32>
    %600 = vector.extract_strided_slice %584 {offsets = [2, 0], sizes = [16, 16], strides = [1, 1]} : vector<20x16xf32> to vector<16x16xf32>
    %601 = arith.mulf %599, %600 : vector<16x16xf32>
    %602 = arith.addf %596, %601 : vector<16x16xf32>
    %c3_378 = arith.constant 3 : index
    %c17_379 = arith.constant 17 : index
    %c0_380 = arith.constant 0 : index
    %c0_381 = arith.constant 0 : index
    %603 = vector.load %arg3[%c3_378, %c17_379, %c0_380, %c0_381] : memref<8x25x16x16xbf16, #tpu.memory_space<vmem>>, vector<1x1x16x16xbf16>
    %604 = vector.shape_cast %603 : vector<1x1x16x16xbf16> to vector<16x16xbf16>
    %605 = arith.extf %604 : vector<16x16xbf16> to vector<16x16xf32>
    %606 = vector.extract_strided_slice %584 {offsets = [3, 0], sizes = [16, 16], strides = [1, 1]} : vector<20x16xf32> to vector<16x16xf32>
    %607 = arith.mulf %605, %606 : vector<16x16xf32>
    %608 = arith.addf %602, %607 : vector<16x16xf32>
    %c3_382 = arith.constant 3 : index
    %c22_383 = arith.constant 22 : index
    %c0_384 = arith.constant 0 : index
    %c0_385 = arith.constant 0 : index
    %609 = vector.load %arg3[%c3_382, %c22_383, %c0_384, %c0_385] : memref<8x25x16x16xbf16, #tpu.memory_space<vmem>>, vector<1x1x16x16xbf16>
    %610 = vector.shape_cast %609 : vector<1x1x16x16xbf16> to vector<16x16xbf16>
    %611 = arith.extf %610 : vector<16x16xbf16> to vector<16x16xf32>
    %612 = vector.extract_strided_slice %584 {offsets = [4, 0], sizes = [16, 16], strides = [1, 1]} : vector<20x16xf32> to vector<16x16xf32>
    %613 = arith.mulf %611, %612 : vector<16x16xf32>
    %614 = arith.addf %608, %613 : vector<16x16xf32>
    %c3_386 = arith.constant 3 : index
    %615 = arith.index_cast %1 : i32 to index
    %c3_387 = arith.constant 3 : index
    %616 = vector.load %arg2[%c3_386, %615, %c3_387] : memref<8x20x20xf32, #tpu.memory_space<vmem>>, vector<1x20x16xf32>
    %617 = vector.shape_cast %616 : vector<1x20x16xf32> to vector<20x16xf32>
    %c3_388 = arith.constant 3 : index
    %c3_389 = arith.constant 3 : index
    %c0_390 = arith.constant 0 : index
    %c0_391 = arith.constant 0 : index
    %618 = vector.load %arg3[%c3_388, %c3_389, %c0_390, %c0_391] : memref<8x25x16x16xbf16, #tpu.memory_space<vmem>>, vector<1x1x16x16xbf16>
    %619 = vector.shape_cast %618 : vector<1x1x16x16xbf16> to vector<16x16xbf16>
    %620 = arith.extf %619 : vector<16x16xbf16> to vector<16x16xf32>
    %621 = vector.extract_strided_slice %617 {offsets = [0, 0], sizes = [16, 16], strides = [1, 1]} : vector<20x16xf32> to vector<16x16xf32>
    %622 = arith.mulf %620, %621 : vector<16x16xf32>
    %623 = arith.addf %614, %622 : vector<16x16xf32>
    %c3_392 = arith.constant 3 : index
    %c8_393 = arith.constant 8 : index
    %c0_394 = arith.constant 0 : index
    %c0_395 = arith.constant 0 : index
    %624 = vector.load %arg3[%c3_392, %c8_393, %c0_394, %c0_395] : memref<8x25x16x16xbf16, #tpu.memory_space<vmem>>, vector<1x1x16x16xbf16>
    %625 = vector.shape_cast %624 : vector<1x1x16x16xbf16> to vector<16x16xbf16>
    %626 = arith.extf %625 : vector<16x16xbf16> to vector<16x16xf32>
    %627 = vector.extract_strided_slice %617 {offsets = [1, 0], sizes = [16, 16], strides = [1, 1]} : vector<20x16xf32> to vector<16x16xf32>
    %628 = arith.mulf %626, %627 : vector<16x16xf32>
    %629 = arith.addf %623, %628 : vector<16x16xf32>
    %c3_396 = arith.constant 3 : index
    %c13_397 = arith.constant 13 : index
    %c0_398 = arith.constant 0 : index
    %c0_399 = arith.constant 0 : index
    %630 = vector.load %arg3[%c3_396, %c13_397, %c0_398, %c0_399] : memref<8x25x16x16xbf16, #tpu.memory_space<vmem>>, vector<1x1x16x16xbf16>
    %631 = vector.shape_cast %630 : vector<1x1x16x16xbf16> to vector<16x16xbf16>
    %632 = arith.extf %631 : vector<16x16xbf16> to vector<16x16xf32>
    %633 = vector.extract_strided_slice %617 {offsets = [2, 0], sizes = [16, 16], strides = [1, 1]} : vector<20x16xf32> to vector<16x16xf32>
    %634 = arith.mulf %632, %633 : vector<16x16xf32>
    %635 = arith.addf %629, %634 : vector<16x16xf32>
    %c3_400 = arith.constant 3 : index
    %c18_401 = arith.constant 18 : index
    %c0_402 = arith.constant 0 : index
    %c0_403 = arith.constant 0 : index
    %636 = vector.load %arg3[%c3_400, %c18_401, %c0_402, %c0_403] : memref<8x25x16x16xbf16, #tpu.memory_space<vmem>>, vector<1x1x16x16xbf16>
    %637 = vector.shape_cast %636 : vector<1x1x16x16xbf16> to vector<16x16xbf16>
    %638 = arith.extf %637 : vector<16x16xbf16> to vector<16x16xf32>
    %639 = vector.extract_strided_slice %617 {offsets = [3, 0], sizes = [16, 16], strides = [1, 1]} : vector<20x16xf32> to vector<16x16xf32>
    %640 = arith.mulf %638, %639 : vector<16x16xf32>
    %641 = arith.addf %635, %640 : vector<16x16xf32>
    %c3_404 = arith.constant 3 : index
    %c23_405 = arith.constant 23 : index
    %c0_406 = arith.constant 0 : index
    %c0_407 = arith.constant 0 : index
    %642 = vector.load %arg3[%c3_404, %c23_405, %c0_406, %c0_407] : memref<8x25x16x16xbf16, #tpu.memory_space<vmem>>, vector<1x1x16x16xbf16>
    %643 = vector.shape_cast %642 : vector<1x1x16x16xbf16> to vector<16x16xbf16>
    %644 = arith.extf %643 : vector<16x16xbf16> to vector<16x16xf32>
    %645 = vector.extract_strided_slice %617 {offsets = [4, 0], sizes = [16, 16], strides = [1, 1]} : vector<20x16xf32> to vector<16x16xf32>
    %646 = arith.mulf %644, %645 : vector<16x16xf32>
    %647 = arith.addf %641, %646 : vector<16x16xf32>
    %c3_408 = arith.constant 3 : index
    %648 = arith.index_cast %1 : i32 to index
    %c4_409 = arith.constant 4 : index
    %649 = vector.load %arg2[%c3_408, %648, %c4_409] : memref<8x20x20xf32, #tpu.memory_space<vmem>>, vector<1x20x16xf32>
    %650 = vector.shape_cast %649 : vector<1x20x16xf32> to vector<20x16xf32>
    %c3_410 = arith.constant 3 : index
    %c4_411 = arith.constant 4 : index
    %c0_412 = arith.constant 0 : index
    %c0_413 = arith.constant 0 : index
    %651 = vector.load %arg3[%c3_410, %c4_411, %c0_412, %c0_413] : memref<8x25x16x16xbf16, #tpu.memory_space<vmem>>, vector<1x1x16x16xbf16>
    %652 = vector.shape_cast %651 : vector<1x1x16x16xbf16> to vector<16x16xbf16>
    %653 = arith.extf %652 : vector<16x16xbf16> to vector<16x16xf32>
    %654 = vector.extract_strided_slice %650 {offsets = [0, 0], sizes = [16, 16], strides = [1, 1]} : vector<20x16xf32> to vector<16x16xf32>
    %655 = arith.mulf %653, %654 : vector<16x16xf32>
    %656 = arith.addf %647, %655 : vector<16x16xf32>
    %c3_414 = arith.constant 3 : index
    %c9_415 = arith.constant 9 : index
    %c0_416 = arith.constant 0 : index
    %c0_417 = arith.constant 0 : index
    %657 = vector.load %arg3[%c3_414, %c9_415, %c0_416, %c0_417] : memref<8x25x16x16xbf16, #tpu.memory_space<vmem>>, vector<1x1x16x16xbf16>
    %658 = vector.shape_cast %657 : vector<1x1x16x16xbf16> to vector<16x16xbf16>
    %659 = arith.extf %658 : vector<16x16xbf16> to vector<16x16xf32>
    %660 = vector.extract_strided_slice %650 {offsets = [1, 0], sizes = [16, 16], strides = [1, 1]} : vector<20x16xf32> to vector<16x16xf32>
    %661 = arith.mulf %659, %660 : vector<16x16xf32>
    %662 = arith.addf %656, %661 : vector<16x16xf32>
    %c3_418 = arith.constant 3 : index
    %c14_419 = arith.constant 14 : index
    %c0_420 = arith.constant 0 : index
    %c0_421 = arith.constant 0 : index
    %663 = vector.load %arg3[%c3_418, %c14_419, %c0_420, %c0_421] : memref<8x25x16x16xbf16, #tpu.memory_space<vmem>>, vector<1x1x16x16xbf16>
    %664 = vector.shape_cast %663 : vector<1x1x16x16xbf16> to vector<16x16xbf16>
    %665 = arith.extf %664 : vector<16x16xbf16> to vector<16x16xf32>
    %666 = vector.extract_strided_slice %650 {offsets = [2, 0], sizes = [16, 16], strides = [1, 1]} : vector<20x16xf32> to vector<16x16xf32>
    %667 = arith.mulf %665, %666 : vector<16x16xf32>
    %668 = arith.addf %662, %667 : vector<16x16xf32>
    %c3_422 = arith.constant 3 : index
    %c19_423 = arith.constant 19 : index
    %c0_424 = arith.constant 0 : index
    %c0_425 = arith.constant 0 : index
    %669 = vector.load %arg3[%c3_422, %c19_423, %c0_424, %c0_425] : memref<8x25x16x16xbf16, #tpu.memory_space<vmem>>, vector<1x1x16x16xbf16>
    %670 = vector.shape_cast %669 : vector<1x1x16x16xbf16> to vector<16x16xbf16>
    %671 = arith.extf %670 : vector<16x16xbf16> to vector<16x16xf32>
    %672 = vector.extract_strided_slice %650 {offsets = [3, 0], sizes = [16, 16], strides = [1, 1]} : vector<20x16xf32> to vector<16x16xf32>
    %673 = arith.mulf %671, %672 : vector<16x16xf32>
    %674 = arith.addf %668, %673 : vector<16x16xf32>
    %c3_426 = arith.constant 3 : index
    %c24_427 = arith.constant 24 : index
    %c0_428 = arith.constant 0 : index
    %c0_429 = arith.constant 0 : index
    %675 = vector.load %arg3[%c3_426, %c24_427, %c0_428, %c0_429] : memref<8x25x16x16xbf16, #tpu.memory_space<vmem>>, vector<1x1x16x16xbf16>
    %676 = vector.shape_cast %675 : vector<1x1x16x16xbf16> to vector<16x16xbf16>
    %677 = arith.extf %676 : vector<16x16xbf16> to vector<16x16xf32>
    %678 = vector.extract_strided_slice %650 {offsets = [4, 0], sizes = [16, 16], strides = [1, 1]} : vector<20x16xf32> to vector<16x16xf32>
    %679 = arith.mulf %677, %678 : vector<16x16xf32>
    %680 = arith.addf %674, %679 : vector<16x16xf32>
    %cst_430 = arith.constant 1.000000e+00 : f32
    %681 = vector.broadcast %cst_430 : f32 to vector<16x16xf32>
    %682 = arith.mulf %680, %681 : vector<16x16xf32>
    %c3_431 = arith.constant 3 : index
    %c0_432 = arith.constant 0 : index
    %c0_433 = arith.constant 0 : index
    %683 = vector.load %arg4[%c3_431, %c0_432, %c0_433] : memref<8x16x16xf32, #tpu.memory_space<vmem>>, vector<1x16x16xf32>
    %684 = vector.shape_cast %683 : vector<1x16x16xf32> to vector<16x16xf32>
    %685 = vector.shape_cast %682 : vector<16x16xf32> to vector<1x16x16xf32>
    tpu.vector_store %arg4[%c3_431, %c0_432, %c0_433], %685 {strides = array<i32>} : memref<8x16x16xf32, #tpu.memory_space<vmem>>, vector<1x16x16xf32>,
    %cst_434 = arith.constant 0.000000e+00 : f32
    %686 = vector.broadcast %cst_434 : f32 to vector<16x16xf32>
    %c4_435 = arith.constant 4 : index
    %687 = arith.index_cast %1 : i32 to index
    %c0_436 = arith.constant 0 : index
    %688 = vector.load %arg2[%c4_435, %687, %c0_436] : memref<8x20x20xf32, #tpu.memory_space<vmem>>, vector<1x20x16xf32>
    %689 = vector.shape_cast %688 : vector<1x20x16xf32> to vector<20x16xf32>
    %c4_437 = arith.constant 4 : index
    %c0_438 = arith.constant 0 : index
    %c0_439 = arith.constant 0 : index
    %c0_440 = arith.constant 0 : index
    %690 = vector.load %arg3[%c4_437, %c0_438, %c0_439, %c0_440] : memref<8x25x16x16xbf16, #tpu.memory_space<vmem>>, vector<1x1x16x16xbf16>
    %691 = vector.shape_cast %690 : vector<1x1x16x16xbf16> to vector<16x16xbf16>
    %692 = arith.extf %691 : vector<16x16xbf16> to vector<16x16xf32>
    %693 = vector.extract_strided_slice %689 {offsets = [0, 0], sizes = [16, 16], strides = [1, 1]} : vector<20x16xf32> to vector<16x16xf32>
    %694 = arith.mulf %692, %693 : vector<16x16xf32>
    %695 = arith.addf %686, %694 : vector<16x16xf32>
    %c4_441 = arith.constant 4 : index
    %c5_442 = arith.constant 5 : index
    %c0_443 = arith.constant 0 : index
    %c0_444 = arith.constant 0 : index
    %696 = vector.load %arg3[%c4_441, %c5_442, %c0_443, %c0_444] : memref<8x25x16x16xbf16, #tpu.memory_space<vmem>>, vector<1x1x16x16xbf16>
    %697 = vector.shape_cast %696 : vector<1x1x16x16xbf16> to vector<16x16xbf16>
    %698 = arith.extf %697 : vector<16x16xbf16> to vector<16x16xf32>
    %699 = vector.extract_strided_slice %689 {offsets = [1, 0], sizes = [16, 16], strides = [1, 1]} : vector<20x16xf32> to vector<16x16xf32>
    %700 = arith.mulf %698, %699 : vector<16x16xf32>
    %701 = arith.addf %695, %700 : vector<16x16xf32>
    %c4_445 = arith.constant 4 : index
    %c10_446 = arith.constant 10 : index
    %c0_447 = arith.constant 0 : index
    %c0_448 = arith.constant 0 : index
    %702 = vector.load %arg3[%c4_445, %c10_446, %c0_447, %c0_448] : memref<8x25x16x16xbf16, #tpu.memory_space<vmem>>, vector<1x1x16x16xbf16>
    %703 = vector.shape_cast %702 : vector<1x1x16x16xbf16> to vector<16x16xbf16>
    %704 = arith.extf %703 : vector<16x16xbf16> to vector<16x16xf32>
    %705 = vector.extract_strided_slice %689 {offsets = [2, 0], sizes = [16, 16], strides = [1, 1]} : vector<20x16xf32> to vector<16x16xf32>
    %706 = arith.mulf %704, %705 : vector<16x16xf32>
    %707 = arith.addf %701, %706 : vector<16x16xf32>
    %c4_449 = arith.constant 4 : index
    %c15_450 = arith.constant 15 : index
    %c0_451 = arith.constant 0 : index
    %c0_452 = arith.constant 0 : index
    %708 = vector.load %arg3[%c4_449, %c15_450, %c0_451, %c0_452] : memref<8x25x16x16xbf16, #tpu.memory_space<vmem>>, vector<1x1x16x16xbf16>
    %709 = vector.shape_cast %708 : vector<1x1x16x16xbf16> to vector<16x16xbf16>
    %710 = arith.extf %709 : vector<16x16xbf16> to vector<16x16xf32>
    %711 = vector.extract_strided_slice %689 {offsets = [3, 0], sizes = [16, 16], strides = [1, 1]} : vector<20x16xf32> to vector<16x16xf32>
    %712 = arith.mulf %710, %711 : vector<16x16xf32>
    %713 = arith.addf %707, %712 : vector<16x16xf32>
    %c4_453 = arith.constant 4 : index
    %c20_454 = arith.constant 20 : index
    %c0_455 = arith.constant 0 : index
    %c0_456 = arith.constant 0 : index
    %714 = vector.load %arg3[%c4_453, %c20_454, %c0_455, %c0_456] : memref<8x25x16x16xbf16, #tpu.memory_space<vmem>>, vector<1x1x16x16xbf16>
    %715 = vector.shape_cast %714 : vector<1x1x16x16xbf16> to vector<16x16xbf16>
    %716 = arith.extf %715 : vector<16x16xbf16> to vector<16x16xf32>
    %717 = vector.extract_strided_slice %689 {offsets = [4, 0], sizes = [16, 16], strides = [1, 1]} : vector<20x16xf32> to vector<16x16xf32>
    %718 = arith.mulf %716, %717 : vector<16x16xf32>
    %719 = arith.addf %713, %718 : vector<16x16xf32>
    %c4_457 = arith.constant 4 : index
    %720 = arith.index_cast %1 : i32 to index
    %c1_458 = arith.constant 1 : index
    %721 = vector.load %arg2[%c4_457, %720, %c1_458] : memref<8x20x20xf32, #tpu.memory_space<vmem>>, vector<1x20x16xf32>
    %722 = vector.shape_cast %721 : vector<1x20x16xf32> to vector<20x16xf32>
    %c4_459 = arith.constant 4 : index
    %c1_460 = arith.constant 1 : index
    %c0_461 = arith.constant 0 : index
    %c0_462 = arith.constant 0 : index
    %723 = vector.load %arg3[%c4_459, %c1_460, %c0_461, %c0_462] : memref<8x25x16x16xbf16, #tpu.memory_space<vmem>>, vector<1x1x16x16xbf16>
    %724 = vector.shape_cast %723 : vector<1x1x16x16xbf16> to vector<16x16xbf16>
    %725 = arith.extf %724 : vector<16x16xbf16> to vector<16x16xf32>
    %726 = vector.extract_strided_slice %722 {offsets = [0, 0], sizes = [16, 16], strides = [1, 1]} : vector<20x16xf32> to vector<16x16xf32>
    %727 = arith.mulf %725, %726 : vector<16x16xf32>
    %728 = arith.addf %719, %727 : vector<16x16xf32>
    %c4_463 = arith.constant 4 : index
    %c6_464 = arith.constant 6 : index
    %c0_465 = arith.constant 0 : index
    %c0_466 = arith.constant 0 : index
    %729 = vector.load %arg3[%c4_463, %c6_464, %c0_465, %c0_466] : memref<8x25x16x16xbf16, #tpu.memory_space<vmem>>, vector<1x1x16x16xbf16>
    %730 = vector.shape_cast %729 : vector<1x1x16x16xbf16> to vector<16x16xbf16>
    %731 = arith.extf %730 : vector<16x16xbf16> to vector<16x16xf32>
    %732 = vector.extract_strided_slice %722 {offsets = [1, 0], sizes = [16, 16], strides = [1, 1]} : vector<20x16xf32> to vector<16x16xf32>
    %733 = arith.mulf %731, %732 : vector<16x16xf32>
    %734 = arith.addf %728, %733 : vector<16x16xf32>
    %c4_467 = arith.constant 4 : index
    %c11_468 = arith.constant 11 : index
    %c0_469 = arith.constant 0 : index
    %c0_470 = arith.constant 0 : index
    %735 = vector.load %arg3[%c4_467, %c11_468, %c0_469, %c0_470] : memref<8x25x16x16xbf16, #tpu.memory_space<vmem>>, vector<1x1x16x16xbf16>
    %736 = vector.shape_cast %735 : vector<1x1x16x16xbf16> to vector<16x16xbf16>
    %737 = arith.extf %736 : vector<16x16xbf16> to vector<16x16xf32>
    %738 = vector.extract_strided_slice %722 {offsets = [2, 0], sizes = [16, 16], strides = [1, 1]} : vector<20x16xf32> to vector<16x16xf32>
    %739 = arith.mulf %737, %738 : vector<16x16xf32>
    %740 = arith.addf %734, %739 : vector<16x16xf32>
    %c4_471 = arith.constant 4 : index
    %c16_472 = arith.constant 16 : index
    %c0_473 = arith.constant 0 : index
    %c0_474 = arith.constant 0 : index
    %741 = vector.load %arg3[%c4_471, %c16_472, %c0_473, %c0_474] : memref<8x25x16x16xbf16, #tpu.memory_space<vmem>>, vector<1x1x16x16xbf16>
    %742 = vector.shape_cast %741 : vector<1x1x16x16xbf16> to vector<16x16xbf16>
    %743 = arith.extf %742 : vector<16x16xbf16> to vector<16x16xf32>
    %744 = vector.extract_strided_slice %722 {offsets = [3, 0], sizes = [16, 16], strides = [1, 1]} : vector<20x16xf32> to vector<16x16xf32>
    %745 = arith.mulf %743, %744 : vector<16x16xf32>
    %746 = arith.addf %740, %745 : vector<16x16xf32>
    %c4_475 = arith.constant 4 : index
    %c21_476 = arith.constant 21 : index
    %c0_477 = arith.constant 0 : index
    %c0_478 = arith.constant 0 : index
    %747 = vector.load %arg3[%c4_475, %c21_476, %c0_477, %c0_478] : memref<8x25x16x16xbf16, #tpu.memory_space<vmem>>, vector<1x1x16x16xbf16>
    %748 = vector.shape_cast %747 : vector<1x1x16x16xbf16> to vector<16x16xbf16>
    %749 = arith.extf %748 : vector<16x16xbf16> to vector<16x16xf32>
    %750 = vector.extract_strided_slice %722 {offsets = [4, 0], sizes = [16, 16], strides = [1, 1]} : vector<20x16xf32> to vector<16x16xf32>
    %751 = arith.mulf %749, %750 : vector<16x16xf32>
    %752 = arith.addf %746, %751 : vector<16x16xf32>
    %c4_479 = arith.constant 4 : index
    %753 = arith.index_cast %1 : i32 to index
    %c2_480 = arith.constant 2 : index
    %754 = vector.load %arg2[%c4_479, %753, %c2_480] : memref<8x20x20xf32, #tpu.memory_space<vmem>>, vector<1x20x16xf32>
    %755 = vector.shape_cast %754 : vector<1x20x16xf32> to vector<20x16xf32>
    %c4_481 = arith.constant 4 : index
    %c2_482 = arith.constant 2 : index
    %c0_483 = arith.constant 0 : index
    %c0_484 = arith.constant 0 : index
    %756 = vector.load %arg3[%c4_481, %c2_482, %c0_483, %c0_484] : memref<8x25x16x16xbf16, #tpu.memory_space<vmem>>, vector<1x1x16x16xbf16>
    %757 = vector.shape_cast %756 : vector<1x1x16x16xbf16> to vector<16x16xbf16>
    %758 = arith.extf %757 : vector<16x16xbf16> to vector<16x16xf32>
    %759 = vector.extract_strided_slice %755 {offsets = [0, 0], sizes = [16, 16], strides = [1, 1]} : vector<20x16xf32> to vector<16x16xf32>
    %760 = arith.mulf %758, %759 : vector<16x16xf32>
    %761 = arith.addf %752, %760 : vector<16x16xf32>
    %c4_485 = arith.constant 4 : index
    %c7_486 = arith.constant 7 : index
    %c0_487 = arith.constant 0 : index
    %c0_488 = arith.constant 0 : index
    %762 = vector.load %arg3[%c4_485, %c7_486, %c0_487, %c0_488] : memref<8x25x16x16xbf16, #tpu.memory_space<vmem>>, vector<1x1x16x16xbf16>
    %763 = vector.shape_cast %762 : vector<1x1x16x16xbf16> to vector<16x16xbf16>
    %764 = arith.extf %763 : vector<16x16xbf16> to vector<16x16xf32>
    %765 = vector.extract_strided_slice %755 {offsets = [1, 0], sizes = [16, 16], strides = [1, 1]} : vector<20x16xf32> to vector<16x16xf32>
    %766 = arith.mulf %764, %765 : vector<16x16xf32>
    %767 = arith.addf %761, %766 : vector<16x16xf32>
    %c4_489 = arith.constant 4 : index
    %c12_490 = arith.constant 12 : index
    %c0_491 = arith.constant 0 : index
    %c0_492 = arith.constant 0 : index
    %768 = vector.load %arg3[%c4_489, %c12_490, %c0_491, %c0_492] : memref<8x25x16x16xbf16, #tpu.memory_space<vmem>>, vector<1x1x16x16xbf16>
    %769 = vector.shape_cast %768 : vector<1x1x16x16xbf16> to vector<16x16xbf16>
    %770 = arith.extf %769 : vector<16x16xbf16> to vector<16x16xf32>
    %771 = vector.extract_strided_slice %755 {offsets = [2, 0], sizes = [16, 16], strides = [1, 1]} : vector<20x16xf32> to vector<16x16xf32>
    %772 = arith.mulf %770, %771 : vector<16x16xf32>
    %773 = arith.addf %767, %772 : vector<16x16xf32>
    %c4_493 = arith.constant 4 : index
    %c17_494 = arith.constant 17 : index
    %c0_495 = arith.constant 0 : index
    %c0_496 = arith.constant 0 : index
    %774 = vector.load %arg3[%c4_493, %c17_494, %c0_495, %c0_496] : memref<8x25x16x16xbf16, #tpu.memory_space<vmem>>, vector<1x1x16x16xbf16>
    %775 = vector.shape_cast %774 : vector<1x1x16x16xbf16> to vector<16x16xbf16>
    %776 = arith.extf %775 : vector<16x16xbf16> to vector<16x16xf32>
    %777 = vector.extract_strided_slice %755 {offsets = [3, 0], sizes = [16, 16], strides = [1, 1]} : vector<20x16xf32> to vector<16x16xf32>
    %778 = arith.mulf %776, %777 : vector<16x16xf32>
    %779 = arith.addf %773, %778 : vector<16x16xf32>
    %c4_497 = arith.constant 4 : index
    %c22_498 = arith.constant 22 : index
    %c0_499 = arith.constant 0 : index
    %c0_500 = arith.constant 0 : index
    %780 = vector.load %arg3[%c4_497, %c22_498, %c0_499, %c0_500] : memref<8x25x16x16xbf16, #tpu.memory_space<vmem>>, vector<1x1x16x16xbf16>
    %781 = vector.shape_cast %780 : vector<1x1x16x16xbf16> to vector<16x16xbf16>
    %782 = arith.extf %781 : vector<16x16xbf16> to vector<16x16xf32>
    %783 = vector.extract_strided_slice %755 {offsets = [4, 0], sizes = [16, 16], strides = [1, 1]} : vector<20x16xf32> to vector<16x16xf32>
    %784 = arith.mulf %782, %783 : vector<16x16xf32>
    %785 = arith.addf %779, %784 : vector<16x16xf32>
    %c4_501 = arith.constant 4 : index
    %786 = arith.index_cast %1 : i32 to index
    %c3_502 = arith.constant 3 : index
    %787 = vector.load %arg2[%c4_501, %786, %c3_502] : memref<8x20x20xf32, #tpu.memory_space<vmem>>, vector<1x20x16xf32>
    %788 = vector.shape_cast %787 : vector<1x20x16xf32> to vector<20x16xf32>
    %c4_503 = arith.constant 4 : index
    %c3_504 = arith.constant 3 : index
    %c0_505 = arith.constant 0 : index
    %c0_506 = arith.constant 0 : index
    %789 = vector.load %arg3[%c4_503, %c3_504, %c0_505, %c0_506] : memref<8x25x16x16xbf16, #tpu.memory_space<vmem>>, vector<1x1x16x16xbf16>
    %790 = vector.shape_cast %789 : vector<1x1x16x16xbf16> to vector<16x16xbf16>
    %791 = arith.extf %790 : vector<16x16xbf16> to vector<16x16xf32>
    %792 = vector.extract_strided_slice %788 {offsets = [0, 0], sizes = [16, 16], strides = [1, 1]} : vector<20x16xf32> to vector<16x16xf32>
    %793 = arith.mulf %791, %792 : vector<16x16xf32>
    %794 = arith.addf %785, %793 : vector<16x16xf32>
    %c4_507 = arith.constant 4 : index
    %c8_508 = arith.constant 8 : index
    %c0_509 = arith.constant 0 : index
    %c0_510 = arith.constant 0 : index
    %795 = vector.load %arg3[%c4_507, %c8_508, %c0_509, %c0_510] : memref<8x25x16x16xbf16, #tpu.memory_space<vmem>>, vector<1x1x16x16xbf16>
    %796 = vector.shape_cast %795 : vector<1x1x16x16xbf16> to vector<16x16xbf16>
    %797 = arith.extf %796 : vector<16x16xbf16> to vector<16x16xf32>
    %798 = vector.extract_strided_slice %788 {offsets = [1, 0], sizes = [16, 16], strides = [1, 1]} : vector<20x16xf32> to vector<16x16xf32>
    %799 = arith.mulf %797, %798 : vector<16x16xf32>
    %800 = arith.addf %794, %799 : vector<16x16xf32>
    %c4_511 = arith.constant 4 : index
    %c13_512 = arith.constant 13 : index
    %c0_513 = arith.constant 0 : index
    %c0_514 = arith.constant 0 : index
    %801 = vector.load %arg3[%c4_511, %c13_512, %c0_513, %c0_514] : memref<8x25x16x16xbf16, #tpu.memory_space<vmem>>, vector<1x1x16x16xbf16>
    %802 = vector.shape_cast %801 : vector<1x1x16x16xbf16> to vector<16x16xbf16>
    %803 = arith.extf %802 : vector<16x16xbf16> to vector<16x16xf32>
    %804 = vector.extract_strided_slice %788 {offsets = [2, 0], sizes = [16, 16], strides = [1, 1]} : vector<20x16xf32> to vector<16x16xf32>
    %805 = arith.mulf %803, %804 : vector<16x16xf32>
    %806 = arith.addf %800, %805 : vector<16x16xf32>
    %c4_515 = arith.constant 4 : index
    %c18_516 = arith.constant 18 : index
    %c0_517 = arith.constant 0 : index
    %c0_518 = arith.constant 0 : index
    %807 = vector.load %arg3[%c4_515, %c18_516, %c0_517, %c0_518] : memref<8x25x16x16xbf16, #tpu.memory_space<vmem>>, vector<1x1x16x16xbf16>
    %808 = vector.shape_cast %807 : vector<1x1x16x16xbf16> to vector<16x16xbf16>
    %809 = arith.extf %808 : vector<16x16xbf16> to vector<16x16xf32>
    %810 = vector.extract_strided_slice %788 {offsets = [3, 0], sizes = [16, 16], strides = [1, 1]} : vector<20x16xf32> to vector<16x16xf32>
    %811 = arith.mulf %809, %810 : vector<16x16xf32>
    %812 = arith.addf %806, %811 : vector<16x16xf32>
    %c4_519 = arith.constant 4 : index
    %c23_520 = arith.constant 23 : index
    %c0_521 = arith.constant 0 : index
    %c0_522 = arith.constant 0 : index
    %813 = vector.load %arg3[%c4_519, %c23_520, %c0_521, %c0_522] : memref<8x25x16x16xbf16, #tpu.memory_space<vmem>>, vector<1x1x16x16xbf16>
    %814 = vector.shape_cast %813 : vector<1x1x16x16xbf16> to vector<16x16xbf16>
    %815 = arith.extf %814 : vector<16x16xbf16> to vector<16x16xf32>
    %816 = vector.extract_strided_slice %788 {offsets = [4, 0], sizes = [16, 16], strides = [1, 1]} : vector<20x16xf32> to vector<16x16xf32>
    %817 = arith.mulf %815, %816 : vector<16x16xf32>
    %818 = arith.addf %812, %817 : vector<16x16xf32>
    %c4_523 = arith.constant 4 : index
    %819 = arith.index_cast %1 : i32 to index
    %c4_524 = arith.constant 4 : index
    %820 = vector.load %arg2[%c4_523, %819, %c4_524] : memref<8x20x20xf32, #tpu.memory_space<vmem>>, vector<1x20x16xf32>
    %821 = vector.shape_cast %820 : vector<1x20x16xf32> to vector<20x16xf32>
    %c4_525 = arith.constant 4 : index
    %c4_526 = arith.constant 4 : index
    %c0_527 = arith.constant 0 : index
    %c0_528 = arith.constant 0 : index
    %822 = vector.load %arg3[%c4_525, %c4_526, %c0_527, %c0_528] : memref<8x25x16x16xbf16, #tpu.memory_space<vmem>>, vector<1x1x16x16xbf16>
    %823 = vector.shape_cast %822 : vector<1x1x16x16xbf16> to vector<16x16xbf16>
    %824 = arith.extf %823 : vector<16x16xbf16> to vector<16x16xf32>
    %825 = vector.extract_strided_slice %821 {offsets = [0, 0], sizes = [16, 16], strides = [1, 1]} : vector<20x16xf32> to vector<16x16xf32>
    %826 = arith.mulf %824, %825 : vector<16x16xf32>
    %827 = arith.addf %818, %826 : vector<16x16xf32>
    %c4_529 = arith.constant 4 : index
    %c9_530 = arith.constant 9 : index
    %c0_531 = arith.constant 0 : index
    %c0_532 = arith.constant 0 : index
    %828 = vector.load %arg3[%c4_529, %c9_530, %c0_531, %c0_532] : memref<8x25x16x16xbf16, #tpu.memory_space<vmem>>, vector<1x1x16x16xbf16>
    %829 = vector.shape_cast %828 : vector<1x1x16x16xbf16> to vector<16x16xbf16>
    %830 = arith.extf %829 : vector<16x16xbf16> to vector<16x16xf32>
    %831 = vector.extract_strided_slice %821 {offsets = [1, 0], sizes = [16, 16], strides = [1, 1]} : vector<20x16xf32> to vector<16x16xf32>
    %832 = arith.mulf %830, %831 : vector<16x16xf32>
    %833 = arith.addf %827, %832 : vector<16x16xf32>
    %c4_533 = arith.constant 4 : index
    %c14_534 = arith.constant 14 : index
    %c0_535 = arith.constant 0 : index
    %c0_536 = arith.constant 0 : index
    %834 = vector.load %arg3[%c4_533, %c14_534, %c0_535, %c0_536] : memref<8x25x16x16xbf16, #tpu.memory_space<vmem>>, vector<1x1x16x16xbf16>
    %835 = vector.shape_cast %834 : vector<1x1x16x16xbf16> to vector<16x16xbf16>
    %836 = arith.extf %835 : vector<16x16xbf16> to vector<16x16xf32>
    %837 = vector.extract_strided_slice %821 {offsets = [2, 0], sizes = [16, 16], strides = [1, 1]} : vector<20x16xf32> to vector<16x16xf32>
    %838 = arith.mulf %836, %837 : vector<16x16xf32>
    %839 = arith.addf %833, %838 : vector<16x16xf32>
    %c4_537 = arith.constant 4 : index
    %c19_538 = arith.constant 19 : index
    %c0_539 = arith.constant 0 : index
    %c0_540 = arith.constant 0 : index
    %840 = vector.load %arg3[%c4_537, %c19_538, %c0_539, %c0_540] : memref<8x25x16x16xbf16, #tpu.memory_space<vmem>>, vector<1x1x16x16xbf16>
    %841 = vector.shape_cast %840 : vector<1x1x16x16xbf16> to vector<16x16xbf16>
    %842 = arith.extf %841 : vector<16x16xbf16> to vector<16x16xf32>
    %843 = vector.extract_strided_slice %821 {offsets = [3, 0], sizes = [16, 16], strides = [1, 1]} : vector<20x16xf32> to vector<16x16xf32>
    %844 = arith.mulf %842, %843 : vector<16x16xf32>
    %845 = arith.addf %839, %844 : vector<16x16xf32>
    %c4_541 = arith.constant 4 : index
    %c24_542 = arith.constant 24 : index
    %c0_543 = arith.constant 0 : index
    %c0_544 = arith.constant 0 : index
    %846 = vector.load %arg3[%c4_541, %c24_542, %c0_543, %c0_544] : memref<8x25x16x16xbf16, #tpu.memory_space<vmem>>, vector<1x1x16x16xbf16>
    %847 = vector.shape_cast %846 : vector<1x1x16x16xbf16> to vector<16x16xbf16>
    %848 = arith.extf %847 : vector<16x16xbf16> to vector<16x16xf32>
    %849 = vector.extract_strided_slice %821 {offsets = [4, 0], sizes = [16, 16], strides = [1, 1]} : vector<20x16xf32> to vector<16x16xf32>
    %850 = arith.mulf %848, %849 : vector<16x16xf32>
    %851 = arith.addf %845, %850 : vector<16x16xf32>
    %cst_545 = arith.constant 1.000000e+00 : f32
    %852 = vector.broadcast %cst_545 : f32 to vector<16x16xf32>
    %853 = arith.mulf %851, %852 : vector<16x16xf32>
    %c4_546 = arith.constant 4 : index
    %c0_547 = arith.constant 0 : index
    %c0_548 = arith.constant 0 : index
    %854 = vector.load %arg4[%c4_546, %c0_547, %c0_548] : memref<8x16x16xf32, #tpu.memory_space<vmem>>, vector<1x16x16xf32>
    %855 = vector.shape_cast %854 : vector<1x16x16xf32> to vector<16x16xf32>
    %856 = vector.shape_cast %853 : vector<16x16xf32> to vector<1x16x16xf32>
    tpu.vector_store %arg4[%c4_546, %c0_547, %c0_548], %856 {strides = array<i32>} : memref<8x16x16xf32, #tpu.memory_space<vmem>>, vector<1x16x16xf32>,
    %cst_549 = arith.constant 0.000000e+00 : f32
    %857 = vector.broadcast %cst_549 : f32 to vector<16x16xf32>
    %c5_550 = arith.constant 5 : index
    %858 = arith.index_cast %1 : i32 to index
    %c0_551 = arith.constant 0 : index
    %859 = vector.load %arg2[%c5_550, %858, %c0_551] : memref<8x20x20xf32, #tpu.memory_space<vmem>>, vector<1x20x16xf32>
    %860 = vector.shape_cast %859 : vector<1x20x16xf32> to vector<20x16xf32>
    %c5_552 = arith.constant 5 : index
    %c0_553 = arith.constant 0 : index
    %c0_554 = arith.constant 0 : index
    %c0_555 = arith.constant 0 : index
    %861 = vector.load %arg3[%c5_552, %c0_553, %c0_554, %c0_555] : memref<8x25x16x16xbf16, #tpu.memory_space<vmem>>, vector<1x1x16x16xbf16>
    %862 = vector.shape_cast %861 : vector<1x1x16x16xbf16> to vector<16x16xbf16>
    %863 = arith.extf %862 : vector<16x16xbf16> to vector<16x16xf32>
    %864 = vector.extract_strided_slice %860 {offsets = [0, 0], sizes = [16, 16], strides = [1, 1]} : vector<20x16xf32> to vector<16x16xf32>
    %865 = arith.mulf %863, %864 : vector<16x16xf32>
    %866 = arith.addf %857, %865 : vector<16x16xf32>
    %c5_556 = arith.constant 5 : index
    %c5_557 = arith.constant 5 : index
    %c0_558 = arith.constant 0 : index
    %c0_559 = arith.constant 0 : index
    %867 = vector.load %arg3[%c5_556, %c5_557, %c0_558, %c0_559] : memref<8x25x16x16xbf16, #tpu.memory_space<vmem>>, vector<1x1x16x16xbf16>
    %868 = vector.shape_cast %867 : vector<1x1x16x16xbf16> to vector<16x16xbf16>
    %869 = arith.extf %868 : vector<16x16xbf16> to vector<16x16xf32>
    %870 = vector.extract_strided_slice %860 {offsets = [1, 0], sizes = [16, 16], strides = [1, 1]} : vector<20x16xf32> to vector<16x16xf32>
    %871 = arith.mulf %869, %870 : vector<16x16xf32>
    %872 = arith.addf %866, %871 : vector<16x16xf32>
    %c5_560 = arith.constant 5 : index
    %c10_561 = arith.constant 10 : index
    %c0_562 = arith.constant 0 : index
    %c0_563 = arith.constant 0 : index
    %873 = vector.load %arg3[%c5_560, %c10_561, %c0_562, %c0_563] : memref<8x25x16x16xbf16, #tpu.memory_space<vmem>>, vector<1x1x16x16xbf16>
    %874 = vector.shape_cast %873 : vector<1x1x16x16xbf16> to vector<16x16xbf16>
    %875 = arith.extf %874 : vector<16x16xbf16> to vector<16x16xf32>
    %876 = vector.extract_strided_slice %860 {offsets = [2, 0], sizes = [16, 16], strides = [1, 1]} : vector<20x16xf32> to vector<16x16xf32>
    %877 = arith.mulf %875, %876 : vector<16x16xf32>
    %878 = arith.addf %872, %877 : vector<16x16xf32>
    %c5_564 = arith.constant 5 : index
    %c15_565 = arith.constant 15 : index
    %c0_566 = arith.constant 0 : index
    %c0_567 = arith.constant 0 : index
    %879 = vector.load %arg3[%c5_564, %c15_565, %c0_566, %c0_567] : memref<8x25x16x16xbf16, #tpu.memory_space<vmem>>, vector<1x1x16x16xbf16>
    %880 = vector.shape_cast %879 : vector<1x1x16x16xbf16> to vector<16x16xbf16>
    %881 = arith.extf %880 : vector<16x16xbf16> to vector<16x16xf32>
    %882 = vector.extract_strided_slice %860 {offsets = [3, 0], sizes = [16, 16], strides = [1, 1]} : vector<20x16xf32> to vector<16x16xf32>
    %883 = arith.mulf %881, %882 : vector<16x16xf32>
    %884 = arith.addf %878, %883 : vector<16x16xf32>
    %c5_568 = arith.constant 5 : index
    %c20_569 = arith.constant 20 : index
    %c0_570 = arith.constant 0 : index
    %c0_571 = arith.constant 0 : index
    %885 = vector.load %arg3[%c5_568, %c20_569, %c0_570, %c0_571] : memref<8x25x16x16xbf16, #tpu.memory_space<vmem>>, vector<1x1x16x16xbf16>
    %886 = vector.shape_cast %885 : vector<1x1x16x16xbf16> to vector<16x16xbf16>
    %887 = arith.extf %886 : vector<16x16xbf16> to vector<16x16xf32>
    %888 = vector.extract_strided_slice %860 {offsets = [4, 0], sizes = [16, 16], strides = [1, 1]} : vector<20x16xf32> to vector<16x16xf32>
    %889 = arith.mulf %887, %888 : vector<16x16xf32>
    %890 = arith.addf %884, %889 : vector<16x16xf32>
    %c5_572 = arith.constant 5 : index
    %891 = arith.index_cast %1 : i32 to index
    %c1_573 = arith.constant 1 : index
    %892 = vector.load %arg2[%c5_572, %891, %c1_573] : memref<8x20x20xf32, #tpu.memory_space<vmem>>, vector<1x20x16xf32>
    %893 = vector.shape_cast %892 : vector<1x20x16xf32> to vector<20x16xf32>
    %c5_574 = arith.constant 5 : index
    %c1_575 = arith.constant 1 : index
    %c0_576 = arith.constant 0 : index
    %c0_577 = arith.constant 0 : index
    %894 = vector.load %arg3[%c5_574, %c1_575, %c0_576, %c0_577] : memref<8x25x16x16xbf16, #tpu.memory_space<vmem>>, vector<1x1x16x16xbf16>
    %895 = vector.shape_cast %894 : vector<1x1x16x16xbf16> to vector<16x16xbf16>
    %896 = arith.extf %895 : vector<16x16xbf16> to vector<16x16xf32>
    %897 = vector.extract_strided_slice %893 {offsets = [0, 0], sizes = [16, 16], strides = [1, 1]} : vector<20x16xf32> to vector<16x16xf32>
    %898 = arith.mulf %896, %897 : vector<16x16xf32>
    %899 = arith.addf %890, %898 : vector<16x16xf32>
    %c5_578 = arith.constant 5 : index
    %c6_579 = arith.constant 6 : index
    %c0_580 = arith.constant 0 : index
    %c0_581 = arith.constant 0 : index
    %900 = vector.load %arg3[%c5_578, %c6_579, %c0_580, %c0_581] : memref<8x25x16x16xbf16, #tpu.memory_space<vmem>>, vector<1x1x16x16xbf16>
    %901 = vector.shape_cast %900 : vector<1x1x16x16xbf16> to vector<16x16xbf16>
    %902 = arith.extf %901 : vector<16x16xbf16> to vector<16x16xf32>
    %903 = vector.extract_strided_slice %893 {offsets = [1, 0], sizes = [16, 16], strides = [1, 1]} : vector<20x16xf32> to vector<16x16xf32>
    %904 = arith.mulf %902, %903 : vector<16x16xf32>
    %905 = arith.addf %899, %904 : vector<16x16xf32>
    %c5_582 = arith.constant 5 : index
    %c11_583 = arith.constant 11 : index
    %c0_584 = arith.constant 0 : index
    %c0_585 = arith.constant 0 : index
    %906 = vector.load %arg3[%c5_582, %c11_583, %c0_584, %c0_585] : memref<8x25x16x16xbf16, #tpu.memory_space<vmem>>, vector<1x1x16x16xbf16>
    %907 = vector.shape_cast %906 : vector<1x1x16x16xbf16> to vector<16x16xbf16>
    %908 = arith.extf %907 : vector<16x16xbf16> to vector<16x16xf32>
    %909 = vector.extract_strided_slice %893 {offsets = [2, 0], sizes = [16, 16], strides = [1, 1]} : vector<20x16xf32> to vector<16x16xf32>
    %910 = arith.mulf %908, %909 : vector<16x16xf32>
    %911 = arith.addf %905, %910 : vector<16x16xf32>
    %c5_586 = arith.constant 5 : index
    %c16_587 = arith.constant 16 : index
    %c0_588 = arith.constant 0 : index
    %c0_589 = arith.constant 0 : index
    %912 = vector.load %arg3[%c5_586, %c16_587, %c0_588, %c0_589] : memref<8x25x16x16xbf16, #tpu.memory_space<vmem>>, vector<1x1x16x16xbf16>
    %913 = vector.shape_cast %912 : vector<1x1x16x16xbf16> to vector<16x16xbf16>
    %914 = arith.extf %913 : vector<16x16xbf16> to vector<16x16xf32>
    %915 = vector.extract_strided_slice %893 {offsets = [3, 0], sizes = [16, 16], strides = [1, 1]} : vector<20x16xf32> to vector<16x16xf32>
    %916 = arith.mulf %914, %915 : vector<16x16xf32>
    %917 = arith.addf %911, %916 : vector<16x16xf32>
    %c5_590 = arith.constant 5 : index
    %c21_591 = arith.constant 21 : index
    %c0_592 = arith.constant 0 : index
    %c0_593 = arith.constant 0 : index
    %918 = vector.load %arg3[%c5_590, %c21_591, %c0_592, %c0_593] : memref<8x25x16x16xbf16, #tpu.memory_space<vmem>>, vector<1x1x16x16xbf16>
    %919 = vector.shape_cast %918 : vector<1x1x16x16xbf16> to vector<16x16xbf16>
    %920 = arith.extf %919 : vector<16x16xbf16> to vector<16x16xf32>
    %921 = vector.extract_strided_slice %893 {offsets = [4, 0], sizes = [16, 16], strides = [1, 1]} : vector<20x16xf32> to vector<16x16xf32>
    %922 = arith.mulf %920, %921 : vector<16x16xf32>
    %923 = arith.addf %917, %922 : vector<16x16xf32>
    %c5_594 = arith.constant 5 : index
    %924 = arith.index_cast %1 : i32 to index
    %c2_595 = arith.constant 2 : index
    %925 = vector.load %arg2[%c5_594, %924, %c2_595] : memref<8x20x20xf32, #tpu.memory_space<vmem>>, vector<1x20x16xf32>
    %926 = vector.shape_cast %925 : vector<1x20x16xf32> to vector<20x16xf32>
    %c5_596 = arith.constant 5 : index
    %c2_597 = arith.constant 2 : index
    %c0_598 = arith.constant 0 : index
    %c0_599 = arith.constant 0 : index
    %927 = vector.load %arg3[%c5_596, %c2_597, %c0_598, %c0_599] : memref<8x25x16x16xbf16, #tpu.memory_space<vmem>>, vector<1x1x16x16xbf16>
    %928 = vector.shape_cast %927 : vector<1x1x16x16xbf16> to vector<16x16xbf16>
    %929 = arith.extf %928 : vector<16x16xbf16> to vector<16x16xf32>
    %930 = vector.extract_strided_slice %926 {offsets = [0, 0], sizes = [16, 16], strides = [1, 1]} : vector<20x16xf32> to vector<16x16xf32>
    %931 = arith.mulf %929, %930 : vector<16x16xf32>
    %932 = arith.addf %923, %931 : vector<16x16xf32>
    %c5_600 = arith.constant 5 : index
    %c7_601 = arith.constant 7 : index
    %c0_602 = arith.constant 0 : index
    %c0_603 = arith.constant 0 : index
    %933 = vector.load %arg3[%c5_600, %c7_601, %c0_602, %c0_603] : memref<8x25x16x16xbf16, #tpu.memory_space<vmem>>, vector<1x1x16x16xbf16>
    %934 = vector.shape_cast %933 : vector<1x1x16x16xbf16> to vector<16x16xbf16>
    %935 = arith.extf %934 : vector<16x16xbf16> to vector<16x16xf32>
    %936 = vector.extract_strided_slice %926 {offsets = [1, 0], sizes = [16, 16], strides = [1, 1]} : vector<20x16xf32> to vector<16x16xf32>
    %937 = arith.mulf %935, %936 : vector<16x16xf32>
    %938 = arith.addf %932, %937 : vector<16x16xf32>
    %c5_604 = arith.constant 5 : index
    %c12_605 = arith.constant 12 : index
    %c0_606 = arith.constant 0 : index
    %c0_607 = arith.constant 0 : index
    %939 = vector.load %arg3[%c5_604, %c12_605, %c0_606, %c0_607] : memref<8x25x16x16xbf16, #tpu.memory_space<vmem>>, vector<1x1x16x16xbf16>
    %940 = vector.shape_cast %939 : vector<1x1x16x16xbf16> to vector<16x16xbf16>
    %941 = arith.extf %940 : vector<16x16xbf16> to vector<16x16xf32>
    %942 = vector.extract_strided_slice %926 {offsets = [2, 0], sizes = [16, 16], strides = [1, 1]} : vector<20x16xf32> to vector<16x16xf32>
    %943 = arith.mulf %941, %942 : vector<16x16xf32>
    %944 = arith.addf %938, %943 : vector<16x16xf32>
    %c5_608 = arith.constant 5 : index
    %c17_609 = arith.constant 17 : index
    %c0_610 = arith.constant 0 : index
    %c0_611 = arith.constant 0 : index
    %945 = vector.load %arg3[%c5_608, %c17_609, %c0_610, %c0_611] : memref<8x25x16x16xbf16, #tpu.memory_space<vmem>>, vector<1x1x16x16xbf16>
    %946 = vector.shape_cast %945 : vector<1x1x16x16xbf16> to vector<16x16xbf16>
    %947 = arith.extf %946 : vector<16x16xbf16> to vector<16x16xf32>
    %948 = vector.extract_strided_slice %926 {offsets = [3, 0], sizes = [16, 16], strides = [1, 1]} : vector<20x16xf32> to vector<16x16xf32>
    %949 = arith.mulf %947, %948 : vector<16x16xf32>
    %950 = arith.addf %944, %949 : vector<16x16xf32>
    %c5_612 = arith.constant 5 : index
    %c22_613 = arith.constant 22 : index
    %c0_614 = arith.constant 0 : index
    %c0_615 = arith.constant 0 : index
    %951 = vector.load %arg3[%c5_612, %c22_613, %c0_614, %c0_615] : memref<8x25x16x16xbf16, #tpu.memory_space<vmem>>, vector<1x1x16x16xbf16>
    %952 = vector.shape_cast %951 : vector<1x1x16x16xbf16> to vector<16x16xbf16>
    %953 = arith.extf %952 : vector<16x16xbf16> to vector<16x16xf32>
    %954 = vector.extract_strided_slice %926 {offsets = [4, 0], sizes = [16, 16], strides = [1, 1]} : vector<20x16xf32> to vector<16x16xf32>
    %955 = arith.mulf %953, %954 : vector<16x16xf32>
    %956 = arith.addf %950, %955 : vector<16x16xf32>
    %c5_616 = arith.constant 5 : index
    %957 = arith.index_cast %1 : i32 to index
    %c3_617 = arith.constant 3 : index
    %958 = vector.load %arg2[%c5_616, %957, %c3_617] : memref<8x20x20xf32, #tpu.memory_space<vmem>>, vector<1x20x16xf32>
    %959 = vector.shape_cast %958 : vector<1x20x16xf32> to vector<20x16xf32>
    %c5_618 = arith.constant 5 : index
    %c3_619 = arith.constant 3 : index
    %c0_620 = arith.constant 0 : index
    %c0_621 = arith.constant 0 : index
    %960 = vector.load %arg3[%c5_618, %c3_619, %c0_620, %c0_621] : memref<8x25x16x16xbf16, #tpu.memory_space<vmem>>, vector<1x1x16x16xbf16>
    %961 = vector.shape_cast %960 : vector<1x1x16x16xbf16> to vector<16x16xbf16>
    %962 = arith.extf %961 : vector<16x16xbf16> to vector<16x16xf32>
    %963 = vector.extract_strided_slice %959 {offsets = [0, 0], sizes = [16, 16], strides = [1, 1]} : vector<20x16xf32> to vector<16x16xf32>
    %964 = arith.mulf %962, %963 : vector<16x16xf32>
    %965 = arith.addf %956, %964 : vector<16x16xf32>
    %c5_622 = arith.constant 5 : index
    %c8_623 = arith.constant 8 : index
    %c0_624 = arith.constant 0 : index
    %c0_625 = arith.constant 0 : index
    %966 = vector.load %arg3[%c5_622, %c8_623, %c0_624, %c0_625] : memref<8x25x16x16xbf16, #tpu.memory_space<vmem>>, vector<1x1x16x16xbf16>
    %967 = vector.shape_cast %966 : vector<1x1x16x16xbf16> to vector<16x16xbf16>
    %968 = arith.extf %967 : vector<16x16xbf16> to vector<16x16xf32>
    %969 = vector.extract_strided_slice %959 {offsets = [1, 0], sizes = [16, 16], strides = [1, 1]} : vector<20x16xf32> to vector<16x16xf32>
    %970 = arith.mulf %968, %969 : vector<16x16xf32>
    %971 = arith.addf %965, %970 : vector<16x16xf32>
    %c5_626 = arith.constant 5 : index
    %c13_627 = arith.constant 13 : index
    %c0_628 = arith.constant 0 : index
    %c0_629 = arith.constant 0 : index
    %972 = vector.load %arg3[%c5_626, %c13_627, %c0_628, %c0_629] : memref<8x25x16x16xbf16, #tpu.memory_space<vmem>>, vector<1x1x16x16xbf16>
    %973 = vector.shape_cast %972 : vector<1x1x16x16xbf16> to vector<16x16xbf16>
    %974 = arith.extf %973 : vector<16x16xbf16> to vector<16x16xf32>
    %975 = vector.extract_strided_slice %959 {offsets = [2, 0], sizes = [16, 16], strides = [1, 1]} : vector<20x16xf32> to vector<16x16xf32>
    %976 = arith.mulf %974, %975 : vector<16x16xf32>
    %977 = arith.addf %971, %976 : vector<16x16xf32>
    %c5_630 = arith.constant 5 : index
    %c18_631 = arith.constant 18 : index
    %c0_632 = arith.constant 0 : index
    %c0_633 = arith.constant 0 : index
    %978 = vector.load %arg3[%c5_630, %c18_631, %c0_632, %c0_633] : memref<8x25x16x16xbf16, #tpu.memory_space<vmem>>, vector<1x1x16x16xbf16>
    %979 = vector.shape_cast %978 : vector<1x1x16x16xbf16> to vector<16x16xbf16>
    %980 = arith.extf %979 : vector<16x16xbf16> to vector<16x16xf32>
    %981 = vector.extract_strided_slice %959 {offsets = [3, 0], sizes = [16, 16], strides = [1, 1]} : vector<20x16xf32> to vector<16x16xf32>
    %982 = arith.mulf %980, %981 : vector<16x16xf32>
    %983 = arith.addf %977, %982 : vector<16x16xf32>
    %c5_634 = arith.constant 5 : index
    %c23_635 = arith.constant 23 : index
    %c0_636 = arith.constant 0 : index
    %c0_637 = arith.constant 0 : index
    %984 = vector.load %arg3[%c5_634, %c23_635, %c0_636, %c0_637] : memref<8x25x16x16xbf16, #tpu.memory_space<vmem>>, vector<1x1x16x16xbf16>
    %985 = vector.shape_cast %984 : vector<1x1x16x16xbf16> to vector<16x16xbf16>
    %986 = arith.extf %985 : vector<16x16xbf16> to vector<16x16xf32>
    %987 = vector.extract_strided_slice %959 {offsets = [4, 0], sizes = [16, 16], strides = [1, 1]} : vector<20x16xf32> to vector<16x16xf32>
    %988 = arith.mulf %986, %987 : vector<16x16xf32>
    %989 = arith.addf %983, %988 : vector<16x16xf32>
    %c5_638 = arith.constant 5 : index
    %990 = arith.index_cast %1 : i32 to index
    %c4_639 = arith.constant 4 : index
    %991 = vector.load %arg2[%c5_638, %990, %c4_639] : memref<8x20x20xf32, #tpu.memory_space<vmem>>, vector<1x20x16xf32>
    %992 = vector.shape_cast %991 : vector<1x20x16xf32> to vector<20x16xf32>
    %c5_640 = arith.constant 5 : index
    %c4_641 = arith.constant 4 : index
    %c0_642 = arith.constant 0 : index
    %c0_643 = arith.constant 0 : index
    %993 = vector.load %arg3[%c5_640, %c4_641, %c0_642, %c0_643] : memref<8x25x16x16xbf16, #tpu.memory_space<vmem>>, vector<1x1x16x16xbf16>
    %994 = vector.shape_cast %993 : vector<1x1x16x16xbf16> to vector<16x16xbf16>
    %995 = arith.extf %994 : vector<16x16xbf16> to vector<16x16xf32>
    %996 = vector.extract_strided_slice %992 {offsets = [0, 0], sizes = [16, 16], strides = [1, 1]} : vector<20x16xf32> to vector<16x16xf32>
    %997 = arith.mulf %995, %996 : vector<16x16xf32>
    %998 = arith.addf %989, %997 : vector<16x16xf32>
    %c5_644 = arith.constant 5 : index
    %c9_645 = arith.constant 9 : index
    %c0_646 = arith.constant 0 : index
    %c0_647 = arith.constant 0 : index
    %999 = vector.load %arg3[%c5_644, %c9_645, %c0_646, %c0_647] : memref<8x25x16x16xbf16, #tpu.memory_space<vmem>>, vector<1x1x16x16xbf16>
    %1000 = vector.shape_cast %999 : vector<1x1x16x16xbf16> to vector<16x16xbf16>
    %1001 = arith.extf %1000 : vector<16x16xbf16> to vector<16x16xf32>
    %1002 = vector.extract_strided_slice %992 {offsets = [1, 0], sizes = [16, 16], strides = [1, 1]} : vector<20x16xf32> to vector<16x16xf32>
    %1003 = arith.mulf %1001, %1002 : vector<16x16xf32>
    %1004 = arith.addf %998, %1003 : vector<16x16xf32>
    %c5_648 = arith.constant 5 : index
    %c14_649 = arith.constant 14 : index
    %c0_650 = arith.constant 0 : index
    %c0_651 = arith.constant 0 : index
    %1005 = vector.load %arg3[%c5_648, %c14_649, %c0_650, %c0_651] : memref<8x25x16x16xbf16, #tpu.memory_space<vmem>>, vector<1x1x16x16xbf16>
    %1006 = vector.shape_cast %1005 : vector<1x1x16x16xbf16> to vector<16x16xbf16>
    %1007 = arith.extf %1006 : vector<16x16xbf16> to vector<16x16xf32>
    %1008 = vector.extract_strided_slice %992 {offsets = [2, 0], sizes = [16, 16], strides = [1, 1]} : vector<20x16xf32> to vector<16x16xf32>
    %1009 = arith.mulf %1007, %1008 : vector<16x16xf32>
    %1010 = arith.addf %1004, %1009 : vector<16x16xf32>
    %c5_652 = arith.constant 5 : index
    %c19_653 = arith.constant 19 : index
    %c0_654 = arith.constant 0 : index
    %c0_655 = arith.constant 0 : index
    %1011 = vector.load %arg3[%c5_652, %c19_653, %c0_654, %c0_655] : memref<8x25x16x16xbf16, #tpu.memory_space<vmem>>, vector<1x1x16x16xbf16>
    %1012 = vector.shape_cast %1011 : vector<1x1x16x16xbf16> to vector<16x16xbf16>
    %1013 = arith.extf %1012 : vector<16x16xbf16> to vector<16x16xf32>
    %1014 = vector.extract_strided_slice %992 {offsets = [3, 0], sizes = [16, 16], strides = [1, 1]} : vector<20x16xf32> to vector<16x16xf32>
    %1015 = arith.mulf %1013, %1014 : vector<16x16xf32>
    %1016 = arith.addf %1010, %1015 : vector<16x16xf32>
    %c5_656 = arith.constant 5 : index
    %c24_657 = arith.constant 24 : index
    %c0_658 = arith.constant 0 : index
    %c0_659 = arith.constant 0 : index
    %1017 = vector.load %arg3[%c5_656, %c24_657, %c0_658, %c0_659] : memref<8x25x16x16xbf16, #tpu.memory_space<vmem>>, vector<1x1x16x16xbf16>
    %1018 = vector.shape_cast %1017 : vector<1x1x16x16xbf16> to vector<16x16xbf16>
    %1019 = arith.extf %1018 : vector<16x16xbf16> to vector<16x16xf32>
    %1020 = vector.extract_strided_slice %992 {offsets = [4, 0], sizes = [16, 16], strides = [1, 1]} : vector<20x16xf32> to vector<16x16xf32>
    %1021 = arith.mulf %1019, %1020 : vector<16x16xf32>
    %1022 = arith.addf %1016, %1021 : vector<16x16xf32>
    %cst_660 = arith.constant 1.000000e+00 : f32
    %1023 = vector.broadcast %cst_660 : f32 to vector<16x16xf32>
    %1024 = arith.mulf %1022, %1023 : vector<16x16xf32>
    %c5_661 = arith.constant 5 : index
    %c0_662 = arith.constant 0 : index
    %c0_663 = arith.constant 0 : index
    %1025 = vector.load %arg4[%c5_661, %c0_662, %c0_663] : memref<8x16x16xf32, #tpu.memory_space<vmem>>, vector<1x16x16xf32>
    %1026 = vector.shape_cast %1025 : vector<1x16x16xf32> to vector<16x16xf32>
    %1027 = vector.shape_cast %1024 : vector<16x16xf32> to vector<1x16x16xf32>
    tpu.vector_store %arg4[%c5_661, %c0_662, %c0_663], %1027 {strides = array<i32>} : memref<8x16x16xf32, #tpu.memory_space<vmem>>, vector<1x16x16xf32>,
    %cst_664 = arith.constant 0.000000e+00 : f32
    %1028 = vector.broadcast %cst_664 : f32 to vector<16x16xf32>
    %c6_665 = arith.constant 6 : index
    %1029 = arith.index_cast %1 : i32 to index
    %c0_666 = arith.constant 0 : index
    %1030 = vector.load %arg2[%c6_665, %1029, %c0_666] : memref<8x20x20xf32, #tpu.memory_space<vmem>>, vector<1x20x16xf32>
    %1031 = vector.shape_cast %1030 : vector<1x20x16xf32> to vector<20x16xf32>
    %c6_667 = arith.constant 6 : index
    %c0_668 = arith.constant 0 : index
    %c0_669 = arith.constant 0 : index
    %c0_670 = arith.constant 0 : index
    %1032 = vector.load %arg3[%c6_667, %c0_668, %c0_669, %c0_670] : memref<8x25x16x16xbf16, #tpu.memory_space<vmem>>, vector<1x1x16x16xbf16>
    %1033 = vector.shape_cast %1032 : vector<1x1x16x16xbf16> to vector<16x16xbf16>
    %1034 = arith.extf %1033 : vector<16x16xbf16> to vector<16x16xf32>
    %1035 = vector.extract_strided_slice %1031 {offsets = [0, 0], sizes = [16, 16], strides = [1, 1]} : vector<20x16xf32> to vector<16x16xf32>
    %1036 = arith.mulf %1034, %1035 : vector<16x16xf32>
    %1037 = arith.addf %1028, %1036 : vector<16x16xf32>
    %c6_671 = arith.constant 6 : index
    %c5_672 = arith.constant 5 : index
    %c0_673 = arith.constant 0 : index
    %c0_674 = arith.constant 0 : index
    %1038 = vector.load %arg3[%c6_671, %c5_672, %c0_673, %c0_674] : memref<8x25x16x16xbf16, #tpu.memory_space<vmem>>, vector<1x1x16x16xbf16>
    %1039 = vector.shape_cast %1038 : vector<1x1x16x16xbf16> to vector<16x16xbf16>
    %1040 = arith.extf %1039 : vector<16x16xbf16> to vector<16x16xf32>
    %1041 = vector.extract_strided_slice %1031 {offsets = [1, 0], sizes = [16, 16], strides = [1, 1]} : vector<20x16xf32> to vector<16x16xf32>
    %1042 = arith.mulf %1040, %1041 : vector<16x16xf32>
    %1043 = arith.addf %1037, %1042 : vector<16x16xf32>
    %c6_675 = arith.constant 6 : index
    %c10_676 = arith.constant 10 : index
    %c0_677 = arith.constant 0 : index
    %c0_678 = arith.constant 0 : index
    %1044 = vector.load %arg3[%c6_675, %c10_676, %c0_677, %c0_678] : memref<8x25x16x16xbf16, #tpu.memory_space<vmem>>, vector<1x1x16x16xbf16>
    %1045 = vector.shape_cast %1044 : vector<1x1x16x16xbf16> to vector<16x16xbf16>
    %1046 = arith.extf %1045 : vector<16x16xbf16> to vector<16x16xf32>
    %1047 = vector.extract_strided_slice %1031 {offsets = [2, 0], sizes = [16, 16], strides = [1, 1]} : vector<20x16xf32> to vector<16x16xf32>
    %1048 = arith.mulf %1046, %1047 : vector<16x16xf32>
    %1049 = arith.addf %1043, %1048 : vector<16x16xf32>
    %c6_679 = arith.constant 6 : index
    %c15_680 = arith.constant 15 : index
    %c0_681 = arith.constant 0 : index
    %c0_682 = arith.constant 0 : index
    %1050 = vector.load %arg3[%c6_679, %c15_680, %c0_681, %c0_682] : memref<8x25x16x16xbf16, #tpu.memory_space<vmem>>, vector<1x1x16x16xbf16>
    %1051 = vector.shape_cast %1050 : vector<1x1x16x16xbf16> to vector<16x16xbf16>
    %1052 = arith.extf %1051 : vector<16x16xbf16> to vector<16x16xf32>
    %1053 = vector.extract_strided_slice %1031 {offsets = [3, 0], sizes = [16, 16], strides = [1, 1]} : vector<20x16xf32> to vector<16x16xf32>
    %1054 = arith.mulf %1052, %1053 : vector<16x16xf32>
    %1055 = arith.addf %1049, %1054 : vector<16x16xf32>
    %c6_683 = arith.constant 6 : index
    %c20_684 = arith.constant 20 : index
    %c0_685 = arith.constant 0 : index
    %c0_686 = arith.constant 0 : index
    %1056 = vector.load %arg3[%c6_683, %c20_684, %c0_685, %c0_686] : memref<8x25x16x16xbf16, #tpu.memory_space<vmem>>, vector<1x1x16x16xbf16>
    %1057 = vector.shape_cast %1056 : vector<1x1x16x16xbf16> to vector<16x16xbf16>
    %1058 = arith.extf %1057 : vector<16x16xbf16> to vector<16x16xf32>
    %1059 = vector.extract_strided_slice %1031 {offsets = [4, 0], sizes = [16, 16], strides = [1, 1]} : vector<20x16xf32> to vector<16x16xf32>
    %1060 = arith.mulf %1058, %1059 : vector<16x16xf32>
    %1061 = arith.addf %1055, %1060 : vector<16x16xf32>
    %c6_687 = arith.constant 6 : index
    %1062 = arith.index_cast %1 : i32 to index
    %c1_688 = arith.constant 1 : index
    %1063 = vector.load %arg2[%c6_687, %1062, %c1_688] : memref<8x20x20xf32, #tpu.memory_space<vmem>>, vector<1x20x16xf32>
    %1064 = vector.shape_cast %1063 : vector<1x20x16xf32> to vector<20x16xf32>
    %c6_689 = arith.constant 6 : index
    %c1_690 = arith.constant 1 : index
    %c0_691 = arith.constant 0 : index
    %c0_692 = arith.constant 0 : index
    %1065 = vector.load %arg3[%c6_689, %c1_690, %c0_691, %c0_692] : memref<8x25x16x16xbf16, #tpu.memory_space<vmem>>, vector<1x1x16x16xbf16>
    %1066 = vector.shape_cast %1065 : vector<1x1x16x16xbf16> to vector<16x16xbf16>
    %1067 = arith.extf %1066 : vector<16x16xbf16> to vector<16x16xf32>
    %1068 = vector.extract_strided_slice %1064 {offsets = [0, 0], sizes = [16, 16], strides = [1, 1]} : vector<20x16xf32> to vector<16x16xf32>
    %1069 = arith.mulf %1067, %1068 : vector<16x16xf32>
    %1070 = arith.addf %1061, %1069 : vector<16x16xf32>
    %c6_693 = arith.constant 6 : index
    %c6_694 = arith.constant 6 : index
    %c0_695 = arith.constant 0 : index
    %c0_696 = arith.constant 0 : index
    %1071 = vector.load %arg3[%c6_693, %c6_694, %c0_695, %c0_696] : memref<8x25x16x16xbf16, #tpu.memory_space<vmem>>, vector<1x1x16x16xbf16>
    %1072 = vector.shape_cast %1071 : vector<1x1x16x16xbf16> to vector<16x16xbf16>
    %1073 = arith.extf %1072 : vector<16x16xbf16> to vector<16x16xf32>
    %1074 = vector.extract_strided_slice %1064 {offsets = [1, 0], sizes = [16, 16], strides = [1, 1]} : vector<20x16xf32> to vector<16x16xf32>
    %1075 = arith.mulf %1073, %1074 : vector<16x16xf32>
    %1076 = arith.addf %1070, %1075 : vector<16x16xf32>
    %c6_697 = arith.constant 6 : index
    %c11_698 = arith.constant 11 : index
    %c0_699 = arith.constant 0 : index
    %c0_700 = arith.constant 0 : index
    %1077 = vector.load %arg3[%c6_697, %c11_698, %c0_699, %c0_700] : memref<8x25x16x16xbf16, #tpu.memory_space<vmem>>, vector<1x1x16x16xbf16>
    %1078 = vector.shape_cast %1077 : vector<1x1x16x16xbf16> to vector<16x16xbf16>
    %1079 = arith.extf %1078 : vector<16x16xbf16> to vector<16x16xf32>
    %1080 = vector.extract_strided_slice %1064 {offsets = [2, 0], sizes = [16, 16], strides = [1, 1]} : vector<20x16xf32> to vector<16x16xf32>
    %1081 = arith.mulf %1079, %1080 : vector<16x16xf32>
    %1082 = arith.addf %1076, %1081 : vector<16x16xf32>
    %c6_701 = arith.constant 6 : index
    %c16_702 = arith.constant 16 : index
    %c0_703 = arith.constant 0 : index
    %c0_704 = arith.constant 0 : index
    %1083 = vector.load %arg3[%c6_701, %c16_702, %c0_703, %c0_704] : memref<8x25x16x16xbf16, #tpu.memory_space<vmem>>, vector<1x1x16x16xbf16>
    %1084 = vector.shape_cast %1083 : vector<1x1x16x16xbf16> to vector<16x16xbf16>
    %1085 = arith.extf %1084 : vector<16x16xbf16> to vector<16x16xf32>
    %1086 = vector.extract_strided_slice %1064 {offsets = [3, 0], sizes = [16, 16], strides = [1, 1]} : vector<20x16xf32> to vector<16x16xf32>
    %1087 = arith.mulf %1085, %1086 : vector<16x16xf32>
    %1088 = arith.addf %1082, %1087 : vector<16x16xf32>
    %c6_705 = arith.constant 6 : index
    %c21_706 = arith.constant 21 : index
    %c0_707 = arith.constant 0 : index
    %c0_708 = arith.constant 0 : index
    %1089 = vector.load %arg3[%c6_705, %c21_706, %c0_707, %c0_708] : memref<8x25x16x16xbf16, #tpu.memory_space<vmem>>, vector<1x1x16x16xbf16>
    %1090 = vector.shape_cast %1089 : vector<1x1x16x16xbf16> to vector<16x16xbf16>
    %1091 = arith.extf %1090 : vector<16x16xbf16> to vector<16x16xf32>
    %1092 = vector.extract_strided_slice %1064 {offsets = [4, 0], sizes = [16, 16], strides = [1, 1]} : vector<20x16xf32> to vector<16x16xf32>
    %1093 = arith.mulf %1091, %1092 : vector<16x16xf32>
    %1094 = arith.addf %1088, %1093 : vector<16x16xf32>
    %c6_709 = arith.constant 6 : index
    %1095 = arith.index_cast %1 : i32 to index
    %c2_710 = arith.constant 2 : index
    %1096 = vector.load %arg2[%c6_709, %1095, %c2_710] : memref<8x20x20xf32, #tpu.memory_space<vmem>>, vector<1x20x16xf32>
    %1097 = vector.shape_cast %1096 : vector<1x20x16xf32> to vector<20x16xf32>
    %c6_711 = arith.constant 6 : index
    %c2_712 = arith.constant 2 : index
    %c0_713 = arith.constant 0 : index
    %c0_714 = arith.constant 0 : index
    %1098 = vector.load %arg3[%c6_711, %c2_712, %c0_713, %c0_714] : memref<8x25x16x16xbf16, #tpu.memory_space<vmem>>, vector<1x1x16x16xbf16>
    %1099 = vector.shape_cast %1098 : vector<1x1x16x16xbf16> to vector<16x16xbf16>
    %1100 = arith.extf %1099 : vector<16x16xbf16> to vector<16x16xf32>
    %1101 = vector.extract_strided_slice %1097 {offsets = [0, 0], sizes = [16, 16], strides = [1, 1]} : vector<20x16xf32> to vector<16x16xf32>
    %1102 = arith.mulf %1100, %1101 : vector<16x16xf32>
    %1103 = arith.addf %1094, %1102 : vector<16x16xf32>
    %c6_715 = arith.constant 6 : index
    %c7_716 = arith.constant 7 : index
    %c0_717 = arith.constant 0 : index
    %c0_718 = arith.constant 0 : index
    %1104 = vector.load %arg3[%c6_715, %c7_716, %c0_717, %c0_718] : memref<8x25x16x16xbf16, #tpu.memory_space<vmem>>, vector<1x1x16x16xbf16>
    %1105 = vector.shape_cast %1104 : vector<1x1x16x16xbf16> to vector<16x16xbf16>
    %1106 = arith.extf %1105 : vector<16x16xbf16> to vector<16x16xf32>
    %1107 = vector.extract_strided_slice %1097 {offsets = [1, 0], sizes = [16, 16], strides = [1, 1]} : vector<20x16xf32> to vector<16x16xf32>
    %1108 = arith.mulf %1106, %1107 : vector<16x16xf32>
    %1109 = arith.addf %1103, %1108 : vector<16x16xf32>
    %c6_719 = arith.constant 6 : index
    %c12_720 = arith.constant 12 : index
    %c0_721 = arith.constant 0 : index
    %c0_722 = arith.constant 0 : index
    %1110 = vector.load %arg3[%c6_719, %c12_720, %c0_721, %c0_722] : memref<8x25x16x16xbf16, #tpu.memory_space<vmem>>, vector<1x1x16x16xbf16>
    %1111 = vector.shape_cast %1110 : vector<1x1x16x16xbf16> to vector<16x16xbf16>
    %1112 = arith.extf %1111 : vector<16x16xbf16> to vector<16x16xf32>
    %1113 = vector.extract_strided_slice %1097 {offsets = [2, 0], sizes = [16, 16], strides = [1, 1]} : vector<20x16xf32> to vector<16x16xf32>
    %1114 = arith.mulf %1112, %1113 : vector<16x16xf32>
    %1115 = arith.addf %1109, %1114 : vector<16x16xf32>
    %c6_723 = arith.constant 6 : index
    %c17_724 = arith.constant 17 : index
    %c0_725 = arith.constant 0 : index
    %c0_726 = arith.constant 0 : index
    %1116 = vector.load %arg3[%c6_723, %c17_724, %c0_725, %c0_726] : memref<8x25x16x16xbf16, #tpu.memory_space<vmem>>, vector<1x1x16x16xbf16>
    %1117 = vector.shape_cast %1116 : vector<1x1x16x16xbf16> to vector<16x16xbf16>
    %1118 = arith.extf %1117 : vector<16x16xbf16> to vector<16x16xf32>
    %1119 = vector.extract_strided_slice %1097 {offsets = [3, 0], sizes = [16, 16], strides = [1, 1]} : vector<20x16xf32> to vector<16x16xf32>
    %1120 = arith.mulf %1118, %1119 : vector<16x16xf32>
    %1121 = arith.addf %1115, %1120 : vector<16x16xf32>
    %c6_727 = arith.constant 6 : index
    %c22_728 = arith.constant 22 : index
    %c0_729 = arith.constant 0 : index
    %c0_730 = arith.constant 0 : index
    %1122 = vector.load %arg3[%c6_727, %c22_728, %c0_729, %c0_730] : memref<8x25x16x16xbf16, #tpu.memory_space<vmem>>, vector<1x1x16x16xbf16>
    %1123 = vector.shape_cast %1122 : vector<1x1x16x16xbf16> to vector<16x16xbf16>
    %1124 = arith.extf %1123 : vector<16x16xbf16> to vector<16x16xf32>
    %1125 = vector.extract_strided_slice %1097 {offsets = [4, 0], sizes = [16, 16], strides = [1, 1]} : vector<20x16xf32> to vector<16x16xf32>
    %1126 = arith.mulf %1124, %1125 : vector<16x16xf32>
    %1127 = arith.addf %1121, %1126 : vector<16x16xf32>
    %c6_731 = arith.constant 6 : index
    %1128 = arith.index_cast %1 : i32 to index
    %c3_732 = arith.constant 3 : index
    %1129 = vector.load %arg2[%c6_731, %1128, %c3_732] : memref<8x20x20xf32, #tpu.memory_space<vmem>>, vector<1x20x16xf32>
    %1130 = vector.shape_cast %1129 : vector<1x20x16xf32> to vector<20x16xf32>
    %c6_733 = arith.constant 6 : index
    %c3_734 = arith.constant 3 : index
    %c0_735 = arith.constant 0 : index
    %c0_736 = arith.constant 0 : index
    %1131 = vector.load %arg3[%c6_733, %c3_734, %c0_735, %c0_736] : memref<8x25x16x16xbf16, #tpu.memory_space<vmem>>, vector<1x1x16x16xbf16>
    %1132 = vector.shape_cast %1131 : vector<1x1x16x16xbf16> to vector<16x16xbf16>
    %1133 = arith.extf %1132 : vector<16x16xbf16> to vector<16x16xf32>
    %1134 = vector.extract_strided_slice %1130 {offsets = [0, 0], sizes = [16, 16], strides = [1, 1]} : vector<20x16xf32> to vector<16x16xf32>
    %1135 = arith.mulf %1133, %1134 : vector<16x16xf32>
    %1136 = arith.addf %1127, %1135 : vector<16x16xf32>
    %c6_737 = arith.constant 6 : index
    %c8_738 = arith.constant 8 : index
    %c0_739 = arith.constant 0 : index
    %c0_740 = arith.constant 0 : index
    %1137 = vector.load %arg3[%c6_737, %c8_738, %c0_739, %c0_740] : memref<8x25x16x16xbf16, #tpu.memory_space<vmem>>, vector<1x1x16x16xbf16>
    %1138 = vector.shape_cast %1137 : vector<1x1x16x16xbf16> to vector<16x16xbf16>
    %1139 = arith.extf %1138 : vector<16x16xbf16> to vector<16x16xf32>
    %1140 = vector.extract_strided_slice %1130 {offsets = [1, 0], sizes = [16, 16], strides = [1, 1]} : vector<20x16xf32> to vector<16x16xf32>
    %1141 = arith.mulf %1139, %1140 : vector<16x16xf32>
    %1142 = arith.addf %1136, %1141 : vector<16x16xf32>
    %c6_741 = arith.constant 6 : index
    %c13_742 = arith.constant 13 : index
    %c0_743 = arith.constant 0 : index
    %c0_744 = arith.constant 0 : index
    %1143 = vector.load %arg3[%c6_741, %c13_742, %c0_743, %c0_744] : memref<8x25x16x16xbf16, #tpu.memory_space<vmem>>, vector<1x1x16x16xbf16>
    %1144 = vector.shape_cast %1143 : vector<1x1x16x16xbf16> to vector<16x16xbf16>
    %1145 = arith.extf %1144 : vector<16x16xbf16> to vector<16x16xf32>
    %1146 = vector.extract_strided_slice %1130 {offsets = [2, 0], sizes = [16, 16], strides = [1, 1]} : vector<20x16xf32> to vector<16x16xf32>
    %1147 = arith.mulf %1145, %1146 : vector<16x16xf32>
    %1148 = arith.addf %1142, %1147 : vector<16x16xf32>
    %c6_745 = arith.constant 6 : index
    %c18_746 = arith.constant 18 : index
    %c0_747 = arith.constant 0 : index
    %c0_748 = arith.constant 0 : index
    %1149 = vector.load %arg3[%c6_745, %c18_746, %c0_747, %c0_748] : memref<8x25x16x16xbf16, #tpu.memory_space<vmem>>, vector<1x1x16x16xbf16>
    %1150 = vector.shape_cast %1149 : vector<1x1x16x16xbf16> to vector<16x16xbf16>
    %1151 = arith.extf %1150 : vector<16x16xbf16> to vector<16x16xf32>
    %1152 = vector.extract_strided_slice %1130 {offsets = [3, 0], sizes = [16, 16], strides = [1, 1]} : vector<20x16xf32> to vector<16x16xf32>
    %1153 = arith.mulf %1151, %1152 : vector<16x16xf32>
    %1154 = arith.addf %1148, %1153 : vector<16x16xf32>
    %c6_749 = arith.constant 6 : index
    %c23_750 = arith.constant 23 : index
    %c0_751 = arith.constant 0 : index
    %c0_752 = arith.constant 0 : index
    %1155 = vector.load %arg3[%c6_749, %c23_750, %c0_751, %c0_752] : memref<8x25x16x16xbf16, #tpu.memory_space<vmem>>, vector<1x1x16x16xbf16>
    %1156 = vector.shape_cast %1155 : vector<1x1x16x16xbf16> to vector<16x16xbf16>
    %1157 = arith.extf %1156 : vector<16x16xbf16> to vector<16x16xf32>
    %1158 = vector.extract_strided_slice %1130 {offsets = [4, 0], sizes = [16, 16], strides = [1, 1]} : vector<20x16xf32> to vector<16x16xf32>
    %1159 = arith.mulf %1157, %1158 : vector<16x16xf32>
    %1160 = arith.addf %1154, %1159 : vector<16x16xf32>
    %c6_753 = arith.constant 6 : index
    %1161 = arith.index_cast %1 : i32 to index
    %c4_754 = arith.constant 4 : index
    %1162 = vector.load %arg2[%c6_753, %1161, %c4_754] : memref<8x20x20xf32, #tpu.memory_space<vmem>>, vector<1x20x16xf32>
    %1163 = vector.shape_cast %1162 : vector<1x20x16xf32> to vector<20x16xf32>
    %c6_755 = arith.constant 6 : index
    %c4_756 = arith.constant 4 : index
    %c0_757 = arith.constant 0 : index
    %c0_758 = arith.constant 0 : index
    %1164 = vector.load %arg3[%c6_755, %c4_756, %c0_757, %c0_758] : memref<8x25x16x16xbf16, #tpu.memory_space<vmem>>, vector<1x1x16x16xbf16>
    %1165 = vector.shape_cast %1164 : vector<1x1x16x16xbf16> to vector<16x16xbf16>
    %1166 = arith.extf %1165 : vector<16x16xbf16> to vector<16x16xf32>
    %1167 = vector.extract_strided_slice %1163 {offsets = [0, 0], sizes = [16, 16], strides = [1, 1]} : vector<20x16xf32> to vector<16x16xf32>
    %1168 = arith.mulf %1166, %1167 : vector<16x16xf32>
    %1169 = arith.addf %1160, %1168 : vector<16x16xf32>
    %c6_759 = arith.constant 6 : index
    %c9_760 = arith.constant 9 : index
    %c0_761 = arith.constant 0 : index
    %c0_762 = arith.constant 0 : index
    %1170 = vector.load %arg3[%c6_759, %c9_760, %c0_761, %c0_762] : memref<8x25x16x16xbf16, #tpu.memory_space<vmem>>, vector<1x1x16x16xbf16>
    %1171 = vector.shape_cast %1170 : vector<1x1x16x16xbf16> to vector<16x16xbf16>
    %1172 = arith.extf %1171 : vector<16x16xbf16> to vector<16x16xf32>
    %1173 = vector.extract_strided_slice %1163 {offsets = [1, 0], sizes = [16, 16], strides = [1, 1]} : vector<20x16xf32> to vector<16x16xf32>
    %1174 = arith.mulf %1172, %1173 : vector<16x16xf32>
    %1175 = arith.addf %1169, %1174 : vector<16x16xf32>
    %c6_763 = arith.constant 6 : index
    %c14_764 = arith.constant 14 : index
    %c0_765 = arith.constant 0 : index
    %c0_766 = arith.constant 0 : index
    %1176 = vector.load %arg3[%c6_763, %c14_764, %c0_765, %c0_766] : memref<8x25x16x16xbf16, #tpu.memory_space<vmem>>, vector<1x1x16x16xbf16>
    %1177 = vector.shape_cast %1176 : vector<1x1x16x16xbf16> to vector<16x16xbf16>
    %1178 = arith.extf %1177 : vector<16x16xbf16> to vector<16x16xf32>
    %1179 = vector.extract_strided_slice %1163 {offsets = [2, 0], sizes = [16, 16], strides = [1, 1]} : vector<20x16xf32> to vector<16x16xf32>
    %1180 = arith.mulf %1178, %1179 : vector<16x16xf32>
    %1181 = arith.addf %1175, %1180 : vector<16x16xf32>
    %c6_767 = arith.constant 6 : index
    %c19_768 = arith.constant 19 : index
    %c0_769 = arith.constant 0 : index
    %c0_770 = arith.constant 0 : index
    %1182 = vector.load %arg3[%c6_767, %c19_768, %c0_769, %c0_770] : memref<8x25x16x16xbf16, #tpu.memory_space<vmem>>, vector<1x1x16x16xbf16>
    %1183 = vector.shape_cast %1182 : vector<1x1x16x16xbf16> to vector<16x16xbf16>
    %1184 = arith.extf %1183 : vector<16x16xbf16> to vector<16x16xf32>
    %1185 = vector.extract_strided_slice %1163 {offsets = [3, 0], sizes = [16, 16], strides = [1, 1]} : vector<20x16xf32> to vector<16x16xf32>
    %1186 = arith.mulf %1184, %1185 : vector<16x16xf32>
    %1187 = arith.addf %1181, %1186 : vector<16x16xf32>
    %c6_771 = arith.constant 6 : index
    %c24_772 = arith.constant 24 : index
    %c0_773 = arith.constant 0 : index
    %c0_774 = arith.constant 0 : index
    %1188 = vector.load %arg3[%c6_771, %c24_772, %c0_773, %c0_774] : memref<8x25x16x16xbf16, #tpu.memory_space<vmem>>, vector<1x1x16x16xbf16>
    %1189 = vector.shape_cast %1188 : vector<1x1x16x16xbf16> to vector<16x16xbf16>
    %1190 = arith.extf %1189 : vector<16x16xbf16> to vector<16x16xf32>
    %1191 = vector.extract_strided_slice %1163 {offsets = [4, 0], sizes = [16, 16], strides = [1, 1]} : vector<20x16xf32> to vector<16x16xf32>
    %1192 = arith.mulf %1190, %1191 : vector<16x16xf32>
    %1193 = arith.addf %1187, %1192 : vector<16x16xf32>
    %cst_775 = arith.constant 1.000000e+00 : f32
    %1194 = vector.broadcast %cst_775 : f32 to vector<16x16xf32>
    %1195 = arith.mulf %1193, %1194 : vector<16x16xf32>
    %c6_776 = arith.constant 6 : index
    %c0_777 = arith.constant 0 : index
    %c0_778 = arith.constant 0 : index
    %1196 = vector.load %arg4[%c6_776, %c0_777, %c0_778] : memref<8x16x16xf32, #tpu.memory_space<vmem>>, vector<1x16x16xf32>
    %1197 = vector.shape_cast %1196 : vector<1x16x16xf32> to vector<16x16xf32>
    %1198 = vector.shape_cast %1195 : vector<16x16xf32> to vector<1x16x16xf32>
    tpu.vector_store %arg4[%c6_776, %c0_777, %c0_778], %1198 {strides = array<i32>} : memref<8x16x16xf32, #tpu.memory_space<vmem>>, vector<1x16x16xf32>,
    %cst_779 = arith.constant 0.000000e+00 : f32
    %1199 = vector.broadcast %cst_779 : f32 to vector<16x16xf32>
    %c7_780 = arith.constant 7 : index
    %1200 = arith.index_cast %1 : i32 to index
    %c0_781 = arith.constant 0 : index
    %1201 = vector.load %arg2[%c7_780, %1200, %c0_781] : memref<8x20x20xf32, #tpu.memory_space<vmem>>, vector<1x20x16xf32>
    %1202 = vector.shape_cast %1201 : vector<1x20x16xf32> to vector<20x16xf32>
    %c7_782 = arith.constant 7 : index
    %c0_783 = arith.constant 0 : index
    %c0_784 = arith.constant 0 : index
    %c0_785 = arith.constant 0 : index
    %1203 = vector.load %arg3[%c7_782, %c0_783, %c0_784, %c0_785] : memref<8x25x16x16xbf16, #tpu.memory_space<vmem>>, vector<1x1x16x16xbf16>
    %1204 = vector.shape_cast %1203 : vector<1x1x16x16xbf16> to vector<16x16xbf16>
    %1205 = arith.extf %1204 : vector<16x16xbf16> to vector<16x16xf32>
    %1206 = vector.extract_strided_slice %1202 {offsets = [0, 0], sizes = [16, 16], strides = [1, 1]} : vector<20x16xf32> to vector<16x16xf32>
    %1207 = arith.mulf %1205, %1206 : vector<16x16xf32>
    %1208 = arith.addf %1199, %1207 : vector<16x16xf32>
    %c7_786 = arith.constant 7 : index
    %c5_787 = arith.constant 5 : index
    %c0_788 = arith.constant 0 : index
    %c0_789 = arith.constant 0 : index
    %1209 = vector.load %arg3[%c7_786, %c5_787, %c0_788, %c0_789] : memref<8x25x16x16xbf16, #tpu.memory_space<vmem>>, vector<1x1x16x16xbf16>
    %1210 = vector.shape_cast %1209 : vector<1x1x16x16xbf16> to vector<16x16xbf16>
    %1211 = arith.extf %1210 : vector<16x16xbf16> to vector<16x16xf32>
    %1212 = vector.extract_strided_slice %1202 {offsets = [1, 0], sizes = [16, 16], strides = [1, 1]} : vector<20x16xf32> to vector<16x16xf32>
    %1213 = arith.mulf %1211, %1212 : vector<16x16xf32>
    %1214 = arith.addf %1208, %1213 : vector<16x16xf32>
    %c7_790 = arith.constant 7 : index
    %c10_791 = arith.constant 10 : index
    %c0_792 = arith.constant 0 : index
    %c0_793 = arith.constant 0 : index
    %1215 = vector.load %arg3[%c7_790, %c10_791, %c0_792, %c0_793] : memref<8x25x16x16xbf16, #tpu.memory_space<vmem>>, vector<1x1x16x16xbf16>
    %1216 = vector.shape_cast %1215 : vector<1x1x16x16xbf16> to vector<16x16xbf16>
    %1217 = arith.extf %1216 : vector<16x16xbf16> to vector<16x16xf32>
    %1218 = vector.extract_strided_slice %1202 {offsets = [2, 0], sizes = [16, 16], strides = [1, 1]} : vector<20x16xf32> to vector<16x16xf32>
    %1219 = arith.mulf %1217, %1218 : vector<16x16xf32>
    %1220 = arith.addf %1214, %1219 : vector<16x16xf32>
    %c7_794 = arith.constant 7 : index
    %c15_795 = arith.constant 15 : index
    %c0_796 = arith.constant 0 : index
    %c0_797 = arith.constant 0 : index
    %1221 = vector.load %arg3[%c7_794, %c15_795, %c0_796, %c0_797] : memref<8x25x16x16xbf16, #tpu.memory_space<vmem>>, vector<1x1x16x16xbf16>
    %1222 = vector.shape_cast %1221 : vector<1x1x16x16xbf16> to vector<16x16xbf16>
    %1223 = arith.extf %1222 : vector<16x16xbf16> to vector<16x16xf32>
    %1224 = vector.extract_strided_slice %1202 {offsets = [3, 0], sizes = [16, 16], strides = [1, 1]} : vector<20x16xf32> to vector<16x16xf32>
    %1225 = arith.mulf %1223, %1224 : vector<16x16xf32>
    %1226 = arith.addf %1220, %1225 : vector<16x16xf32>
    %c7_798 = arith.constant 7 : index
    %c20_799 = arith.constant 20 : index
    %c0_800 = arith.constant 0 : index
    %c0_801 = arith.constant 0 : index
    %1227 = vector.load %arg3[%c7_798, %c20_799, %c0_800, %c0_801] : memref<8x25x16x16xbf16, #tpu.memory_space<vmem>>, vector<1x1x16x16xbf16>
    %1228 = vector.shape_cast %1227 : vector<1x1x16x16xbf16> to vector<16x16xbf16>
    %1229 = arith.extf %1228 : vector<16x16xbf16> to vector<16x16xf32>
    %1230 = vector.extract_strided_slice %1202 {offsets = [4, 0], sizes = [16, 16], strides = [1, 1]} : vector<20x16xf32> to vector<16x16xf32>
    %1231 = arith.mulf %1229, %1230 : vector<16x16xf32>
    %1232 = arith.addf %1226, %1231 : vector<16x16xf32>
    %c7_802 = arith.constant 7 : index
    %1233 = arith.index_cast %1 : i32 to index
    %c1_803 = arith.constant 1 : index
    %1234 = vector.load %arg2[%c7_802, %1233, %c1_803] : memref<8x20x20xf32, #tpu.memory_space<vmem>>, vector<1x20x16xf32>
    %1235 = vector.shape_cast %1234 : vector<1x20x16xf32> to vector<20x16xf32>
    %c7_804 = arith.constant 7 : index
    %c1_805 = arith.constant 1 : index
    %c0_806 = arith.constant 0 : index
    %c0_807 = arith.constant 0 : index
    %1236 = vector.load %arg3[%c7_804, %c1_805, %c0_806, %c0_807] : memref<8x25x16x16xbf16, #tpu.memory_space<vmem>>, vector<1x1x16x16xbf16>
    %1237 = vector.shape_cast %1236 : vector<1x1x16x16xbf16> to vector<16x16xbf16>
    %1238 = arith.extf %1237 : vector<16x16xbf16> to vector<16x16xf32>
    %1239 = vector.extract_strided_slice %1235 {offsets = [0, 0], sizes = [16, 16], strides = [1, 1]} : vector<20x16xf32> to vector<16x16xf32>
    %1240 = arith.mulf %1238, %1239 : vector<16x16xf32>
    %1241 = arith.addf %1232, %1240 : vector<16x16xf32>
    %c7_808 = arith.constant 7 : index
    %c6_809 = arith.constant 6 : index
    %c0_810 = arith.constant 0 : index
    %c0_811 = arith.constant 0 : index
    %1242 = vector.load %arg3[%c7_808, %c6_809, %c0_810, %c0_811] : memref<8x25x16x16xbf16, #tpu.memory_space<vmem>>, vector<1x1x16x16xbf16>
    %1243 = vector.shape_cast %1242 : vector<1x1x16x16xbf16> to vector<16x16xbf16>
    %1244 = arith.extf %1243 : vector<16x16xbf16> to vector<16x16xf32>
    %1245 = vector.extract_strided_slice %1235 {offsets = [1, 0], sizes = [16, 16], strides = [1, 1]} : vector<20x16xf32> to vector<16x16xf32>
    %1246 = arith.mulf %1244, %1245 : vector<16x16xf32>
    %1247 = arith.addf %1241, %1246 : vector<16x16xf32>
    %c7_812 = arith.constant 7 : index
    %c11_813 = arith.constant 11 : index
    %c0_814 = arith.constant 0 : index
    %c0_815 = arith.constant 0 : index
    %1248 = vector.load %arg3[%c7_812, %c11_813, %c0_814, %c0_815] : memref<8x25x16x16xbf16, #tpu.memory_space<vmem>>, vector<1x1x16x16xbf16>
    %1249 = vector.shape_cast %1248 : vector<1x1x16x16xbf16> to vector<16x16xbf16>
    %1250 = arith.extf %1249 : vector<16x16xbf16> to vector<16x16xf32>
    %1251 = vector.extract_strided_slice %1235 {offsets = [2, 0], sizes = [16, 16], strides = [1, 1]} : vector<20x16xf32> to vector<16x16xf32>
    %1252 = arith.mulf %1250, %1251 : vector<16x16xf32>
    %1253 = arith.addf %1247, %1252 : vector<16x16xf32>
    %c7_816 = arith.constant 7 : index
    %c16_817 = arith.constant 16 : index
    %c0_818 = arith.constant 0 : index
    %c0_819 = arith.constant 0 : index
    %1254 = vector.load %arg3[%c7_816, %c16_817, %c0_818, %c0_819] : memref<8x25x16x16xbf16, #tpu.memory_space<vmem>>, vector<1x1x16x16xbf16>
    %1255 = vector.shape_cast %1254 : vector<1x1x16x16xbf16> to vector<16x16xbf16>
    %1256 = arith.extf %1255 : vector<16x16xbf16> to vector<16x16xf32>
    %1257 = vector.extract_strided_slice %1235 {offsets = [3, 0], sizes = [16, 16], strides = [1, 1]} : vector<20x16xf32> to vector<16x16xf32>
    %1258 = arith.mulf %1256, %1257 : vector<16x16xf32>
    %1259 = arith.addf %1253, %1258 : vector<16x16xf32>
    %c7_820 = arith.constant 7 : index
    %c21_821 = arith.constant 21 : index
    %c0_822 = arith.constant 0 : index
    %c0_823 = arith.constant 0 : index
    %1260 = vector.load %arg3[%c7_820, %c21_821, %c0_822, %c0_823] : memref<8x25x16x16xbf16, #tpu.memory_space<vmem>>, vector<1x1x16x16xbf16>
    %1261 = vector.shape_cast %1260 : vector<1x1x16x16xbf16> to vector<16x16xbf16>
    %1262 = arith.extf %1261 : vector<16x16xbf16> to vector<16x16xf32>
    %1263 = vector.extract_strided_slice %1235 {offsets = [4, 0], sizes = [16, 16], strides = [1, 1]} : vector<20x16xf32> to vector<16x16xf32>
    %1264 = arith.mulf %1262, %1263 : vector<16x16xf32>
    %1265 = arith.addf %1259, %1264 : vector<16x16xf32>
    %c7_824 = arith.constant 7 : index
    %1266 = arith.index_cast %1 : i32 to index
    %c2_825 = arith.constant 2 : index
    %1267 = vector.load %arg2[%c7_824, %1266, %c2_825] : memref<8x20x20xf32, #tpu.memory_space<vmem>>, vector<1x20x16xf32>
    %1268 = vector.shape_cast %1267 : vector<1x20x16xf32> to vector<20x16xf32>
    %c7_826 = arith.constant 7 : index
    %c2_827 = arith.constant 2 : index
    %c0_828 = arith.constant 0 : index
    %c0_829 = arith.constant 0 : index
    %1269 = vector.load %arg3[%c7_826, %c2_827, %c0_828, %c0_829] : memref<8x25x16x16xbf16, #tpu.memory_space<vmem>>, vector<1x1x16x16xbf16>
    %1270 = vector.shape_cast %1269 : vector<1x1x16x16xbf16> to vector<16x16xbf16>
    %1271 = arith.extf %1270 : vector<16x16xbf16> to vector<16x16xf32>
    %1272 = vector.extract_strided_slice %1268 {offsets = [0, 0], sizes = [16, 16], strides = [1, 1]} : vector<20x16xf32> to vector<16x16xf32>
    %1273 = arith.mulf %1271, %1272 : vector<16x16xf32>
    %1274 = arith.addf %1265, %1273 : vector<16x16xf32>
    %c7_830 = arith.constant 7 : index
    %c7_831 = arith.constant 7 : index
    %c0_832 = arith.constant 0 : index
    %c0_833 = arith.constant 0 : index
    %1275 = vector.load %arg3[%c7_830, %c7_831, %c0_832, %c0_833] : memref<8x25x16x16xbf16, #tpu.memory_space<vmem>>, vector<1x1x16x16xbf16>
    %1276 = vector.shape_cast %1275 : vector<1x1x16x16xbf16> to vector<16x16xbf16>
    %1277 = arith.extf %1276 : vector<16x16xbf16> to vector<16x16xf32>
    %1278 = vector.extract_strided_slice %1268 {offsets = [1, 0], sizes = [16, 16], strides = [1, 1]} : vector<20x16xf32> to vector<16x16xf32>
    %1279 = arith.mulf %1277, %1278 : vector<16x16xf32>
    %1280 = arith.addf %1274, %1279 : vector<16x16xf32>
    %c7_834 = arith.constant 7 : index
    %c12_835 = arith.constant 12 : index
    %c0_836 = arith.constant 0 : index
    %c0_837 = arith.constant 0 : index
    %1281 = vector.load %arg3[%c7_834, %c12_835, %c0_836, %c0_837] : memref<8x25x16x16xbf16, #tpu.memory_space<vmem>>, vector<1x1x16x16xbf16>
    %1282 = vector.shape_cast %1281 : vector<1x1x16x16xbf16> to vector<16x16xbf16>
    %1283 = arith.extf %1282 : vector<16x16xbf16> to vector<16x16xf32>
    %1284 = vector.extract_strided_slice %1268 {offsets = [2, 0], sizes = [16, 16], strides = [1, 1]} : vector<20x16xf32> to vector<16x16xf32>
    %1285 = arith.mulf %1283, %1284 : vector<16x16xf32>
    %1286 = arith.addf %1280, %1285 : vector<16x16xf32>
    %c7_838 = arith.constant 7 : index
    %c17_839 = arith.constant 17 : index
    %c0_840 = arith.constant 0 : index
    %c0_841 = arith.constant 0 : index
    %1287 = vector.load %arg3[%c7_838, %c17_839, %c0_840, %c0_841] : memref<8x25x16x16xbf16, #tpu.memory_space<vmem>>, vector<1x1x16x16xbf16>
    %1288 = vector.shape_cast %1287 : vector<1x1x16x16xbf16> to vector<16x16xbf16>
    %1289 = arith.extf %1288 : vector<16x16xbf16> to vector<16x16xf32>
    %1290 = vector.extract_strided_slice %1268 {offsets = [3, 0], sizes = [16, 16], strides = [1, 1]} : vector<20x16xf32> to vector<16x16xf32>
    %1291 = arith.mulf %1289, %1290 : vector<16x16xf32>
    %1292 = arith.addf %1286, %1291 : vector<16x16xf32>
    %c7_842 = arith.constant 7 : index
    %c22_843 = arith.constant 22 : index
    %c0_844 = arith.constant 0 : index
    %c0_845 = arith.constant 0 : index
    %1293 = vector.load %arg3[%c7_842, %c22_843, %c0_844, %c0_845] : memref<8x25x16x16xbf16, #tpu.memory_space<vmem>>, vector<1x1x16x16xbf16>
    %1294 = vector.shape_cast %1293 : vector<1x1x16x16xbf16> to vector<16x16xbf16>
    %1295 = arith.extf %1294 : vector<16x16xbf16> to vector<16x16xf32>
    %1296 = vector.extract_strided_slice %1268 {offsets = [4, 0], sizes = [16, 16], strides = [1, 1]} : vector<20x16xf32> to vector<16x16xf32>
    %1297 = arith.mulf %1295, %1296 : vector<16x16xf32>
    %1298 = arith.addf %1292, %1297 : vector<16x16xf32>
    %c7_846 = arith.constant 7 : index
    %1299 = arith.index_cast %1 : i32 to index
    %c3_847 = arith.constant 3 : index
    %1300 = vector.load %arg2[%c7_846, %1299, %c3_847] : memref<8x20x20xf32, #tpu.memory_space<vmem>>, vector<1x20x16xf32>
    %1301 = vector.shape_cast %1300 : vector<1x20x16xf32> to vector<20x16xf32>
    %c7_848 = arith.constant 7 : index
    %c3_849 = arith.constant 3 : index
    %c0_850 = arith.constant 0 : index
    %c0_851 = arith.constant 0 : index
    %1302 = vector.load %arg3[%c7_848, %c3_849, %c0_850, %c0_851] : memref<8x25x16x16xbf16, #tpu.memory_space<vmem>>, vector<1x1x16x16xbf16>
    %1303 = vector.shape_cast %1302 : vector<1x1x16x16xbf16> to vector<16x16xbf16>
    %1304 = arith.extf %1303 : vector<16x16xbf16> to vector<16x16xf32>
    %1305 = vector.extract_strided_slice %1301 {offsets = [0, 0], sizes = [16, 16], strides = [1, 1]} : vector<20x16xf32> to vector<16x16xf32>
    %1306 = arith.mulf %1304, %1305 : vector<16x16xf32>
    %1307 = arith.addf %1298, %1306 : vector<16x16xf32>
    %c7_852 = arith.constant 7 : index
    %c8_853 = arith.constant 8 : index
    %c0_854 = arith.constant 0 : index
    %c0_855 = arith.constant 0 : index
    %1308 = vector.load %arg3[%c7_852, %c8_853, %c0_854, %c0_855] : memref<8x25x16x16xbf16, #tpu.memory_space<vmem>>, vector<1x1x16x16xbf16>
    %1309 = vector.shape_cast %1308 : vector<1x1x16x16xbf16> to vector<16x16xbf16>
    %1310 = arith.extf %1309 : vector<16x16xbf16> to vector<16x16xf32>
    %1311 = vector.extract_strided_slice %1301 {offsets = [1, 0], sizes = [16, 16], strides = [1, 1]} : vector<20x16xf32> to vector<16x16xf32>
    %1312 = arith.mulf %1310, %1311 : vector<16x16xf32>
    %1313 = arith.addf %1307, %1312 : vector<16x16xf32>
    %c7_856 = arith.constant 7 : index
    %c13_857 = arith.constant 13 : index
    %c0_858 = arith.constant 0 : index
    %c0_859 = arith.constant 0 : index
    %1314 = vector.load %arg3[%c7_856, %c13_857, %c0_858, %c0_859] : memref<8x25x16x16xbf16, #tpu.memory_space<vmem>>, vector<1x1x16x16xbf16>
    %1315 = vector.shape_cast %1314 : vector<1x1x16x16xbf16> to vector<16x16xbf16>
    %1316 = arith.extf %1315 : vector<16x16xbf16> to vector<16x16xf32>
    %1317 = vector.extract_strided_slice %1301 {offsets = [2, 0], sizes = [16, 16], strides = [1, 1]} : vector<20x16xf32> to vector<16x16xf32>
    %1318 = arith.mulf %1316, %1317 : vector<16x16xf32>
    %1319 = arith.addf %1313, %1318 : vector<16x16xf32>
    %c7_860 = arith.constant 7 : index
    %c18_861 = arith.constant 18 : index
    %c0_862 = arith.constant 0 : index
    %c0_863 = arith.constant 0 : index
    %1320 = vector.load %arg3[%c7_860, %c18_861, %c0_862, %c0_863] : memref<8x25x16x16xbf16, #tpu.memory_space<vmem>>, vector<1x1x16x16xbf16>
    %1321 = vector.shape_cast %1320 : vector<1x1x16x16xbf16> to vector<16x16xbf16>
    %1322 = arith.extf %1321 : vector<16x16xbf16> to vector<16x16xf32>
    %1323 = vector.extract_strided_slice %1301 {offsets = [3, 0], sizes = [16, 16], strides = [1, 1]} : vector<20x16xf32> to vector<16x16xf32>
    %1324 = arith.mulf %1322, %1323 : vector<16x16xf32>
    %1325 = arith.addf %1319, %1324 : vector<16x16xf32>
    %c7_864 = arith.constant 7 : index
    %c23_865 = arith.constant 23 : index
    %c0_866 = arith.constant 0 : index
    %c0_867 = arith.constant 0 : index
    %1326 = vector.load %arg3[%c7_864, %c23_865, %c0_866, %c0_867] : memref<8x25x16x16xbf16, #tpu.memory_space<vmem>>, vector<1x1x16x16xbf16>
    %1327 = vector.shape_cast %1326 : vector<1x1x16x16xbf16> to vector<16x16xbf16>
    %1328 = arith.extf %1327 : vector<16x16xbf16> to vector<16x16xf32>
    %1329 = vector.extract_strided_slice %1301 {offsets = [4, 0], sizes = [16, 16], strides = [1, 1]} : vector<20x16xf32> to vector<16x16xf32>
    %1330 = arith.mulf %1328, %1329 : vector<16x16xf32>
    %1331 = arith.addf %1325, %1330 : vector<16x16xf32>
    %c7_868 = arith.constant 7 : index
    %1332 = arith.index_cast %1 : i32 to index
    %c4_869 = arith.constant 4 : index
    %1333 = vector.load %arg2[%c7_868, %1332, %c4_869] : memref<8x20x20xf32, #tpu.memory_space<vmem>>, vector<1x20x16xf32>
    %1334 = vector.shape_cast %1333 : vector<1x20x16xf32> to vector<20x16xf32>
    %c7_870 = arith.constant 7 : index
    %c4_871 = arith.constant 4 : index
    %c0_872 = arith.constant 0 : index
    %c0_873 = arith.constant 0 : index
    %1335 = vector.load %arg3[%c7_870, %c4_871, %c0_872, %c0_873] : memref<8x25x16x16xbf16, #tpu.memory_space<vmem>>, vector<1x1x16x16xbf16>
    %1336 = vector.shape_cast %1335 : vector<1x1x16x16xbf16> to vector<16x16xbf16>
    %1337 = arith.extf %1336 : vector<16x16xbf16> to vector<16x16xf32>
    %1338 = vector.extract_strided_slice %1334 {offsets = [0, 0], sizes = [16, 16], strides = [1, 1]} : vector<20x16xf32> to vector<16x16xf32>
    %1339 = arith.mulf %1337, %1338 : vector<16x16xf32>
    %1340 = arith.addf %1331, %1339 : vector<16x16xf32>
    %c7_874 = arith.constant 7 : index
    %c9_875 = arith.constant 9 : index
    %c0_876 = arith.constant 0 : index
    %c0_877 = arith.constant 0 : index
    %1341 = vector.load %arg3[%c7_874, %c9_875, %c0_876, %c0_877] : memref<8x25x16x16xbf16, #tpu.memory_space<vmem>>, vector<1x1x16x16xbf16>
    %1342 = vector.shape_cast %1341 : vector<1x1x16x16xbf16> to vector<16x16xbf16>
    %1343 = arith.extf %1342 : vector<16x16xbf16> to vector<16x16xf32>
    %1344 = vector.extract_strided_slice %1334 {offsets = [1, 0], sizes = [16, 16], strides = [1, 1]} : vector<20x16xf32> to vector<16x16xf32>
    %1345 = arith.mulf %1343, %1344 : vector<16x16xf32>
    %1346 = arith.addf %1340, %1345 : vector<16x16xf32>
    %c7_878 = arith.constant 7 : index
    %c14_879 = arith.constant 14 : index
    %c0_880 = arith.constant 0 : index
    %c0_881 = arith.constant 0 : index
    %1347 = vector.load %arg3[%c7_878, %c14_879, %c0_880, %c0_881] : memref<8x25x16x16xbf16, #tpu.memory_space<vmem>>, vector<1x1x16x16xbf16>
    %1348 = vector.shape_cast %1347 : vector<1x1x16x16xbf16> to vector<16x16xbf16>
    %1349 = arith.extf %1348 : vector<16x16xbf16> to vector<16x16xf32>
    %1350 = vector.extract_strided_slice %1334 {offsets = [2, 0], sizes = [16, 16], strides = [1, 1]} : vector<20x16xf32> to vector<16x16xf32>
    %1351 = arith.mulf %1349, %1350 : vector<16x16xf32>
    %1352 = arith.addf %1346, %1351 : vector<16x16xf32>
    %c7_882 = arith.constant 7 : index
    %c19_883 = arith.constant 19 : index
    %c0_884 = arith.constant 0 : index
    %c0_885 = arith.constant 0 : index
    %1353 = vector.load %arg3[%c7_882, %c19_883, %c0_884, %c0_885] : memref<8x25x16x16xbf16, #tpu.memory_space<vmem>>, vector<1x1x16x16xbf16>
    %1354 = vector.shape_cast %1353 : vector<1x1x16x16xbf16> to vector<16x16xbf16>
    %1355 = arith.extf %1354 : vector<16x16xbf16> to vector<16x16xf32>
    %1356 = vector.extract_strided_slice %1334 {offsets = [3, 0], sizes = [16, 16], strides = [1, 1]} : vector<20x16xf32> to vector<16x16xf32>
    %1357 = arith.mulf %1355, %1356 : vector<16x16xf32>
    %1358 = arith.addf %1352, %1357 : vector<16x16xf32>
    %c7_886 = arith.constant 7 : index
    %c24_887 = arith.constant 24 : index
    %c0_888 = arith.constant 0 : index
    %c0_889 = arith.constant 0 : index
    %1359 = vector.load %arg3[%c7_886, %c24_887, %c0_888, %c0_889] : memref<8x25x16x16xbf16, #tpu.memory_space<vmem>>, vector<1x1x16x16xbf16>
    %1360 = vector.shape_cast %1359 : vector<1x1x16x16xbf16> to vector<16x16xbf16>
    %1361 = arith.extf %1360 : vector<16x16xbf16> to vector<16x16xf32>
    %1362 = vector.extract_strided_slice %1334 {offsets = [4, 0], sizes = [16, 16], strides = [1, 1]} : vector<20x16xf32> to vector<16x16xf32>
    %1363 = arith.mulf %1361, %1362 : vector<16x16xf32>
    %1364 = arith.addf %1358, %1363 : vector<16x16xf32>
    %cst_890 = arith.constant 1.000000e+00 : f32
    %1365 = vector.broadcast %cst_890 : f32 to vector<16x16xf32>
    %1366 = arith.mulf %1364, %1365 : vector<16x16xf32>
    %c7_891 = arith.constant 7 : index
    %c0_892 = arith.constant 0 : index
    %c0_893 = arith.constant 0 : index
    %1367 = vector.load %arg4[%c7_891, %c0_892, %c0_893] : memref<8x16x16xf32, #tpu.memory_space<vmem>>, vector<1x16x16xf32>
    %1368 = vector.shape_cast %1367 : vector<1x16x16xf32> to vector<16x16xf32>
    %1369 = vector.shape_cast %1366 : vector<16x16xf32> to vector<1x16x16xf32>
    tpu.vector_store %arg4[%c7_891, %c0_892, %c0_893], %1369 {strides = array<i32>} : memref<8x16x16xf32, #tpu.memory_space<vmem>>, vector<1x16x16xf32>,
    return
  }
  func.func @transform_0(%arg0: i32, %arg1: i32) -> (i32, i32, i32) {
    %c0_i32 = arith.constant 0 : i32
    %c0_i32_0 = arith.constant 0 : i32
    %c0_i32_1 = arith.constant 0 : i32
    return %arg0, %c0_i32, %c0_i32_0 : i32, i32, i32
  }
  func.func @transform_1(%arg0: i32, %arg1: i32) -> (i32, i32, i32, i32) {
    %c0_i32 = arith.constant 0 : i32
    %c0_i32_0 = arith.constant 0 : i32
    %c0_i32_1 = arith.constant 0 : i32
    return %arg0, %c0_i32, %arg1, %c0_i32_0 : i32, i32, i32, i32
  }
  func.func @transform_2(%arg0: i32, %arg1: i32) -> (i32, i32, i32) {
    %c0_i32 = arith.constant 0 : i32
    %c0_i32_0 = arith.constant 0 : i32
    return %arg0, %arg1, %c0_i32 : i32, i32, i32
  }
}

</mosaic_0001>

<bundles_post_ra>
// kernel: tpu_custom_call.1
= control target key start
LH: loop header
LB: loop body
LE: loop exit
PB: predicated region body
PF: predicated region fallthrough
CT: control target
= control target key end

     0   :  { %vm33_vm0 = vcmask 1046528   ;;  %s4563_s13 = smov 127   ;;  %s6935_s0 = inlined_call_operand.vmem [shape: f32[8,20,20], index: 0, kind: input, shape index: {}]   ;;  %s6936_s1 = inlined_call_operand.vmem [shape: bf16[8,25,16,16], index: 1, kind: input, shape index: {}]   ;;  %s6937_s2 = inlined_call_operand.hbm [shape: f32[8,16,16], index: 2, kind: output, shape index: {}]  }
   0x1   :  { %v4588_v0 = vld [vmem:[%s6935_s0] sm:$0xff]  ;;  %v4593_v1 = vld [vmem:[%s6935_s0 + $0x8] sm:$0xff]  ;;  %v16_v4 = vld [vmem:[%s6935_s0 + $0x10] sm:$0xf] }
   0x2   :  { %101 = vrot.lane.b32.xlu0 %v4588_v0, %s4563_s13  ;;  %v34_v2 = vrot.slane %v4588_v0, 1  ;;  %v35_v3 = vrot.slane %v4593_v1, 1 }
   0x4   :  { %v4603_v5 = vsel %vm33_vm0, %v34_v2, %v35_v3 }
   0x5   :  { %7 = vsyncpa [#allocation3], 0  ;;  %116 = vrot.lane.b32.xlu1 %v4603_v5, %s4563_s13  ;;  %v37_v6 = vrot.slane %v16_v4, 1  ;;  %vm50_vm1 = vcmask 1045504   ;;  %v51_v7 = vrot.slane %v4588_v0, 2  ;;  %v52_v8 = vrot.slane %v4593_v1, 2 }
   0x6   :  { %v68_v11 = vrot.slane %v4588_v0, 3  ;;  %v69_v12 = vrot.slane %v4593_v1, 3  ;;  %v54_v13 = vrot.slane %v16_v4, 2  ;;  %vm67_vm2 = vcmask 1044480   ;;  %s4564_s16 = smov 126   ;;  %s4565_s17 = smov 125  }
   0x7   :  { %v4610_v9 = vsel %vm50_vm1, %v51_v7, %v52_v8  ;;  %v4615_v10 = vsel %vm33_vm0, %v35_v3, %v37_v6  ;;  %v71_v14 = vrot.slane %v16_v4, 3  ;;  %v86_v18 = vrot.slane %v4593_v1, 4  ;;  %s4566_s18 = smov 124   ;;  %v4711_v24 = vld [vmem:[%s6935_s0 + $0x20] sm:$0xff]  ;;  %v4718_v25 = vld [vmem:[%s6935_s0 + $0x18] sm:$0xff]  ;;  %v4331_v57 = vld [vmem:[%s6936_s1 + $0x28] sm:$0xff]  }
   0x8   :  { %131 = vrot.lane.b32.xlu2 %v4610_v9, %s4563_s13  ;;  %v4624_v15 = vsel %vm67_vm2, %v68_v11, %v69_v12  ;;  %v4627_v16 = vsel %vm50_vm1, %v52_v8, %v54_v13  ;;  %v88_v19 = vrot.slane %v16_v4, 4  ;;  %v85_v20 = vrot.slane %v4588_v0, 4  ;;  %v3162_v28 = vld [vmem:[%s6935_s0 + $0x28] sm:$0xf]  ;;  %v3532_v58 = vld [vmem:[%s6936_s1] sm:$0xff]   ;;  %v4332_v63 = vld [vmem:[%s6936_s1 + $0x50] sm:$0xff]  }
   0x9   :  { %v4632_v17 = vsel %vm67_vm2, %v69_v12, %v71_v14  ;;  %vm84_vm3 = vcmask 1043456   ;;  %v421_v26 = vrot.slane %v4718_v25, 1  ;;  %v422_v27 = vrot.slane %v4711_v24, 1  ;;  %v4333_v7 = vld [vmem:[%s6936_s1 + $0x78] sm:$0xff]   ;;  %s4567_s9 = smov [#allocation2]   ;;  %s3093_s12 = sshll.u32 %s6937_s2, 4  ;;  %s3094_s12 = int_to_ptr.hbm [resolvable:$true] %s3093_s12 }
   0xa   :  { %103 = vrot.lane.b32.xlu0 %v4593_v1, %s4563_s13  ;;  %v4641_v21 = vsel %vm84_vm3, %v86_v18, %v88_v19  ;;  %v4644_v22 = vsel %vm84_vm3, %v85_v20, %v86_v18  ;;  %v424_v30 = vrot.slane %v3162_v28, 1  ;;  %v438_v33 = vrot.slane %v4711_v24, 2  ;;  %v4334_v18 = vld [vmem:[%s6936_s1 + $0xa0] sm:$0xff]   ;;  %s3091_s10 = sshll.u32 %s4567_s9, 4  ;;  %s4569_s14 = smov 8   ;;  %s3092_s10 = int_to_ptr.vmem [resolvable:$true] %s3091_s10 }
   0xb   :  { %v4732_v31 = vsel %vm33_vm0, %v421_v26, %v422_v27  ;;  %v440_v34 = vrot.slane %v3162_v28, 2  ;;  %v437_v35 = vrot.slane %v4718_v25, 2  ;;  %v453_v38 = vrot.slane %v4718_v25, 3 }
   0xc   :  { %v4737_v32 = vsel %vm33_vm0, %v422_v27, %v424_v30  ;;  %v454_v39 = vrot.slane %v4711_v24, 3  ;;  %v469_v44 = vrot.slane %v4718_v25, 4  ;;  %v470_v45 = vrot.slane %v4711_v24, 4 }
   0xd   :  { %118 = vrot.lane.b32.xlu1 %v4615_v10, %s4563_s13  ;;  %v4754_v41 = vsel %vm50_vm1, %v438_v33, %v440_v34  ;;  %v4757_v42 = vsel %vm50_vm1, %v437_v35, %v438_v33  ;;  %v456_v46 = vrot.slane %v3162_v28, 3  ;;  %v472_v49 = vrot.slane %v3162_v28, 4 }
   0xe   :  { %v4762_v43 = vsel %vm67_vm2, %v453_v38, %v454_v39  ;;  %v4777_v51 = vsel %vm84_vm3, %v469_v44, %v470_v45  ;;  %v3537_v61 = vunpack.c.l.bf16 %v4331_v57  ;;  %v3533_v62 = vunpack.c.l.bf16 %v3532_v58 }
   0xf   :  { %v4780_v52 = vsel %vm67_vm2, %v454_v39, %v456_v46  ;;  %v4785_v53 = vsel %vm84_vm3, %v470_v45, %v472_v49  ;;  %v3541_v4 = vunpack.c.l.bf16 %v4332_v63  ;;  %v3538_v8 = vunpack.c.h.bf16 %v4331_v57  ;;  %v4336_v45 = vld [vmem:[%s6936_s1 + $0x30] sm:$0xff]  }
  0x10   :  { %133 = vrot.lane.b32.xlu2 %v4627_v16, %s4563_s13  ;;  %v41_v3 = vmul.f32 %v3537_v61, %v4603_v5  ;;  %v21_v6 = vmul.f32 %v3533_v62, %v4588_v0  ;;  %v3534_v11 = vunpack.c.h.bf16 %v3532_v58  ;;  %v3542_v26 = vunpack.c.h.bf16 %v4332_v63 }
  0x11   :  { %v42_v19 = vmul.f32 %v3538_v8, %v4615_v10  ;;  %v3549_v28 = vunpack.c.l.bf16 %v4334_v18  ;;  %v3546_v34 = vunpack.c.h.bf16 %v4333_v7  ;;  %v3557_v62 = vunpack.c.l.bf16 %v4336_v45 }
  0x12   :  { %146 = vrot.lane.b32.xlu0 %v4624_v15, %s4563_s13  ;;  %v43_v14 = vadd.f32 %v41_v3, %v21_v6  ;;  %v22_v20 = vmul.f32 %v3534_v11, %v4593_v1  ;;  %vm396_vm4 = vcmask 130048  }
  0x13   :  { %v92_v44 = vmul.f32 %v3549_v28, %v4644_v22  ;;  %v76_v49 = vmul.f32 %v3546_v34, %v4632_v17 }
  0x15   :  { %148 = vrot.lane.b32.xlu1 %v4632_v17, %s4563_s13 }
  0x18   :  { %161 = vrot.lane.b32.xlu2 %v4644_v22, %s4563_s13 }
  0x1a   :  { %163 = vrot.lane.b32.xlu0 %v4641_v21, %s4563_s13 }
  0x1d   :  { %176 = vrot.lane.b32.xlu1 %v4588_v0, %s4564_s16 }
  0x20   :  { %178 = vrot.lane.b32.xlu2 %v4593_v1, %s4564_s16 }
  0x22   :  { %191 = vrot.lane.b32.xlu0 %v4603_v5, %s4564_s16 }
  0x25   :  { %193 = vrot.lane.b32.xlu1 %v4615_v10, %s4564_s16 }
  0x28   :  { %206 = vrot.lane.b32.xlu2 %v4610_v9, %s4564_s16 }
  0x2a   :  { %208 = vrot.lane.b32.xlu0 %v4627_v16, %s4564_s16 }
  0x2d   :  { %221 = vrot.lane.b32.xlu1 %v4624_v15, %s4564_s16 }
  0x30   :  { %223 = vrot.lane.b32.xlu2 %v4632_v17, %s4564_s16 }
  0x32   :  { %236 = vrot.lane.b32.xlu0 %v4644_v22, %s4564_s16 }
  0x35   :  { %238 = vrot.lane.b32.xlu1 %v4641_v21, %s4564_s16 }
  0x38   :  { %251 = vrot.lane.b32.xlu2 %v4588_v0, %s4565_s17 }
  0x3a   :  { %253 = vrot.lane.b32.xlu0 %v4593_v1, %s4565_s17 }
  0x3d   :  { %266 = vrot.lane.b32.xlu1 %v4603_v5, %s4565_s17 }
  0x40   :  { %268 = vrot.lane.b32.xlu2 %v4615_v10, %s4565_s17 }
  0x42   :  { %281 = vrot.lane.b32.xlu0 %v4610_v9, %s4565_s17 }
  0x45   :  { %283 = vrot.lane.b32.xlu1 %v4627_v16, %s4565_s17 }
  0x48   :  { %296 = vrot.lane.b32.xlu2 %v4624_v15, %s4565_s17 }
  0x4a   :  { %298 = vrot.lane.b32.xlu0 %v4632_v17, %s4565_s17 }
  0x4d   :  { %311 = vrot.lane.b32.xlu1 %v4644_v22, %s4565_s17 }
  0x50   :  { %313 = vrot.lane.b32.xlu2 %v4641_v21, %s4565_s17 }
  0x52   :  { %326 = vrot.lane.b32.xlu0 %v4588_v0, %s4566_s18  ;;  %v58_v0 = vmul.f32 %v3541_v4, %v4610_v9  ;;  %v4338_v4 = vld [vmem:[%s6936_s1 + $0x80] sm:$0xff]  }
  0x54   :  { %v60_v30 = vadd.f32 %v58_v0, %v43_v14  ;;  %v3565_v0 = vunpack.c.l.bf16 %v4338_v4 }
  0x55   :  { %328 = vrot.lane.b32.xlu1 %v4593_v1, %s4566_s18  ;;  %v59_v1 = vmul.f32 %v3542_v26, %v4627_v16 }
  0x58   :  { %341 = vrot.lane.b32.xlu2 %v4603_v5, %s4566_s18  ;;  %v3545_v5 = vunpack.c.l.bf16 %v4333_v7 }
  0x5a   :  { %343 = vrot.lane.b32.xlu0 %v4615_v10, %s4566_s18  ;;  %v75_v33 = vmul.f32 %v3545_v5, %v4624_v15  ;;  %v44_v10 = vadd.f32 %v42_v19, %v22_v20  ;;  %v4339_v19 = vld [vmem:[%s6936_s1 + $0xa8] sm:$0xff]  }
  0x5c   :  { %v61_v46 = vadd.f32 %v59_v1, %v44_v10 }
  0x5d   :  { %356 = vrot.lane.b32.xlu1 %v4610_v9, %s4566_s18  ;;  %v4335_v9 = vld [vmem:[%s6936_s1 + $0x8] sm:$0xff]  }
  0x5e   :  { %v3553_v39 = vunpack.c.l.bf16 %v4335_v9  ;;  %v78_v63 = vadd.f32 %v76_v49, %v61_v46  ;;  %v3554_v3 = vunpack.c.h.bf16 %v4335_v9  ;;  %v3569_v9 = vunpack.c.l.bf16 %v4339_v19 }
  0x60   :  { %358 = vrot.lane.b32.xlu2 %v4627_v16, %s4566_s18  ;;  %v3550_v16 = vunpack.c.h.bf16 %v4334_v18 }
  0x62   :  { %371 = vrot.lane.b32.xlu0 %v4624_v15, %s4566_s18  ;;  %v4704_v23 = vpop.permute.xlu2 %131  ;;  %v77_v15 = vadd.f32 %v75_v33, %v60_v30 }
  0x64   :  { %v94_v58 = vadd.f32 %v92_v44, %v77_v15 }
  0x65   :  { %373 = vrot.lane.b32.xlu1 %v4632_v17, %s4566_s18  ;;  %v93_v17 = vmul.f32 %v3550_v16, %v4641_v21  ;;  %v4342_v16 = vld [vmem:[%s6936_s1 + $0x60] sm:$0xff]  }
  0x67   :  { %v95_v5 = vadd.f32 %v93_v17, %v78_v63  ;;  %v3581_v63 = vunpack.c.l.bf16 %v4342_v16 }
  0x68   :  { %386 = vrot.lane.b32.xlu2 %v4644_v22, %s4566_s18  ;;  %v4337_v22 = vld [vmem:[%s6936_s1 + $0x58] sm:$0xff]  }
  0x69   :  { %v3561_v8 = vunpack.c.l.bf16 %v4337_v22  ;;  %v3562_v28 = vunpack.c.h.bf16 %v4337_v22 }
  0x6a   :  { %388 = vrot.lane.b32.xlu0 %v4641_v21, %s4566_s18  ;;  %v4727_v29 = vpop.permute.xlu2 %133  ;;  %v3558_v21 = vunpack.c.h.bf16 %v4336_v45 }
  0x6b   :  { %v137_v20 = vmul.f32 %v3561_v8, %v4704_v23  ;;  %v4341_v23 = vld [vmem:[%s6936_s1 + $0x38] sm:$0xff]   ;;  %v138_v44 = vmul.f32 %v3562_v28, %v4727_v29  ;;  %v4343_v29 = vld [vmem:[%s6936_s1 + $0x88] sm:$0xff]  }
  0x6c   :  { %v3577_v49 = vunpack.c.l.bf16 %v4341_v23 }
  0x6d   :  { %485 = vrot.lane.b32.xlu1 %v4718_v25, %s4563_s13 }
  0x70   :  { %487 = vrot.lane.b32.xlu2 %v4711_v24, %s4563_s13 }
  0x72   :  { %500 = vrot.lane.b32.xlu0 %v4732_v31, %s4563_s13  ;;  %v4745_v37 = vpop.permute.xlu2 %161 }
  0x73   :  { %v167_v46 = vmul.f32 %v3569_v9, %v4745_v37 }
  0x74   :  { %v4743_v36 = vpop.permute.xlu0 %101 }
  0x75   :  { %502 = vrot.lane.b32.xlu1 %v4737_v32, %s4563_s13  ;;  %v107_v61 = vmul.f32 %v3553_v39, %v4743_v36  ;;  %v3566_v39 = vunpack.c.h.bf16 %v4338_v4 }
  0x77   :  { %v4751_v40 = vpop.permute.xlu1 %116  ;;  %v109_v7 = vadd.f32 %v107_v61, %v94_v58 }
  0x78   :  { %515 = vrot.lane.b32.xlu2 %v4757_v42, %s4563_s13  ;;  %v122_v11 = vmul.f32 %v3557_v62, %v4751_v40  ;;  %v4340_v40 = vld [vmem:[%s6936_s1 + $0x10] sm:$0xff]  }
  0x79   :  { %v3573_v15 = vunpack.c.l.bf16 %v4340_v40  ;;  %v3574_v22 = vunpack.c.h.bf16 %v4340_v40 }
  0x7a   :  { %517 = vrot.lane.b32.xlu0 %v4754_v41, %s4563_s13  ;;  %v4770_v48 = vpop.permute.xlu2 %178  ;;  %v124_v26 = vadd.f32 %v122_v11, %v109_v7 }
  0x7c   :  { %v4768_v47 = vpop.permute.xlu0 %103  ;;  %v139_v34 = vadd.f32 %v137_v20, %v124_v26  ;;  %v4345_v26 = vld [vmem:[%s6936_s1 + $0x18] sm:$0xff]  }
  0x7d   :  { %530 = vrot.lane.b32.xlu1 %v4762_v43, %s4563_s13  ;;  %v108_v14 = vmul.f32 %v3554_v3, %v4768_v47 }
  0x7f   :  { %v4774_v50 = vpop.permute.xlu1 %118  ;;  %v110_v47 = vadd.f32 %v108_v14, %v95_v5  ;;  %v3578_v5 = vunpack.c.h.bf16 %v4341_v23  ;;  %v3585_v14 = vunpack.c.l.bf16 %v4343_v29 }
  0x80   :  { %532 = vrot.lane.b32.xlu2 %v4780_v52, %s4563_s13  ;;  %v123_v30 = vmul.f32 %v3558_v21, %v4774_v50  ;;  %v3570_v50 = vunpack.c.h.bf16 %v4339_v19  ;;  %v183_v21 = vmul.f32 %v3574_v22, %v4770_v48  ;;  %v4346_v48 = vld [vmem:[%s6936_s1 + $0x40] sm:$0xff]  }
  0x82   :  { %545 = vrot.lane.b32.xlu0 %v4777_v51, %s4563_s13  ;;  %v4791_v55 = vpop.permute.xlu2 %206  ;;  %v125_v45 = vadd.f32 %v123_v30, %v110_v47  ;;  %v3586_v30 = vunpack.c.h.bf16 %v4343_v29  ;;  %v3598_v29 = vunpack.c.h.bf16 %v4346_v48 }
  0x84   :  { %v4789_v54 = vpop.permute.xlu0 %146  ;;  %v140_v17 = vadd.f32 %v138_v44, %v125_v45  ;;  %v3597_v45 = vunpack.c.l.bf16 %v4346_v48 }
  0x85   :  { %547 = vrot.lane.b32.xlu1 %v4785_v53, %s4563_s13  ;;  %v152_v33 = vmul.f32 %v3565_v0, %v4789_v54  ;;  %v3582_v0 = vunpack.c.h.bf16 %v4342_v16 }
  0x87   :  { %v4795_v56 = vpop.permute.xlu1 %148  ;;  %v154_v54 = vadd.f32 %v152_v33, %v139_v34  ;;  %v3593_v33 = vunpack.c.l.bf16 %v4345_v26 }
  0x88   :  { %560 = vrot.lane.b32.xlu2 %v4718_v25, %s4564_s16  ;;  %v153_v61 = vmul.f32 %v3566_v39, %v4795_v56 }
  0x89   :  { %v169_v37 = vadd.f32 %v167_v46, %v154_v54  ;;  %v3594_v46 = vunpack.c.h.bf16 %v4345_v26 }
  0x8a   :  { %562 = vrot.lane.b32.xlu0 %v4711_v24, %s4564_s16  ;;  %v4809_v60 = vpop.permute.xlu2 %223  ;;  %v155_v8 = vadd.f32 %v153_v61, %v140_v17  ;;  %v4348_v61 = vld [vmem:[%s6936_s1 + $0x90] sm:$0xff]  }
  0x8b   :  { %v228_v54 = vmul.f32 %v3586_v30, %v4809_v60  ;;  %v4349_v60 = vld [vmem:[%s6936_s1 + $0xb8] sm:$0xff]  }
  0x8c   :  { %v4807_v59 = vpop.permute.xlu0 %163 }
  0x8d   :  { %575 = vrot.lane.b32.xlu1 %v4732_v31, %s4564_s16  ;;  %v168_v3 = vmul.f32 %v3570_v50, %v4807_v59 }
  0x8f   :  { %v4816_v2 = vpop.permute.xlu1 %176  ;;  %v170_v59 = vadd.f32 %v168_v3, %v155_v8 }
  0x90   :  { %577 = vrot.lane.b32.xlu2 %v4737_v32, %s4564_s16  ;;  %v182_v62 = vmul.f32 %v3573_v15, %v4816_v2  ;;  %v4344_v2 = vld [vmem:[%s6936_s1 + $0xb0] sm:$0xff]  }
  0x91   :  { %v3589_v20 = vunpack.c.l.bf16 %v4344_v2  ;;  %v3590_v50 = vunpack.c.h.bf16 %v4344_v2 }
  0x92   :  { %590 = vrot.lane.b32.xlu0 %v4757_v42, %s4564_s16  ;;  %v4829_v13 = vpop.permute.xlu2 %251  ;;  %v184_v11 = vadd.f32 %v182_v62, %v169_v37  ;;  %v3605_v37 = vunpack.c.l.bf16 %v4348_v61 }
  0x94   :  { %v4827_v12 = vpop.permute.xlu0 %191 }
  0x95   :  { %592 = vrot.lane.b32.xlu1 %v4754_v41, %s4564_s16  ;;  %v197_v56 = vmul.f32 %v3577_v49, %v4827_v12  ;;  %v212_v12 = vmul.f32 %v3581_v63, %v4791_v55  ;;  %v185_v55 = vadd.f32 %v183_v21, %v170_v59 }
  0x97   :  { %v4839_v27 = vpop.permute.xlu1 %193  ;;  %v199_v19 = vadd.f32 %v197_v56, %v184_v11 }
  0x98   :  { %605 = vrot.lane.b32.xlu2 %v4762_v43, %s4564_s16  ;;  %v198_v40 = vmul.f32 %v3578_v5, %v4839_v27 }
  0x99   :  { %v214_v9 = vadd.f32 %v212_v12, %v199_v19  ;;  %v4351_v12 = vld [vmem:[%s6936_s1 + $0x48] sm:$0xff]  }
  0x9a   :  { %607 = vrot.lane.b32.xlu0 %v4780_v52, %s4564_s16  ;;  %v4852_v38 = vpop.permute.xlu2 %268  ;;  %v200_v15 = vadd.f32 %v198_v40, %v185_v55  ;;  %v3617_v30 = vunpack.c.l.bf16 %v4351_v12 }
  0x9b   :  { %v273_v21 = vmul.f32 %v3598_v29, %v4852_v38  ;;  %v4352_v38 = vld [vmem:[%s6936_s1 + $0x70] sm:$0xff]  }
  0x9c   :  { %v4850_v35 = vpop.permute.xlu0 %208 }
  0x9d   :  { %620 = vrot.lane.b32.xlu1 %v4777_v51, %s4564_s16  ;;  %v213_v23 = vmul.f32 %v3582_v0, %v4850_v35  ;;  %v3606_v0 = vunpack.c.h.bf16 %v4348_v61 }
  0x9f   :  { %v4861_v57 = vpop.permute.xlu1 %221  ;;  %v215_v35 = vadd.f32 %v213_v23, %v200_v15  ;;  %v3621_v15 = vunpack.c.l.bf16 %v4352_v38 }
  0xa0   :  { %622 = vrot.lane.b32.xlu2 %v4785_v53, %s4564_s16  ;;  %v227_v47 = vmul.f32 %v3585_v14, %v4861_v57  ;;  %v4347_v57 = vld [vmem:[%s6936_s1 + $0x68] sm:$0xff]   ;;  %v3609_v14 = vunpack.c.l.bf16 %v4349_v60 }
  0xa1   :  { %v3601_v16 = vunpack.c.l.bf16 %v4347_v57  ;;  %v3602_v5 = vunpack.c.h.bf16 %v4347_v57 }
  0xa2   :  { %635 = vrot.lane.b32.xlu0 %v4718_v25, %s4565_s17  ;;  %v4877_v6 = vpop.permute.xlu2 %296  ;;  %v229_v44 = vadd.f32 %v227_v47, %v214_v9  ;;  %v3610_v47 = vunpack.c.h.bf16 %v4349_v60 }
  0xa4   :  { %v4875_v36 = vpop.permute.xlu0 %236 }
  0xa5   :  { %637 = vrot.lane.b32.xlu1 %v4711_v24, %s4565_s17  ;;  %v242_v27 = vmul.f32 %v3589_v20, %v4875_v36  ;;  %v257_v36 = vmul.f32 %v3593_v33, %v4829_v13  ;;  %v230_v13 = vadd.f32 %v228_v54, %v215_v35 }
  0xa7   :  { %v4883_v18 = vpop.permute.xlu1 %238  ;;  %v244_v49 = vadd.f32 %v242_v27, %v229_v44  ;;  %v3618_v44 = vunpack.c.h.bf16 %v4351_v12 }
  0xa8   :  { %650 = vrot.lane.b32.xlu2 %v4732_v31, %s4565_s17  ;;  %v243_v22 = vmul.f32 %v3590_v50, %v4883_v18  ;;  %v4350_v18 = vld [vmem:[%s6936_s1 + $0x20] sm:$0xff]   ;;  %v4353_v50 = vld [vmem:[%s6936_s1 + $0x98] sm:$0xff]  }
  0xa9   :  { %v259_v17 = vadd.f32 %v257_v36, %v244_v49  ;;  %v3614_v57 = vunpack.c.h.bf16 %v4350_v18  ;;  %v3625_v61 = vunpack.c.l.bf16 %v4353_v50 }
  0xaa   :  { %652 = vrot.lane.b32.xlu0 %v4737_v32, %s4565_s17  ;;  %v4903_v1 = vpop.permute.xlu2 %313  ;;  %v245_v8 = vadd.f32 %v243_v22, %v230_v13  ;;  %v3626_v13 = vunpack.c.h.bf16 %v4353_v50 }
  0xab   :  { %v318_v54 = vmul.f32 %v3610_v47, %v4903_v1  ;;  %v5003_v1 = vld [vmem:[%s6935_s0 + $0x38] sm:$0xff] }
  0xac   :  { %v4901_v10 = vpop.permute.xlu0 %253 }
  0xad   :  { %665 = vrot.lane.b32.xlu1 %v4757_v42, %s4565_s17  ;;  %v258_v3 = vmul.f32 %v3594_v46, %v4901_v10  ;;  %v302_v10 = vmul.f32 %v3605_v37, %v4877_v6  ;;  %v3622_v37 = vunpack.c.h.bf16 %v4352_v38 }
  0xaf   :  { %v267_v58 = vpop.permute.xlu1 %266  ;;  %v260_v59 = vadd.f32 %v258_v3, %v245_v8 }
  0xb0   :  { %667 = vrot.lane.b32.xlu2 %v4754_v41, %s4565_s17  ;;  %v272_v63 = vmul.f32 %v3597_v45, %v267_v58 }
  0xb1   :  { %v275_v6 = vadd.f32 %v273_v21, %v260_v59 }
  0xb2   :  { %680 = vrot.lane.b32.xlu0 %v4762_v43, %s4565_s17  ;;  %v4926_v7 = vpop.permute.xlu2 %341  ;;  %v274_v11 = vadd.f32 %v272_v63, %v259_v17 }
  0xb3   :  { %v347_v35 = vmul.f32 %v3617_v30, %v4926_v7  ;;  %v5008_v7 = vld [vmem:[%s6935_s0 + $0x30] sm:$0xff] }
  0xb4   :  { %v282_v4 = vpop.permute.xlu0 %281  ;;  %v805_v8 = vrot.slane %v5008_v7, 1  ;;  %v821_v12 = vrot.slane %v5008_v7, 2 }
  0xb5   :  { %682 = vrot.lane.b32.xlu1 %v4780_v52, %s4565_s17  ;;  %v287_v56 = vmul.f32 %v3601_v16, %v282_v4  ;;  %v3613_v4 = vunpack.c.l.bf16 %v4350_v18 }
  0xb7   :  { %v284_v28 = vpop.permute.xlu1 %283  ;;  %v289_v19 = vadd.f32 %v287_v56, %v274_v11  ;;  %v806_v11 = vrot.slane %v5003_v1, 1 }
  0xb8   :  { %695 = vrot.lane.b32.xlu2 %v4777_v51, %s4565_s17  ;;  %v288_v26 = vmul.f32 %v3602_v5, %v284_v28 }
  0xb9   :  { %v304_v33 = vadd.f32 %v302_v10, %v289_v19 }
  0xba   :  { %697 = vrot.lane.b32.xlu0 %v4785_v53, %s4565_s17  ;;  %v4949_v39 = vpop.permute.xlu2 %358  ;;  %v290_v28 = vadd.f32 %v288_v26, %v275_v6 }
  0xbc   :  { %v299_v34 = vpop.permute.xlu0 %298 }
  0xbd   :  { %710 = vrot.lane.b32.xlu1 %v4718_v25, %s4566_s18  ;;  %v303_v48 = vmul.f32 %v3606_v0, %v299_v34  ;;  %v4354_v34 = vld [vmem:[%s6936_s1 + $0xc0] sm:$0xff]  }
  0xbe   :  { %v3630_v10 = vunpack.c.h.bf16 %v4354_v34 }
  0xbf   :  { %v312_v62 = vpop.permute.xlu1 %311  ;;  %v305_v45 = vadd.f32 %v303_v48, %v290_v28 }
  0xc0   :  { %712 = vrot.lane.b32.xlu2 %v4711_v24, %s4566_s18  ;;  %v317_v40 = vmul.f32 %v3609_v14, %v312_v62  ;;  %v3629_v62 = vunpack.c.l.bf16 %v4354_v34  ;;  %v363_v14 = vmul.f32 %v3622_v37, %v4949_v39  ;;  %v853_v34 = vrot.slane %v5008_v7, 4 }
  0xc1   :  { %v320_v22 = vadd.f32 %v318_v54, %v305_v45  ;;  %v854_v45 = vrot.slane %v5003_v1, 4 }
  0xc2   :  { %725 = vrot.lane.b32.xlu0 %v4732_v31, %s4566_s18  ;;  %v387_v2 = vpop.permute.xlu2 %386  ;;  %v319_v27 = vadd.f32 %v317_v40, %v304_v33 }
  0xc4   :  { %v327_v58 = vpop.permute.xlu0 %326 }
  0xc5   :  { %727 = vrot.lane.b32.xlu1 %v4737_v32, %s4566_s18  ;;  %v332_v55 = vmul.f32 %v3613_v4, %v327_v58  ;;  %v392_v58 = vmul.f32 %v3629_v62, %v387_v2  ;;  %v5020_v4 = vsel %vm33_vm0, %v805_v8, %v806_v11  ;;  %v3215_v2 = vld [vmem:[%s6935_s0 + $0x40] sm:$0xf] }
  0xc6   :  { %v808_v26 = vrot.slane %v3215_v2, 1  ;;  %v824_v6 = vrot.slane %v3215_v2, 2 }
  0xc7   :  { %v329_v20 = vpop.permute.xlu1 %328  ;;  %v334_v46 = vadd.f32 %v332_v55, %v319_v27  ;;  %v838_v27 = vrot.slane %v5003_v1, 3 }
  0xc8   :  { %740 = vrot.lane.b32.xlu2 %v4757_v42, %s4566_s18  ;;  %v333_v36 = vmul.f32 %v3614_v57, %v329_v20  ;;  %v822_v20 = vrot.slane %v5003_v1, 2  ;;  %v840_v57 = vrot.slane %v3215_v2, 3 }
  0xc9   :  { %v349_v63 = vadd.f32 %v347_v35, %v334_v46 }
  0xca   :  { %742 = vrot.lane.b32.xlu0 %v4754_v41, %s4566_s18  ;;  %v4984_v23 = vpop.permute.xlu2 %487  ;;  %v335_v3 = vadd.f32 %v333_v36, %v320_v22  ;;  %v5037_v55 = vsel %vm50_vm1, %v821_v12, %v822_v20  ;;  %v5046_v28 = vsel %vm50_vm1, %v822_v20, %v824_v6  ;;  %v5063_v46 = vsel %vm67_vm2, %v838_v27, %v840_v57 }
  0xcb   :  { %v856_v36 = vrot.slane %v3215_v2, 4 }
  0xcc   :  { %v344_v9 = vpop.permute.xlu0 %343 }
  0xcd   :  { %755 = vrot.lane.b32.xlu1 %v4762_v43, %s4566_s18  ;;  %v348_v29 = vmul.f32 %v3618_v44, %v344_v9  ;;  %v5040_v9 = vsel %vm33_vm0, %v806_v11, %v808_v26  ;;  %v5084_v22 = vsel %vm84_vm3, %v854_v45, %v856_v36 }
  0xcf   :  { %v357_v49 = vpop.permute.xlu1 %356  ;;  %v350_v5 = vadd.f32 %v348_v29, %v335_v3 }
  0xd0   :  { %v362_v16 = vmul.f32 %v3621_v15, %v357_v49  ;;  %757 = vrot.lane.b32.xlu2 %v4780_v52, %s4566_s18  ;;  %v837_v15 = vrot.slane %v5008_v7, 3  ;;  %v5071_v49 = vsel %vm84_vm3, %v853_v34, %v854_v45  ;;  %v4360_v34 = vld [vmem:[%s6936_s1 + $0xd0] sm:$0xff]  }
  0xd1   :  { %v365_v39 = vadd.f32 %v363_v14, %v350_v5  ;;  %v4357_v5 = vld [vmem:[%s6936_s1 + $0x118] sm:$0xff]  }
  0xd2   :  { %770 = vrot.lane.b32.xlu0 %v4777_v51, %s4566_s18  ;;  %v5010_v17 = vpop.permute.xlu2 %515  ;;  %v364_v56 = vadd.f32 %v362_v16, %v349_v63  ;;  %v5066_v35 = vsel %vm67_vm2, %v837_v15, %v838_v27  ;;  %v3642_v2 = vunpack.c.h.bf16 %v4357_v5 }
  0xd4   :  { %v372_v60 = vpop.permute.xlu0 %371  ;;  %v445_v26 = vmul.f32 %v3642_v2, %v4754_v41  ;;  %v4361_v41 = vld [vmem:[%s6936_s1 + $0xf8] sm:$0xff]  }
  0xd5   :  { %v377_v18 = vmul.f32 %v3625_v61, %v372_v60  ;;  %772 = vrot.lane.b32.xlu1 %v4785_v53, %s4566_s18  ;;  %v4356_v60 = vld [vmem:[%s6936_s1 + $0xf0] sm:$0xff]  }
  0xd6   :  { %v3638_v8 = vunpack.c.h.bf16 %v4356_v60 }
  0xd7   :  { %v379_v21 = vadd.f32 %v377_v18, %v364_v56  ;;  %v374_v0 = vpop.permute.xlu1 %373  ;;  %v3637_v18 = vunpack.c.l.bf16 %v4356_v60  ;;  %v3653_v60 = vunpack.c.l.bf16 %v4360_v34 }
  0xd8   :  { %v378_v19 = vmul.f32 %v3626_v13, %v374_v0  ;;  %869 = vrot.lane.b32.xlu2 %v5008_v7, %s4563_s13  ;;  %v4355_v13 = vld [vmem:[%s6936_s1 + $0xc8] sm:$0xff]  }
  0xd9   :  { %v394_v59 = vadd.f32 %v392_v58, %v379_v21  ;;  %v3633_v58 = vunpack.c.l.bf16 %v4355_v13  ;;  %v3634_v11 = vunpack.c.h.bf16 %v4355_v13  ;;  %v428_v21 = vmul.f32 %v3637_v18, %v4732_v31 }
  0xda   :  { %871 = vrot.lane.b32.xlu0 %v5003_v1, %s4563_s13  ;;  %v5030_v47 = vpop.permute.xlu2 %532  ;;  %v380_v30 = vadd.f32 %v378_v19, %v365_v39  ;;  %v429_v19 = vmul.f32 %v3638_v8, %v4737_v32  ;;  %v4358_v39 = vld [vmem:[%s6936_s1 + $0x140] sm:$0xff]   ;;  %v3657_v8 = vunpack.c.l.bf16 %v4361_v41 }
  0xdb   :  { %397 = vst.msk [vmem:[#allocation2] sm:$0xff] %vm396_vm4, %v394_v59  ;;  %v409_v0 = vmul.f32 %v3633_v58, %v4718_v25  ;;  %v3641_v59 = vunpack.c.l.bf16 %v4357_v5  ;;  %v3645_v20 = vunpack.c.l.bf16 %v4358_v39  ;;  %v3654_v58 = vunpack.c.h.bf16 %v4360_v34  ;;  %v4362_v5 = vld [vmem:[%s6936_s1 + $0x120] sm:$0xff]  }
  0xdc   :  { %v389_v40 = vpop.permute.xlu0 %388  ;;  %v3661_v2 = vunpack.c.l.bf16 %v4362_v5 }
  0xdd   :  { %v393_v38 = vmul.f32 %v3630_v10, %v389_v40  ;;  %884 = vrot.lane.b32.xlu1 %v5020_v4, %s4563_s13  ;;  %v410_v10 = vmul.f32 %v3634_v11, %v4711_v24  ;;  %v430_v25 = vadd.f32 %v428_v21, %v409_v0  ;;  %v444_v32 = vmul.f32 %v3641_v59, %v4757_v42 }
  0xde   :  { %v3646_v40 = vunpack.c.h.bf16 %v4358_v39  ;;  %v3662_v39 = vunpack.c.h.bf16 %v4362_v5 }
  0xdf   :  { %v395_v33 = vadd.f32 %v393_v38, %v380_v30  ;;  %v5034_v48 = vpop.permute.xlu1 %485  ;;  %v431_v24 = vadd.f32 %v429_v19, %v410_v10  ;;  %v4359_v30 = vld [vmem:[%s6936_s1 + $0x168] sm:$0xff]   ;;  %v446_v6 = vadd.f32 %v444_v32, %v430_v25  ;;  %v3658_v19 = vunpack.c.h.bf16 %v4361_v41 }
  0xe0   :  { %886 = vrot.lane.b32.xlu2 %v5040_v9, %s4563_s13  ;;  %v3649_v27 = vunpack.c.l.bf16 %v4359_v30  ;;  %v461_v42 = vmul.f32 %v3646_v40, %v4780_v52  ;;  %v3650_v15 = vunpack.c.h.bf16 %v4359_v30  ;;  %v491_v0 = vmul.f32 %v3653_v60, %v5034_v48  ;;  %v4363_v10 = vld [vmem:[%s6936_s1 + $0x148] sm:$0xff]   ;;  %v4364_v48 = vld [vmem:[%s6936_s1 + $0x170] sm:$0xff]  }
  0xe1   :  { %398 = vst.msk [vmem:[#allocation2 + $0x8] sm:$0xff] %vm396_vm4, %v395_v33  ;;  %v460_v33 = vmul.f32 %v3645_v20, %v4762_v43  ;;  %v447_v57 = vadd.f32 %v445_v26, %v431_v24  ;;  %v3665_v20 = vunpack.c.l.bf16 %v4363_v10  ;;  %v3669_v30 = vunpack.c.l.bf16 %v4364_v48  ;;  %v4367_v60 = vld [vmem:[%s6936_s1 + $0x128] sm:$0xff]  }
  0xe2   :  { %899 = vrot.lane.b32.xlu0 %v5037_v55, %s4563_s13  ;;  %v5054_v50 = vpop.permute.xlu2 %560  ;;  %v476_v36 = vmul.f32 %v3649_v27, %v4777_v51  ;;  %v477_v18 = vmul.f32 %v3650_v15, %v4785_v53  ;;  %v492_v51 = vmul.f32 %v3654_v58, %v4984_v23  ;;  %v3666_v27 = vunpack.c.h.bf16 %v4363_v10  ;;  %v4368_v10 = vld [vmem:[%s6936_s1 + $0x150] sm:$0xff]  }
  0xe3   :  { %v462_v52 = vadd.f32 %v460_v33, %v446_v6  ;;  %v463_v13 = vadd.f32 %v461_v42, %v447_v57  ;;  %v4365_v57 = vld [vmem:[%s6936_s1 + $0xd8] sm:$0xff]   ;;  %v3670_v34 = vunpack.c.h.bf16 %v4364_v48  ;;  %v3685_v48 = vunpack.c.l.bf16 %v4368_v10 }
  0xe4   :  { %v5052_v44 = vpop.permute.xlu0 %500  ;;  %v3673_v41 = vunpack.c.l.bf16 %v4365_v57 }
  0xe5   :  { %901 = vrot.lane.b32.xlu1 %v5046_v28, %s4563_s13  ;;  %v478_v21 = vadd.f32 %v476_v36, %v462_v52  ;;  %v479_v59 = vadd.f32 %v477_v18, %v463_v13  ;;  %v506_v53 = vmul.f32 %v3657_v8, %v5052_v44  ;;  %v521_v44 = vmul.f32 %v3661_v2, %v5010_v17 }
  0xe6   :  { %v537_v36 = vmul.f32 %v3666_v27, %v5030_v47  ;;  %v3681_v47 = vunpack.c.l.bf16 %v4367_v60 }
  0xe7   :  { %v5060_v54 = vpop.permute.xlu1 %502  ;;  %v493_v32 = vadd.f32 %v491_v0, %v478_v21  ;;  %v494_v24 = vadd.f32 %v492_v51, %v479_v59  ;;  %v566_v21 = vmul.f32 %v3673_v41, %v5054_v50 }
  0xe8   :  { %914 = vrot.lane.b32.xlu2 %v5066_v35, %s4563_s13  ;;  %v507_v26 = vmul.f32 %v3658_v19, %v5060_v54  ;;  %v4366_v54 = vld [vmem:[%s6936_s1 + $0x100] sm:$0xff]  }
  0xe9   :  { %v508_v40 = vadd.f32 %v506_v53, %v493_v32  ;;  %v3677_v8 = vunpack.c.l.bf16 %v4366_v54  ;;  %v3678_v19 = vunpack.c.h.bf16 %v4366_v54  ;;  %v4371_v54 = vld [vmem:[%s6936_s1 + $0x108] sm:$0xff]  }
  0xea   :  { %916 = vrot.lane.b32.xlu0 %v5063_v46, %s4563_s13  ;;  %v5077_v61 = vpop.permute.xlu2 %577  ;;  %v509_v15 = vadd.f32 %v507_v26, %v494_v24  ;;  %v4370_v24 = vld [vmem:[%s6936_s1 + $0xe0] sm:$0xff]  }
  0xeb   :  { %v523_v17 = vadd.f32 %v521_v44, %v508_v40  ;;  %v3694_v41 = vunpack.c.h.bf16 %v4370_v24 }
  0xec   :  { %v5075_v16 = vpop.permute.xlu0 %517 }
  0xed   :  { %929 = vrot.lane.b32.xlu1 %v5071_v49, %s4563_s13  ;;  %v522_v33 = vmul.f32 %v3662_v39, %v5075_v16  ;;  %v3682_v39 = vunpack.c.h.bf16 %v4367_v60  ;;  %v4373_v60 = vld [vmem:[%s6936_s1 + $0x158] sm:$0xff]  }
  0xef   :  { %v5081_v62 = vpop.permute.xlu1 %530  ;;  %v524_v52 = vadd.f32 %v522_v33, %v509_v15 }
  0xf0   :  { %931 = vrot.lane.b32.xlu2 %v5084_v22, %s4563_s13  ;;  %v536_v42 = vmul.f32 %v3665_v20, %v5081_v62  ;;  %v3674_v62 = vunpack.c.h.bf16 %v4365_v57  ;;  %v582_v20 = vmul.f32 %v3678_v19, %v5077_v61  ;;  %v3693_v57 = vunpack.c.l.bf16 %v4370_v24 }
  0xf1   :  { %v539_v59 = vadd.f32 %v537_v36, %v524_v52  ;;  %v3697_v52 = vunpack.c.l.bf16 %v4371_v54 }
  0xf2   :  { %944 = vrot.lane.b32.xlu0 %v5008_v7, %s4564_s16  ;;  %v5092_v29 = vpop.permute.xlu2 %605  ;;  %v538_v58 = vadd.f32 %v536_v42, %v523_v17 }
  0xf3   :  { %v611_v27 = vmul.f32 %v3685_v48, %v5092_v29 }
  0xf4   :  { %v5090_v63 = vpop.permute.xlu0 %545 }
  0xf5   :  { %946 = vrot.lane.b32.xlu1 %v5003_v1, %s4564_s16  ;;  %v551_v16 = vmul.f32 %v3669_v30, %v5090_v63 }
  0xf7   :  { %v5096_v37 = vpop.permute.xlu1 %547  ;;  %v553_v5 = vadd.f32 %v551_v16, %v538_v58 }
  0xf8   :  { %959 = vrot.lane.b32.xlu2 %v5020_v4, %s4564_s16  ;;  %v552_v63 = vmul.f32 %v3670_v34, %v5096_v37  ;;  %v4369_v37 = vld [vmem:[%s6936_s1 + $0x178] sm:$0xff]  }
  0xf9   :  { %v568_v50 = vadd.f32 %v566_v21, %v553_v5  ;;  %v3689_v30 = vunpack.c.l.bf16 %v4369_v37  ;;  %v3690_v34 = vunpack.c.h.bf16 %v4369_v37  ;;  %v3706_v37 = vunpack.c.h.bf16 %v4373_v60 }
  0xfa   :  { %961 = vrot.lane.b32.xlu0 %v5040_v9, %s4564_s16  ;;  %v5110_v56 = vpop.permute.xlu2 %622  ;;  %v554_v2 = vadd.f32 %v552_v63, %v539_v59  ;;  %v3705_v59 = vunpack.c.l.bf16 %v4373_v60 }
  0xfc   :  { %v5108_v3 = vpop.permute.xlu0 %562 }
  0xfd   :  { %974 = vrot.lane.b32.xlu1 %v5037_v55, %s4564_s16  ;;  %v567_v51 = vmul.f32 %v3674_v62, %v5108_v3  ;;  %v627_v62 = vmul.f32 %v3690_v34, %v5110_v56 }
  0xff   :  { %v5117_v14 = vpop.permute.xlu1 %575  ;;  %v569_v32 = vadd.f32 %v567_v51, %v554_v2 }
 0x100   :  { %976 = vrot.lane.b32.xlu2 %v5046_v28, %s4564_s16  ;;  %v581_v53 = vmul.f32 %v3677_v8, %v5117_v14  ;;  %v3686_v14 = vunpack.c.h.bf16 %v4368_v10 }
 0x101   :  { %v584_v42 = vadd.f32 %v582_v20, %v569_v32 }
 0x102   :  { %989 = vrot.lane.b32.xlu0 %v5066_v35, %s4564_s16  ;;  %v5132_v31 = vpop.permute.xlu2 %650  ;;  %v583_v44 = vadd.f32 %v581_v53, %v568_v50  ;;  %v4374_v53 = vld [vmem:[%s6936_s1 + $0x180] sm:$0xff]  }
 0x103   :  { %v3709_v50 = vunpack.c.l.bf16 %v4374_v53  ;;  %v3710_v32 = vunpack.c.h.bf16 %v4374_v53 }
 0x104   :  { %v5130_v12 = vpop.permute.xlu0 %590 }
 0x105   :  { %991 = vrot.lane.b32.xlu1 %v5063_v46, %s4564_s16  ;;  %v596_v3 = vmul.f32 %v3681_v47, %v5130_v12  ;;  %v656_v47 = vmul.f32 %v3697_v52, %v5132_v31 }
 0x107   :  { %v5141_v38 = vpop.permute.xlu1 %592  ;;  %v598_v12 = vadd.f32 %v596_v3, %v583_v44 }
 0x108   :  { %1004 = vrot.lane.b32.xlu2 %v5071_v49, %s4564_s16  ;;  %v597_v33 = vmul.f32 %v3682_v39, %v5141_v38  ;;  %v4372_v38 = vld [vmem:[%s6936_s1 + $0x130] sm:$0xff]  }
 0x109   :  { %v613_v29 = vadd.f32 %v611_v27, %v598_v12  ;;  %v3701_v5 = vunpack.c.l.bf16 %v4372_v38  ;;  %v3702_v10 = vunpack.c.h.bf16 %v4372_v38 }
 0x10a   :  { %1006 = vrot.lane.b32.xlu0 %v5084_v22, %s4564_s16  ;;  %v5157_v45 = vpop.permute.xlu2 %667  ;;  %v599_v16 = vadd.f32 %v597_v33, %v584_v42 }
 0x10b   :  { %v672_v48 = vmul.f32 %v3702_v10, %v5157_v45 }
 0x10c   :  { %v5155_v43 = vpop.permute.xlu0 %607 }
 0x10d   :  { %1019 = vrot.lane.b32.xlu1 %v5008_v7, %s4565_s17  ;;  %v612_v15 = vmul.f32 %v3686_v14, %v5155_v43 }
 0x10f   :  { %v5163_v11 = vpop.permute.xlu1 %620  ;;  %v614_v36 = vadd.f32 %v612_v15, %v599_v16  ;;  %v4377_v15 = vld [vmem:[%s6936_s1 + $0x138] sm:$0xff]  }
 0x110   :  { %1021 = vrot.lane.b32.xlu2 %v5003_v1, %s4565_s17  ;;  %v626_v17 = vmul.f32 %v3689_v30, %v5163_v11  ;;  %v3698_v11 = vunpack.c.h.bf16 %v4371_v54 }
 0x111   :  { %v629_v51 = vadd.f32 %v627_v62, %v614_v36 }
 0x112   :  { %1034 = vrot.lane.b32.xlu0 %v5020_v4, %s4565_s17  ;;  %v5183_v25 = vpop.permute.xlu2 %695  ;;  %v628_v63 = vadd.f32 %v626_v17, %v613_v29 }
 0x114   :  { %v5181_v23 = vpop.permute.xlu0 %635 }
 0x115   :  { %1036 = vrot.lane.b32.xlu1 %v5040_v9, %s4565_s17  ;;  %v641_v43 = vmul.f32 %v3693_v57, %v5181_v23 }
 0x117   :  { %v5189_v6 = vpop.permute.xlu1 %637  ;;  %v643_v23 = vadd.f32 %v641_v43, %v628_v63  ;;  %v3722_v43 = vunpack.c.h.bf16 %v4377_v15 }
 0x118   :  { %1049 = vrot.lane.b32.xlu2 %v5037_v55, %s4565_s17  ;;  %v642_v21 = vmul.f32 %v3694_v41, %v5189_v6  ;;  %v4375_v6 = vld [vmem:[%s6936_s1 + $0xe8] sm:$0xff]   ;;  %v3721_v41 = vunpack.c.l.bf16 %v4377_v15 }
 0x119   :  { %v658_v31 = vadd.f32 %v656_v47, %v643_v23  ;;  %v3713_v44 = vunpack.c.l.bf16 %v4375_v6  ;;  %v3714_v42 = vunpack.c.h.bf16 %v4375_v6 }
 0x11a   :  { %1051 = vrot.lane.b32.xlu0 %v5046_v28, %s4565_s17  ;;  %v5210_v18 = vpop.permute.xlu2 %712  ;;  %v644_v39 = vadd.f32 %v642_v21, %v629_v51 }
 0x11b   :  { %v717_v29 = vmul.f32 %v3714_v42, %v5210_v18  ;;  %v5304_v18 = vld [vmem:[%s6935_s0 + $0x48] sm:$0xff] }
 0x11c   :  { %v5208_v13 = vpop.permute.xlu0 %652 }
 0x11d   :  { %1064 = vrot.lane.b32.xlu1 %v5066_v35, %s4565_s17  ;;  %v657_v19 = vmul.f32 %v3698_v11, %v5208_v13 }
 0x11f   :  { %v666_v0 = vpop.permute.xlu1 %665  ;;  %v659_v3 = vadd.f32 %v657_v19, %v644_v39 }
 0x120   :  { %1066 = vrot.lane.b32.xlu2 %v5063_v46, %s4565_s17  ;;  %v671_v2 = vmul.f32 %v3701_v5, %v666_v0  ;;  %v4376_v0 = vld [vmem:[%s6936_s1 + $0x110] sm:$0xff]  }
 0x121   :  { %v3717_v12 = vunpack.c.l.bf16 %v4376_v0  ;;  %v674_v45 = vadd.f32 %v672_v48, %v659_v3  ;;  %v3718_v17 = vunpack.c.h.bf16 %v4376_v0  ;;  %v1205_v0 = vrot.slane %v5304_v18, 2 }
 0x122   :  { %1079 = vrot.lane.b32.xlu0 %v5071_v49, %s4565_s17  ;;  %v5233_v40 = vpop.permute.xlu2 %740  ;;  %v673_v24 = vadd.f32 %v671_v2, %v658_v31 }
 0x123   :  { %v746_v5 = vmul.f32 %v3721_v41, %v5233_v40  ;;  %v5314_v40 = vld [vmem:[%s6935_s0 + $0x50] sm:$0xff] }
 0x124   :  { %v681_v26 = vpop.permute.xlu0 %680  ;;  %v1190_v2 = vrot.slane %v5314_v40, 1  ;;  %v1238_v41 = vrot.slane %v5314_v40, 4 }
 0x125   :  { %1081 = vrot.lane.b32.xlu1 %v5084_v22, %s4565_s17  ;;  %v686_v13 = vmul.f32 %v3705_v59, %v681_v26  ;;  %v701_v26 = vmul.f32 %v3709_v50, %v5183_v25 }
 0x127   :  { %v683_v61 = vpop.permute.xlu1 %682  ;;  %v688_v33 = vadd.f32 %v686_v13, %v673_v24 }
 0x128   :  { %1094 = vrot.lane.b32.xlu2 %v5008_v7, %s4566_s18  ;;  %v687_v30 = vmul.f32 %v3706_v37, %v683_v61  ;;  %v4378_v61 = vld [vmem:[%s6936_s1 + $0x160] sm:$0xff]   ;;  %v1189_v37 = vrot.slane %v5304_v18, 1 }
 0x129   :  { %v703_v25 = vadd.f32 %v701_v26, %v688_v33  ;;  %v3725_v11 = vunpack.c.l.bf16 %v4378_v61  ;;  %v3726_v59 = vunpack.c.h.bf16 %v4378_v61 }
 0x12a   :  { %1096 = vrot.lane.b32.xlu0 %v5003_v1, %s4566_s18  ;;  %v5256_v8 = vpop.permute.xlu2 %757  ;;  %v689_v54 = vadd.f32 %v687_v30, %v674_v45  ;;  %v1221_v45 = vrot.slane %v5304_v18, 3 }
 0x12b   :  { %v762_v31 = vmul.f32 %v3726_v59, %v5256_v8  ;;  %v5331_v8 = vsel %vm33_vm0, %v1189_v37, %v1190_v2 }
 0x12c   :  { %v698_v58 = vpop.permute.xlu0 %697 }
 0x12d   :  { %1109 = vrot.lane.b32.xlu1 %v5020_v4, %s4566_s18  ;;  %v702_v57 = vmul.f32 %v3710_v32, %v698_v58  ;;  %v4379_v58 = vld [vmem:[%s6936_s1 + $0x188] sm:$0xff]  }
 0x12e   :  { %v3729_v19 = vunpack.c.l.bf16 %v4379_v58  ;;  %v3730_v50 = vunpack.c.h.bf16 %v4379_v58 }
 0x12f   :  { %v711_v56 = vpop.permute.xlu1 %710  ;;  %v704_v38 = vadd.f32 %v702_v57, %v689_v54  ;;  %v1222_v57 = vrot.slane %v5314_v40, 3 }
 0x130   :  { %1111 = vrot.lane.b32.xlu2 %v5040_v9, %s4566_s18  ;;  %v716_v34 = vmul.f32 %v3713_v44, %v711_v56  ;;  %v3268_v56 = vld [vmem:[%s6935_s0 + $0x58] sm:$0xf] }
 0x131   :  { %v719_v23 = vadd.f32 %v717_v29, %v704_v38  ;;  %v1192_v39 = vrot.slane %v3268_v56, 1  ;;  %v1208_v42 = vrot.slane %v3268_v56, 2  ;;  %v1224_v54 = vrot.slane %v3268_v56, 3 }
 0x132   :  { %1124 = vrot.lane.b32.xlu0 %v5037_v55, %s4566_s18  ;;  %v5277_v14 = vpop.permute.xlu2 %869  ;;  %v718_v62 = vadd.f32 %v716_v34, %v703_v25  ;;  %v5353_v61 = vsel %vm67_vm2, %v1221_v45, %v1222_v57  ;;  %v1240_v38 = vrot.slane %v3268_v56, 4  ;;  %v1237_v29 = vrot.slane %v5304_v18, 4 }
 0x133   :  { %v5328_v30 = vsel %vm33_vm0, %v1190_v2, %v1192_v39 }
 0x134   :  { %v726_v20 = vpop.permute.xlu0 %725 }
 0x135   :  { %1126 = vrot.lane.b32.xlu1 %v5046_v28, %s4566_s18  ;;  %v731_v16 = vmul.f32 %v3717_v12, %v726_v20  ;;  %v1206_v20 = vrot.slane %v5314_v40, 2 }
 0x137   :  { %v728_v27 = vpop.permute.xlu1 %727  ;;  %v733_v63 = vadd.f32 %v731_v16, %v718_v62  ;;  %v5356_v25 = vsel %vm50_vm1, %v1206_v20, %v1208_v42  ;;  %v5361_v16 = vsel %vm67_vm2, %v1222_v57, %v1224_v54 }
 0x138   :  { %1139 = vrot.lane.b32.xlu2 %v5066_v35, %s4566_s18  ;;  %v732_v60 = vmul.f32 %v3718_v17, %v728_v27  ;;  %v5337_v27 = vsel %vm50_vm1, %v1205_v0, %v1206_v20 }
 0x139   :  { %v748_v53 = vadd.f32 %v746_v5, %v733_v63 }
 0x13a   :  { %1141 = vrot.lane.b32.xlu0 %v5063_v46, %s4566_s18  ;;  %v5293_v36 = vpop.permute.xlu2 %886  ;;  %v734_v10 = vadd.f32 %v732_v60, %v719_v23  ;;  %v5379_v60 = vsel %vm84_vm3, %v1237_v29, %v1238_v41  ;;  %v4380_v23 = vld [vmem:[%s6936_s1 + $0x190] sm:$0xff]  }
 0x13c   :  { %v743_v52 = vpop.permute.xlu0 %742 }
 0x13d   :  { %1154 = vrot.lane.b32.xlu1 %v5071_v49, %s4566_s18  ;;  %v747_v47 = vmul.f32 %v3722_v43, %v743_v52 }
 0x13f   :  { %v756_v21 = vpop.permute.xlu1 %755  ;;  %v749_v6 = vadd.f32 %v747_v47, %v734_v10  ;;  %v4382_v10 = vld [vmem:[%s6936_s1 + $0x1e0] sm:$0xff]  }
 0x140   :  { %v761_v51 = vmul.f32 %v3725_v11, %v756_v21  ;;  %1156 = vrot.lane.b32.xlu2 %v5084_v22, %s4566_s18  ;;  %v5376_v11 = vsel %vm84_vm3, %v1238_v41, %v1240_v38  ;;  %v4381_v21 = vld [vmem:[%s6936_s1 + $0x1b8] sm:$0xff]  }
 0x141   :  { %v764_v33 = vadd.f32 %v762_v31, %v749_v6  ;;  %v3737_v56 = vunpack.c.l.bf16 %v4381_v21  ;;  %v3741_v6 = vunpack.c.l.bf16 %v4382_v10 }
 0x142   :  { %1253 = vrot.lane.b32.xlu0 %v5304_v18, %s4563_s13  ;;  %v5321_v3 = vpop.permute.xlu2 %914  ;;  %v763_v48 = vadd.f32 %v761_v51, %v748_v53  ;;  %v3733_v51 = vunpack.c.l.bf16 %v4380_v23  ;;  %v3734_v53 = vunpack.c.h.bf16 %v4380_v23 }
 0x143   :  { %v812_v39 = vmul.f32 %v3737_v56, %v5020_v4  ;;  %v828_v0 = vmul.f32 %v3741_v6, %v5037_v55  ;;  %v4385_v55 = vld [vmem:[%s6936_s1 + $0x198] sm:$0xff]  }
 0x144   :  { %v771_v13 = vpop.permute.xlu0 %770  ;;  %v793_v37 = vmul.f32 %v3733_v51, %v5008_v7  ;;  %v3753_v29 = vunpack.c.l.bf16 %v4385_v55  ;;  %v3754_v56 = vunpack.c.h.bf16 %v4385_v55 }
 0x145   :  { %v776_v32 = vmul.f32 %v3729_v19, %v771_v13  ;;  %1255 = vrot.lane.b32.xlu1 %v5314_v40, %s4563_s13  ;;  %v3738_v19 = vunpack.c.h.bf16 %v4381_v21  ;;  %v4383_v13 = vld [vmem:[%s6936_s1 + $0x208] sm:$0xff]  }
 0x146   :  { %v814_v7 = vadd.f32 %v812_v39, %v793_v37  ;;  %v3745_v20 = vunpack.c.l.bf16 %v4383_v13 }
 0x147   :  { %v778_v24 = vadd.f32 %v776_v32, %v763_v48  ;;  %v773_v44 = vpop.permute.xlu1 %772  ;;  %v813_v31 = vmul.f32 %v3738_v19, %v5040_v9  ;;  %v3742_v48 = vunpack.c.h.bf16 %v4382_v10  ;;  %v4384_v9 = vld [vmem:[%s6936_s1 + $0x230] sm:$0xff]   ;;  %v4387_v19 = vld [vmem:[%s6936_s1 + $0x1e8] sm:$0xff]  }
 0x148   :  { %v777_v26 = vmul.f32 %v3730_v50, %v773_v44  ;;  %1268 = vrot.lane.b32.xlu2 %v5331_v8, %s4563_s13  ;;  %v794_v50 = vmul.f32 %v3734_v53, %v5003_v1  ;;  %v3746_v1 = vunpack.c.h.bf16 %v4383_v13  ;;  %v3749_v45 = vunpack.c.l.bf16 %v4384_v9 }
 0x149   :  { %781 = vst.msk [vmem:[#allocation2 + $0x10] sm:$0xff] %vm396_vm4, %v778_v24  ;;  %v829_v44 = vmul.f32 %v3742_v48, %v5046_v28  ;;  %v3750_v42 = vunpack.c.h.bf16 %v4384_v9  ;;  %v875_v53 = vmul.f32 %v3753_v29, %v5277_v14  ;;  %v3761_v6 = vunpack.c.l.bf16 %v4387_v19  ;;  %v4388_v14 = vld [vmem:[%s6936_s1 + $0x210] sm:$0xff]   ;;  %v4389_v9 = vld [vmem:[%s6936_s1 + $0x238] sm:$0xff]   ;;  %v4391_v29 = vld [vmem:[%s6936_s1 + $0x1c8] sm:$0xff]  }
 0x14a   :  { %v779_v12 = vadd.f32 %v777_v26, %v764_v33  ;;  %1270 = vrot.lane.b32.xlu0 %v5328_v30, %s4563_s13  ;;  %v5346_v34 = vpop.permute.xlu2 %931  ;;  %v815_v24 = vadd.f32 %v813_v31, %v794_v50  ;;  %v830_v26 = vadd.f32 %v828_v0, %v814_v7  ;;  %v845_v28 = vmul.f32 %v3746_v1, %v5063_v46  ;;  %v4386_v46 = vld [vmem:[%s6936_s1 + $0x1c0] sm:$0xff]  }
 0x14b   :  { %v860_v38 = vmul.f32 %v3749_v45, %v5071_v49  ;;  %v861_v23 = vmul.f32 %v3750_v42, %v5084_v22  ;;  %v3757_v39 = vunpack.c.l.bf16 %v4386_v46  ;;  %v3758_v37 = vunpack.c.h.bf16 %v4386_v46  ;;  %v4392_v46 = vld [vmem:[%s6936_s1 + $0x1f0] sm:$0xff]  }
 0x14c   :  { %782 = vst.msk [vmem:[#allocation2 + $0x18] sm:$0xff] %vm396_vm4, %v779_v12  ;;  %v5344_v15 = vpop.permute.xlu0 %871  ;;  %v844_v12 = vmul.f32 %v3745_v20, %v5066_v35  ;;  %v831_v57 = vadd.f32 %v829_v44, %v815_v24  ;;  %v3762_v50 = vunpack.c.h.bf16 %v4387_v19  ;;  %v3766_v20 = vunpack.c.h.bf16 %v4388_v14 }
 0x14d   :  { %1283 = vrot.lane.b32.xlu1 %v5337_v27, %s4563_s13  ;;  %v876_v22 = vmul.f32 %v3754_v56, %v5344_v15  ;;  %v891_v15 = vmul.f32 %v3758_v37, %v5293_v36  ;;  %v3765_v1 = vunpack.c.l.bf16 %v4388_v14  ;;  %v3769_v45 = vunpack.c.l.bf16 %v4389_v9 }
 0x14e   :  { %v846_v35 = vadd.f32 %v844_v12, %v830_v26  ;;  %v847_v21 = vadd.f32 %v845_v28, %v831_v57  ;;  %v4390_v12 = vld [vmem:[%s6936_s1 + $0x1a0] sm:$0xff]   ;;  %v3770_v57 = vunpack.c.h.bf16 %v4389_v9  ;;  %v3781_v37 = vunpack.c.l.bf16 %v4392_v46 }
 0x14f   :  { %v5350_v17 = vpop.permute.xlu1 %884  ;;  %v920_v28 = vmul.f32 %v3765_v1, %v5321_v3  ;;  %v3778_v3 = vunpack.c.h.bf16 %v4391_v29  ;;  %v3782_v14 = vunpack.c.h.bf16 %v4392_v46 }
 0x150   :  { %1285 = vrot.lane.b32.xlu2 %v5356_v25, %s4563_s13  ;;  %v862_v10 = vadd.f32 %v860_v38, %v846_v35  ;;  %v863_v49 = vadd.f32 %v861_v23, %v847_v21  ;;  %v890_v7 = vmul.f32 %v3757_v39, %v5350_v17  ;;  %v3774_v21 = vunpack.c.h.bf16 %v4390_v12 }
 0x151   :  { %v936_v56 = vmul.f32 %v3770_v57, %v5346_v34  ;;  %v3777_v39 = vunpack.c.l.bf16 %v4391_v29 }
 0x152   :  { %1298 = vrot.lane.b32.xlu0 %v5353_v61, %s4563_s13  ;;  %v5369_v52 = vpop.permute.xlu2 %959  ;;  %v877_v48 = vadd.f32 %v875_v53, %v862_v10  ;;  %v878_v0 = vadd.f32 %v876_v22, %v863_v49  ;;  %v4393_v22 = vld [vmem:[%s6936_s1 + $0x218] sm:$0xff]  }
 0x154   :  { %v5367_v43 = vpop.permute.xlu0 %899  ;;  %v892_v17 = vadd.f32 %v890_v7, %v877_v48  ;;  %v893_v36 = vadd.f32 %v891_v15, %v878_v0  ;;  %v4394_v15 = vld [vmem:[%s6936_s1 + $0x240] sm:$0xff]  }
 0x155   :  { %1300 = vrot.lane.b32.xlu1 %v5361_v16, %s4563_s13  ;;  %v905_v44 = vmul.f32 %v3761_v6, %v5367_v43  ;;  %v3790_v1 = vunpack.c.h.bf16 %v4394_v15 }
 0x157   :  { %v5373_v62 = vpop.permute.xlu1 %901  ;;  %v907_v43 = vadd.f32 %v905_v44, %v892_v17 }
 0x158   :  { %1313 = vrot.lane.b32.xlu2 %v5379_v60, %s4563_s13  ;;  %v906_v26 = vmul.f32 %v3762_v50, %v5373_v62  ;;  %v3773_v62 = vunpack.c.l.bf16 %v4390_v12  ;;  %v965_v50 = vmul.f32 %v3777_v39, %v5369_v52  ;;  %v4395_v52 = vld [vmem:[%s6936_s1 + $0x1a8] sm:$0xff]  }
 0x159   :  { %v922_v10 = vadd.f32 %v920_v28, %v907_v43  ;;  %v3793_v57 = vunpack.c.l.bf16 %v4395_v52  ;;  %v3794_v28 = vunpack.c.h.bf16 %v4395_v52 }
 0x15a   :  { %1315 = vrot.lane.b32.xlu0 %v5376_v11, %s4563_s13  ;;  %v5387_v63 = vpop.permute.xlu2 %976  ;;  %v908_v38 = vadd.f32 %v906_v26, %v893_v36 }
 0x15b   :  { %v981_v44 = vmul.f32 %v3782_v14, %v5387_v63 }
 0x15c   :  { %v5385_v58 = vpop.permute.xlu0 %916 }
 0x15d   :  { %1328 = vrot.lane.b32.xlu1 %v5304_v18, %s4564_s16  ;;  %v921_v55 = vmul.f32 %v3766_v20, %v5385_v58  ;;  %v3786_v20 = vunpack.c.h.bf16 %v4393_v22 }
 0x15f   :  { %v5391_v5 = vpop.permute.xlu1 %929  ;;  %v923_v23 = vadd.f32 %v921_v55, %v908_v38  ;;  %v4396_v55 = vld [vmem:[%s6936_s1 + $0x1d0] sm:$0xff]  }
 0x160   :  { %1330 = vrot.lane.b32.xlu2 %v5314_v40, %s4564_s16  ;;  %v935_v58 = vmul.f32 %v3769_v45, %v5391_v5  ;;  %v3789_v45 = vunpack.c.l.bf16 %v4394_v15 }
 0x161   :  { %v938_v34 = vadd.f32 %v936_v56, %v923_v23  ;;  %v3798_v23 = vunpack.c.h.bf16 %v4396_v55 }
 0x162   :  { %1343 = vrot.lane.b32.xlu0 %v5331_v8, %s4564_s16  ;;  %v5405_v59 = vpop.permute.xlu2 %1004  ;;  %v937_v5 = vadd.f32 %v935_v58, %v922_v10  ;;  %v4397_v58 = vld [vmem:[%s6936_s1 + $0x1f8] sm:$0xff]  }
 0x163   :  { %v3802_v46 = vunpack.c.h.bf16 %v4397_v58 }
 0x164   :  { %v5403_v47 = vpop.permute.xlu0 %944 }
 0x165   :  { %1345 = vrot.lane.b32.xlu1 %v5328_v30, %s4564_s16  ;;  %v950_v53 = vmul.f32 %v3773_v62, %v5403_v47  ;;  %v1010_v62 = vmul.f32 %v3789_v45, %v5405_v59  ;;  %v4398_v59 = vld [vmem:[%s6936_s1 + $0x220] sm:$0xff]  }
 0x166   :  { %v4402_v45 = vld [vmem:[%s6936_s1 + $0x200] sm:$0xff]  }
 0x167   :  { %v5412_v2 = vpop.permute.xlu1 %946  ;;  %v952_v47 = vadd.f32 %v950_v53, %v937_v5  ;;  %v4399_v5 = vld [vmem:[%s6936_s1 + $0x248] sm:$0xff]  }
 0x168   :  { %1358 = vrot.lane.b32.xlu2 %v5337_v27, %s4564_s16  ;;  %v951_v49 = vmul.f32 %v3774_v21, %v5412_v2  ;;  %v3785_v2 = vunpack.c.l.bf16 %v4393_v22  ;;  %v3810_v15 = vunpack.c.h.bf16 %v4399_v5 }
 0x169   :  { %v967_v12 = vadd.f32 %v965_v50, %v952_v47  ;;  %v3809_v47 = vunpack.c.l.bf16 %v4399_v5 }
 0x16a   :  { %1360 = vrot.lane.b32.xlu0 %v5356_v25, %s4564_s16  ;;  %v5427_v4 = vpop.permute.xlu2 %1021  ;;  %v953_v0 = vadd.f32 %v951_v49, %v938_v34  ;;  %v3801_v49 = vunpack.c.l.bf16 %v4397_v58  ;;  %v4404_v58 = vld [vmem:[%s6936_s1 + $0x250] sm:$0xff]  }
 0x16c   :  { %v5425_v32 = vpop.permute.xlu0 %961 }
 0x16d   :  { %1373 = vrot.lane.b32.xlu1 %v5353_v61, %s4564_s16  ;;  %v966_v6 = vmul.f32 %v3778_v3, %v5425_v32  ;;  %v1026_v3 = vmul.f32 %v3794_v28, %v5427_v4 }
 0x16f   :  { %v5436_v33 = vpop.permute.xlu1 %974  ;;  %v968_v32 = vadd.f32 %v966_v6, %v953_v0  ;;  %v3806_v6 = vunpack.c.h.bf16 %v4398_v59  ;;  %v4400_v0 = vld [vmem:[%s6936_s1 + $0x1b0] sm:$0xff]  }
 0x170   :  { %1375 = vrot.lane.b32.xlu2 %v5361_v16, %s4564_s16  ;;  %v980_v9 = vmul.f32 %v3781_v37, %v5436_v33 }
 0x171   :  { %v983_v63 = vadd.f32 %v981_v44, %v968_v32  ;;  %v3814_v32 = vunpack.c.h.bf16 %v4400_v0 }
 0x172   :  { %1388 = vrot.lane.b32.xlu0 %v5379_v60, %s4564_s16  ;;  %v5449_v41 = vpop.permute.xlu2 %1049  ;;  %v982_v33 = vadd.f32 %v980_v9, %v967_v12  ;;  %v3813_v12 = vunpack.c.l.bf16 %v4400_v0 }
 0x174   :  { %v5447_v54 = vpop.permute.xlu0 %989 }
 0x175   :  { %1390 = vrot.lane.b32.xlu1 %v5376_v11, %s4564_s16  ;;  %v995_v17 = vmul.f32 %v3785_v2, %v5447_v54 }
 0x177   :  { %v5458_v51 = vpop.permute.xlu1 %991  ;;  %v997_v54 = vadd.f32 %v995_v17, %v982_v33 }
 0x178   :  { %1403 = vrot.lane.b32.xlu2 %v5304_v18, %s4565_s17  ;;  %v996_v36 = vmul.f32 %v3786_v20, %v5458_v51  ;;  %v3797_v51 = vunpack.c.l.bf16 %v4396_v55 }
 0x179   :  { %v1012_v53 = vadd.f32 %v1010_v62, %v997_v54 }
 0x17a   :  { %1405 = vrot.lane.b32.xlu0 %v5314_v40, %s4565_s17  ;;  %v5471_v13 = vpop.permute.xlu2 %1066  ;;  %v998_v21 = vadd.f32 %v996_v36, %v983_v63 }
 0x17c   :  { %v5469_v31 = vpop.permute.xlu0 %1006 }
 0x17d   :  { %1418 = vrot.lane.b32.xlu1 %v5331_v8, %s4565_s17  ;;  %v1011_v43 = vmul.f32 %v3790_v1, %v5469_v31 }
 0x17f   :  { %v5483_v24 = vpop.permute.xlu1 %1019  ;;  %v1013_v31 = vadd.f32 %v1011_v43, %v998_v21  ;;  %v3821_v43 = vunpack.c.l.bf16 %v4402_v45 }
 0x180   :  { %1420 = vrot.lane.b32.xlu2 %v5328_v30, %s4565_s17  ;;  %v1025_v56 = vmul.f32 %v3793_v57, %v5483_v24  ;;  %v3805_v24 = vunpack.c.l.bf16 %v4398_v59  ;;  %v5596_v59 = vld [vmem:[%s6935_s0 + $0x68] sm:$0xff] }
 0x181   :  { %v1028_v4 = vadd.f32 %v1026_v3, %v1013_v31 }
 0x182   :  { %1433 = vrot.lane.b32.xlu0 %v5337_v27, %s4565_s17  ;;  %v5498_v35 = vpop.permute.xlu2 %1094  ;;  %v1027_v37 = vadd.f32 %v1025_v56, %v1012_v53 }
 0x183   :  { %v1100_v63 = vmul.f32 %v3813_v12, %v5498_v35 }
 0x184   :  { %v5496_v42 = vpop.permute.xlu0 %1034 }
 0x185   :  { %1435 = vrot.lane.b32.xlu1 %v5356_v25, %s4565_s17  ;;  %v1040_v39 = vmul.f32 %v3797_v51, %v5496_v42  ;;  %v1055_v42 = vmul.f32 %v3801_v49, %v5449_v41  ;;  %v4401_v41 = vld [vmem:[%s6936_s1 + $0x1d8] sm:$0xff]   ;;  %v4403_v51 = vld [vmem:[%s6936_s1 + $0x228] sm:$0xff]  }
 0x186   :  { %v3817_v55 = vunpack.c.l.bf16 %v4401_v41  ;;  %v3818_v33 = vunpack.c.h.bf16 %v4401_v41  ;;  %v3826_v53 = vunpack.c.h.bf16 %v4403_v51 }
 0x187   :  { %v1037_v19 = vpop.permute.xlu1 %1036  ;;  %v1042_v14 = vadd.f32 %v1040_v39, %v1027_v37  ;;  %v3830_v39 = vunpack.c.h.bf16 %v4404_v58  ;;  %v1574_v37 = vrot.slane %v5596_v59, 1 }
 0x188   :  { %1448 = vrot.lane.b32.xlu2 %v5353_v61, %s4565_s17  ;;  %v1041_v22 = vmul.f32 %v3798_v23, %v1037_v19 }
 0x189   :  { %v1057_v1 = vadd.f32 %v1055_v42, %v1042_v14  ;;  %v3829_v14 = vunpack.c.l.bf16 %v4404_v58 }
 0x18a   :  { %1450 = vrot.lane.b32.xlu0 %v5361_v16, %s4565_s17  ;;  %v5521_v7 = vpop.permute.xlu2 %1111  ;;  %v1043_v2 = vadd.f32 %v1041_v22, %v1028_v4 }
 0x18b   :  { %v1116_v35 = vmul.f32 %v3818_v33, %v5521_v7  ;;  %v5603_v7 = vld [vmem:[%s6935_s0 + $0x60] sm:$0xff] }
 0x18c   :  { %v1052_v48 = vpop.permute.xlu0 %1051  ;;  %v1573_v5 = vrot.slane %v5603_v7, 1 }
 0x18d   :  { %1463 = vrot.lane.b32.xlu1 %v5379_v60, %s4565_s17  ;;  %v1056_v34 = vmul.f32 %v3802_v46, %v1052_v48  ;;  %v1071_v48 = vmul.f32 %v3806_v6, %v5471_v13  ;;  %v3825_v46 = vunpack.c.l.bf16 %v4403_v51 }
 0x18f   :  { %v1065_v26 = vpop.permute.xlu1 %1064  ;;  %v1058_v9 = vadd.f32 %v1056_v34, %v1043_v2 }
 0x190   :  { %1465 = vrot.lane.b32.xlu2 %v5376_v11, %s4565_s17  ;;  %v1070_v20 = vmul.f32 %v3805_v24, %v1065_v26  ;;  %v3321_v24 = vld [vmem:[%s6935_s0 + $0x70] sm:$0xf] }
 0x191   :  { %v1073_v13 = vadd.f32 %v1071_v48, %v1058_v9  ;;  %v1576_v0 = vrot.slane %v3321_v24, 1  ;;  %v5618_v9 = vsel %vm33_vm0, %v1573_v5, %v1574_v37  ;;  %v1624_v51 = vrot.slane %v3321_v24, 4  ;;  %v4407_v5 = vld [vmem:[%s6936_s1 + $0x2a8] sm:$0xff]  }
 0x192   :  { %1478 = vrot.lane.b32.xlu0 %v5304_v18, %s4566_s18  ;;  %v5544_v29 = vpop.permute.xlu2 %1139  ;;  %v1072_v36 = vadd.f32 %v1070_v20, %v1057_v1  ;;  %v1592_v1 = vrot.slane %v3321_v24, 2 }
 0x193   :  { %v1145_v34 = vmul.f32 %v3825_v46, %v5544_v29  ;;  %v4405_v46 = vld [vmem:[%s6936_s1 + $0x258] sm:$0xff]  }
 0x194   :  { %v1080_v38 = vpop.permute.xlu0 %1079 }
 0x195   :  { %1480 = vrot.lane.b32.xlu1 %v5314_v40, %s4566_s18  ;;  %v1085_v52 = vmul.f32 %v3809_v47, %v1080_v38  ;;  %v3822_v38 = vunpack.c.h.bf16 %v4402_v45  ;;  %v1605_v45 = vrot.slane %v5603_v7, 3 }
 0x197   :  { %v1082_v10 = vpop.permute.xlu1 %1081  ;;  %v1087_v57 = vadd.f32 %v1085_v52, %v1072_v36  ;;  %v1589_v52 = vrot.slane %v5603_v7, 2  ;;  %v1606_v36 = vrot.slane %v5596_v59, 3 }
 0x198   :  { %1493 = vrot.lane.b32.xlu2 %v5331_v8, %s4566_s18  ;;  %v1086_v17 = vmul.f32 %v3810_v15, %v1082_v10 }
 0x199   :  { %v1102_v31 = vadd.f32 %v1100_v63, %v1087_v57  ;;  %v5650_v33 = vsel %vm67_vm2, %v1605_v45, %v1606_v36  ;;  %v1621_v57 = vrot.slane %v5603_v7, 4  ;;  %v1622_v63 = vrot.slane %v5596_v59, 4 }
 0x19a   :  { %1495 = vrot.lane.b32.xlu0 %v5328_v30, %s4566_s18  ;;  %v1157_v50 = vpop.permute.xlu2 %1156  ;;  %v1088_v62 = vadd.f32 %v1086_v17, %v1073_v13 }
 0x19b   :  { %v1161_v2 = vmul.f32 %v3830_v39, %v1157_v50  ;;  %v1590_v50 = vrot.slane %v5596_v59, 2 }
 0x19c   :  { %v1097_v19 = vpop.permute.xlu0 %1096 }
 0x19d   :  { %1508 = vrot.lane.b32.xlu1 %v5337_v27, %s4566_s18  ;;  %v1101_v26 = vmul.f32 %v3814_v32, %v1097_v19  ;;  %v5642_v13 = vsel %vm50_vm1, %v1590_v50, %v1592_v1 }
 0x19f   :  { %v1110_v44 = vpop.permute.xlu1 %1109  ;;  %v1103_v23 = vadd.f32 %v1101_v26, %v1088_v62  ;;  %v5645_v26 = vsel %vm50_vm1, %v1589_v52, %v1590_v50  ;;  %v4410_v50 = vld [vmem:[%s6936_s1 + $0x260] sm:$0xff]  }
 0x1a0   :  { %1510 = vrot.lane.b32.xlu2 %v5356_v25, %s4566_s18  ;;  %v1115_v21 = vmul.f32 %v3817_v55, %v1110_v44  ;;  %v5623_v44 = vsel %vm33_vm0, %v1574_v37, %v1576_v0 }
 0x1a1   :  { %v1118_v22 = vadd.f32 %v1116_v35, %v1103_v23  ;;  %v5673_v23 = vsel %vm84_vm3, %v1622_v63, %v1624_v51 }
 0x1a2   :  { %1523 = vrot.lane.b32.xlu0 %v5353_v61, %s4566_s18  ;;  %v5582_v54 = vpop.permute.xlu2 %1268  ;;  %v1117_v49 = vadd.f32 %v1115_v21, %v1102_v31  ;;  %v5665_v21 = vsel %vm84_vm3, %v1621_v57, %v1622_v63 }
 0x1a4   :  { %v1125_v28 = vpop.permute.xlu0 %1124 }
 0x1a5   :  { %1525 = vrot.lane.b32.xlu1 %v5361_v16, %s4566_s18  ;;  %v1130_v3 = vmul.f32 %v3821_v43, %v1125_v28  ;;  %v1608_v43 = vrot.slane %v3321_v24, 3 }
 0x1a7   :  { %v1127_v56 = vpop.permute.xlu1 %1126  ;;  %v1132_v4 = vadd.f32 %v1130_v3, %v1117_v49  ;;  %v5668_v58 = vsel %vm67_vm2, %v1606_v36, %v1608_v43  ;;  %v4406_v3 = vld [vmem:[%s6936_s1 + $0x280] sm:$0xff]   ;;  %v3833_v49 = vunpack.c.l.bf16 %v4405_v46  ;;  %v4411_v43 = vld [vmem:[%s6936_s1 + $0x288] sm:$0xff]  }
 0x1a8   :  { %v1131_v10 = vmul.f32 %v3822_v38, %v1127_v56  ;;  %1538 = vrot.lane.b32.xlu2 %v5379_v60, %s4566_s18  ;;  %v3837_v39 = vunpack.c.l.bf16 %v4406_v3 }
 0x1a9   :  { %v1147_v48 = vadd.f32 %v1145_v34, %v1132_v4  ;;  %v1177_v24 = vmul.f32 %v3833_v49, %v5304_v18  ;;  %v3841_v4 = vunpack.c.l.bf16 %v4407_v5  ;;  %v4408_v34 = vld [vmem:[%s6936_s1 + $0x2d0] sm:$0xff]   ;;  %v4409_v18 = vld [vmem:[%s6936_s1 + $0x2f8] sm:$0xff]   ;;  %v3857_v49 = vunpack.c.l.bf16 %v4411_v43 }
 0x1aa   :  { %1540 = vrot.lane.b32.xlu0 %v5376_v11, %s4566_s18  ;;  %v5613_v42 = vpop.permute.xlu2 %1285  ;;  %v1133_v47 = vadd.f32 %v1131_v10, %v1118_v22  ;;  %v1196_v37 = vmul.f32 %v3837_v39, %v5331_v8  ;;  %v3845_v8 = vunpack.c.l.bf16 %v4408_v34  ;;  %v3846_v45 = vunpack.c.h.bf16 %v4408_v34 }
 0x1ab   :  { %v1212_v0 = vmul.f32 %v3841_v4, %v5337_v27  ;;  %v3854_v34 = vunpack.c.h.bf16 %v4410_v50 }
 0x1ac   :  { %v1142_v6 = vpop.permute.xlu0 %1141  ;;  %v1228_v27 = vmul.f32 %v3845_v8, %v5353_v61  ;;  %v3853_v61 = vunpack.c.l.bf16 %v4410_v50 }
 0x1ad   :  { %v1146_v19 = vmul.f32 %v3826_v53, %v1142_v6  ;;  %1637 = vrot.lane.b32.xlu1 %v5603_v7, %s4563_s13 }
 0x1af   :  { %v1148_v15 = vadd.f32 %v1146_v19, %v1133_v47  ;;  %v1155_v20 = vpop.permute.xlu1 %1154  ;;  %v3838_v47 = vunpack.c.h.bf16 %v4406_v3  ;;  %v3834_v19 = vunpack.c.h.bf16 %v4405_v46  ;;  %v1229_v3 = vmul.f32 %v3846_v45, %v5361_v16 }
 0x1b0   :  { %v1160_v32 = vmul.f32 %v3829_v14, %v1155_v20  ;;  %1639 = vrot.lane.b32.xlu2 %v5596_v59, %s4563_s13  ;;  %v3850_v46 = vunpack.c.h.bf16 %v4409_v18 }
 0x1b1   :  { %v1163_v41 = vadd.f32 %v1161_v2, %v1148_v15  ;;  %v1198_v2 = vadd.f32 %v1196_v37, %v1177_v24  ;;  %v1197_v20 = vmul.f32 %v3838_v47, %v5328_v30 }
 0x1b2   :  { %v1162_v29 = vadd.f32 %v1160_v32, %v1147_v48  ;;  %1652 = vrot.lane.b32.xlu0 %v5618_v9, %s4563_s13  ;;  %v5633_v17 = vpop.permute.xlu2 %1313  ;;  %v1178_v48 = vmul.f32 %v3834_v19, %v5314_v40  ;;  %v3842_v32 = vunpack.c.h.bf16 %v4407_v5  ;;  %v4413_v5 = vld [vmem:[%s6936_s1 + $0x2d8] sm:$0xff]   ;;  %v1245_v4 = vmul.f32 %v3850_v46, %v5376_v11 }
 0x1b3   :  { %1166 = vst.msk [vmem:[#allocation2 + $0x28] sm:$0xff] %vm396_vm4, %v1163_v41  ;;  %v1214_v41 = vadd.f32 %v1212_v0, %v1198_v2  ;;  %v3858_v2 = vunpack.c.h.bf16 %v4411_v43  ;;  %v3865_v0 = vunpack.c.l.bf16 %v4413_v5  ;;  %v4417_v46 = vld [vmem:[%s6936_s1 + $0x2b8] sm:$0xff]  }
 0x1b4   :  { %1165 = vst.msk [vmem:[#allocation2 + $0x20] sm:$0xff] %vm396_vm4, %v1162_v29  ;;  %v5631_v12 = vpop.permute.xlu0 %1253  ;;  %v3849_v29 = vunpack.c.l.bf16 %v4409_v18  ;;  %v1199_v40 = vadd.f32 %v1197_v20, %v1178_v48  ;;  %v1213_v52 = vmul.f32 %v3842_v32, %v5356_v25  ;;  %v4412_v25 = vld [vmem:[%s6936_s1 + $0x2b0] sm:$0xff]   ;;  %v4414_v18 = vld [vmem:[%s6936_s1 + $0x300] sm:$0xff]  }
 0x1b5   :  { %1654 = vrot.lane.b32.xlu1 %v5623_v44, %s4563_s13  ;;  %v1230_v36 = vadd.f32 %v1228_v27, %v1214_v41  ;;  %v1259_v39 = vmul.f32 %v3853_v61, %v5631_v12  ;;  %v3861_v47 = vunpack.c.l.bf16 %v4412_v25  ;;  %v1274_v12 = vmul.f32 %v3857_v49, %v5582_v54  ;;  %v4415_v41 = vld [vmem:[%s6936_s1 + $0x268] sm:$0xff]  }
 0x1b6   :  { %v1244_v57 = vmul.f32 %v3849_v29, %v5379_v60  ;;  %v1215_v51 = vadd.f32 %v1213_v52, %v1199_v40  ;;  %v3862_v32 = vunpack.c.h.bf16 %v4412_v25  ;;  %v3869_v50 = vunpack.c.l.bf16 %v4414_v18 }
 0x1b7   :  { %v5639_v55 = vpop.permute.xlu1 %1255  ;;  %v3870_v61 = vunpack.c.h.bf16 %v4414_v18  ;;  %v3874_v49 = vunpack.c.h.bf16 %v4415_v41 }
 0x1b8   :  { %1667 = vrot.lane.b32.xlu2 %v5645_v26, %s4563_s13  ;;  %v1246_v60 = vadd.f32 %v1244_v57, %v1230_v36  ;;  %v1231_v24 = vadd.f32 %v1229_v3, %v1215_v51  ;;  %v1260_v48 = vmul.f32 %v3854_v34, %v5639_v55  ;;  %v4416_v55 = vld [vmem:[%s6936_s1 + $0x290] sm:$0xff]   ;;  %v3866_v36 = vunpack.c.h.bf16 %v4413_v5 }
 0x1b9   :  { %v3873_v57 = vunpack.c.l.bf16 %v4415_v41  ;;  %v1319_v51 = vmul.f32 %v3869_v50, %v5633_v17  ;;  %v3877_v3 = vunpack.c.l.bf16 %v4416_v55  ;;  %v3881_v5 = vunpack.c.l.bf16 %v4417_v46 }
 0x1ba   :  { %1669 = vrot.lane.b32.xlu0 %v5642_v13, %s4563_s13  ;;  %v5658_v62 = vpop.permute.xlu2 %1330  ;;  %v1261_v19 = vadd.f32 %v1259_v39, %v1246_v60  ;;  %v1247_v20 = vadd.f32 %v1245_v4, %v1231_v24 }
 0x1bb   :  { %v1335_v18 = vmul.f32 %v3874_v49, %v5658_v62  ;;  %v4421_v62 = vld [vmem:[%s6936_s1 + $0x298] sm:$0xff]  }
 0x1bc   :  { %v5656_v28 = vpop.permute.xlu0 %1270  ;;  %v1276_v54 = vadd.f32 %v1274_v12, %v1261_v19  ;;  %v1262_v52 = vadd.f32 %v1260_v48, %v1247_v20  ;;  %v3882_v20 = vunpack.c.h.bf16 %v4417_v46 }
 0x1bd   :  { %1682 = vrot.lane.b32.xlu1 %v5650_v33, %s4563_s13  ;;  %v1275_v27 = vmul.f32 %v3858_v2, %v5656_v28  ;;  %v1290_v28 = vmul.f32 %v3862_v32, %v5613_v42  ;;  %v4418_v42 = vld [vmem:[%s6936_s1 + $0x2e0] sm:$0xff]   ;;  %v3878_v2 = vunpack.c.h.bf16 %v4416_v55  ;;  %v4420_v32 = vld [vmem:[%s6936_s1 + $0x270] sm:$0xff]  }
 0x1be   :  { %v3893_v50 = vunpack.c.l.bf16 %v4420_v32 }
 0x1bf   :  { %v5662_v38 = vpop.permute.xlu1 %1283 }
 0x1c0   :  { %1684 = vrot.lane.b32.xlu2 %v5668_v58, %s4563_s13  ;;  %v1289_v11 = vmul.f32 %v3861_v47, %v5662_v38 }
 0x1c2   :  { %1697 = vrot.lane.b32.xlu0 %v5665_v21, %s4563_s13  ;;  %v5679_v56 = vpop.permute.xlu2 %1358  ;;  %v1291_v45 = vadd.f32 %v1289_v11, %v1276_v54 }
 0x1c4   :  { %v5677_v35 = vpop.permute.xlu0 %1298 }
 0x1c5   :  { %1699 = vrot.lane.b32.xlu1 %v5673_v23, %s4563_s13  ;;  %v1304_v29 = vmul.f32 %v3865_v0, %v5677_v35  ;;  %v1277_v35 = vadd.f32 %v1275_v27, %v1262_v52  ;;  %v3885_v0 = vunpack.c.l.bf16 %v4418_v42 }
 0x1c7   :  { %v5683_v31 = vpop.permute.xlu1 %1300  ;;  %v1306_v43 = vadd.f32 %v1304_v29, %v1291_v45  ;;  %v1292_v17 = vadd.f32 %v1290_v28, %v1277_v35  ;;  %v3886_v29 = vunpack.c.h.bf16 %v4418_v42  ;;  %v3897_v35 = vunpack.c.l.bf16 %v4421_v62 }
 0x1c8   :  { %1712 = vrot.lane.b32.xlu2 %v5603_v7, %s4564_s16  ;;  %v1305_v60 = vmul.f32 %v3866_v36, %v5683_v31  ;;  %v3898_v42 = vunpack.c.h.bf16 %v4421_v62 }
 0x1c9   :  { %v1321_v24 = vadd.f32 %v1319_v51, %v1306_v43  ;;  %v3894_v51 = vunpack.c.h.bf16 %v4420_v32 }
 0x1ca   :  { %1714 = vrot.lane.b32.xlu0 %v5596_v59, %s4564_s16  ;;  %v5697_v53 = vpop.permute.xlu2 %1375  ;;  %v1307_v19 = vadd.f32 %v1305_v60, %v1292_v17  ;;  %v4423_v60 = vld [vmem:[%s6936_s1 + $0x2e8] sm:$0xff]  }
 0x1cb   :  { %v1380_v43 = vmul.f32 %v3886_v29, %v5697_v53  ;;  %v3905_v17 = vunpack.c.l.bf16 %v4423_v60  ;;  %v4424_v53 = vld [vmem:[%s6936_s1 + $0x310] sm:$0xff]  }
 0x1cc   :  { %v5695_v10 = vpop.permute.xlu0 %1315 }
 0x1cd   :  { %1727 = vrot.lane.b32.xlu1 %v5618_v9, %s4564_s16  ;;  %v1320_v4 = vmul.f32 %v3870_v61, %v5695_v10 }
 0x1cf   :  { %v5701_v22 = vpop.permute.xlu1 %1328  ;;  %v1322_v10 = vadd.f32 %v1320_v4, %v1307_v19 }
 0x1d0   :  { %1729 = vrot.lane.b32.xlu2 %v5623_v44, %s4564_s16  ;;  %v1334_v39 = vmul.f32 %v3873_v57, %v5701_v22  ;;  %v4419_v22 = vld [vmem:[%s6936_s1 + $0x308] sm:$0xff]  }
 0x1d1   :  { %v3889_v11 = vunpack.c.l.bf16 %v4419_v22  ;;  %v3890_v61 = vunpack.c.h.bf16 %v4419_v22 }
 0x1d2   :  { %1742 = vrot.lane.b32.xlu0 %v5645_v26, %s4564_s16  ;;  %v5717_v14 = vpop.permute.xlu2 %1403  ;;  %v1336_v12 = vadd.f32 %v1334_v39, %v1321_v24 }
 0x1d4   :  { %v5715_v6 = vpop.permute.xlu0 %1343 }
 0x1d5   :  { %1744 = vrot.lane.b32.xlu1 %v5642_v13, %s4564_s16  ;;  %v1349_v31 = vmul.f32 %v3877_v3, %v5715_v6  ;;  %v1364_v6 = vmul.f32 %v3881_v5, %v5679_v56  ;;  %v1337_v56 = vadd.f32 %v1335_v18, %v1322_v10 }
 0x1d7   :  { %v5722_v15 = vpop.permute.xlu1 %1345  ;;  %v1351_v48 = vadd.f32 %v1349_v31, %v1336_v12 }
 0x1d8   :  { %1757 = vrot.lane.b32.xlu2 %v5650_v33, %s4564_s16  ;;  %v1350_v54 = vmul.f32 %v3878_v2, %v5722_v15 }
 0x1d9   :  { %v1366_v55 = vadd.f32 %v1364_v6, %v1351_v48  ;;  %v4426_v6 = vld [vmem:[%s6936_s1 + $0x2a0] sm:$0xff]  }
 0x1da   :  { %1759 = vrot.lane.b32.xlu0 %v5668_v58, %s4564_s16  ;;  %v5739_v30 = vpop.permute.xlu2 %1420  ;;  %v1352_v57 = vadd.f32 %v1350_v54, %v1337_v56  ;;  %v3917_v29 = vunpack.c.l.bf16 %v4426_v6 }
 0x1db   :  { %v1425_v18 = vmul.f32 %v3898_v42, %v5739_v30  ;;  %v4427_v30 = vld [vmem:[%s6936_s1 + $0x2c8] sm:$0xff]  }
 0x1dc   :  { %v5737_v1 = vpop.permute.xlu0 %1360 }
 0x1dd   :  { %1772 = vrot.lane.b32.xlu1 %v5665_v21, %s4564_s16  ;;  %v1365_v52 = vmul.f32 %v3882_v20, %v5737_v1  ;;  %v3906_v20 = vunpack.c.h.bf16 %v4423_v60 }
 0x1df   :  { %v5745_v63 = vpop.permute.xlu1 %1373  ;;  %v1367_v1 = vadd.f32 %v1365_v52, %v1352_v57  ;;  %v3921_v57 = vunpack.c.l.bf16 %v4427_v30 }
 0x1e0   :  { %1774 = vrot.lane.b32.xlu2 %v5673_v23, %s4564_s16  ;;  %v1379_v27 = vmul.f32 %v3885_v0, %v5745_v63  ;;  %v4422_v63 = vld [vmem:[%s6936_s1 + $0x2c0] sm:$0xff]   ;;  %v3909_v0 = vunpack.c.l.bf16 %v4424_v53 }
 0x1e1   :  { %v3901_v46 = vunpack.c.l.bf16 %v4422_v63  ;;  %v3902_v2 = vunpack.c.h.bf16 %v4422_v63 }
 0x1e2   :  { %1787 = vrot.lane.b32.xlu0 %v5603_v7, %s4565_s17  ;;  %v5764_v37 = vpop.permute.xlu2 %1448  ;;  %v1381_v28 = vadd.f32 %v1379_v27, %v1366_v55  ;;  %v3910_v27 = vunpack.c.h.bf16 %v4424_v53 }
 0x1e4   :  { %v5762_v16 = vpop.permute.xlu0 %1388 }
 0x1e5   :  { %1789 = vrot.lane.b32.xlu1 %v5596_v59, %s4565_s17  ;;  %v1394_v15 = vmul.f32 %v3889_v11, %v5762_v16  ;;  %v1409_v16 = vmul.f32 %v3893_v50, %v5717_v14  ;;  %v1382_v14 = vadd.f32 %v1380_v43, %v1367_v1 }
 0x1e7   :  { %v5770_v8 = vpop.permute.xlu1 %1390  ;;  %v1396_v3 = vadd.f32 %v1394_v15, %v1381_v28  ;;  %v3918_v28 = vunpack.c.h.bf16 %v4426_v6 }
 0x1e8   :  { %1802 = vrot.lane.b32.xlu2 %v5618_v9, %s4565_s17  ;;  %v1395_v49 = vmul.f32 %v3890_v61, %v5770_v8  ;;  %v4425_v8 = vld [vmem:[%s6936_s1 + $0x278] sm:$0xff]   ;;  %v4428_v61 = vld [vmem:[%s6936_s1 + $0x2f0] sm:$0xff]  }
 0x1e9   :  { %v1411_v24 = vadd.f32 %v1409_v16, %v1396_v3  ;;  %v3914_v63 = vunpack.c.h.bf16 %v4425_v8  ;;  %v3925_v60 = vunpack.c.l.bf16 %v4428_v61 }
 0x1ea   :  { %1804 = vrot.lane.b32.xlu0 %v5623_v44, %s4565_s17  ;;  %v5791_v40 = vpop.permute.xlu2 %1465  ;;  %v1397_v19 = vadd.f32 %v1395_v49, %v1382_v14  ;;  %v3926_v14 = vunpack.c.h.bf16 %v4428_v61 }
 0x1eb   :  { %v1470_v43 = vmul.f32 %v3910_v27, %v5791_v40  ;;  %v5891_v40 = vld [vmem:[%s6935_s0 + $0x80] sm:$0xff] }
 0x1ec   :  { %v5789_v38 = vpop.permute.xlu0 %1405 }
 0x1ed   :  { %1817 = vrot.lane.b32.xlu1 %v5645_v26, %s4565_s17  ;;  %v1410_v4 = vmul.f32 %v3894_v51, %v5789_v38  ;;  %v1454_v38 = vmul.f32 %v3905_v17, %v5764_v37  ;;  %v3922_v17 = vunpack.c.h.bf16 %v4427_v30 }
 0x1ef   :  { %v1419_v25 = vpop.permute.xlu1 %1418  ;;  %v1412_v10 = vadd.f32 %v1410_v4, %v1397_v19 }
 0x1f0   :  { %1819 = vrot.lane.b32.xlu2 %v5642_v13, %s4565_s17  ;;  %v1424_v5 = vmul.f32 %v3897_v35, %v1419_v25 }
 0x1f1   :  { %v1427_v37 = vadd.f32 %v1425_v18, %v1412_v10 }
 0x1f2   :  { %1832 = vrot.lane.b32.xlu0 %v5650_v33, %s4565_s17  ;;  %v5814_v47 = vpop.permute.xlu2 %1493  ;;  %v1426_v12 = vadd.f32 %v1424_v5, %v1411_v24 }
 0x1f3   :  { %v1499_v1 = vmul.f32 %v3917_v29, %v5814_v47  ;;  %v5896_v47 = vld [vmem:[%s6935_s0 + $0x78] sm:$0xff] }
 0x1f4   :  { %v1434_v34 = vpop.permute.xlu0 %1433  ;;  %v1957_v19 = vrot.slane %v5896_v47, 1 }
 0x1f5   :  { %1834 = vrot.lane.b32.xlu1 %v5668_v58, %s4565_s17  ;;  %v1439_v31 = vmul.f32 %v3901_v46, %v1434_v34  ;;  %v3913_v34 = vunpack.c.l.bf16 %v4425_v8 }
 0x1f7   :  { %v1436_v41 = vpop.permute.xlu1 %1435  ;;  %v1441_v48 = vadd.f32 %v1439_v31, %v1426_v12  ;;  %v1958_v12 = vrot.slane %v5891_v40, 1 }
 0x1f8   :  { %1847 = vrot.lane.b32.xlu2 %v5665_v21, %s4565_s17  ;;  %v1440_v32 = vmul.f32 %v3902_v2, %v1436_v41 }
 0x1f9   :  { %v1456_v50 = vadd.f32 %v1454_v38, %v1441_v48 }
 0x1fa   :  { %1849 = vrot.lane.b32.xlu0 %v5673_v23, %s4565_s17  ;;  %v5837_v36 = vpop.permute.xlu2 %1510  ;;  %v1442_v41 = vadd.f32 %v1440_v32, %v1427_v37 }
 0x1fc   :  { %v1451_v45 = vpop.permute.xlu0 %1450 }
 0x1fd   :  { %1862 = vrot.lane.b32.xlu1 %v5603_v7, %s4566_s18  ;;  %v1455_v62 = vmul.f32 %v3906_v20, %v1451_v45  ;;  %v4429_v45 = vld [vmem:[%s6936_s1 + $0x318] sm:$0xff]  }
 0x1fe   :  { %v3930_v38 = vunpack.c.h.bf16 %v4429_v45 }
 0x1ff   :  { %v1464_v39 = vpop.permute.xlu1 %1463  ;;  %v1457_v35 = vadd.f32 %v1455_v62, %v1442_v41 }
 0x200   :  { %1864 = vrot.lane.b32.xlu2 %v5596_v59, %s4566_s18  ;;  %v1469_v54 = vmul.f32 %v3909_v0, %v1464_v39  ;;  %v3929_v39 = vunpack.c.l.bf16 %v4429_v45  ;;  %v1515_v0 = vmul.f32 %v3922_v17, %v5837_v36  ;;  %v1973_v36 = vrot.slane %v5896_v47, 2 }
 0x201   :  { %v1472_v49 = vadd.f32 %v1470_v43, %v1457_v35  ;;  %v2005_v45 = vrot.slane %v5896_v47, 4  ;;  %v2006_v35 = vrot.slane %v5891_v40, 4 }
 0x202   :  { %1877 = vrot.lane.b32.xlu0 %v5618_v9, %s4566_s18  ;;  %v1539_v22 = vpop.permute.xlu2 %1538  ;;  %v1471_v15 = vadd.f32 %v1469_v54, %v1456_v50 }
 0x204   :  { %v1479_v25 = vpop.permute.xlu0 %1478 }
 0x205   :  { %1879 = vrot.lane.b32.xlu1 %v5623_v44, %s4566_s18  ;;  %v1484_v56 = vmul.f32 %v3913_v34, %v1479_v25  ;;  %v1544_v25 = vmul.f32 %v3929_v39, %v1539_v22  ;;  %v5908_v34 = vsel %vm33_vm0, %v1957_v19, %v1958_v12  ;;  %v3374_v22 = vld [vmem:[%s6935_s0 + $0x88] sm:$0xf] }
 0x206   :  { %v1960_v32 = vrot.slane %v3374_v22, 1  ;;  %v1976_v37 = vrot.slane %v3374_v22, 2 }
 0x207   :  { %v1481_v11 = vpop.permute.xlu1 %1480  ;;  %v1486_v51 = vadd.f32 %v1484_v56, %v1471_v15  ;;  %v1990_v15 = vrot.slane %v5891_v40, 3 }
 0x208   :  { %1892 = vrot.lane.b32.xlu2 %v5645_v26, %s4566_s18  ;;  %v1485_v16 = vmul.f32 %v3914_v63, %v1481_v11  ;;  %v1974_v11 = vrot.slane %v5891_v40, 2  ;;  %v1992_v63 = vrot.slane %v3374_v22, 3 }
 0x209   :  { %v1501_v5 = vadd.f32 %v1499_v1, %v1486_v51 }
 0x20a   :  { %1894 = vrot.lane.b32.xlu0 %v5642_v13, %s4566_s18  ;;  %v5872_v52 = vpop.permute.xlu2 %1639  ;;  %v1487_v4 = vadd.f32 %v1485_v16, %v1472_v49  ;;  %v5925_v56 = vsel %vm50_vm1, %v1973_v36, %v1974_v11  ;;  %v5934_v41 = vsel %vm50_vm1, %v1974_v11, %v1976_v37  ;;  %v5951_v51 = vsel %vm67_vm2, %v1990_v15, %v1992_v63 }
 0x20b   :  { %v2008_v16 = vrot.slane %v3374_v22, 4 }
 0x20c   :  { %v1496_v55 = vpop.permute.xlu0 %1495 }
 0x20d   :  { %1907 = vrot.lane.b32.xlu1 %v5650_v33, %s4566_s18  ;;  %v1500_v42 = vmul.f32 %v3918_v28, %v1496_v55  ;;  %v5928_v55 = vsel %vm33_vm0, %v1958_v12, %v1960_v32  ;;  %v5972_v49 = vsel %vm84_vm3, %v2006_v35, %v2008_v16 }
 0x20f   :  { %v1509_v3 = vpop.permute.xlu1 %1508  ;;  %v1502_v2 = vadd.f32 %v1500_v42, %v1487_v4 }
 0x210   :  { %v1514_v46 = vmul.f32 %v3921_v57, %v1509_v3  ;;  %1909 = vrot.lane.b32.xlu2 %v5668_v58, %s4566_s18  ;;  %v1989_v57 = vrot.slane %v5896_v47, 3  ;;  %v5959_v3 = vsel %vm84_vm3, %v2005_v45, %v2006_v35  ;;  %v4435_v45 = vld [vmem:[%s6936_s1 + $0x328] sm:$0xff]  }
 0x211   :  { %v1517_v6 = vadd.f32 %v1515_v0, %v1502_v2  ;;  %v4432_v2 = vld [vmem:[%s6936_s1 + $0x370] sm:$0xff]  }
 0x212   :  { %1922 = vrot.lane.b32.xlu0 %v5665_v21, %s4566_s18  ;;  %v5898_v24 = vpop.permute.xlu2 %1667  ;;  %v1516_v31 = vadd.f32 %v1514_v46, %v1501_v5  ;;  %v5954_v1 = vsel %vm67_vm2, %v1989_v57, %v1990_v15  ;;  %v3942_v22 = vunpack.c.h.bf16 %v4432_v2 }
 0x214   :  { %v1524_v53 = vpop.permute.xlu0 %1523  ;;  %v1597_v32 = vmul.f32 %v3942_v22, %v5642_v13  ;;  %v4436_v13 = vld [vmem:[%s6936_s1 + $0x350] sm:$0xff]  }
 0x215   :  { %v1529_v8 = vmul.f32 %v3925_v60, %v1524_v53  ;;  %1924 = vrot.lane.b32.xlu1 %v5673_v23, %s4566_s18  ;;  %v4431_v53 = vld [vmem:[%s6936_s1 + $0x348] sm:$0xff]  }
 0x216   :  { %v3938_v19 = vunpack.c.h.bf16 %v4431_v53 }
 0x217   :  { %v1531_v18 = vadd.f32 %v1529_v8, %v1516_v31  ;;  %v1526_v20 = vpop.permute.xlu1 %1525  ;;  %v3937_v8 = vunpack.c.l.bf16 %v4431_v53  ;;  %v3953_v53 = vunpack.c.l.bf16 %v4435_v45 }
 0x218   :  { %v1530_v48 = vmul.f32 %v3926_v14, %v1526_v20  ;;  %2021 = vrot.lane.b32.xlu2 %v5896_v47, %s4563_s13  ;;  %v4430_v14 = vld [vmem:[%s6936_s1 + $0x320] sm:$0xff]  }
 0x219   :  { %v1546_v10 = vadd.f32 %v1544_v25, %v1531_v18  ;;  %v3933_v25 = vunpack.c.l.bf16 %v4430_v14  ;;  %v3934_v12 = vunpack.c.h.bf16 %v4430_v14  ;;  %v1580_v18 = vmul.f32 %v3937_v8, %v5618_v9 }
 0x21a   :  { %2023 = vrot.lane.b32.xlu0 %v5891_v40, %s4563_s13  ;;  %v5918_v27 = vpop.permute.xlu2 %1684  ;;  %v1532_v29 = vadd.f32 %v1530_v48, %v1517_v6  ;;  %v1581_v48 = vmul.f32 %v3938_v19, %v5623_v44  ;;  %v4433_v6 = vld [vmem:[%s6936_s1 + $0x398] sm:$0xff]   ;;  %v3957_v19 = vunpack.c.l.bf16 %v4436_v13 }
 0x21b   :  { %1549 = vst.msk [vmem:[#allocation2 + $0x30] sm:$0xff] %vm396_vm4, %v1546_v10  ;;  %v1561_v20 = vmul.f32 %v3933_v25, %v5603_v7  ;;  %v3941_v10 = vunpack.c.l.bf16 %v4432_v2  ;;  %v3945_v11 = vunpack.c.l.bf16 %v4433_v6  ;;  %v3954_v25 = vunpack.c.h.bf16 %v4435_v45  ;;  %v4437_v2 = vld [vmem:[%s6936_s1 + $0x378] sm:$0xff]  }
 0x21c   :  { %v1541_v54 = vpop.permute.xlu0 %1540  ;;  %v3961_v22 = vunpack.c.l.bf16 %v4437_v2 }
 0x21d   :  { %v1545_v30 = vmul.f32 %v3930_v38, %v1541_v54  ;;  %2036 = vrot.lane.b32.xlu1 %v5908_v34, %s4563_s13  ;;  %v1562_v38 = vmul.f32 %v3934_v12, %v5596_v59  ;;  %v1582_v7 = vadd.f32 %v1580_v18, %v1561_v20  ;;  %v1596_v44 = vmul.f32 %v3941_v10, %v5645_v26 }
 0x21e   :  { %v3946_v54 = vunpack.c.h.bf16 %v4433_v6  ;;  %v3962_v6 = vunpack.c.h.bf16 %v4437_v2 }
 0x21f   :  { %v1547_v50 = vadd.f32 %v1545_v30, %v1532_v29  ;;  %v5922_v62 = vpop.permute.xlu1 %1637  ;;  %v1583_v59 = vadd.f32 %v1581_v48, %v1562_v38  ;;  %v4434_v29 = vld [vmem:[%s6936_s1 + $0x3c0] sm:$0xff]   ;;  %v1598_v37 = vadd.f32 %v1596_v44, %v1582_v7  ;;  %v3958_v48 = vunpack.c.h.bf16 %v4436_v13 }
 0x220   :  { %2038 = vrot.lane.b32.xlu2 %v5928_v55, %s4563_s13  ;;  %v3949_v15 = vunpack.c.l.bf16 %v4434_v29  ;;  %v1613_v26 = vmul.f32 %v3946_v54, %v5668_v58  ;;  %v3950_v57 = vunpack.c.h.bf16 %v4434_v29  ;;  %v1643_v20 = vmul.f32 %v3953_v53, %v5922_v62  ;;  %v4438_v38 = vld [vmem:[%s6936_s1 + $0x3a0] sm:$0xff]   ;;  %v4439_v62 = vld [vmem:[%s6936_s1 + $0x3c8] sm:$0xff]  }
 0x221   :  { %1550 = vst.msk [vmem:[#allocation2 + $0x38] sm:$0xff] %vm396_vm4, %v1547_v50  ;;  %v1612_v50 = vmul.f32 %v3945_v11, %v5650_v33  ;;  %v1599_v63 = vadd.f32 %v1597_v32, %v1583_v59  ;;  %v3965_v11 = vunpack.c.l.bf16 %v4438_v38  ;;  %v3969_v29 = vunpack.c.l.bf16 %v4439_v62  ;;  %v4442_v53 = vld [vmem:[%s6936_s1 + $0x380] sm:$0xff]  }
 0x222   :  { %2051 = vrot.lane.b32.xlu0 %v5925_v56, %s4563_s13  ;;  %v5942_v61 = vpop.permute.xlu2 %1712  ;;  %v1628_v16 = vmul.f32 %v3949_v15, %v5665_v21  ;;  %v1629_v8 = vmul.f32 %v3950_v57, %v5673_v23  ;;  %v1644_v21 = vmul.f32 %v3954_v25, %v5872_v52  ;;  %v3966_v15 = vunpack.c.h.bf16 %v4438_v38  ;;  %v4443_v38 = vld [vmem:[%s6936_s1 + $0x3a8] sm:$0xff]  }
 0x223   :  { %v1614_v58 = vadd.f32 %v1612_v50, %v1598_v37  ;;  %v1615_v14 = vadd.f32 %v1613_v26, %v1599_v63  ;;  %v4440_v63 = vld [vmem:[%s6936_s1 + $0x330] sm:$0xff]   ;;  %v3970_v45 = vunpack.c.h.bf16 %v4439_v62  ;;  %v3985_v62 = vunpack.c.l.bf16 %v4443_v38 }
 0x224   :  { %v5940_v28 = vpop.permute.xlu0 %1652  ;;  %v3973_v13 = vunpack.c.l.bf16 %v4440_v63 }
 0x225   :  { %2053 = vrot.lane.b32.xlu1 %v5934_v41, %s4563_s13  ;;  %v1630_v18 = vadd.f32 %v1628_v16, %v1614_v58  ;;  %v1631_v10 = vadd.f32 %v1629_v8, %v1615_v14  ;;  %v1658_v23 = vmul.f32 %v3957_v19, %v5940_v28  ;;  %v1673_v28 = vmul.f32 %v3961_v22, %v5898_v24 }
 0x226   :  { %v1689_v16 = vmul.f32 %v3966_v15, %v5918_v27  ;;  %v3981_v27 = vunpack.c.l.bf16 %v4442_v53 }
 0x227   :  { %v5948_v43 = vpop.permute.xlu1 %1654  ;;  %v1645_v44 = vadd.f32 %v1643_v20, %v1630_v18  ;;  %v1646_v59 = vadd.f32 %v1644_v21, %v1631_v10  ;;  %v1718_v18 = vmul.f32 %v3973_v13, %v5942_v61 }
 0x228   :  { %2066 = vrot.lane.b32.xlu2 %v5954_v1, %s4563_s13  ;;  %v1659_v32 = vmul.f32 %v3958_v48, %v5948_v43  ;;  %v4441_v43 = vld [vmem:[%s6936_s1 + $0x358] sm:$0xff]  }
 0x229   :  { %v1660_v54 = vadd.f32 %v1658_v23, %v1645_v44  ;;  %v3977_v19 = vunpack.c.l.bf16 %v4441_v43  ;;  %v3978_v48 = vunpack.c.h.bf16 %v4441_v43  ;;  %v4446_v43 = vld [vmem:[%s6936_s1 + $0x360] sm:$0xff]  }
 0x22a   :  { %2068 = vrot.lane.b32.xlu0 %v5951_v51, %s4563_s13  ;;  %v5965_v60 = vpop.permute.xlu2 %1729  ;;  %v1661_v57 = vadd.f32 %v1659_v32, %v1646_v59  ;;  %v4445_v59 = vld [vmem:[%s6936_s1 + $0x338] sm:$0xff]  }
 0x22b   :  { %v1675_v24 = vadd.f32 %v1673_v28, %v1660_v54  ;;  %v3994_v13 = vunpack.c.h.bf16 %v4445_v59 }
 0x22c   :  { %v5963_v46 = vpop.permute.xlu0 %1669 }
 0x22d   :  { %2081 = vrot.lane.b32.xlu1 %v5959_v3, %s4563_s13  ;;  %v1674_v50 = vmul.f32 %v3962_v6, %v5963_v46  ;;  %v3982_v6 = vunpack.c.h.bf16 %v4442_v53  ;;  %v4448_v53 = vld [vmem:[%s6936_s1 + $0x3b0] sm:$0xff]  }
 0x22f   :  { %v5969_v39 = vpop.permute.xlu1 %1682  ;;  %v1676_v58 = vadd.f32 %v1674_v50, %v1661_v57 }
 0x230   :  { %2083 = vrot.lane.b32.xlu2 %v5972_v49, %s4563_s13  ;;  %v1688_v26 = vmul.f32 %v3965_v11, %v5969_v39  ;;  %v3974_v39 = vunpack.c.h.bf16 %v4440_v63  ;;  %v1734_v11 = vmul.f32 %v3978_v48, %v5965_v60  ;;  %v3993_v63 = vunpack.c.l.bf16 %v4445_v59 }
 0x231   :  { %v1691_v10 = vadd.f32 %v1689_v16, %v1676_v58  ;;  %v3997_v58 = vunpack.c.l.bf16 %v4446_v43 }
 0x232   :  { %2096 = vrot.lane.b32.xlu0 %v5896_v47, %s4564_s16  ;;  %v5980_v42 = vpop.permute.xlu2 %1757  ;;  %v1690_v25 = vadd.f32 %v1688_v26, %v1675_v24 }
 0x233   :  { %v1763_v15 = vmul.f32 %v3985_v62, %v5980_v42 }
 0x234   :  { %v5978_v5 = vpop.permute.xlu0 %1697 }
 0x235   :  { %2098 = vrot.lane.b32.xlu1 %v5891_v40, %s4564_s16  ;;  %v1703_v46 = vmul.f32 %v3969_v29, %v5978_v5 }
 0x237   :  { %v5984_v17 = vpop.permute.xlu1 %1699  ;;  %v1705_v2 = vadd.f32 %v1703_v46, %v1690_v25 }
 0x238   :  { %2111 = vrot.lane.b32.xlu2 %v5908_v34, %s4564_s16  ;;  %v1704_v5 = vmul.f32 %v3970_v45, %v5984_v17  ;;  %v4444_v17 = vld [vmem:[%s6936_s1 + $0x3d0] sm:$0xff]  }
 0x239   :  { %v1720_v61 = vadd.f32 %v1718_v18, %v1705_v2  ;;  %v3989_v29 = vunpack.c.l.bf16 %v4444_v17  ;;  %v3990_v45 = vunpack.c.h.bf16 %v4444_v17  ;;  %v4006_v17 = vunpack.c.h.bf16 %v4448_v53 }
 0x23a   :  { %2113 = vrot.lane.b32.xlu0 %v5928_v55, %s4564_s16  ;;  %v5998_v31 = vpop.permute.xlu2 %1774  ;;  %v1706_v22 = vadd.f32 %v1704_v5, %v1691_v10  ;;  %v4005_v10 = vunpack.c.l.bf16 %v4448_v53 }
 0x23c   :  { %v5996_v4 = vpop.permute.xlu0 %1714 }
 0x23d   :  { %2126 = vrot.lane.b32.xlu1 %v5925_v56, %s4564_s16  ;;  %v1719_v21 = vmul.f32 %v3974_v39, %v5996_v4  ;;  %v1779_v39 = vmul.f32 %v3990_v45, %v5998_v31 }
 0x23f   :  { %v6005_v0 = vpop.permute.xlu1 %1727  ;;  %v1721_v44 = vadd.f32 %v1719_v21, %v1706_v22 }
 0x240   :  { %2128 = vrot.lane.b32.xlu2 %v5934_v41, %s4564_s16  ;;  %v1733_v23 = vmul.f32 %v3977_v19, %v6005_v0  ;;  %v3986_v0 = vunpack.c.h.bf16 %v4443_v38 }
 0x241   :  { %v1736_v26 = vadd.f32 %v1734_v11, %v1721_v44 }
 0x242   :  { %2141 = vrot.lane.b32.xlu0 %v5954_v1, %s4564_s16  ;;  %v6020_v9 = vpop.permute.xlu2 %1802  ;;  %v1735_v28 = vadd.f32 %v1733_v23, %v1720_v61  ;;  %v4449_v23 = vld [vmem:[%s6936_s1 + $0x3d8] sm:$0xff]  }
 0x243   :  { %v4009_v61 = vunpack.c.l.bf16 %v4449_v23  ;;  %v4010_v44 = vunpack.c.h.bf16 %v4449_v23 }
 0x244   :  { %v6018_v36 = vpop.permute.xlu0 %1742 }
 0x245   :  { %2143 = vrot.lane.b32.xlu1 %v5951_v51, %s4564_s16  ;;  %v1748_v4 = vmul.f32 %v3981_v27, %v6018_v36  ;;  %v1808_v27 = vmul.f32 %v3997_v58, %v6020_v9 }
 0x247   :  { %v6029_v30 = vpop.permute.xlu1 %1744  ;;  %v1750_v36 = vadd.f32 %v1748_v4, %v1735_v28 }
 0x248   :  { %2156 = vrot.lane.b32.xlu2 %v5959_v3, %s4564_s16  ;;  %v1749_v50 = vmul.f32 %v3982_v6, %v6029_v30  ;;  %v4447_v30 = vld [vmem:[%s6936_s1 + $0x388] sm:$0xff]  }
 0x249   :  { %v1765_v42 = vadd.f32 %v1763_v15, %v1750_v36  ;;  %v4001_v2 = vunpack.c.l.bf16 %v4447_v30  ;;  %v4002_v38 = vunpack.c.h.bf16 %v4447_v30 }
 0x24a   :  { %2158 = vrot.lane.b32.xlu0 %v5972_v49, %s4564_s16  ;;  %v6045_v35 = vpop.permute.xlu2 %1819  ;;  %v1751_v46 = vadd.f32 %v1749_v50, %v1736_v26 }
 0x24b   :  { %v1824_v62 = vmul.f32 %v4002_v38, %v6045_v35 }
 0x24c   :  { %v6043_v33 = vpop.permute.xlu0 %1759 }
 0x24d   :  { %2171 = vrot.lane.b32.xlu1 %v5896_v47, %s4565_s17  ;;  %v1764_v57 = vmul.f32 %v3986_v0, %v6043_v33 }
 0x24f   :  { %v6051_v12 = vpop.permute.xlu1 %1772  ;;  %v1766_v16 = vadd.f32 %v1764_v57, %v1751_v46  ;;  %v4452_v57 = vld [vmem:[%s6936_s1 + $0x390] sm:$0xff]  }
 0x250   :  { %2173 = vrot.lane.b32.xlu2 %v5891_v40, %s4565_s17  ;;  %v1778_v24 = vmul.f32 %v3989_v29, %v6051_v12  ;;  %v3998_v12 = vunpack.c.h.bf16 %v4446_v43 }
 0x251   :  { %v1781_v21 = vadd.f32 %v1779_v39, %v1766_v16 }
 0x252   :  { %2186 = vrot.lane.b32.xlu0 %v5908_v34, %s4565_s17  ;;  %v6071_v7 = vpop.permute.xlu2 %1847  ;;  %v1780_v5 = vadd.f32 %v1778_v24, %v1765_v42 }
 0x254   :  { %v6069_v52 = vpop.permute.xlu0 %1787 }
 0x255   :  { %2188 = vrot.lane.b32.xlu1 %v5928_v55, %s4565_s17  ;;  %v1793_v33 = vmul.f32 %v3993_v63, %v6069_v52 }
 0x257   :  { %v6077_v37 = vpop.permute.xlu1 %1789  ;;  %v1795_v52 = vadd.f32 %v1793_v33, %v1780_v5  ;;  %v4022_v33 = vunpack.c.h.bf16 %v4452_v57 }
 0x258   :  { %2201 = vrot.lane.b32.xlu2 %v5925_v56, %s4565_s17  ;;  %v1794_v18 = vmul.f32 %v3994_v13, %v6077_v37  ;;  %v4450_v37 = vld [vmem:[%s6936_s1 + $0x340] sm:$0xff]   ;;  %v4021_v13 = vunpack.c.l.bf16 %v4452_v57 }
 0x259   :  { %v1810_v9 = vadd.f32 %v1808_v27, %v1795_v52  ;;  %v4013_v28 = vunpack.c.l.bf16 %v4450_v37  ;;  %v4014_v26 = vunpack.c.h.bf16 %v4450_v37 }
 0x25a   :  { %2203 = vrot.lane.b32.xlu0 %v5934_v41, %s4565_s17  ;;  %v6098_v8 = vpop.permute.xlu2 %1864  ;;  %v1796_v6 = vadd.f32 %v1794_v18, %v1781_v21 }
 0x25b   :  { %v1869_v42 = vmul.f32 %v4014_v26, %v6098_v8  ;;  %v6192_v8 = vld [vmem:[%s6935_s0 + $0x90] sm:$0xff] }
 0x25c   :  { %v6096_v14 = vpop.permute.xlu0 %1804 }
 0x25d   :  { %2216 = vrot.lane.b32.xlu1 %v5954_v1, %s4565_s17  ;;  %v1809_v48 = vmul.f32 %v3998_v12, %v6096_v14 }
 0x25f   :  { %v1818_v20 = vpop.permute.xlu1 %1817  ;;  %v1811_v4 = vadd.f32 %v1809_v48, %v1796_v6 }
 0x260   :  { %2218 = vrot.lane.b32.xlu2 %v5951_v51, %s4565_s17  ;;  %v1823_v22 = vmul.f32 %v4001_v2, %v1818_v20  ;;  %v4451_v20 = vld [vmem:[%s6936_s1 + $0x368] sm:$0xff]  }
 0x261   :  { %v4017_v36 = vunpack.c.l.bf16 %v4451_v20  ;;  %v1826_v35 = vadd.f32 %v1824_v62, %v1811_v4  ;;  %v4018_v24 = vunpack.c.h.bf16 %v4451_v20  ;;  %v2357_v20 = vrot.slane %v6192_v8, 2 }
 0x262   :  { %2231 = vrot.lane.b32.xlu0 %v5959_v3, %s4565_s17  ;;  %v6121_v54 = vpop.permute.xlu2 %1892  ;;  %v1825_v59 = vadd.f32 %v1823_v22, %v1810_v9 }
 0x263   :  { %v1898_v2 = vmul.f32 %v4021_v13, %v6121_v54  ;;  %v6202_v54 = vld [vmem:[%s6935_s0 + $0x98] sm:$0xff] }
 0x264   :  { %v1833_v32 = vpop.permute.xlu0 %1832  ;;  %v2342_v22 = vrot.slane %v6202_v54, 1  ;;  %v2390_v13 = vrot.slane %v6202_v54, 4 }
 0x265   :  { %2233 = vrot.lane.b32.xlu1 %v5972_v49, %s4565_s17  ;;  %v1838_v14 = vmul.f32 %v4005_v10, %v1833_v32  ;;  %v1853_v32 = vmul.f32 %v4009_v61, %v6071_v7 }
 0x267   :  { %v1835_v60 = vpop.permute.xlu1 %1834  ;;  %v1840_v50 = vadd.f32 %v1838_v14, %v1825_v59 }
 0x268   :  { %2246 = vrot.lane.b32.xlu2 %v5896_v47, %s4566_s18  ;;  %v1839_v29 = vmul.f32 %v4006_v17, %v1835_v60  ;;  %v4453_v60 = vld [vmem:[%s6936_s1 + $0x3b8] sm:$0xff]   ;;  %v2341_v17 = vrot.slane %v6192_v8, 1 }
 0x269   :  { %v1855_v7 = vadd.f32 %v1853_v32, %v1840_v50  ;;  %v4025_v12 = vunpack.c.l.bf16 %v4453_v60  ;;  %v4026_v10 = vunpack.c.h.bf16 %v4453_v60 }
 0x26a   :  { %2248 = vrot.lane.b32.xlu0 %v5891_v40, %s4566_s18  ;;  %v6144_v19 = vpop.permute.xlu2 %1909  ;;  %v1841_v43 = vadd.f32 %v1839_v29, %v1826_v35  ;;  %v2373_v35 = vrot.slane %v6192_v8, 3 }
 0x26b   :  { %v1914_v9 = vmul.f32 %v4026_v10, %v6144_v19  ;;  %v6219_v19 = vsel %vm33_vm0, %v2341_v17, %v2342_v22 }
 0x26c   :  { %v1850_v25 = vpop.permute.xlu0 %1849 }
 0x26d   :  { %2261 = vrot.lane.b32.xlu1 %v5908_v34, %s4566_s18  ;;  %v1854_v63 = vmul.f32 %v4010_v44, %v1850_v25  ;;  %v4454_v25 = vld [vmem:[%s6936_s1 + $0x3e0] sm:$0xff]  }
 0x26e   :  { %v4029_v48 = vunpack.c.l.bf16 %v4454_v25  ;;  %v4030_v61 = vunpack.c.h.bf16 %v4454_v25 }
 0x26f   :  { %v1863_v31 = vpop.permute.xlu1 %1862  ;;  %v1856_v30 = vadd.f32 %v1854_v63, %v1841_v43  ;;  %v2374_v63 = vrot.slane %v6202_v54, 3 }
 0x270   :  { %2263 = vrot.lane.b32.xlu2 %v5928_v55, %s4566_s18  ;;  %v1868_v45 = vmul.f32 %v4013_v28, %v1863_v31  ;;  %v3427_v31 = vld [vmem:[%s6935_s0 + $0xa0] sm:$0xf] }
 0x271   :  { %v1871_v52 = vadd.f32 %v1869_v42, %v1856_v30  ;;  %v2344_v6 = vrot.slane %v3427_v31, 1  ;;  %v2360_v26 = vrot.slane %v3427_v31, 2  ;;  %v2376_v43 = vrot.slane %v3427_v31, 3 }
 0x272   :  { %2276 = vrot.lane.b32.xlu0 %v5925_v56, %s4566_s18  ;;  %v6165_v0 = vpop.permute.xlu2 %2021  ;;  %v1870_v39 = vadd.f32 %v1868_v45, %v1855_v7  ;;  %v6241_v60 = vsel %vm67_vm2, %v2373_v35, %v2374_v63  ;;  %v2392_v30 = vrot.slane %v3427_v31, 4  ;;  %v2389_v42 = vrot.slane %v6192_v8, 4 }
 0x273   :  { %v6216_v29 = vsel %vm33_vm0, %v2342_v22, %v2344_v6 }
 0x274   :  { %v1878_v11 = vpop.permute.xlu0 %1877 }
 0x275   :  { %2278 = vrot.lane.b32.xlu1 %v5934_v41, %s4566_s18  ;;  %v1883_v46 = vmul.f32 %v4017_v36, %v1878_v11  ;;  %v2358_v11 = vrot.slane %v6202_v54, 2 }
 0x277   :  { %v1880_v15 = vpop.permute.xlu1 %1879  ;;  %v1885_v5 = vadd.f32 %v1883_v46, %v1870_v39  ;;  %v6244_v7 = vsel %vm50_vm1, %v2358_v11, %v2360_v26  ;;  %v6249_v46 = vsel %vm67_vm2, %v2374_v63, %v2376_v43 }
 0x278   :  { %2291 = vrot.lane.b32.xlu2 %v5954_v1, %s4566_s18  ;;  %v1884_v53 = vmul.f32 %v4018_v24, %v1880_v15  ;;  %v6225_v15 = vsel %vm50_vm1, %v2357_v20, %v2358_v11 }
 0x279   :  { %v1900_v23 = vadd.f32 %v1898_v2, %v1885_v5 }
 0x27a   :  { %2293 = vrot.lane.b32.xlu0 %v5951_v51, %s4566_s18  ;;  %v6181_v16 = vpop.permute.xlu2 %2038  ;;  %v1886_v38 = vadd.f32 %v1884_v53, %v1871_v52  ;;  %v6267_v53 = vsel %vm84_vm3, %v2389_v42, %v2390_v13  ;;  %v4455_v52 = vld [vmem:[%s6936_s1 + $0x3e8] sm:$0xff]  }
 0x27c   :  { %v1895_v58 = vpop.permute.xlu0 %1894 }
 0x27d   :  { %2306 = vrot.lane.b32.xlu1 %v5959_v3, %s4566_s18  ;;  %v1899_v27 = vmul.f32 %v4022_v33, %v1895_v58 }
 0x27f   :  { %v1908_v18 = vpop.permute.xlu1 %1907  ;;  %v1901_v37 = vadd.f32 %v1899_v27, %v1886_v38  ;;  %v4457_v38 = vld [vmem:[%s6936_s1 + $0x438] sm:$0xff]  }
 0x280   :  { %v1913_v21 = vmul.f32 %v4025_v12, %v1908_v18  ;;  %2308 = vrot.lane.b32.xlu2 %v5972_v49, %s4566_s18  ;;  %v6264_v12 = vsel %vm84_vm3, %v2390_v13, %v2392_v30  ;;  %v4456_v18 = vld [vmem:[%s6936_s1 + $0x410] sm:$0xff]  }
 0x281   :  { %v1916_v50 = vadd.f32 %v1914_v9, %v1901_v37  ;;  %v4037_v31 = vunpack.c.l.bf16 %v4456_v18  ;;  %v4041_v37 = vunpack.c.l.bf16 %v4457_v38 }
 0x282   :  { %2405 = vrot.lane.b32.xlu0 %v6192_v8, %s4563_s13  ;;  %v6209_v4 = vpop.permute.xlu2 %2066  ;;  %v1915_v62 = vadd.f32 %v1913_v21, %v1900_v23  ;;  %v4033_v21 = vunpack.c.l.bf16 %v4455_v52  ;;  %v4034_v23 = vunpack.c.h.bf16 %v4455_v52 }
 0x283   :  { %v1964_v6 = vmul.f32 %v4037_v31, %v5908_v34  ;;  %v1980_v20 = vmul.f32 %v4041_v37, %v5925_v56  ;;  %v4460_v56 = vld [vmem:[%s6936_s1 + $0x3f0] sm:$0xff]  }
 0x284   :  { %v1923_v14 = vpop.permute.xlu0 %1922  ;;  %v1945_v17 = vmul.f32 %v4033_v21, %v5896_v47  ;;  %v4053_v42 = vunpack.c.l.bf16 %v4460_v56  ;;  %v4054_v31 = vunpack.c.h.bf16 %v4460_v56 }
 0x285   :  { %v1928_v44 = vmul.f32 %v4029_v48, %v1923_v14  ;;  %2407 = vrot.lane.b32.xlu1 %v6202_v54, %s4563_s13  ;;  %v4038_v48 = vunpack.c.h.bf16 %v4456_v18  ;;  %v4458_v14 = vld [vmem:[%s6936_s1 + $0x460] sm:$0xff]  }
 0x286   :  { %v1966_v47 = vadd.f32 %v1964_v6, %v1945_v17  ;;  %v4045_v11 = vunpack.c.l.bf16 %v4458_v14 }
 0x287   :  { %v1930_v59 = vadd.f32 %v1928_v44, %v1915_v62  ;;  %v1925_v28 = vpop.permute.xlu1 %1924  ;;  %v1965_v9 = vmul.f32 %v4038_v48, %v5928_v55  ;;  %v4042_v62 = vunpack.c.h.bf16 %v4457_v38  ;;  %v4459_v55 = vld [vmem:[%s6936_s1 + $0x488] sm:$0xff]   ;;  %v4462_v48 = vld [vmem:[%s6936_s1 + $0x440] sm:$0xff]  }
 0x288   :  { %v1929_v32 = vmul.f32 %v4030_v61, %v1925_v28  ;;  %2420 = vrot.lane.b32.xlu2 %v6219_v19, %s4563_s13  ;;  %v1946_v61 = vmul.f32 %v4034_v23, %v5891_v40  ;;  %v4046_v40 = vunpack.c.h.bf16 %v4458_v14  ;;  %v4049_v35 = vunpack.c.l.bf16 %v4459_v55 }
 0x289   :  { %1933 = vst.msk [vmem:[#allocation2 + $0x40] sm:$0xff] %vm396_vm4, %v1930_v59  ;;  %v1981_v28 = vmul.f32 %v4042_v62, %v5934_v41  ;;  %v4050_v26 = vunpack.c.h.bf16 %v4459_v55  ;;  %v2027_v23 = vmul.f32 %v4053_v42, %v6165_v0  ;;  %v4061_v37 = vunpack.c.l.bf16 %v4462_v48  ;;  %v4463_v0 = vld [vmem:[%s6936_s1 + $0x468] sm:$0xff]   ;;  %v4464_v55 = vld [vmem:[%s6936_s1 + $0x490] sm:$0xff]   ;;  %v4466_v42 = vld [vmem:[%s6936_s1 + $0x420] sm:$0xff]  }
 0x28a   :  { %v1931_v36 = vadd.f32 %v1929_v32, %v1916_v50  ;;  %2422 = vrot.lane.b32.xlu0 %v6216_v29, %s4563_s13  ;;  %v6234_v45 = vpop.permute.xlu2 %2083  ;;  %v1967_v59 = vadd.f32 %v1965_v9, %v1946_v61  ;;  %v1982_v32 = vadd.f32 %v1980_v20, %v1966_v47  ;;  %v1997_v41 = vmul.f32 %v4046_v40, %v5951_v51  ;;  %v4461_v51 = vld [vmem:[%s6936_s1 + $0x418] sm:$0xff]  }
 0x28b   :  { %v2012_v30 = vmul.f32 %v4049_v35, %v5959_v3  ;;  %v2013_v52 = vmul.f32 %v4050_v26, %v5972_v49  ;;  %v4057_v6 = vunpack.c.l.bf16 %v4461_v51  ;;  %v4058_v17 = vunpack.c.h.bf16 %v4461_v51  ;;  %v4467_v51 = vld [vmem:[%s6936_s1 + $0x448] sm:$0xff]  }
 0x28c   :  { %1934 = vst.msk [vmem:[#allocation2 + $0x48] sm:$0xff] %vm396_vm4, %v1931_v36  ;;  %v6232_v57 = vpop.permute.xlu0 %2023  ;;  %v1996_v36 = vmul.f32 %v4045_v11, %v5954_v1  ;;  %v1983_v63 = vadd.f32 %v1981_v28, %v1967_v59  ;;  %v4062_v61 = vunpack.c.h.bf16 %v4462_v48  ;;  %v4066_v11 = vunpack.c.h.bf16 %v4463_v0 }
 0x28d   :  { %2435 = vrot.lane.b32.xlu1 %v6225_v15, %s4563_s13  ;;  %v2028_v49 = vmul.f32 %v4054_v31, %v6232_v57  ;;  %v2043_v57 = vmul.f32 %v4058_v17, %v6181_v16  ;;  %v4065_v40 = vunpack.c.l.bf16 %v4463_v0  ;;  %v4069_v35 = vunpack.c.l.bf16 %v4464_v55 }
 0x28e   :  { %v1998_v1 = vadd.f32 %v1996_v36, %v1982_v32  ;;  %v1999_v18 = vadd.f32 %v1997_v41, %v1983_v63  ;;  %v4465_v36 = vld [vmem:[%s6936_s1 + $0x3f8] sm:$0xff]   ;;  %v4070_v63 = vunpack.c.h.bf16 %v4464_v55  ;;  %v4081_v17 = vunpack.c.l.bf16 %v4467_v51 }
 0x28f   :  { %v6238_v24 = vpop.permute.xlu1 %2036  ;;  %v2072_v41 = vmul.f32 %v4065_v40, %v6209_v4  ;;  %v4078_v4 = vunpack.c.h.bf16 %v4466_v42  ;;  %v4082_v0 = vunpack.c.h.bf16 %v4467_v51 }
 0x290   :  { %2437 = vrot.lane.b32.xlu2 %v6244_v7, %s4563_s13  ;;  %v2014_v38 = vadd.f32 %v2012_v30, %v1998_v1  ;;  %v2015_v3 = vadd.f32 %v2013_v52, %v1999_v18  ;;  %v2042_v47 = vmul.f32 %v4057_v6, %v6238_v24  ;;  %v4074_v18 = vunpack.c.h.bf16 %v4465_v36 }
 0x291   :  { %v2088_v31 = vmul.f32 %v4070_v63, %v6234_v45  ;;  %v4077_v6 = vunpack.c.l.bf16 %v4466_v42 }
 0x292   :  { %2450 = vrot.lane.b32.xlu0 %v6241_v60, %s4563_s13  ;;  %v6257_v58 = vpop.permute.xlu2 %2111  ;;  %v2029_v62 = vadd.f32 %v2027_v23, %v2014_v38  ;;  %v2030_v20 = vadd.f32 %v2028_v49, %v2015_v3  ;;  %v4468_v49 = vld [vmem:[%s6936_s1 + $0x470] sm:$0xff]  }
 0x294   :  { %v6255_v33 = vpop.permute.xlu0 %2051  ;;  %v2044_v24 = vadd.f32 %v2042_v47, %v2029_v62  ;;  %v2045_v16 = vadd.f32 %v2043_v57, %v2030_v20  ;;  %v4469_v57 = vld [vmem:[%s6936_s1 + $0x498] sm:$0xff]  }
 0x295   :  { %2452 = vrot.lane.b32.xlu1 %v6249_v46, %s4563_s13  ;;  %v2057_v28 = vmul.f32 %v4061_v37, %v6255_v33  ;;  %v4090_v40 = vunpack.c.h.bf16 %v4469_v57 }
 0x297   :  { %v6261_v39 = vpop.permute.xlu1 %2053  ;;  %v2059_v33 = vadd.f32 %v2057_v28, %v2044_v24 }
 0x298   :  { %2465 = vrot.lane.b32.xlu2 %v6267_v53, %s4563_s13  ;;  %v2058_v32 = vmul.f32 %v4062_v61, %v6261_v39  ;;  %v4073_v39 = vunpack.c.l.bf16 %v4465_v36  ;;  %v2117_v61 = vmul.f32 %v4077_v6, %v6257_v58  ;;  %v4470_v58 = vld [vmem:[%s6936_s1 + $0x400] sm:$0xff]  }
 0x299   :  { %v2074_v38 = vadd.f32 %v2072_v41, %v2059_v33  ;;  %v4093_v63 = vunpack.c.l.bf16 %v4470_v58  ;;  %v4094_v41 = vunpack.c.h.bf16 %v4470_v58 }
 0x29a   :  { %2467 = vrot.lane.b32.xlu0 %v6264_v12, %s4563_s13  ;;  %v6275_v5 = vpop.permute.xlu2 %2128  ;;  %v2060_v30 = vadd.f32 %v2058_v32, %v2045_v16 }
 0x29b   :  { %v2133_v28 = vmul.f32 %v4082_v0, %v6275_v5 }
 0x29c   :  { %v6273_v25 = vpop.permute.xlu0 %2068 }
 0x29d   :  { %2480 = vrot.lane.b32.xlu1 %v6192_v8, %s4564_s16  ;;  %v2073_v56 = vmul.f32 %v4066_v11, %v6273_v25  ;;  %v4086_v11 = vunpack.c.h.bf16 %v4468_v49 }
 0x29f   :  { %v6279_v2 = vpop.permute.xlu1 %2081  ;;  %v2075_v52 = vadd.f32 %v2073_v56, %v2060_v30  ;;  %v4471_v56 = vld [vmem:[%s6936_s1 + $0x428] sm:$0xff]  }
 0x2a0   :  { %2482 = vrot.lane.b32.xlu2 %v6202_v54, %s4564_s16  ;;  %v2087_v25 = vmul.f32 %v4069_v35, %v6279_v2  ;;  %v4089_v35 = vunpack.c.l.bf16 %v4469_v57 }
 0x2a1   :  { %v2090_v45 = vadd.f32 %v2088_v31, %v2075_v52  ;;  %v4098_v52 = vunpack.c.h.bf16 %v4471_v56 }
 0x2a2   :  { %2495 = vrot.lane.b32.xlu0 %v6219_v19, %s4564_s16  ;;  %v6293_v10 = vpop.permute.xlu2 %2156  ;;  %v2089_v2 = vadd.f32 %v2087_v25, %v2074_v38  ;;  %v4472_v25 = vld [vmem:[%s6936_s1 + $0x450] sm:$0xff]  }
 0x2a3   :  { %v4102_v51 = vunpack.c.h.bf16 %v4472_v25 }
 0x2a4   :  { %v6291_v27 = vpop.permute.xlu0 %2096 }
 0x2a5   :  { %2497 = vrot.lane.b32.xlu1 %v6216_v29, %s4564_s16  ;;  %v2102_v23 = vmul.f32 %v4073_v39, %v6291_v27  ;;  %v2162_v39 = vmul.f32 %v4089_v35, %v6293_v10  ;;  %v4473_v10 = vld [vmem:[%s6936_s1 + $0x478] sm:$0xff]  }
 0x2a6   :  { %v4477_v35 = vld [vmem:[%s6936_s1 + $0x458] sm:$0xff]  }
 0x2a7   :  { %v6300_v22 = vpop.permute.xlu1 %2098  ;;  %v2104_v27 = vadd.f32 %v2102_v23, %v2089_v2  ;;  %v4474_v2 = vld [vmem:[%s6936_s1 + $0x4a0] sm:$0xff]  }
 0x2a8   :  { %2510 = vrot.lane.b32.xlu2 %v6225_v15, %s4564_s16  ;;  %v2103_v3 = vmul.f32 %v4074_v18, %v6300_v22  ;;  %v4085_v22 = vunpack.c.l.bf16 %v4468_v49  ;;  %v4110_v57 = vunpack.c.h.bf16 %v4474_v2 }
 0x2a9   :  { %v2119_v36 = vadd.f32 %v2117_v61, %v2104_v27  ;;  %v4109_v27 = vunpack.c.l.bf16 %v4474_v2 }
 0x2aa   :  { %2512 = vrot.lane.b32.xlu0 %v6244_v7, %s4564_s16  ;;  %v6315_v34 = vpop.permute.xlu2 %2173  ;;  %v2105_v20 = vadd.f32 %v2103_v3, %v2090_v45  ;;  %v4101_v3 = vunpack.c.l.bf16 %v4472_v25  ;;  %v4479_v25 = vld [vmem:[%s6936_s1 + $0x4a8] sm:$0xff]  }
 0x2ac   :  { %v6313_v44 = vpop.permute.xlu0 %2113 }
 0x2ad   :  { %2525 = vrot.lane.b32.xlu1 %v6241_v60, %s4564_s16  ;;  %v2118_v37 = vmul.f32 %v4078_v4, %v6313_v44  ;;  %v2178_v4 = vmul.f32 %v4094_v41, %v6315_v34 }
 0x2af   :  { %v6324_v50 = vpop.permute.xlu1 %2126  ;;  %v2120_v44 = vadd.f32 %v2118_v37, %v2105_v20  ;;  %v4106_v37 = vunpack.c.h.bf16 %v4473_v10  ;;  %v4475_v20 = vld [vmem:[%s6936_s1 + $0x408] sm:$0xff]  }
 0x2b0   :  { %2527 = vrot.lane.b32.xlu2 %v6249_v46, %s4564_s16  ;;  %v2132_v55 = vmul.f32 %v4081_v17, %v6324_v50 }
 0x2b1   :  { %v2135_v5 = vadd.f32 %v2133_v28, %v2120_v44  ;;  %v4114_v44 = vunpack.c.h.bf16 %v4475_v20 }
 0x2b2   :  { %2540 = vrot.lane.b32.xlu0 %v6267_v53, %s4564_s16  ;;  %v6337_v13 = vpop.permute.xlu2 %2201  ;;  %v2134_v50 = vadd.f32 %v2132_v55, %v2119_v36  ;;  %v4113_v36 = vunpack.c.l.bf16 %v4475_v20 }
 0x2b4   :  { %v6335_v43 = vpop.permute.xlu0 %2141 }
 0x2b5   :  { %2542 = vrot.lane.b32.xlu1 %v6264_v12, %s4564_s16  ;;  %v2147_v24 = vmul.f32 %v4085_v22, %v6335_v43 }
 0x2b7   :  { %v6346_v21 = vpop.permute.xlu1 %2143  ;;  %v2149_v43 = vadd.f32 %v2147_v24, %v2134_v50 }
 0x2b8   :  { %2555 = vrot.lane.b32.xlu2 %v6192_v8, %s4565_s17  ;;  %v2148_v16 = vmul.f32 %v4086_v11, %v6346_v21  ;;  %v4097_v21 = vunpack.c.l.bf16 %v4471_v56 }
 0x2b9   :  { %v2164_v23 = vadd.f32 %v2162_v39, %v2149_v43 }
 0x2ba   :  { %2557 = vrot.lane.b32.xlu0 %v6202_v54, %s4565_s17  ;;  %v6359_v14 = vpop.permute.xlu2 %2218  ;;  %v2150_v18 = vadd.f32 %v2148_v16, %v2135_v5 }
 0x2bc   :  { %v6357_v9 = vpop.permute.xlu0 %2158 }
 0x2bd   :  { %2570 = vrot.lane.b32.xlu1 %v6219_v19, %s4565_s17  ;;  %v2163_v33 = vmul.f32 %v4090_v40, %v6357_v9 }
 0x2bf   :  { %v6371_v59 = vpop.permute.xlu1 %2171  ;;  %v2165_v9 = vadd.f32 %v2163_v33, %v2150_v18  ;;  %v4121_v33 = vunpack.c.l.bf16 %v4477_v35 }
 0x2c0   :  { %2572 = vrot.lane.b32.xlu2 %v6216_v29, %s4565_s17  ;;  %v2177_v31 = vmul.f32 %v4093_v63, %v6371_v59  ;;  %v4105_v59 = vunpack.c.l.bf16 %v4473_v10  ;;  %v6484_v10 = vld [vmem:[%s6935_s0 + $0xb0] sm:$0xff] }
 0x2c1   :  { %v2180_v34 = vadd.f32 %v2178_v4, %v2165_v9 }
 0x2c2   :  { %2585 = vrot.lane.b32.xlu0 %v6225_v15, %s4565_s17  ;;  %v6386_v1 = vpop.permute.xlu2 %2246  ;;  %v2179_v17 = vadd.f32 %v2177_v31, %v2164_v23 }
 0x2c3   :  { %v2252_v5 = vmul.f32 %v4113_v36, %v6386_v1 }
 0x2c4   :  { %v6384_v26 = vpop.permute.xlu0 %2186 }
 0x2c5   :  { %2587 = vrot.lane.b32.xlu1 %v6244_v7, %s4565_s17  ;;  %v2192_v6 = vmul.f32 %v4097_v21, %v6384_v26  ;;  %v2207_v26 = vmul.f32 %v4101_v3, %v6337_v13  ;;  %v4476_v13 = vld [vmem:[%s6936_s1 + $0x430] sm:$0xff]   ;;  %v4478_v21 = vld [vmem:[%s6936_s1 + $0x480] sm:$0xff]  }
 0x2c6   :  { %v4117_v56 = vunpack.c.l.bf16 %v4476_v13  ;;  %v4118_v50 = vunpack.c.h.bf16 %v4476_v13  ;;  %v4126_v23 = vunpack.c.h.bf16 %v4478_v21 }
 0x2c7   :  { %v2189_v48 = vpop.permute.xlu1 %2188  ;;  %v2194_v0 = vadd.f32 %v2192_v6, %v2179_v17  ;;  %v4130_v6 = vunpack.c.h.bf16 %v4479_v25  ;;  %v2726_v17 = vrot.slane %v6484_v10, 1 }
 0x2c8   :  { %2600 = vrot.lane.b32.xlu2 %v6241_v60, %s4565_s17  ;;  %v2193_v49 = vmul.f32 %v4098_v52, %v2189_v48 }
 0x2c9   :  { %v2209_v40 = vadd.f32 %v2207_v26, %v2194_v0  ;;  %v4129_v0 = vunpack.c.l.bf16 %v4479_v25 }
 0x2ca   :  { %2602 = vrot.lane.b32.xlu0 %v6249_v46, %s4565_s17  ;;  %v6409_v47 = vpop.permute.xlu2 %2263  ;;  %v2195_v22 = vadd.f32 %v2193_v49, %v2180_v34 }
 0x2cb   :  { %v2268_v1 = vmul.f32 %v4118_v50, %v6409_v47  ;;  %v6491_v47 = vld [vmem:[%s6935_s0 + $0xa8] sm:$0xff] }
 0x2cc   :  { %v2204_v62 = vpop.permute.xlu0 %2203  ;;  %v2725_v2 = vrot.slane %v6491_v47, 1 }
 0x2cd   :  { %2615 = vrot.lane.b32.xlu1 %v6267_v53, %s4565_s17  ;;  %v2208_v45 = vmul.f32 %v4102_v51, %v2204_v62  ;;  %v2223_v62 = vmul.f32 %v4106_v37, %v6359_v14  ;;  %v4125_v51 = vunpack.c.l.bf16 %v4478_v21 }
 0x2cf   :  { %v2217_v32 = vpop.permute.xlu1 %2216  ;;  %v2210_v55 = vadd.f32 %v2208_v45, %v2195_v22 }
 0x2d0   :  { %2617 = vrot.lane.b32.xlu2 %v6264_v12, %s4565_s17  ;;  %v2222_v11 = vmul.f32 %v4105_v59, %v2217_v32  ;;  %v3480_v59 = vld [vmem:[%s6935_s0 + $0xb8] sm:$0xf] }
 0x2d1   :  { %v2225_v14 = vadd.f32 %v2223_v62, %v2210_v55  ;;  %v2728_v20 = vrot.slane %v3480_v59, 1  ;;  %v6506_v55 = vsel %vm33_vm0, %v2725_v2, %v2726_v17  ;;  %v2776_v21 = vrot.slane %v3480_v59, 4  ;;  %v4482_v2 = vld [vmem:[%s6936_s1 + $0x500] sm:$0xff]  }
 0x2d2   :  { %2630 = vrot.lane.b32.xlu0 %v6192_v8, %s4566_s18  ;;  %v6432_v42 = vpop.permute.xlu2 %2291  ;;  %v2224_v16 = vadd.f32 %v2222_v11, %v2209_v40  ;;  %v2744_v40 = vrot.slane %v3480_v59, 2 }
 0x2d3   :  { %v2297_v45 = vmul.f32 %v4125_v51, %v6432_v42  ;;  %v4480_v51 = vld [vmem:[%s6936_s1 + $0x4b0] sm:$0xff]  }
 0x2d4   :  { %v2232_v30 = vpop.permute.xlu0 %2231 }
 0x2d5   :  { %2632 = vrot.lane.b32.xlu1 %v6202_v54, %s4566_s18  ;;  %v2237_v58 = vmul.f32 %v4109_v27, %v2232_v30  ;;  %v4122_v30 = vunpack.c.h.bf16 %v4477_v35  ;;  %v2757_v35 = vrot.slane %v6491_v47, 3 }
 0x2d7   :  { %v2234_v38 = vpop.permute.xlu1 %2233  ;;  %v2239_v63 = vadd.f32 %v2237_v58, %v2224_v16  ;;  %v2741_v58 = vrot.slane %v6491_v47, 2  ;;  %v2758_v16 = vrot.slane %v6484_v10, 3 }
 0x2d8   :  { %2645 = vrot.lane.b32.xlu2 %v6219_v19, %s4566_s18  ;;  %v2238_v24 = vmul.f32 %v4110_v57, %v2234_v38 }
 0x2d9   :  { %v2254_v9 = vadd.f32 %v2252_v5, %v2239_v63  ;;  %v6538_v50 = vsel %vm67_vm2, %v2757_v35, %v2758_v16  ;;  %v2773_v63 = vrot.slane %v6491_v47, 4  ;;  %v2774_v5 = vrot.slane %v6484_v10, 4 }
 0x2da   :  { %2647 = vrot.lane.b32.xlu0 %v6216_v29, %s4566_s18  ;;  %v2309_v61 = vpop.permute.xlu2 %2308  ;;  %v2240_v39 = vadd.f32 %v2238_v24, %v2225_v14 }
 0x2db   :  { %v2313_v22 = vmul.f32 %v4130_v6, %v2309_v61  ;;  %v2742_v61 = vrot.slane %v6484_v10, 2 }
 0x2dc   :  { %v2249_v48 = vpop.permute.xlu0 %2248 }
 0x2dd   :  { %2660 = vrot.lane.b32.xlu1 %v6225_v15, %s4566_s18  ;;  %v2253_v32 = vmul.f32 %v4114_v44, %v2249_v48  ;;  %v6530_v14 = vsel %vm50_vm1, %v2742_v61, %v2744_v40 }
 0x2df   :  { %v2262_v28 = vpop.permute.xlu1 %2261  ;;  %v2255_v52 = vadd.f32 %v2253_v32, %v2240_v39  ;;  %v6533_v32 = vsel %vm50_vm1, %v2741_v58, %v2742_v61  ;;  %v4485_v61 = vld [vmem:[%s6936_s1 + $0x4b8] sm:$0xff]  }
 0x2e0   :  { %2662 = vrot.lane.b32.xlu2 %v6244_v7, %s4566_s18  ;;  %v2267_v18 = vmul.f32 %v4117_v56, %v2262_v28  ;;  %v6511_v28 = vsel %vm33_vm0, %v2726_v17, %v2728_v20 }
 0x2e1   :  { %v2270_v49 = vadd.f32 %v2268_v1, %v2255_v52  ;;  %v6561_v52 = vsel %vm84_vm3, %v2774_v5, %v2776_v21 }
 0x2e2   :  { %2675 = vrot.lane.b32.xlu0 %v6241_v60, %s4566_s18  ;;  %v6470_v43 = vpop.permute.xlu2 %2420  ;;  %v2269_v3 = vadd.f32 %v2267_v18, %v2254_v9  ;;  %v6553_v18 = vsel %vm84_vm3, %v2773_v63, %v2774_v5 }
 0x2e4   :  { %v2277_v41 = vpop.permute.xlu0 %2276 }
 0x2e5   :  { %2677 = vrot.lane.b32.xlu1 %v6249_v46, %s4566_s18  ;;  %v2282_v4 = vmul.f32 %v4121_v33, %v2277_v41  ;;  %v2760_v33 = vrot.slane %v3480_v59, 3 }
 0x2e7   :  { %v2279_v31 = vpop.permute.xlu1 %2278  ;;  %v2284_v34 = vadd.f32 %v2282_v4, %v2269_v3  ;;  %v6556_v25 = vsel %vm67_vm2, %v2758_v16, %v2760_v33  ;;  %v4481_v4 = vld [vmem:[%s6936_s1 + $0x4d8] sm:$0xff]   ;;  %v4133_v3 = vunpack.c.l.bf16 %v4480_v51  ;;  %v4486_v33 = vld [vmem:[%s6936_s1 + $0x4e0] sm:$0xff]  }
 0x2e8   :  { %v2283_v38 = vmul.f32 %v4122_v30, %v2279_v31  ;;  %2690 = vrot.lane.b32.xlu2 %v6267_v53, %s4566_s18  ;;  %v4137_v6 = vunpack.c.l.bf16 %v4481_v4 }
 0x2e9   :  { %v2299_v62 = vadd.f32 %v2297_v45, %v2284_v34  ;;  %v2329_v59 = vmul.f32 %v4133_v3, %v6192_v8  ;;  %v4141_v34 = vunpack.c.l.bf16 %v4482_v2  ;;  %v4483_v45 = vld [vmem:[%s6936_s1 + $0x528] sm:$0xff]   ;;  %v4484_v8 = vld [vmem:[%s6936_s1 + $0x550] sm:$0xff]   ;;  %v4157_v3 = vunpack.c.l.bf16 %v4486_v33 }
 0x2ea   :  { %2692 = vrot.lane.b32.xlu0 %v6264_v12, %s4566_s18  ;;  %v6501_v26 = vpop.permute.xlu2 %2437  ;;  %v2285_v27 = vadd.f32 %v2283_v38, %v2270_v49  ;;  %v2348_v17 = vmul.f32 %v4137_v6, %v6219_v19  ;;  %v4145_v19 = vunpack.c.l.bf16 %v4483_v45  ;;  %v4146_v35 = vunpack.c.h.bf16 %v4483_v45 }
 0x2eb   :  { %v2364_v20 = vmul.f32 %v4141_v34, %v6225_v15  ;;  %v4154_v45 = vunpack.c.h.bf16 %v4485_v61 }
 0x2ec   :  { %v2294_v37 = vpop.permute.xlu0 %2293  ;;  %v2380_v15 = vmul.f32 %v4145_v19, %v6241_v60  ;;  %v4153_v60 = vunpack.c.l.bf16 %v4485_v61 }
 0x2ed   :  { %v2298_v48 = vmul.f32 %v4126_v23, %v2294_v37  ;;  %2789 = vrot.lane.b32.xlu1 %v6491_v47, %s4563_s13 }
 0x2ef   :  { %v2300_v57 = vadd.f32 %v2298_v48, %v2285_v27  ;;  %v2307_v11 = vpop.permute.xlu1 %2306  ;;  %v4138_v27 = vunpack.c.h.bf16 %v4481_v4  ;;  %v4134_v48 = vunpack.c.h.bf16 %v4480_v51  ;;  %v2381_v4 = vmul.f32 %v4146_v35, %v6249_v46 }
 0x2f0   :  { %v2312_v44 = vmul.f32 %v4129_v0, %v2307_v11  ;;  %2791 = vrot.lane.b32.xlu2 %v6484_v10, %s4563_s13  ;;  %v4150_v51 = vunpack.c.h.bf16 %v4484_v8 }
 0x2f1   :  { %v2315_v13 = vadd.f32 %v2313_v22, %v2300_v57  ;;  %v2350_v22 = vadd.f32 %v2348_v17, %v2329_v59  ;;  %v2349_v11 = vmul.f32 %v4138_v27, %v6216_v29 }
 0x2f2   :  { %v2314_v42 = vadd.f32 %v2312_v44, %v2299_v62  ;;  %2804 = vrot.lane.b32.xlu0 %v6506_v55, %s4563_s13  ;;  %v6521_v24 = vpop.permute.xlu2 %2465  ;;  %v2330_v62 = vmul.f32 %v4134_v48, %v6202_v54  ;;  %v4142_v44 = vunpack.c.h.bf16 %v4482_v2  ;;  %v4488_v2 = vld [vmem:[%s6936_s1 + $0x530] sm:$0xff]   ;;  %v2397_v34 = vmul.f32 %v4150_v51, %v6264_v12 }
 0x2f3   :  { %2318 = vst.msk [vmem:[#allocation2 + $0x58] sm:$0xff] %vm396_vm4, %v2315_v13  ;;  %v2366_v13 = vadd.f32 %v2364_v20, %v2350_v22  ;;  %v4158_v22 = vunpack.c.h.bf16 %v4486_v33  ;;  %v4165_v20 = vunpack.c.l.bf16 %v4488_v2  ;;  %v4492_v51 = vld [vmem:[%s6936_s1 + $0x510] sm:$0xff]  }
 0x2f4   :  { %2317 = vst.msk [vmem:[#allocation2 + $0x50] sm:$0xff] %vm396_vm4, %v2314_v42  ;;  %v6519_v36 = vpop.permute.xlu0 %2405  ;;  %v4149_v42 = vunpack.c.l.bf16 %v4484_v8  ;;  %v2351_v54 = vadd.f32 %v2349_v11, %v2330_v62  ;;  %v2365_v58 = vmul.f32 %v4142_v44, %v6244_v7  ;;  %v4487_v7 = vld [vmem:[%s6936_s1 + $0x508] sm:$0xff]   ;;  %v4489_v8 = vld [vmem:[%s6936_s1 + $0x558] sm:$0xff]  }
 0x2f5   :  { %2806 = vrot.lane.b32.xlu1 %v6511_v28, %s4563_s13  ;;  %v2382_v16 = vadd.f32 %v2380_v15, %v2366_v13  ;;  %v2411_v6 = vmul.f32 %v4153_v60, %v6519_v36  ;;  %v4161_v27 = vunpack.c.l.bf16 %v4487_v7  ;;  %v2426_v36 = vmul.f32 %v4157_v3, %v6470_v43  ;;  %v4490_v13 = vld [vmem:[%s6936_s1 + $0x4c0] sm:$0xff]  }
 0x2f6   :  { %v2396_v63 = vmul.f32 %v4149_v42, %v6267_v53  ;;  %v2367_v21 = vadd.f32 %v2365_v58, %v2351_v54  ;;  %v4162_v44 = vunpack.c.h.bf16 %v4487_v7  ;;  %v4169_v61 = vunpack.c.l.bf16 %v4489_v8 }
 0x2f7   :  { %v6527_v56 = vpop.permute.xlu1 %2407  ;;  %v4170_v60 = vunpack.c.h.bf16 %v4489_v8  ;;  %v4174_v3 = vunpack.c.h.bf16 %v4490_v13 }
 0x2f8   :  { %2819 = vrot.lane.b32.xlu2 %v6533_v32, %s4563_s13  ;;  %v2398_v53 = vadd.f32 %v2396_v63, %v2382_v16  ;;  %v2383_v59 = vadd.f32 %v2381_v4, %v2367_v21  ;;  %v2412_v62 = vmul.f32 %v4154_v45, %v6527_v56  ;;  %v4491_v56 = vld [vmem:[%s6936_s1 + $0x4e8] sm:$0xff]   ;;  %v4166_v16 = vunpack.c.h.bf16 %v4488_v2 }
 0x2f9   :  { %v4173_v63 = vunpack.c.l.bf16 %v4490_v13  ;;  %v2471_v21 = vmul.f32 %v4169_v61, %v6521_v24  ;;  %v4177_v4 = vunpack.c.l.bf16 %v4491_v56  ;;  %v4181_v2 = vunpack.c.l.bf16 %v4492_v51 }
 0x2fa   :  { %2821 = vrot.lane.b32.xlu0 %v6530_v14, %s4563_s13  ;;  %v6546_v39 = vpop.permute.xlu2 %2482  ;;  %v2413_v48 = vadd.f32 %v2411_v6, %v2398_v53  ;;  %v2399_v11 = vadd.f32 %v2397_v34, %v2383_v59 }
 0x2fb   :  { %v2487_v8 = vmul.f32 %v4174_v3, %v6546_v39  ;;  %v4496_v39 = vld [vmem:[%s6936_s1 + $0x4f0] sm:$0xff]  }
 0x2fc   :  { %v6544_v41 = vpop.permute.xlu0 %2422  ;;  %v2428_v43 = vadd.f32 %v2426_v36, %v2413_v48  ;;  %v2414_v58 = vadd.f32 %v2412_v62, %v2399_v11  ;;  %v4182_v11 = vunpack.c.h.bf16 %v4492_v51 }
 0x2fd   :  { %2834 = vrot.lane.b32.xlu1 %v6538_v50, %s4563_s13  ;;  %v2427_v15 = vmul.f32 %v4158_v22, %v6544_v41  ;;  %v2442_v41 = vmul.f32 %v4162_v44, %v6501_v26  ;;  %v4493_v26 = vld [vmem:[%s6936_s1 + $0x538] sm:$0xff]   ;;  %v4178_v22 = vunpack.c.h.bf16 %v4491_v56  ;;  %v4495_v44 = vld [vmem:[%s6936_s1 + $0x4c8] sm:$0xff]  }
 0x2fe   :  { %v4193_v61 = vunpack.c.l.bf16 %v4495_v44 }
 0x2ff   :  { %v6550_v30 = vpop.permute.xlu1 %2435 }
 0x300   :  { %2836 = vrot.lane.b32.xlu2 %v6556_v25, %s4563_s13  ;;  %v2441_v12 = vmul.f32 %v4161_v27, %v6550_v30 }
 0x302   :  { %2849 = vrot.lane.b32.xlu0 %v6553_v18, %s4563_s13  ;;  %v6567_v31 = vpop.permute.xlu2 %2510  ;;  %v2443_v35 = vadd.f32 %v2441_v12, %v2428_v43 }
 0x304   :  { %v6565_v1 = vpop.permute.xlu0 %2450 }
 0x305   :  { %2851 = vrot.lane.b32.xlu1 %v6561_v52, %s4563_s13  ;;  %v2456_v42 = vmul.f32 %v4165_v20, %v6565_v1  ;;  %v2429_v1 = vadd.f32 %v2427_v15, %v2414_v58  ;;  %v4185_v20 = vunpack.c.l.bf16 %v4493_v26 }
 0x307   :  { %v6571_v9 = vpop.permute.xlu1 %2452  ;;  %v2458_v33 = vadd.f32 %v2456_v42, %v2443_v35  ;;  %v2444_v24 = vadd.f32 %v2442_v41, %v2429_v1  ;;  %v4186_v42 = vunpack.c.h.bf16 %v4493_v26  ;;  %v4197_v1 = vunpack.c.l.bf16 %v4496_v39 }
 0x308   :  { %2864 = vrot.lane.b32.xlu2 %v6491_v47, %s4564_s16  ;;  %v2457_v53 = vmul.f32 %v4166_v16, %v6571_v9  ;;  %v4198_v26 = vunpack.c.h.bf16 %v4496_v39 }
 0x309   :  { %v2473_v59 = vadd.f32 %v2471_v21, %v2458_v33  ;;  %v4194_v21 = vunpack.c.h.bf16 %v4495_v44 }
 0x30a   :  { %2866 = vrot.lane.b32.xlu0 %v6484_v10, %s4564_s16  ;;  %v6585_v23 = vpop.permute.xlu2 %2527  ;;  %v2459_v48 = vadd.f32 %v2457_v53, %v2444_v24  ;;  %v4498_v53 = vld [vmem:[%s6936_s1 + $0x540] sm:$0xff]  }
 0x30b   :  { %v2532_v33 = vmul.f32 %v4186_v42, %v6585_v23  ;;  %v4205_v24 = vunpack.c.l.bf16 %v4498_v53  ;;  %v4499_v23 = vld [vmem:[%s6936_s1 + $0x568] sm:$0xff]  }
 0x30c   :  { %v6583_v38 = vpop.permute.xlu0 %2467 }
 0x30d   :  { %2879 = vrot.lane.b32.xlu1 %v6506_v55, %s4564_s16  ;;  %v2472_v34 = vmul.f32 %v4170_v60, %v6583_v38 }
 0x30f   :  { %v6589_v49 = vpop.permute.xlu1 %2480  ;;  %v2474_v38 = vadd.f32 %v2472_v34, %v2459_v48 }
 0x310   :  { %2881 = vrot.lane.b32.xlu2 %v6511_v28, %s4564_s16  ;;  %v2486_v6 = vmul.f32 %v4173_v63, %v6589_v49  ;;  %v4494_v49 = vld [vmem:[%s6936_s1 + $0x560] sm:$0xff]  }
 0x311   :  { %v4189_v12 = vunpack.c.l.bf16 %v4494_v49  ;;  %v4190_v60 = vunpack.c.h.bf16 %v4494_v49 }
 0x312   :  { %2894 = vrot.lane.b32.xlu0 %v6533_v32, %s4564_s16  ;;  %v6605_v0 = vpop.permute.xlu2 %2555  ;;  %v2488_v36 = vadd.f32 %v2486_v6, %v2473_v59 }
 0x314   :  { %v6603_v37 = vpop.permute.xlu0 %2495 }
 0x315   :  { %2896 = vrot.lane.b32.xlu1 %v6530_v14, %s4564_s16  ;;  %v2501_v9 = vmul.f32 %v4177_v4, %v6603_v37  ;;  %v2516_v37 = vmul.f32 %v4181_v2, %v6567_v31  ;;  %v2489_v31 = vadd.f32 %v2487_v8, %v2474_v38 }
 0x317   :  { %v6610_v57 = vpop.permute.xlu1 %2497  ;;  %v2503_v62 = vadd.f32 %v2501_v9, %v2488_v36 }
 0x318   :  { %2909 = vrot.lane.b32.xlu2 %v6538_v50, %s4564_s16  ;;  %v2502_v43 = vmul.f32 %v4178_v22, %v6610_v57 }
 0x319   :  { %v2518_v56 = vadd.f32 %v2516_v37, %v2503_v62  ;;  %v4501_v37 = vld [vmem:[%s6936_s1 + $0x4f8] sm:$0xff]  }
 0x31a   :  { %2911 = vrot.lane.b32.xlu0 %v6556_v25, %s4564_s16  ;;  %v6627_v29 = vpop.permute.xlu2 %2572  ;;  %v2504_v63 = vadd.f32 %v2502_v43, %v2489_v31  ;;  %v4217_v42 = vunpack.c.l.bf16 %v4501_v37 }
 0x31b   :  { %v2577_v8 = vmul.f32 %v4198_v26, %v6627_v29  ;;  %v4502_v29 = vld [vmem:[%s6936_s1 + $0x520] sm:$0xff]  }
 0x31c   :  { %v6625_v40 = vpop.permute.xlu0 %2512 }
 0x31d   :  { %2924 = vrot.lane.b32.xlu1 %v6553_v18, %s4564_s16  ;;  %v2517_v58 = vmul.f32 %v4182_v11, %v6625_v40  ;;  %v4206_v11 = vunpack.c.h.bf16 %v4498_v53 }
 0x31f   :  { %v6633_v5 = vpop.permute.xlu1 %2525  ;;  %v2519_v40 = vadd.f32 %v2517_v58, %v2504_v63  ;;  %v4221_v63 = vunpack.c.l.bf16 %v4502_v29 }
 0x320   :  { %2926 = vrot.lane.b32.xlu2 %v6561_v52, %s4564_s16  ;;  %v2531_v15 = vmul.f32 %v4185_v20, %v6633_v5  ;;  %v4497_v5 = vld [vmem:[%s6936_s1 + $0x518] sm:$0xff]   ;;  %v4209_v20 = vunpack.c.l.bf16 %v4499_v23  ;;  %s4568_s16 = smov 128  }
 0x321   :  { %v4201_v51 = vunpack.c.l.bf16 %v4497_v5  ;;  %v4202_v22 = vunpack.c.h.bf16 %v4497_v5 }
 0x322   :  { %2939 = vrot.lane.b32.xlu0 %v6491_v47, %s4565_s17  ;;  %v6652_v17 = vpop.permute.xlu2 %2600  ;;  %v2533_v41 = vadd.f32 %v2531_v15, %v2518_v56  ;;  %v4210_v15 = vunpack.c.h.bf16 %v4499_v23 }
 0x324   :  { %v6650_v46 = vpop.permute.xlu0 %2540 }
 0x325   :  { %2941 = vrot.lane.b32.xlu1 %v6484_v10, %s4565_s17  ;;  %v2546_v57 = vmul.f32 %v4189_v12, %v6650_v46  ;;  %v2561_v46 = vmul.f32 %v4193_v61, %v6605_v0  ;;  %v2534_v0 = vadd.f32 %v2532_v33, %v2519_v40 }
 0x327   :  { %v6658_v19 = vpop.permute.xlu1 %2542  ;;  %v2548_v4 = vadd.f32 %v2546_v57, %v2533_v41  ;;  %v4218_v41 = vunpack.c.h.bf16 %v4501_v37 }
 0x328   :  { %2954 = vrot.lane.b32.xlu2 %v6506_v55, %s4565_s17  ;;  %v2547_v3 = vmul.f32 %v4190_v60, %v6658_v19  ;;  %v4500_v19 = vld [vmem:[%s6936_s1 + $0x4d0] sm:$0xff]   ;;  %v4503_v60 = vld [vmem:[%s6936_s1 + $0x548] sm:$0xff]  }
 0x329   :  { %v2563_v59 = vadd.f32 %v2561_v46, %v2548_v4  ;;  %v4214_v5 = vunpack.c.h.bf16 %v4500_v19  ;;  %v4225_v53 = vunpack.c.l.bf16 %v4503_v60 }
 0x32a   :  { %2956 = vrot.lane.b32.xlu0 %v6511_v28, %s4565_s17  ;;  %v6679_v54 = vpop.permute.xlu2 %2617  ;;  %v2549_v48 = vadd.f32 %v2547_v3, %v2534_v0 }
 0x32b   :  { %v2622_v33 = vmul.f32 %v4210_v15, %v6679_v54  ;;  %v4226_v54 = vunpack.c.h.bf16 %v4503_v60 }
 0x32c   :  { %v6677_v30 = vpop.permute.xlu0 %2557 }
 0x32d   :  { %2969 = vrot.lane.b32.xlu1 %v6533_v32, %s4565_s17  ;;  %v2562_v34 = vmul.f32 %v4194_v21, %v6677_v30  ;;  %v2606_v30 = vmul.f32 %v4205_v24, %v6652_v17  ;;  %v4222_v24 = vunpack.c.h.bf16 %v4502_v29 }
 0x32f   :  { %v2571_v7 = vpop.permute.xlu1 %2570  ;;  %v2564_v38 = vadd.f32 %v2562_v34, %v2549_v48 }
 0x330   :  { %2971 = vrot.lane.b32.xlu2 %v6530_v14, %s4565_s17  ;;  %v2576_v2 = vmul.f32 %v4197_v1, %v2571_v7 }
 0x331   :  { %v2579_v17 = vadd.f32 %v2577_v8, %v2564_v38 }
 0x332   :  { %2984 = vrot.lane.b32.xlu0 %v6538_v50, %s4565_s17  ;;  %v6702_v27 = vpop.permute.xlu2 %2645  ;;  %v2578_v36 = vadd.f32 %v2576_v2, %v2563_v59 }
 0x333   :  { %v2651_v40 = vmul.f32 %v4217_v42, %v6702_v27 }
 0x334   :  { %v2586_v45 = vpop.permute.xlu0 %2585 }
 0x335   :  { %2986 = vrot.lane.b32.xlu1 %v6556_v25, %s4565_s17  ;;  %v2591_v9 = vmul.f32 %v4201_v51, %v2586_v45  ;;  %v4213_v45 = vunpack.c.l.bf16 %v4500_v19 }
 0x337   :  { %v2588_v13 = vpop.permute.xlu1 %2587  ;;  %v2593_v62 = vadd.f32 %v2591_v9, %v2578_v36 }
 0x338   :  { %2999 = vrot.lane.b32.xlu2 %v6553_v18, %s4565_s17  ;;  %v2592_v44 = vmul.f32 %v4202_v22, %v2588_v13 }
 0x339   :  { %v2608_v61 = vadd.f32 %v2606_v30, %v2593_v62 }
 0x33a   :  { %3001 = vrot.lane.b32.xlu0 %v6561_v52, %s4565_s17  ;;  %v6725_v16 = vpop.permute.xlu2 %2662  ;;  %v2594_v13 = vadd.f32 %v2592_v44, %v2579_v17 }
 0x33c   :  { %v2603_v35 = vpop.permute.xlu0 %2602 }
 0x33d   :  { %3014 = vrot.lane.b32.xlu1 %v6491_v47, %s4566_s18  ;;  %v2607_v39 = vmul.f32 %v4206_v11, %v2603_v35  ;;  %v4504_v35 = vld [vmem:[%s6936_s1 + $0x570] sm:$0xff]  }
 0x33e   :  { %v4230_v8 = vunpack.c.h.bf16 %v4504_v35 }
 0x33f   :  { %v2616_v6 = vpop.permute.xlu1 %2615  ;;  %v2609_v1 = vadd.f32 %v2607_v39, %v2594_v13  ;;  %v4505_v39 = vld [vmem:[%s6936_s1 + $0x578] sm:$0xff]  }
 0x340   :  { %3016 = vrot.lane.b32.xlu2 %v6484_v10, %s4566_s18  ;;  %v2621_v43 = vmul.f32 %v4209_v20, %v2616_v6  ;;  %v4229_v6 = vunpack.c.l.bf16 %v4504_v35 }
 0x341   :  { %v2624_v3 = vadd.f32 %v2622_v33, %v2609_v1 }
 0x342   :  { %3029 = vrot.lane.b32.xlu0 %v6506_v55, %s4566_s18  ;;  %v2691_v49 = vpop.permute.xlu2 %2690  ;;  %v2623_v57 = vadd.f32 %v2621_v43, %v2608_v61  ;;  %v4506_v61 = vld [vmem:[%s6936_s1 + $0x5a0] sm:$0xff]  }
 0x343   :  { %v2696_v9 = vmul.f32 %v4229_v6, %v2691_v49  ;;  %v4237_v13 = vunpack.c.l.bf16 %v4506_v61 }
 0x344   :  { %v2631_v7 = vpop.permute.xlu0 %2630 }
 0x345   :  { %3031 = vrot.lane.b32.xlu1 %v6511_v28, %s4566_s18  ;;  %v2636_v31 = vmul.f32 %v4213_v45, %v2631_v7  ;;  %v2667_v7 = vmul.f32 %v4222_v24, %v6725_v16  ;;  %v2732_v35 = vmul.f32 %v4237_v13, %v6506_v55 }
 0x347   :  { %v2633_v12 = vpop.permute.xlu1 %2632  ;;  %v2638_v21 = vadd.f32 %v2636_v31, %v2623_v57  ;;  %v4233_v57 = vunpack.c.l.bf16 %v4505_v39 }
 0x348   :  { %3044 = vrot.lane.b32.xlu2 %v6533_v32, %s4566_s18  ;;  %v2637_v46 = vmul.f32 %v4214_v5, %v2633_v12  ;;  %v4238_v5 = vunpack.c.h.bf16 %v4506_v61 }
 0x349   :  { %v2653_v2 = vadd.f32 %v2651_v40, %v2638_v21  ;;  %v2713_v1 = vmul.f32 %v4233_v57, %v6491_v47  ;;  %v4514_v57 = vld [vmem:[%s6936_s1 + $0x620] sm:$0xff]  }
 0x34a   :  { %3046 = vrot.lane.b32.xlu0 %v6530_v14, %s4566_s18  ;;  %v6760_v58 = vpop.permute.xlu2 %2791  ;;  %v2639_v27 = vadd.f32 %v2637_v46, %v2624_v3  ;;  %v2733_v21 = vmul.f32 %v4238_v5, %v6511_v28  ;;  %v4508_v46 = vld [vmem:[%s6936_s1 + $0x5f0] sm:$0xff]  }
 0x34b   :  { %v4245_v3 = vunpack.c.l.bf16 %v4508_v46 }
 0x34c   :  { %v2648_v56 = vpop.permute.xlu0 %2647 }
 0x34d   :  { %3059 = vrot.lane.b32.xlu1 %v6538_v50, %s4566_s18  ;;  %v2652_v26 = vmul.f32 %v4218_v41, %v2648_v56  ;;  %v4507_v41 = vld [vmem:[%s6936_s1 + $0x5c8] sm:$0xff]  }
 0x34e   :  { %v4241_v33 = vunpack.c.l.bf16 %v4507_v41 }
 0x34f   :  { %v2661_v4 = vpop.permute.xlu1 %2660  ;;  %v2654_v19 = vadd.f32 %v2652_v26, %v2639_v27  ;;  %v4246_v26 = vunpack.c.h.bf16 %v4508_v46 }
 0x350   :  { %v2666_v51 = vmul.f32 %v4221_v63, %v2661_v4  ;;  %3061 = vrot.lane.b32.xlu2 %v6556_v25, %s4566_s18  ;;  %v4234_v63 = vunpack.c.h.bf16 %v4505_v39  ;;  %v4242_v4 = vunpack.c.h.bf16 %v4507_v41  ;;  %v2748_v6 = vmul.f32 %v4241_v33, %v6533_v32 }
 0x351   :  { %v2669_v11 = vadd.f32 %v2667_v7, %v2654_v19  ;;  %v2765_v32 = vmul.f32 %v4246_v26, %v6556_v25  ;;  %v4269_v33 = vunpack.c.l.bf16 %v4514_v57 }
 0x352   :  { %3074 = vrot.lane.b32.xlu0 %v6553_v18, %s4566_s18  ;;  %v6776_v0 = vpop.permute.xlu2 %2819  ;;  %v2668_v59 = vadd.f32 %v2666_v51, %v2653_v2  ;;  %v2714_v40 = vmul.f32 %v4234_v63, %v6484_v10  ;;  %v2749_v47 = vmul.f32 %v4242_v4, %v6530_v14  ;;  %v4509_v10 = vld [vmem:[%s6936_s1 + $0x618] sm:$0xff]   ;;  %v4511_v14 = vld [vmem:[%s6936_s1 + $0x5a8] sm:$0xff]  }
 0x353   :  { %v4257_v25 = vunpack.c.l.bf16 %v4511_v14  ;;  %v4515_v4 = vld [vmem:[%s6936_s1 + $0x588] sm:$0xff]  }
 0x354   :  { %v2676_v23 = vpop.permute.xlu0 %2675  ;;  %v2735_v55 = vadd.f32 %v2733_v21, %v2714_v40 }
 0x355   :  { %v2681_v34 = vmul.f32 %v4225_v53, %v2676_v23  ;;  %3076 = vrot.lane.b32.xlu1 %v6561_v52, %s4566_s18  ;;  %v2734_v53 = vadd.f32 %v2732_v35, %v2713_v1  ;;  %v2764_v23 = vmul.f32 %v4245_v3, %v6538_v50  ;;  %v4270_v3 = vunpack.c.h.bf16 %v4514_v57 }
 0x356   :  { %v2751_v27 = vadd.f32 %v2749_v47, %v2735_v55  ;;  %v4273_v47 = vunpack.c.l.bf16 %v4515_v4 }
 0x357   :  { %v2683_v48 = vadd.f32 %v2681_v34, %v2668_v59  ;;  %v2678_v36 = vpop.permute.xlu1 %2677  ;;  %v2750_v24 = vadd.f32 %v2748_v6, %v2734_v53  ;;  %v4250_v59 = vunpack.c.h.bf16 %v4509_v10  ;;  %v4510_v34 = vld [vmem:[%s6936_s1 + $0x580] sm:$0xff]  }
 0x358   :  { %v2682_v20 = vmul.f32 %v4226_v54, %v2678_v36  ;;  %v4249_v54 = vunpack.c.l.bf16 %v4509_v10  ;;  %v2767_v50 = vadd.f32 %v2765_v32, %v2751_v27  ;;  %v4274_v10 = vunpack.c.h.bf16 %v4515_v4  ;;  %v4523_v4 = vld [vmem:[%s6936_s1 + $0x608] sm:$0xff]  }
 0x359   :  { %v2698_v22 = vadd.f32 %v2696_v9, %v2683_v48  ;;  %v2766_v19 = vadd.f32 %v2764_v23, %v2750_v24  ;;  %v4253_v48 = vunpack.c.l.bf16 %v4510_v34  ;;  %v2781_v36 = vmul.f32 %v4250_v59, %v6561_v52  ;;  %v4513_v52 = vld [vmem:[%s6936_s1 + $0x5f8] sm:$0xff]  }
 0x35a   :  { %v2684_v62 = vadd.f32 %v2682_v20, %v2669_v11  ;;  %v6782_v45 = vpop.permute.xlu2 %2836  ;;  %v2780_v7 = vmul.f32 %v4249_v54, %v6553_v18  ;;  %v4512_v11 = vld [vmem:[%s6936_s1 + $0x5d0] sm:$0xff]   ;;  %v4258_v18 = vunpack.c.h.bf16 %v4511_v14  ;;  %v4265_v41 = vunpack.c.l.bf16 %v4513_v52 }
 0x35b   :  { %2701 = vst.msk [vmem:[#allocation2 + $0x60] sm:$0xff] %vm396_vm4, %v2698_v22  ;;  %v4254_v22 = vunpack.c.h.bf16 %v4510_v34  ;;  %v4261_v39 = vunpack.c.l.bf16 %v4512_v11  ;;  %v4262_v13 = vunpack.c.h.bf16 %v4512_v11  ;;  %v4266_v40 = vunpack.c.h.bf16 %v4513_v52 }
 0x35c   :  { %v2693_v38 = vpop.permute.xlu0 %2692 }
 0x35d   :  { %v2697_v30 = vmul.f32 %v4230_v8, %v2693_v38  ;;  %v2782_v38 = vadd.f32 %v2780_v7, %v2766_v19  ;;  %v2825_v1 = vmul.f32 %v4261_v39, %v6776_v0  ;;  %v4516_v0 = vld [vmem:[%s6936_s1 + $0x5b0] sm:$0xff]   ;;  %v2841_v26 = vmul.f32 %v4266_v40, %v6782_v45  ;;  %v4518_v45 = vld [vmem:[%s6936_s1 + $0x600] sm:$0xff]  }
 0x35e   :  { %v4277_v54 = vunpack.c.l.bf16 %v4516_v0  ;;  %v4278_v7 = vunpack.c.h.bf16 %v4516_v0 }
 0x35f   :  { %v2699_v37 = vadd.f32 %v2697_v30, %v2684_v62  ;;  %v2790_v12 = vpop.permute.xlu1 %2789  ;;  %v2783_v30 = vadd.f32 %v2781_v36, %v2767_v50 }
 0x360   :  { %v2795_v62 = vmul.f32 %v4253_v48, %v2790_v12 }
 0x361   :  { %2702 = vst.msk [vmem:[#allocation2 + $0x68] sm:$0xff] %vm396_vm4, %v2699_v37  ;;  %v2796_v37 = vmul.f32 %v4254_v22, %v6760_v58 }
 0x362   :  { %v6787_v16 = vpop.permute.xlu2 %2864  ;;  %v2797_v63 = vadd.f32 %v2795_v62, %v2782_v38  ;;  %v4286_v62 = vunpack.c.h.bf16 %v4518_v45 }
 0x363   :  { %v2798_v12 = vadd.f32 %v2796_v37, %v2783_v30  ;;  %v2870_v59 = vmul.f32 %v4273_v47, %v6787_v16  ;;  %v4520_v30 = vld [vmem:[%s6936_s1 + $0x590] sm:$0xff]   ;;  %v4305_v47 = vunpack.c.l.bf16 %v4523_v4 }
 0x364   :  { %v2805_v49 = vpop.permute.xlu0 %2804 }
 0x365   :  { %v2810_v61 = vmul.f32 %v4257_v25, %v2805_v49  ;;  %v4285_v25 = vunpack.c.l.bf16 %v4518_v45 }
 0x367   :  { %v6785_v44 = vpop.permute.xlu1 %2806  ;;  %v2812_v58 = vadd.f32 %v2810_v61, %v2797_v63 }
 0x368   :  { %v2811_v35 = vmul.f32 %v4258_v18, %v6785_v44 }
 0x369   :  { %v2827_v44 = vadd.f32 %v2825_v1, %v2812_v58  ;;  %v4294_v58 = vunpack.c.h.bf16 %v4520_v30 }
 0x36a   :  { %v6793_v42 = vpop.permute.xlu2 %2881  ;;  %v2813_v6 = vadd.f32 %v2811_v35, %v2798_v12 }
 0x36c   :  { %v6789_v43 = vpop.permute.xlu0 %2821 }
 0x36d   :  { %v2826_v49 = vmul.f32 %v4262_v13, %v6789_v43  ;;  %v4293_v13 = vunpack.c.l.bf16 %v4520_v30 }
 0x36f   :  { %v6791_v15 = vpop.permute.xlu1 %2834  ;;  %v2828_v43 = vadd.f32 %v2826_v49, %v2813_v6 }
 0x370   :  { %v2840_v46 = vmul.f32 %v4265_v41, %v6791_v15  ;;  %v4517_v15 = vld [vmem:[%s6936_s1 + $0x5d8] sm:$0xff]  }
 0x371   :  { %v4281_v34 = vunpack.c.l.bf16 %v4517_v15  ;;  %v4282_v36 = vunpack.c.h.bf16 %v4517_v15 }
 0x372   :  { %v6805_v31 = vpop.permute.xlu2 %2909  ;;  %v2842_v23 = vadd.f32 %v2840_v46, %v2827_v44 }
 0x373   :  { %v2915_v39 = vmul.f32 %v4285_v25, %v6805_v31 }
 0x374   :  { %v6795_v29 = vpop.permute.xlu0 %2849 }
 0x375   :  { %v2855_v55 = vmul.f32 %v4269_v33, %v6795_v29  ;;  %v2843_v29 = vadd.f32 %v2841_v26, %v2828_v43 }
 0x377   :  { %v6797_v17 = vpop.permute.xlu1 %2851  ;;  %v2857_v32 = vadd.f32 %v2855_v55, %v2842_v23 }
 0x378   :  { %v2856_v27 = vmul.f32 %v4270_v3, %v6797_v17  ;;  %v4519_v17 = vld [vmem:[%s6936_s1 + $0x628] sm:$0xff]  }
 0x379   :  { %v2872_v22 = vadd.f32 %v2870_v59, %v2857_v32  ;;  %v4289_v18 = vunpack.c.l.bf16 %v4519_v17  ;;  %v4290_v41 = vunpack.c.h.bf16 %v4519_v17 }
 0x37a   :  { %v6824_v2 = vpop.permute.xlu2 %2926  ;;  %v2858_v50 = vadd.f32 %v2856_v27, %v2843_v29  ;;  %v4525_v27 = vld [vmem:[%s6936_s1 + $0x598] sm:$0xff]  }
 0x37c   :  { %v6807_v56 = vpop.permute.xlu0 %2866 }
 0x37d   :  { %v2871_v19 = vmul.f32 %v4274_v10, %v6807_v56  ;;  %v2886_v56 = vmul.f32 %v4278_v7, %v6793_v42  ;;  %v4521_v42 = vld [vmem:[%s6936_s1 + $0x5b8] sm:$0xff]  }
 0x37e   :  { %v4297_v33 = vunpack.c.l.bf16 %v4521_v42  ;;  %v4298_v40 = vunpack.c.h.bf16 %v4521_v42 }
 0x37f   :  { %v6812_v60 = vpop.permute.xlu1 %2879  ;;  %v2873_v38 = vadd.f32 %v2871_v19, %v2858_v50 }
 0x380   :  { %v2885_v48 = vmul.f32 %v4277_v54, %v6812_v60  ;;  %v4306_v54 = vunpack.c.h.bf16 %v4523_v4 }
 0x381   :  { %v2888_v57 = vadd.f32 %v2886_v56, %v2873_v38  ;;  %v4314_v38 = vunpack.c.h.bf16 %v4525_v27 }
 0x382   :  { %v6846_v8 = vpop.permute.xlu2 %2954  ;;  %v2887_v37 = vadd.f32 %v2885_v48, %v2872_v22 }
 0x383   :  { %v2960_v55 = vmul.f32 %v4297_v33, %v6846_v8 }
 0x384   :  { %v6821_v51 = vpop.permute.xlu0 %2894 }
 0x385   :  { %v2900_v16 = vmul.f32 %v4281_v34, %v6821_v51 }
 0x387   :  { %v6830_v28 = vpop.permute.xlu1 %2896  ;;  %v2902_v61 = vadd.f32 %v2900_v16, %v2887_v37 }
 0x388   :  { %v2901_v52 = vmul.f32 %v4282_v36, %v6830_v28  ;;  %v4522_v28 = vld [vmem:[%s6936_s1 + $0x5e0] sm:$0xff]  }
 0x389   :  { %v2917_v1 = vadd.f32 %v2915_v39, %v2902_v61  ;;  %v4301_v6 = vunpack.c.l.bf16 %v4522_v28  ;;  %v4302_v10 = vunpack.c.h.bf16 %v4522_v28 }
 0x38a   :  { %v6869_v53 = vpop.permute.xlu2 %2971  ;;  %v2903_v35 = vadd.f32 %v2901_v52, %v2888_v57 }
 0x38b   :  { %v2976_v34 = vmul.f32 %v4302_v10, %v6869_v53  ;;  %v4527_v53 = vld [vmem:[%s6936_s1 + $0x5e8] sm:$0xff]  }
 0x38c   :  { %v6840_v9 = vpop.permute.xlu0 %2911  ;;  %v4322_v39 = vunpack.c.h.bf16 %v4527_v53 }
 0x38d   :  { %v2916_v63 = vmul.f32 %v4286_v62, %v6840_v9  ;;  %v2931_v9 = vmul.f32 %v4290_v41, %v6824_v2  ;;  %v4524_v2 = vld [vmem:[%s6936_s1 + $0x630] sm:$0xff]   ;;  %v4529_v41 = vld [vmem:[%s6936_s1 + $0x638] sm:$0xff]  }
 0x38e   :  { %v4309_v59 = vunpack.c.l.bf16 %v4524_v2  ;;  %v4310_v29 = vunpack.c.h.bf16 %v4524_v2 }
 0x38f   :  { %v6844_v20 = vpop.permute.xlu1 %2924  ;;  %v2918_v49 = vadd.f32 %v2916_v63, %v2903_v35 }
 0x390   :  { %v2930_v12 = vmul.f32 %v4289_v18, %v6844_v20 }
 0x391   :  { %v2933_v43 = vadd.f32 %v2931_v9, %v2918_v49  ;;  %v4329_v49 = vunpack.c.l.bf16 %v4529_v41 }
 0x392   :  { %v3000_v11 = vpop.permute.xlu2 %2999  ;;  %v2932_v20 = vadd.f32 %v2930_v12, %v2917_v1 }
 0x393   :  { %v3005_v50 = vmul.f32 %v4309_v59, %v3000_v11  ;;  %v4321_v11 = vunpack.c.l.bf16 %v4527_v53 }
 0x394   :  { %v6858_v5 = vpop.permute.xlu0 %2939 }
 0x395   :  { %v2945_v31 = vmul.f32 %v4293_v13, %v6858_v5 }
 0x397   :  { %v6862_v21 = vpop.permute.xlu1 %2941  ;;  %v2947_v44 = vadd.f32 %v2945_v31, %v2932_v20 }
 0x398   :  { %v2946_v0 = vmul.f32 %v4294_v58, %v6862_v21 }
 0x399   :  { %v2962_v21 = vadd.f32 %v2960_v55, %v2947_v44 }
 0x39a   :  { %v3017_v3 = vpop.permute.xlu2 %3016  ;;  %v2948_v23 = vadd.f32 %v2946_v0, %v2933_v43 }
 0x39b   :  { %v3021_v61 = vmul.f32 %v4314_v38, %v3017_v3 }
 0x39c   :  { %v2957_v24 = vpop.permute.xlu0 %2956 }
 0x39d   :  { %v2961_v26 = vmul.f32 %v4298_v40, %v2957_v24  ;;  %v4526_v24 = vld [vmem:[%s6936_s1 + $0x5c0] sm:$0xff]  }
 0x39e   :  { %v4317_v36 = vunpack.c.l.bf16 %v4526_v24  ;;  %v4318_v30 = vunpack.c.h.bf16 %v4526_v24 }
 0x39f   :  { %v2970_v14 = vpop.permute.xlu1 %2969  ;;  %v2963_v8 = vadd.f32 %v2961_v26, %v2948_v23 }
 0x3a0   :  { %v2975_v15 = vmul.f32 %v4301_v6, %v2970_v14  ;;  %v4313_v14 = vunpack.c.l.bf16 %v4525_v27  ;;  %v4330_v6 = vunpack.c.h.bf16 %v4529_v41 }
 0x3a1   :  { %v2978_v16 = vadd.f32 %v2976_v34, %v2963_v8 }
 0x3a2   :  { %v2977_v7 = vadd.f32 %v2975_v15, %v2962_v21  ;;  %v3045_v17 = vpop.permute.xlu2 %3044 }
 0x3a3   :  { %v3050_v12 = vmul.f32 %v4321_v11, %v3045_v17 }
 0x3a4   :  { %v2985_v60 = vpop.permute.xlu0 %2984 }
 0x3a5   :  { %v2990_v32 = vmul.f32 %v4305_v47, %v2985_v60  ;;  %v4528_v60 = vld [vmem:[%s6936_s1 + $0x610] sm:$0xff]  }
 0x3a6   :  { %v4325_v57 = vunpack.c.l.bf16 %v4528_v60  ;;  %v4326_v1 = vunpack.c.h.bf16 %v4528_v60 }
 0x3a7   :  { %v2987_v51 = vpop.permute.xlu1 %2986  ;;  %v2992_v48 = vadd.f32 %v2990_v32, %v2977_v7 }
 0x3a8   :  { %v2991_v45 = vmul.f32 %v4306_v54, %v2987_v51 }
 0x3a9   :  { %v3007_v37 = vadd.f32 %v3005_v50, %v2992_v48 }
 0x3aa   :  { %v2993_v62 = vadd.f32 %v2991_v45, %v2978_v16  ;;  %v3062_v31 = vpop.permute.xlu2 %3061 }
 0x3ac   :  { %v3002_v46 = vpop.permute.xlu0 %3001 }
 0x3ad   :  { %v3006_v25 = vmul.f32 %v4310_v29, %v3002_v46  ;;  %v3066_v46 = vmul.f32 %v4326_v1, %v3062_v31 }
 0x3af   :  { %v3015_v5 = vpop.permute.xlu1 %3014  ;;  %v3008_v52 = vadd.f32 %v3006_v25, %v2993_v62 }
 0x3b0   :  { %v3020_v56 = vmul.f32 %v4313_v14, %v3015_v5 }
 0x3b1   :  { %v3023_v58 = vadd.f32 %v3021_v61, %v3008_v52 }
 0x3b2   :  { %v3022_v51 = vadd.f32 %v3020_v56, %v3007_v37 }
 0x3b4   :  { %v3030_v19 = vpop.permute.xlu0 %3029 }
 0x3b5   :  { %v3035_v18 = vmul.f32 %v4317_v36, %v3030_v19 }
 0x3b7   :  { %v3032_v22 = vpop.permute.xlu1 %3031  ;;  %v3037_v42 = vadd.f32 %v3035_v18, %v3022_v51 }
 0x3b8   :  { %v3036_v63 = vmul.f32 %v4318_v30, %v3032_v22 }
 0x3b9   :  { %v3052_v40 = vadd.f32 %v3050_v12, %v3037_v42 }
 0x3ba   :  { %v3038_v9 = vadd.f32 %v3036_v63, %v3023_v58 }
 0x3bc   :  { %v3047_v13 = vpop.permute.xlu0 %3046 }
 0x3bd   :  { %v3051_v28 = vmul.f32 %v4322_v39, %v3047_v13 }
 0x3bf   :  { %v3060_v35 = vpop.permute.xlu1 %3059  ;;  %v3053_v4 = vadd.f32 %v3051_v28, %v3038_v9 }
 0x3c0   :  { %v3065_v33 = vmul.f32 %v4325_v57, %v3060_v35 }
 0x3c1   :  { %v3068_v47 = vadd.f32 %v3066_v46, %v3053_v4 }
 0x3c2   :  { %v3067_v3 = vadd.f32 %v3065_v33, %v3052_v40 }
 0x3c4   :  { %v3075_v20 = vpop.permute.xlu0 %3074 }
 0x3c5   :  { %v3080_v0 = vmul.f32 %v4329_v49, %v3075_v20 }
 0x3c7   :  { %v3082_v44 = vadd.f32 %v3080_v0, %v3067_v3  ;;  %v3077_v55 = vpop.permute.xlu1 %3076 }
 0x3c8   :  { %v3081_v5 = vmul.f32 %v4330_v6, %v3077_v55 }
 0x3c9   :  { %3085 = vst.msk [vmem:[#allocation2 + $0x70] sm:$0xff] %vm396_vm4, %v3082_v44 }
 0x3ca   :  { %v3083_v43 = vadd.f32 %v3081_v5, %v3068_v47 }
 0x3cc   :  { %3086 = vst.msk [vmem:[#allocation2 + $0x78] sm:$0xff] %vm396_vm4, %v3083_v43 }
 0x3cd   :  { %3099 = dma.vmem_to_hbm [thread:$0]  %s3092_s10, 2048, %s3094_s12, [#allocation3], %s4568_s16, %s4568_s16, %s4569_s14  }
 0x3ce   :  { %4561 = dma.done.wait [#allocation3], 2048  }
 0x3cf   :  { %4562 = vsyncadd [#allocation3], 4294965248 }
 0x3d0   :  { %3104 = vsyncpa [#allocation3], 1 }

</bundles_post_ra>
